<compile_context>
chip_gen: v5e
topology: v5e:2x2
jax: 0.10.0
libtpu: 0.0.40
codegen_flags: <defaults>
</compile_context>

<pallas_src>
import functools
import math

import jax
import jax.numpy as jnp
from jax.experimental import pallas as pl
from jax.experimental.pallas import tpu as pltpu


# ---------------------------------------------------------------------------
# Helpers (padding / sizing / VMEM budgeting).
# ---------------------------------------------------------------------------
_LANE = 128     # vreg lane width
_SUBLANE = 16   # sublane multiple that is dense for both f32 (8) and bf16 (16)


def _round_up(n, m):
    return ((n + m - 1) // m) * m


def _bytes(shape, dtype):
    return math.prod(shape) * jnp.dtype(dtype).itemsize


def _vmem_limit(*byte_counts):
    """Shape-derived scoped-VMEM request: 2x for double-buffering + 2x margin,
    floored at the smallest default (16 MiB on v5e), capped at v7x's 64 MiB."""
    est = 2 * sum(byte_counts)
    return int(min(max(2 * est, 16 * 2**20), 64 * 2**20))


def _pad_cols(a, cols):
    return jnp.pad(a, ((0, 0), (0, cols - a.shape[1])))


# ---------------------------------------------------------------------------
# Kernel A: fused (matmul + bias [+ train-mode BatchNorm1d] [+ activation]).
# Used for both Conv1d layers.  x/w are bf16, accumulation/BN/act are f32.
# x: (rows, Kp)  w: (Kp, Cp)  b/gamma/beta: (1, Cp)  -> out: (rows, Cp)
# Columns are padded to 128 lanes in glue (padded columns stay exactly zero).
# ---------------------------------------------------------------------------
def _matmul_bn_act_kernel(x_ref, w_ref, b_ref, g_ref, beta_ref, o_ref, *,
                          use_bn, act, eps):
    y = jnp.dot(x_ref[...], w_ref[...], preferred_element_type=jnp.float32) + b_ref[...]
    if use_bn:
        # BatchNorm1d training-mode forward: stats over all (batch*length) rows,
        # biased variance, then affine gamma/beta (single block -> exact batch stats).
        mean = jnp.mean(y, axis=0, keepdims=True)
        var = jnp.mean((y - mean) ** 2, axis=0, keepdims=True)
        y = (y - mean) * jax.lax.rsqrt(var + eps)
        y = y * g_ref[...] + beta_ref[...]
    if act == 'swish':            # nn.SiLU
        y = y * jax.nn.sigmoid(y)
    elif act is not None:         # nn.Tanh
        y = jnp.tanh(y)
    o_ref[...] = y.astype(o_ref.dtype)


def matmul_bn_act(x, w, b, gamma, beta, *, use_bn, act, out_dtype, eps=1e-5):
    rows, cols = x.shape[0], w.shape[1]
    kern = functools.partial(_matmul_bn_act_kernel, use_bn=use_bn, act=act, eps=eps)
    limit = _vmem_limit(_bytes(x.shape, x.dtype), _bytes(w.shape, w.dtype),
                        3 * _bytes(b.shape, b.dtype), _bytes((rows, cols), out_dtype))
    # TODO(synk): tile rows/cols with a grid (+ two-pass BN stats, 'parallel' rows for v7x's
    #             second TensorCore) once rows*cols stops fitting a single VMEM block.
    return pl.pallas_call(
        kern,
        out_shape=jax.ShapeDtypeStruct((rows, cols), out_dtype),
        compiler_params=pltpu.CompilerParams(vmem_limit_bytes=limit),
    )(x, w, b, gamma, beta)


def conv1d_bn_act(x_nlc, w, b, gamma, beta, *, stride, padding, use_bn, act,
                  seq_first_out, out_dtype):
    """Conv1d + optional BatchNorm1d(train) + activation on (N, L, C) input.

    Returns (N, Lout, Cp) — or (Lout, N, Cp) when seq_first_out — with Cout padded to 128
    lanes (padded channels are exactly zero so they can feed the LSTM stack unchanged).
    """
    N, Lin, Cin = x_nlc.shape
    Cout, _, K = w.shape
    Lout = (Lin + 2 * padding - K) // stride + 1
    Cp = _round_up(Cout, _LANE)
    KC = K * Cin
    KCp = _round_up(KC, _LANE)

    # TODO(synk): at large L/Cin this im2col gather should become K shifted matmuls inside the
    #             kernel to avoid duplicating the conv input ~K x in HBM.
    x_pad = jnp.pad(x_nlc, ((0, 0), (padding, padding), (0, 0)))
    tap = stride * jnp.arange(Lout)[:, None] + jnp.arange(K)[None, :]          # (Lout, K)
    patches = x_pad[:, tap, :]                                                 # (N, Lout, K, Cin)
    if seq_first_out:
        patches = patches.transpose(1, 0, 2, 3)                                # (Lout, N, K, Cin)
        d0, d1 = Lout, N
    else:
        d0, d1 = N, Lout
    patches = patches.reshape(d0 * d1, KC)
    patches = _pad_cols(patches, KCp).astype(jnp.bfloat16)

    w_mat = w.transpose(2, 1, 0).reshape(KC, Cout)            # row k*Cin+cin  <->  w[:, cin, k]
    w_mat = jnp.pad(w_mat, ((0, KCp - KC), (0, Cp - Cout))).astype(jnp.bfloat16)
    b_p = _pad_cols(b.reshape(1, Cout), Cp).astype(jnp.float32)
    g_p = _pad_cols(gamma.reshape(1, Cout), Cp).astype(jnp.float32)
    beta_p = _pad_cols(beta.reshape(1, Cout), Cp).astype(jnp.float32)

    y = matmul_bn_act(patches, w_mat, b_p, g_p, beta_p,
                      use_bn=use_bn, act=act, out_dtype=out_dtype)
    return y.reshape(d0, d1, Cp)


# ---------------------------------------------------------------------------
# Kernel B: one LSTM layer, T-chunked on an "arbitrary" grid axis.
#   * per chunk: one hoisted (Tc*Np, Ip) x (Ip, 4Hp) input projection into a 3-D gx scratch
#   * fori_loop recurrence; per step only gx_ref[t] + h @ W_hh stays on the serial path
#   * gates per-gate padded to 128 lanes -> all slices are free views, stores are dense tiles
#   * reversal by reversed chunk index_map + reversed in-chunk order (no flips, original slots)
#   * last layer: h_t buffered in VMEM and the final Linear done as dense matmuls post-loop
# ---------------------------------------------------------------------------
def _lstm_recurrence(gx_ref, whh_ref, h_ref, c_ref, emit, *, chunk, hidden_p, reverse):
    Hp = hidden_p

    def step(s, carry):
        h, c = carry
        t = (chunk - 1 - s) if reverse else s
        # TODO(synk): W_hh is loop-invariant; holding it in MXU weight registers via
        #             pltpu.matmul_push_rhs/acc_lhs/pop would avoid re-pushing it every step.
        gates = gx_ref[t] + jnp.dot(h.astype(jnp.bfloat16), whh_ref[...],
                                    preferred_element_type=jnp.float32)
        # One sigmoid over the full 4*Hp gates + one tanh on the lane-aligned g block
        # (5*Hp transcendental elements/step instead of 8*Hp).  Gate order: i, f, g, o.
        sig = jax.nn.sigmoid(gates)
        g_cell = jnp.tanh(gates[:, 2 * Hp:3 * Hp])
        c = sig[:, Hp:2 * Hp] * c + sig[:, 0:Hp] * g_cell
        h = sig[:, 3 * Hp:4 * Hp] * jnp.tanh(c)
        emit(t, h)
        return h, c

    unroll = chunk if chunk <= 16 else (8 if chunk % 8 == 0 else 1)
    h, c = jax.lax.fori_loop(0, chunk, step, (h_ref[...], c_ref[...]), unroll=unroll)
    h_ref[...] = h
    c_ref[...] = c


def _lstm_seq_kernel(x_ref, wih_ref, whh_ref, b_ref, o_ref,
                     gx_ref, h_ref, c_ref, *, chunk, hidden_p, reverse):
    @pl.when(pl.program_id(0) == 0)
    def _():
        h_ref[...] = jnp.zeros_like(h_ref)
        c_ref[...] = jnp.zeros_like(c_ref)

    Tc, Np, Ip = x_ref.shape
    gx = jnp.dot(x_ref[...].reshape(Tc * Np, Ip), wih_ref[...],
                 preferred_element_type=jnp.float32) + b_ref[...]
    gx_ref[...] = gx.reshape(Tc, Np, 4 * hidden_p)

    def emit(t, h):
        o_ref[t] = h.astype(o_ref.dtype)          # dense (Np, Hp) tile store, original slot

    _lstm_recurrence(gx_ref, whh_ref, h_ref, c_ref, emit,
                     chunk=chunk, hidden_p=hidden_p, reverse=reverse)


def _lstm_fc_kernel(x_ref, wih_ref, whh_ref, b_ref, wfc_ref, bfc_ref, o_ref,
                    gx_ref, h_ref, c_ref, hbuf_ref, *, chunk, hidden_p, reverse):
    first = pl.program_id(0) == 0
    last = pl.program_id(0) == pl.num_programs(0) - 1

    @pl.when(first)
    def _():
        h_ref[...] = jnp.zeros_like(h_ref)
        c_ref[...] = jnp.zeros_like(c_ref)
        o_ref[...] = jnp.zeros_like(o_ref)

    Tc, Np, Ip = x_ref.shape
    gx = jnp.dot(x_ref[...].reshape(Tc * Np, Ip), wih_ref[...],
                 preferred_element_type=jnp.float32) + b_ref[...]
    gx_ref[...] = gx.reshape(Tc, Np, 4 * hidden_p)

    def emit(t, h):
        hbuf_ref[t] = h.astype(hbuf_ref.dtype)    # dense (Np, Hp) bf16 tile into VMEM scratch

    _lstm_recurrence(gx_ref, whh_ref, h_ref, c_ref, emit,
                     chunk=chunk, hidden_p=hidden_p, reverse=reverse)

    # Final Linear partial for this chunk, off the serial recurrence path:
    # out[n, :] += sum_t h_t[n, :] @ W_fc[t]  with 128-lane dense operands.
    fc_acc = jnp.zeros(o_ref.shape, jnp.float32)
    for t in range(chunk):                        # static indices -> free views
        fc_acc = fc_acc + jnp.dot(hbuf_ref[t], wfc_ref[t],
                                  preferred_element_type=jnp.float32)
    o_ref[...] = o_ref[...] + fc_acc

    @pl.when(last)
    def _():
        o_ref[...] = o_ref[...] + bfc_ref[...]


def _pack_lstm_weights(w_ih, w_hh, b_ih, b_hh, in_p, hid_p):
    """Per-gate lane padding: gate g occupies columns [g*hid_p, (g+1)*hid_p)."""
    fourH, _ = w_ih.shape
    H = fourH // 4

    def pad2(a, r, c):
        return jnp.pad(a, ((0, r - a.shape[0]), (0, c - a.shape[1])))

    wih = jnp.concatenate(
        [pad2(w_ih[g * H:(g + 1) * H, :].T, in_p, hid_p) for g in range(4)], axis=1)
    whh = jnp.concatenate(
        [pad2(w_hh[g * H:(g + 1) * H, :].T, hid_p, hid_p) for g in range(4)], axis=1)
    b = (b_ih + b_hh).reshape(4, H)
    b = jnp.pad(b, ((0, 0), (0, hid_p - H))).reshape(1, 4 * hid_p)
    return wih.astype(jnp.bfloat16), whh.astype(jnp.bfloat16), b.astype(jnp.float32)


def _pick_time_chunk(T, Np, Hp, budget_bytes=4 * 2**20):
    """Largest divisor of T whose f32 gx chunk stays within a small VMEM budget."""
    per_step = Np * 4 * Hp * 4
    tc = max(1, min(T, budget_bytes // max(per_step, 1)))
    while T % tc:
        tc -= 1
    return tc


def lstm_layer_seq(x, w_ih, w_hh, b_ih, b_hh, *, reverse):
    """x: (T, Np, Ip) bf16 (lane/sublane padded) -> (T, Np, Hp) bf16."""
    T, Np, Ip = x.shape
    H = w_hh.shape[1]
    Hp = _round_up(H, _LANE)
    wih, whh, b = _pack_lstm_weights(w_ih, w_hh, b_ih, b_hh, Ip, Hp)
    Tc = _pick_time_chunk(T, Np, Hp)
    nc = T // Tc
    idx = (lambda i: (nc - 1 - i, 0, 0)) if reverse else (lambda i: (i, 0, 0))

    kern = functools.partial(_lstm_seq_kernel, chunk=Tc, hidden_p=Hp, reverse=reverse)
    limit = _vmem_limit(
        _bytes((Tc, Np, Ip), jnp.bfloat16), _bytes((Ip, 4 * Hp), jnp.bfloat16),
        _bytes((Hp, 4 * Hp), jnp.bfloat16), _bytes((1, 4 * Hp), jnp.float32),
        _bytes((Tc, Np, Hp), jnp.bfloat16),
        _bytes((Tc, Np, 4 * Hp), jnp.float32), 2 * _bytes((Np, Hp), jnp.float32))
    # TODO(synk): for v7x, add a leading batch-parallel grid axis ('parallel') once the real
    #             batch is large enough to split across the two TensorCores.
    return pl.pallas_call(
        kern,
        out_shape=jax.ShapeDtypeStruct((T, Np, Hp), jnp.bfloat16),   # bf16 layer seam
        grid_spec=pltpu.PrefetchScalarGridSpec(
            num_scalar_prefetch=0,
            grid=(nc,),
            in_specs=[pl.BlockSpec((Tc, Np, Ip), idx),
                      pl.BlockSpec((Ip, 4 * Hp), lambda i: (0, 0)),
                      pl.BlockSpec((Hp, 4 * Hp), lambda i: (0, 0)),
                      pl.BlockSpec((1, 4 * Hp), lambda i: (0, 0))],
            out_specs=pl.BlockSpec((Tc, Np, Hp), idx),
            scratch_shapes=[pltpu.VMEM((Tc, Np, 4 * Hp), jnp.float32),   # gx
                            pltpu.VMEM((Np, Hp), jnp.float32),           # h
                            pltpu.VMEM((Np, Hp), jnp.float32)]),         # c
        compiler_params=pltpu.CompilerParams(
            dimension_semantics=("arbitrary",),       # h/c carried across T-chunks
            vmem_limit_bytes=limit),
    )(x, wih, whh, b)


def lstm_layer_fc(x, w_ih, w_hh, b_ih, b_hh, w_fc, b_fc, *, reverse):
    """Last LSTM layer with the final Linear fused in. x: (T, Np, Ip) -> (Np, Cp) f32."""
    T, Np, Ip = x.shape
    H = w_hh.shape[1]
    Hp = _round_up(H, _LANE)
    C = w_fc.shape[0]
    Cp = _round_up(C, _LANE)
    wih, whh, b = _pack_lstm_weights(w_ih, w_hh, b_ih, b_hh, Ip, Hp)
    # Reference flattening order is feature = t*H + h.
    wfc = w_fc.reshape(C, T, H).transpose(1, 2, 0)                            # (T, H, C)
    wfc = jnp.pad(wfc, ((0, 0), (0, Hp - H), (0, Cp - C))).astype(jnp.bfloat16)
    bfc = _pad_cols(b_fc.reshape(1, C), Cp).astype(jnp.float32)

    Tc = _pick_time_chunk(T, Np, Hp)
    nc = T // Tc
    idx3 = (lambda i: (nc - 1 - i, 0, 0)) if reverse else (lambda i: (i, 0, 0))

    kern = functools.partial(_lstm_fc_kernel, chunk=Tc, hidden_p=Hp, reverse=reverse)
    limit = _vmem_limit(
        _bytes((Tc, Np, Ip), jnp.bfloat16), _bytes((Ip, 4 * Hp), jnp.bfloat16),
        _bytes((Hp, 4 * Hp), jnp.bfloat16), _bytes((1, 4 * Hp), jnp.float32),
        _bytes((Tc, Hp, Cp), jnp.bfloat16), _bytes((1, Cp), jnp.float32),
        _bytes((Np, Cp), jnp.float32),
        _bytes((Tc, Np, 4 * Hp), jnp.float32), 2 * _bytes((Np, Hp), jnp.float32),
        _bytes((Tc, Np, Hp), jnp.bfloat16))
    return pl.pallas_call(
        kern,
        out_shape=jax.ShapeDtypeStruct((Np, Cp), jnp.float32),
        grid_spec=pltpu.PrefetchScalarGridSpec(
            num_scalar_prefetch=0,
            grid=(nc,),
            in_specs=[pl.BlockSpec((Tc, Np, Ip), idx3),
                      pl.BlockSpec((Ip, 4 * Hp), lambda i: (0, 0)),
                      pl.BlockSpec((Hp, 4 * Hp), lambda i: (0, 0)),
                      pl.BlockSpec((1, 4 * Hp), lambda i: (0, 0)),
                      pl.BlockSpec((Tc, Hp, Cp), idx3),
                      pl.BlockSpec((1, Cp), lambda i: (0, 0))],
            out_specs=pl.BlockSpec((Np, Cp), lambda i: (0, 0)),   # resident accumulator
            scratch_shapes=[pltpu.VMEM((Tc, Np, 4 * Hp), jnp.float32),   # gx
                            pltpu.VMEM((Np, Hp), jnp.float32),           # h
                            pltpu.VMEM((Np, Hp), jnp.float32),           # c
                            pltpu.VMEM((Tc, Np, Hp), jnp.bfloat16)]),    # h_t buffer for FC
        compiler_params=pltpu.CompilerParams(
            dimension_semantics=("arbitrary",),
            vmem_limit_bytes=limit),
    )(x, wih, whh, b, wfc, bfc)


# ---------------------------------------------------------------------------
# Full CLSTM forward.
# ---------------------------------------------------------------------------
def clstm_forward(params, x, *, conv_cfgs, lstm_cfg, num_classes):
    n_conv = len(conv_cfgs)
    n_lstm = lstm_cfg['LSTM_layers_num']
    assert n_lstm >= 1

    x = jnp.transpose(x, (0, 2, 1))                  # NCL -> NLC (channels on lanes)

    for i, cfg in enumerate(conv_cfgs):
        p = params['conv'][i]
        last = (i == n_conv - 1)
        y = conv1d_bn_act(x, p['w'], p['b'], p['gamma'], p['beta'],
                          stride=cfg['stride'], padding=cfg['padding'],
                          use_bn=(cfg['batchnorm1D'] is not None),
                          act=cfg['activation'],
                          seq_first_out=last,
                          out_dtype=jnp.bfloat16 if last else jnp.float32)
        # The last conv keeps its 128-lane channel padding (exact zeros): it *is* the LSTM's
        # padded input, so no slice + re-pad at the seam.
        x = y if last else y[:, :, :cfg['output_size']]

    # x is (T, N, Ip) sequence-first, i.e. the reference's x.permute([2, 0, 1]), lane-padded.
    T, N, _ = x.shape
    Np = _round_up(N, _SUBLANE)
    x = jnp.pad(x, ((0, 0), (0, Np - N), (0, 0)))    # batch pad stays inside the kernels

    out = None
    for i in range(n_lstm):
        reverse = ((n_lstm - i) % 2 == 1)            # mirrors the alternating .flip(0) pattern
        lp = params['lstm'][i]
        if i == n_lstm - 1:
            fp = params['fc']
            out = lstm_layer_fc(x, lp['w_ih'], lp['w_hh'], lp['b_ih'], lp['b_hh'],
                                fp['w'], fp['b'], reverse=reverse)
        else:
            x = lstm_layer_seq(x, lp['w_ih'], lp['w_hh'], lp['b_ih'], lp['b_hh'],
                               reverse=reverse)
    return out[:N, :num_classes]                     # strip batch/lane padding in glue


# ---------------------------------------------------------------------------
# Deterministic parameter init (shapes match the nn.Module; values are synthetic).
# ---------------------------------------------------------------------------
def init_params(key, conv_cfgs, lstm_cfg, last_seq_len, num_classes):
    params = {'conv': [], 'lstm': []}
    for cfg in conv_cfgs:
        key, k1, k2 = jax.random.split(key, 3)
        cin, cout, K = cfg['input_size'], cfg['output_size'], cfg['kernel_size']
        params['conv'].append({
            'w': 0.1 * jax.random.normal(k1, (cout, cin, K), jnp.float32),
            'b': 0.1 * jax.random.normal(k2, (cout,), jnp.float32),
            'gamma': jnp.ones((cout,), jnp.float32),     # BatchNorm1d affine init
            'beta': jnp.zeros((cout,), jnp.float32),
        })
    I = lstm_cfg['LSTM_input_size']
    H = lstm_cfg['LSTM_hidden_size']
    for _ in range(lstm_cfg['LSTM_layers_num']):
        key, k1, k2, k3, k4 = jax.random.split(key, 5)
        params['lstm'].append({
            'w_ih': 0.2 * jax.random.normal(k1, (4 * H, I), jnp.float32),
            'w_hh': 0.2 * jax.random.normal(k2, (4 * H, H), jnp.float32),
            'b_ih': 0.1 * jax.random.normal(k3, (4 * H,), jnp.float32),
            'b_hh': 0.1 * jax.random.normal(k4, (4 * H,), jnp.float32),
        })
    key, k1, k2 = jax.random.split(key, 3)
    F = last_seq_len * lstm_cfg['LSTM_input_size']
    params['fc'] = {
        'w': 0.1 * jax.random.normal(k1, (num_classes, F), jnp.float32),
        'b': 0.1 * jax.random.normal(k2, (num_classes,), jnp.float32),
    }
    return params


if __name__ == "__main__":
    # Small config consistent with the module's forward:
    #   x: (batch=2, in_channels=4, length=16)
    #   conv1: 4->8,  k=3, s=1, p=1, BN, swish  -> L=16
    #   conv2: 8->16, k=3, s=2, p=1, BN, tanh   -> L=8
    #   LSTM: input=hidden=16, 2 layers; lastSeqLength=8; fc: 8*16 -> 2
    conv_cfgs = [
        dict(input_size=4, output_size=8, kernel_size=3, stride=1, padding=1,
             batchnorm1D=True, activation='swish'),
        dict(input_size=8, output_size=16, kernel_size=3, stride=2, padding=1,
             batchnorm1D=True, activation='tanh'),
    ]
    lstm_cfg = dict(LSTM_layers_num=2, LSTM_input_size=16, LSTM_hidden_size=16)
    last_seq_len = 8
    num_classes = 2

    key = jax.random.PRNGKey(0)
    pkey, xkey = jax.random.split(key)
    params = init_params(pkey, conv_cfgs, lstm_cfg, last_seq_len, num_classes)

    x = jax.random.normal(xkey, (2, 4, 16), jnp.float32)   # NCL, like PyTorch Conv1d input

    fwd = jax.jit(functools.partial(clstm_forward, conv_cfgs=conv_cfgs,
                                    lstm_cfg=lstm_cfg, num_classes=num_classes))
    out = jax.block_until_ready(fwd(params, x))
    assert out.shape == (2, num_classes) and out.dtype == jnp.float32
    assert bool(jnp.all(jnp.isfinite(out)))
    print("KERNEL_OK")
</pallas_src>

<mosaic_0001>
module attributes {stable_mosaic.version = 11 : i64} {
  func.func @_matmul_bn_act_kernel(%arg0: memref<32x128xbf16, #tpu.memory_space<vmem>>, %arg1: memref<128x128xbf16, #tpu.memory_space<vmem>>, %arg2: memref<1x128xf32, #tpu.memory_space<vmem>>, %arg3: memref<1x128xf32, #tpu.memory_space<vmem>>, %arg4: memref<1x128xf32, #tpu.memory_space<vmem>>, %arg5: memref<32x128xf32, #tpu.memory_space<vmem>>) attributes {dimension_semantics = [], scalar_prefetch = 0 : i64, scratch_operands = 0 : i64, tpu.core_type = #tpu.core_type<tc>} {
    %c0 = arith.constant 0 : index
    %c0_0 = arith.constant 0 : index
    %0 = vector.load %arg0[%c0, %c0_0] : memref<32x128xbf16, #tpu.memory_space<vmem>>, vector<32x128xbf16>
    %c0_1 = arith.constant 0 : index
    %c0_2 = arith.constant 0 : index
    %1 = vector.load %arg1[%c0_1, %c0_2] : memref<128x128xbf16, #tpu.memory_space<vmem>>, vector<128x128xbf16>
    %cst = arith.constant dense<0.000000e+00> : vector<32x128xf32>
    %2 = tpu.matmul %0, %1, %cst {dimension_numbers = #tpu.dot_dimension_numbers<[1], [0], [0], [1], [0, 0, 1, 1], [], []>} : vector<32x128xbf16>, vector<128x128xbf16>, vector<32x128xf32> -> vector<32x128xf32>
    %c0_3 = arith.constant 0 : index
    %c0_4 = arith.constant 0 : index
    %3 = vector.load %arg2[%c0_3, %c0_4] : memref<1x128xf32, #tpu.memory_space<vmem>>, vector<1x128xf32>
    %4 = vector.broadcast %3 : vector<1x128xf32> to vector<32x128xf32>
    %5 = arith.addf %2, %4 : vector<32x128xf32>
    %cst_5 = arith.constant dense<0.000000e+00> : vector<128xf32>
    %6 = vector.multi_reduction <add>, %5, %cst_5 [0] : vector<32x128xf32> to vector<128xf32>
    %7 = vector.shape_cast %6 : vector<128xf32> to vector<1x128xf32>
    %cst_6 = arith.constant 3.200000e+01 : f32
    %8 = vector.broadcast %cst_6 : f32 to vector<1x128xf32>
    %9 = arith.divf %7, %8 : vector<1x128xf32>
    %10 = vector.broadcast %9 : vector<1x128xf32> to vector<32x128xf32>
    %11 = arith.subf %5, %10 : vector<32x128xf32>
    %12 = arith.mulf %11, %11 : vector<32x128xf32>
    %cst_7 = arith.constant dense<0.000000e+00> : vector<128xf32>
    %13 = vector.multi_reduction <add>, %12, %cst_7 [0] : vector<32x128xf32> to vector<128xf32>
    %14 = vector.shape_cast %13 : vector<128xf32> to vector<1x128xf32>
    %cst_8 = arith.constant 3.200000e+01 : f32
    %15 = vector.broadcast %cst_8 : f32 to vector<1x128xf32>
    %16 = arith.divf %14, %15 : vector<1x128xf32>
    %17 = vector.broadcast %9 : vector<1x128xf32> to vector<32x128xf32>
    %18 = arith.subf %5, %17 : vector<32x128xf32>
    %cst_9 = arith.constant 9.99999974E-6 : f32
    %19 = vector.broadcast %cst_9 : f32 to vector<1x128xf32>
    %20 = arith.addf %16, %19 : vector<1x128xf32>
    %21 = math.rsqrt %20 : vector<1x128xf32>
    %22 = vector.broadcast %21 : vector<1x128xf32> to vector<32x128xf32>
    %23 = arith.mulf %18, %22 : vector<32x128xf32>
    %c0_10 = arith.constant 0 : index
    %c0_11 = arith.constant 0 : index
    %24 = vector.load %arg3[%c0_10, %c0_11] : memref<1x128xf32, #tpu.memory_space<vmem>>, vector<1x128xf32>
    %25 = vector.broadcast %24 : vector<1x128xf32> to vector<32x128xf32>
    %26 = arith.mulf %23, %25 : vector<32x128xf32>
    %c0_12 = arith.constant 0 : index
    %c0_13 = arith.constant 0 : index
    %27 = vector.load %arg4[%c0_12, %c0_13] : memref<1x128xf32, #tpu.memory_space<vmem>>, vector<1x128xf32>
    %28 = vector.broadcast %27 : vector<1x128xf32> to vector<32x128xf32>
    %29 = arith.addf %26, %28 : vector<32x128xf32>
    %30 = arith.negf %29 : vector<32x128xf32>
    %31 = math.exp %30 : vector<32x128xf32>
    %cst_14 = arith.constant 1.000000e+00 : f32
    %32 = vector.broadcast %cst_14 : f32 to vector<32x128xf32>
    %33 = arith.addf %32, %31 : vector<32x128xf32>
    %34 = arith.divf %32, %33 : vector<32x128xf32>
    %35 = arith.mulf %29, %34 : vector<32x128xf32>
    %c0_15 = arith.constant 0 : index
    %c0_16 = arith.constant 0 : index
    %36 = vector.load %arg5[%c0_15, %c0_16] : memref<32x128xf32, #tpu.memory_space<vmem>>, vector<32x128xf32>
    tpu.vector_store %arg5[%c0_15, %c0_16], %35 {strides = array<i32>} : memref<32x128xf32, #tpu.memory_space<vmem>>, vector<32x128xf32>,
    return
  }
}

module attributes {stable_mosaic.version = 11 : i64} {
  func.func @_matmul_bn_act_kernel(%arg0: memref<16x128xbf16, #tpu.memory_space<vmem>>, %arg1: memref<128x128xbf16, #tpu.memory_space<vmem>>, %arg2: memref<1x128xf32, #tpu.memory_space<vmem>>, %arg3: memref<1x128xf32, #tpu.memory_space<vmem>>, %arg4: memref<1x128xf32, #tpu.memory_space<vmem>>, %arg5: memref<16x128xbf16, #tpu.memory_space<vmem>>) attributes {dimension_semantics = [], scalar_prefetch = 0 : i64, scratch_operands = 0 : i64, tpu.core_type = #tpu.core_type<tc>} {
    %c0 = arith.constant 0 : index
    %c0_0 = arith.constant 0 : index
    %0 = vector.load %arg0[%c0, %c0_0] : memref<16x128xbf16, #tpu.memory_space<vmem>>, vector<16x128xbf16>
    %c0_1 = arith.constant 0 : index
    %c0_2 = arith.constant 0 : index
    %1 = vector.load %arg1[%c0_1, %c0_2] : memref<128x128xbf16, #tpu.memory_space<vmem>>, vector<128x128xbf16>
    %cst = arith.constant dense<0.000000e+00> : vector<16x128xf32>
    %2 = tpu.matmul %0, %1, %cst {dimension_numbers = #tpu.dot_dimension_numbers<[1], [0], [0], [1], [0, 0, 1, 1], [], []>} : vector<16x128xbf16>, vector<128x128xbf16>, vector<16x128xf32> -> vector<16x128xf32>
    %c0_3 = arith.constant 0 : index
    %c0_4 = arith.constant 0 : index
    %3 = vector.load %arg2[%c0_3, %c0_4] : memref<1x128xf32, #tpu.memory_space<vmem>>, vector<1x128xf32>
    %4 = vector.broadcast %3 : vector<1x128xf32> to vector<16x128xf32>
    %5 = arith.addf %2, %4 : vector<16x128xf32>
    %cst_5 = arith.constant dense<0.000000e+00> : vector<128xf32>
    %6 = vector.multi_reduction <add>, %5, %cst_5 [0] : vector<16x128xf32> to vector<128xf32>
    %7 = vector.shape_cast %6 : vector<128xf32> to vector<1x128xf32>
    %cst_6 = arith.constant 1.600000e+01 : f32
    %8 = vector.broadcast %cst_6 : f32 to vector<1x128xf32>
    %9 = arith.divf %7, %8 : vector<1x128xf32>
    %10 = vector.broadcast %9 : vector<1x128xf32> to vector<16x128xf32>
    %11 = arith.subf %5, %10 : vector<16x128xf32>
    %12 = arith.mulf %11, %11 : vector<16x128xf32>
    %cst_7 = arith.constant dense<0.000000e+00> : vector<128xf32>
    %13 = vector.multi_reduction <add>, %12, %cst_7 [0] : vector<16x128xf32> to vector<128xf32>
    %14 = vector.shape_cast %13 : vector<128xf32> to vector<1x128xf32>
    %cst_8 = arith.constant 1.600000e+01 : f32
    %15 = vector.broadcast %cst_8 : f32 to vector<1x128xf32>
    %16 = arith.divf %14, %15 : vector<1x128xf32>
    %17 = vector.broadcast %9 : vector<1x128xf32> to vector<16x128xf32>
    %18 = arith.subf %5, %17 : vector<16x128xf32>
    %cst_9 = arith.constant 9.99999974E-6 : f32
    %19 = vector.broadcast %cst_9 : f32 to vector<1x128xf32>
    %20 = arith.addf %16, %19 : vector<1x128xf32>
    %21 = math.rsqrt %20 : vector<1x128xf32>
    %22 = vector.broadcast %21 : vector<1x128xf32> to vector<16x128xf32>
    %23 = arith.mulf %18, %22 : vector<16x128xf32>
    %c0_10 = arith.constant 0 : index
    %c0_11 = arith.constant 0 : index
    %24 = vector.load %arg3[%c0_10, %c0_11] : memref<1x128xf32, #tpu.memory_space<vmem>>, vector<1x128xf32>
    %25 = vector.broadcast %24 : vector<1x128xf32> to vector<16x128xf32>
    %26 = arith.mulf %23, %25 : vector<16x128xf32>
    %c0_12 = arith.constant 0 : index
    %c0_13 = arith.constant 0 : index
    %27 = vector.load %arg4[%c0_12, %c0_13] : memref<1x128xf32, #tpu.memory_space<vmem>>, vector<1x128xf32>
    %28 = vector.broadcast %27 : vector<1x128xf32> to vector<16x128xf32>
    %29 = arith.addf %26, %28 : vector<16x128xf32>
    %30 = math.tanh %29 : vector<16x128xf32>
    %31 = arith.truncf %30 : vector<16x128xf32> to vector<16x128xbf16>
    %c0_14 = arith.constant 0 : index
    %c0_15 = arith.constant 0 : index
    %32 = vector.load %arg5[%c0_14, %c0_15] : memref<16x128xbf16, #tpu.memory_space<vmem>>, vector<16x128xbf16>
    tpu.vector_store %arg5[%c0_14, %c0_15], %31 {strides = array<i32>} : memref<16x128xbf16, #tpu.memory_space<vmem>>, vector<16x128xbf16>,
    return
  }
}

module attributes {stable_mosaic.version = 11 : i64} {
  func.func @_lstm_seq_kernel(%arg0: i32, %arg1: memref<8x16x128xbf16, #tpu.memory_space<vmem>>, %arg2: memref<128x512xbf16, #tpu.memory_space<vmem>>, %arg3: memref<128x512xbf16, #tpu.memory_space<vmem>>, %arg4: memref<1x512xf32, #tpu.memory_space<vmem>>, %arg5: memref<8x16x128xbf16, #tpu.memory_space<vmem>>, %arg6: memref<8x16x512xf32, #tpu.memory_space<vmem>>, %arg7: memref<16x128xf32, #tpu.memory_space<vmem>>, %arg8: memref<16x128xf32, #tpu.memory_space<vmem>>) attributes {dimension_semantics = [#tpu.dimension_semantics<arbitrary>], iteration_bounds = array<i64: 1>, scalar_prefetch = 0 : i64, scratch_operands = 3 : i64, tpu.core_type = #tpu.core_type<tc>, window_params = [{transform_indices = @transform_0, window_bounds = array<i64: 8, 16, 128>}, {pipeline_mode = #tpu.pipeline_mode<synchronous>, transform_indices = @transform_1, window_bounds = array<i64: 128, 512>}, {pipeline_mode = #tpu.pipeline_mode<synchronous>, transform_indices = @transform_2, window_bounds = array<i64: 128, 512>}, {pipeline_mode = #tpu.pipeline_mode<synchronous>, transform_indices = @transform_3, window_bounds = array<i64: 1, 512>}, {transform_indices = @transform_4, window_bounds = array<i64: 8, 16, 128>}]} {
    %c0_i32 = arith.constant 0 : i32
    %0 = arith.cmpi eq, %arg0, %c0_i32 : i32
    %1 = arith.extui %0 : i1 to i32
    %c0_i32_0 = arith.constant 0 : i32
    %2 = arith.cmpi ne, %1, %c0_i32_0 : i32
    scf.if %2 {
      %cst_83 = arith.constant 0.000000e+00 : f32
      %232 = vector.broadcast %cst_83 : f32 to vector<16x128xf32>
      %c0_84 = arith.constant 0 : index
      %c0_85 = arith.constant 0 : index
      %233 = vector.load %arg7[%c0_84, %c0_85] : memref<16x128xf32, #tpu.memory_space<vmem>>, vector<16x128xf32>
      tpu.vector_store %arg7[%c0_84, %c0_85], %232 {strides = array<i32>} : memref<16x128xf32, #tpu.memory_space<vmem>>, vector<16x128xf32>,
      %cst_86 = arith.constant 0.000000e+00 : f32
      %234 = vector.broadcast %cst_86 : f32 to vector<16x128xf32>
      %c0_87 = arith.constant 0 : index
      %c0_88 = arith.constant 0 : index
      %235 = vector.load %arg8[%c0_87, %c0_88] : memref<16x128xf32, #tpu.memory_space<vmem>>, vector<16x128xf32>
      tpu.vector_store %arg8[%c0_87, %c0_88], %234 {strides = array<i32>} : memref<16x128xf32, #tpu.memory_space<vmem>>, vector<16x128xf32>,
    } else {
    }
    %c0 = arith.constant 0 : index
    %c0_1 = arith.constant 0 : index
    %c0_2 = arith.constant 0 : index
    %3 = vector.load %arg1[%c0, %c0_1, %c0_2] : memref<8x16x128xbf16, #tpu.memory_space<vmem>>, vector<8x16x128xbf16>
    %4 = vector.shape_cast %3 : vector<8x16x128xbf16> to vector<128x128xbf16>
    %c0_3 = arith.constant 0 : index
    %c0_4 = arith.constant 0 : index
    %5 = vector.load %arg2[%c0_3, %c0_4] : memref<128x512xbf16, #tpu.memory_space<vmem>>, vector<128x512xbf16>
    %cst = arith.constant dense<0.000000e+00> : vector<128x512xf32>
    %6 = tpu.matmul %4, %5, %cst {dimension_numbers = #tpu.dot_dimension_numbers<[1], [0], [0], [1], [0, 0, 1, 1], [], []>} : vector<128x128xbf16>, vector<128x512xbf16>, vector<128x512xf32> -> vector<128x512xf32>
    %c0_5 = arith.constant 0 : index
    %c0_6 = arith.constant 0 : index
    %7 = vector.load %arg4[%c0_5, %c0_6] : memref<1x512xf32, #tpu.memory_space<vmem>>, vector<1x512xf32>
    %8 = vector.broadcast %7 : vector<1x512xf32> to vector<128x512xf32>
    %9 = arith.addf %6, %8 : vector<128x512xf32>
    %10 = vector.shape_cast %9 : vector<128x512xf32> to vector<8x16x512xf32>
    %c0_7 = arith.constant 0 : index
    %c0_8 = arith.constant 0 : index
    %c0_9 = arith.constant 0 : index
    %11 = vector.load %arg6[%c0_7, %c0_8, %c0_9] : memref<8x16x512xf32, #tpu.memory_space<vmem>>, vector<8x16x512xf32>
    tpu.vector_store %arg6[%c0_7, %c0_8, %c0_9], %10 {strides = array<i32>} : memref<8x16x512xf32, #tpu.memory_space<vmem>>, vector<8x16x512xf32>,
    %c0_10 = arith.constant 0 : index
    %c0_11 = arith.constant 0 : index
    %12 = vector.load %arg7[%c0_10, %c0_11] : memref<16x128xf32, #tpu.memory_space<vmem>>, vector<16x128xf32>
    %c0_12 = arith.constant 0 : index
    %c0_13 = arith.constant 0 : index
    %13 = vector.load %arg8[%c0_12, %c0_13] : memref<16x128xf32, #tpu.memory_space<vmem>>, vector<16x128xf32>
    %c0_i32_14 = arith.constant 0 : i32
    %14 = arith.index_cast %c0_i32_14 : i32 to index
    %c0_15 = arith.constant 0 : index
    %c0_16 = arith.constant 0 : index
    %15 = vector.load %arg6[%14, %c0_15, %c0_16] : memref<8x16x512xf32, #tpu.memory_space<vmem>>, vector<1x16x512xf32>
    %16 = vector.shape_cast %15 : vector<1x16x512xf32> to vector<16x512xf32>
    %17 = arith.truncf %12 : vector<16x128xf32> to vector<16x128xbf16>
    %c0_17 = arith.constant 0 : index
    %c0_18 = arith.constant 0 : index
    %18 = vector.load %arg3[%c0_17, %c0_18] : memref<128x512xbf16, #tpu.memory_space<vmem>>, vector<128x512xbf16>
    %cst_19 = arith.constant dense<0.000000e+00> : vector<16x512xf32>
    %19 = tpu.matmul %17, %18, %cst_19 {dimension_numbers = #tpu.dot_dimension_numbers<[1], [0], [0], [1], [0, 0, 1, 1], [], []>} : vector<16x128xbf16>, vector<128x512xbf16>, vector<16x512xf32> -> vector<16x512xf32>
    %20 = arith.addf %16, %19 : vector<16x512xf32>
    %21 = arith.negf %20 : vector<16x512xf32>
    %22 = math.exp %21 : vector<16x512xf32>
    %cst_20 = arith.constant 1.000000e+00 : f32
    %23 = vector.broadcast %cst_20 : f32 to vector<16x512xf32>
    %24 = arith.addf %23, %22 : vector<16x512xf32>
    %25 = arith.divf %23, %24 : vector<16x512xf32>
    %26 = vector.extract_strided_slice %20 {offsets = [0, 256], sizes = [16, 128], strides = [1, 1]} : vector<16x512xf32> to vector<16x128xf32>
    %27 = math.tanh %26 : vector<16x128xf32>
    %28 = vector.extract_strided_slice %25 {offsets = [0, 128], sizes = [16, 128], strides = [1, 1]} : vector<16x512xf32> to vector<16x128xf32>
    %29 = arith.mulf %28, %13 : vector<16x128xf32>
    %30 = vector.extract_strided_slice %25 {offsets = [0, 0], sizes = [16, 128], strides = [1, 1]} : vector<16x512xf32> to vector<16x128xf32>
    %31 = arith.mulf %30, %27 : vector<16x128xf32>
    %32 = arith.addf %29, %31 : vector<16x128xf32>
    %33 = vector.extract_strided_slice %25 {offsets = [0, 384], sizes = [16, 128], strides = [1, 1]} : vector<16x512xf32> to vector<16x128xf32>
    %34 = math.tanh %32 : vector<16x128xf32>
    %35 = arith.mulf %33, %34 : vector<16x128xf32>
    %36 = arith.truncf %35 : vector<16x128xf32> to vector<16x128xbf16>
    %37 = arith.index_cast %c0_i32_14 : i32 to index
    %c0_21 = arith.constant 0 : index
    %c0_22 = arith.constant 0 : index
    %38 = vector.load %arg5[%37, %c0_21, %c0_22] : memref<8x16x128xbf16, #tpu.memory_space<vmem>>, vector<1x16x128xbf16>
    %39 = vector.shape_cast %38 : vector<1x16x128xbf16> to vector<16x128xbf16>
    %40 = vector.shape_cast %36 : vector<16x128xbf16> to vector<1x16x128xbf16>
    tpu.vector_store %arg5[%37, %c0_21, %c0_22], %40 {strides = array<i32>} : memref<8x16x128xbf16, #tpu.memory_space<vmem>>, vector<1x16x128xbf16>,
    %c1_i32 = arith.constant 1 : i32
    %41 = arith.index_cast %c1_i32 : i32 to index
    %c0_23 = arith.constant 0 : index
    %c0_24 = arith.constant 0 : index
    %42 = vector.load %arg6[%41, %c0_23, %c0_24] : memref<8x16x512xf32, #tpu.memory_space<vmem>>, vector<1x16x512xf32>
    %43 = vector.shape_cast %42 : vector<1x16x512xf32> to vector<16x512xf32>
    %44 = arith.truncf %35 : vector<16x128xf32> to vector<16x128xbf16>
    %c0_25 = arith.constant 0 : index
    %c0_26 = arith.constant 0 : index
    %45 = vector.load %arg3[%c0_25, %c0_26] : memref<128x512xbf16, #tpu.memory_space<vmem>>, vector<128x512xbf16>
    %cst_27 = arith.constant dense<0.000000e+00> : vector<16x512xf32>
    %46 = tpu.matmul %44, %45, %cst_27 {dimension_numbers = #tpu.dot_dimension_numbers<[1], [0], [0], [1], [0, 0, 1, 1], [], []>} : vector<16x128xbf16>, vector<128x512xbf16>, vector<16x512xf32> -> vector<16x512xf32>
    %47 = arith.addf %43, %46 : vector<16x512xf32>
    %48 = arith.negf %47 : vector<16x512xf32>
    %49 = math.exp %48 : vector<16x512xf32>
    %cst_28 = arith.constant 1.000000e+00 : f32
    %50 = vector.broadcast %cst_28 : f32 to vector<16x512xf32>
    %51 = arith.addf %50, %49 : vector<16x512xf32>
    %52 = arith.divf %50, %51 : vector<16x512xf32>
    %53 = vector.extract_strided_slice %47 {offsets = [0, 256], sizes = [16, 128], strides = [1, 1]} : vector<16x512xf32> to vector<16x128xf32>
    %54 = math.tanh %53 : vector<16x128xf32>
    %55 = vector.extract_strided_slice %52 {offsets = [0, 128], sizes = [16, 128], strides = [1, 1]} : vector<16x512xf32> to vector<16x128xf32>
    %56 = arith.mulf %55, %32 : vector<16x128xf32>
    %57 = vector.extract_strided_slice %52 {offsets = [0, 0], sizes = [16, 128], strides = [1, 1]} : vector<16x512xf32> to vector<16x128xf32>
    %58 = arith.mulf %57, %54 : vector<16x128xf32>
    %59 = arith.addf %56, %58 : vector<16x128xf32>
    %60 = vector.extract_strided_slice %52 {offsets = [0, 384], sizes = [16, 128], strides = [1, 1]} : vector<16x512xf32> to vector<16x128xf32>
    %61 = math.tanh %59 : vector<16x128xf32>
    %62 = arith.mulf %60, %61 : vector<16x128xf32>
    %63 = arith.truncf %62 : vector<16x128xf32> to vector<16x128xbf16>
    %64 = arith.index_cast %c1_i32 : i32 to index
    %c0_29 = arith.constant 0 : index
    %c0_30 = arith.constant 0 : index
    %65 = vector.load %arg5[%64, %c0_29, %c0_30] : memref<8x16x128xbf16, #tpu.memory_space<vmem>>, vector<1x16x128xbf16>
    %66 = vector.shape_cast %65 : vector<1x16x128xbf16> to vector<16x128xbf16>
    %67 = vector.shape_cast %63 : vector<16x128xbf16> to vector<1x16x128xbf16>
    tpu.vector_store %arg5[%64, %c0_29, %c0_30], %67 {strides = array<i32>} : memref<8x16x128xbf16, #tpu.memory_space<vmem>>, vector<1x16x128xbf16>,
    %c2_i32 = arith.constant 2 : i32
    %68 = arith.index_cast %c2_i32 : i32 to index
    %c0_31 = arith.constant 0 : index
    %c0_32 = arith.constant 0 : index
    %69 = vector.load %arg6[%68, %c0_31, %c0_32] : memref<8x16x512xf32, #tpu.memory_space<vmem>>, vector<1x16x512xf32>
    %70 = vector.shape_cast %69 : vector<1x16x512xf32> to vector<16x512xf32>
    %71 = arith.truncf %62 : vector<16x128xf32> to vector<16x128xbf16>
    %c0_33 = arith.constant 0 : index
    %c0_34 = arith.constant 0 : index
    %72 = vector.load %arg3[%c0_33, %c0_34] : memref<128x512xbf16, #tpu.memory_space<vmem>>, vector<128x512xbf16>
    %cst_35 = arith.constant dense<0.000000e+00> : vector<16x512xf32>
    %73 = tpu.matmul %71, %72, %cst_35 {dimension_numbers = #tpu.dot_dimension_numbers<[1], [0], [0], [1], [0, 0, 1, 1], [], []>} : vector<16x128xbf16>, vector<128x512xbf16>, vector<16x512xf32> -> vector<16x512xf32>
    %74 = arith.addf %70, %73 : vector<16x512xf32>
    %75 = arith.negf %74 : vector<16x512xf32>
    %76 = math.exp %75 : vector<16x512xf32>
    %cst_36 = arith.constant 1.000000e+00 : f32
    %77 = vector.broadcast %cst_36 : f32 to vector<16x512xf32>
    %78 = arith.addf %77, %76 : vector<16x512xf32>
    %79 = arith.divf %77, %78 : vector<16x512xf32>
    %80 = vector.extract_strided_slice %74 {offsets = [0, 256], sizes = [16, 128], strides = [1, 1]} : vector<16x512xf32> to vector<16x128xf32>
    %81 = math.tanh %80 : vector<16x128xf32>
    %82 = vector.extract_strided_slice %79 {offsets = [0, 128], sizes = [16, 128], strides = [1, 1]} : vector<16x512xf32> to vector<16x128xf32>
    %83 = arith.mulf %82, %59 : vector<16x128xf32>
    %84 = vector.extract_strided_slice %79 {offsets = [0, 0], sizes = [16, 128], strides = [1, 1]} : vector<16x512xf32> to vector<16x128xf32>
    %85 = arith.mulf %84, %81 : vector<16x128xf32>
    %86 = arith.addf %83, %85 : vector<16x128xf32>
    %87 = vector.extract_strided_slice %79 {offsets = [0, 384], sizes = [16, 128], strides = [1, 1]} : vector<16x512xf32> to vector<16x128xf32>
    %88 = math.tanh %86 : vector<16x128xf32>
    %89 = arith.mulf %87, %88 : vector<16x128xf32>
    %90 = arith.truncf %89 : vector<16x128xf32> to vector<16x128xbf16>
    %91 = arith.index_cast %c2_i32 : i32 to index
    %c0_37 = arith.constant 0 : index
    %c0_38 = arith.constant 0 : index
    %92 = vector.load %arg5[%91, %c0_37, %c0_38] : memref<8x16x128xbf16, #tpu.memory_space<vmem>>, vector<1x16x128xbf16>
    %93 = vector.shape_cast %92 : vector<1x16x128xbf16> to vector<16x128xbf16>
    %94 = vector.shape_cast %90 : vector<16x128xbf16> to vector<1x16x128xbf16>
    tpu.vector_store %arg5[%91, %c0_37, %c0_38], %94 {strides = array<i32>} : memref<8x16x128xbf16, #tpu.memory_space<vmem>>, vector<1x16x128xbf16>,
    %c3_i32 = arith.constant 3 : i32
    %95 = arith.index_cast %c3_i32 : i32 to index
    %c0_39 = arith.constant 0 : index
    %c0_40 = arith.constant 0 : index
    %96 = vector.load %arg6[%95, %c0_39, %c0_40] : memref<8x16x512xf32, #tpu.memory_space<vmem>>, vector<1x16x512xf32>
    %97 = vector.shape_cast %96 : vector<1x16x512xf32> to vector<16x512xf32>
    %98 = arith.truncf %89 : vector<16x128xf32> to vector<16x128xbf16>
    %c0_41 = arith.constant 0 : index
    %c0_42 = arith.constant 0 : index
    %99 = vector.load %arg3[%c0_41, %c0_42] : memref<128x512xbf16, #tpu.memory_space<vmem>>, vector<128x512xbf16>
    %cst_43 = arith.constant dense<0.000000e+00> : vector<16x512xf32>
    %100 = tpu.matmul %98, %99, %cst_43 {dimension_numbers = #tpu.dot_dimension_numbers<[1], [0], [0], [1], [0, 0, 1, 1], [], []>} : vector<16x128xbf16>, vector<128x512xbf16>, vector<16x512xf32> -> vector<16x512xf32>
    %101 = arith.addf %97, %100 : vector<16x512xf32>
    %102 = arith.negf %101 : vector<16x512xf32>
    %103 = math.exp %102 : vector<16x512xf32>
    %cst_44 = arith.constant 1.000000e+00 : f32
    %104 = vector.broadcast %cst_44 : f32 to vector<16x512xf32>
    %105 = arith.addf %104, %103 : vector<16x512xf32>
    %106 = arith.divf %104, %105 : vector<16x512xf32>
    %107 = vector.extract_strided_slice %101 {offsets = [0, 256], sizes = [16, 128], strides = [1, 1]} : vector<16x512xf32> to vector<16x128xf32>
    %108 = math.tanh %107 : vector<16x128xf32>
    %109 = vector.extract_strided_slice %106 {offsets = [0, 128], sizes = [16, 128], strides = [1, 1]} : vector<16x512xf32> to vector<16x128xf32>
    %110 = arith.mulf %109, %86 : vector<16x128xf32>
    %111 = vector.extract_strided_slice %106 {offsets = [0, 0], sizes = [16, 128], strides = [1, 1]} : vector<16x512xf32> to vector<16x128xf32>
    %112 = arith.mulf %111, %108 : vector<16x128xf32>
    %113 = arith.addf %110, %112 : vector<16x128xf32>
    %114 = vector.extract_strided_slice %106 {offsets = [0, 384], sizes = [16, 128], strides = [1, 1]} : vector<16x512xf32> to vector<16x128xf32>
    %115 = math.tanh %113 : vector<16x128xf32>
    %116 = arith.mulf %114, %115 : vector<16x128xf32>
    %117 = arith.truncf %116 : vector<16x128xf32> to vector<16x128xbf16>
    %118 = arith.index_cast %c3_i32 : i32 to index
    %c0_45 = arith.constant 0 : index
    %c0_46 = arith.constant 0 : index
    %119 = vector.load %arg5[%118, %c0_45, %c0_46] : memref<8x16x128xbf16, #tpu.memory_space<vmem>>, vector<1x16x128xbf16>
    %120 = vector.shape_cast %119 : vector<1x16x128xbf16> to vector<16x128xbf16>
    %121 = vector.shape_cast %117 : vector<16x128xbf16> to vector<1x16x128xbf16>
    tpu.vector_store %arg5[%118, %c0_45, %c0_46], %121 {strides = array<i32>} : memref<8x16x128xbf16, #tpu.memory_space<vmem>>, vector<1x16x128xbf16>,
    %c4_i32 = arith.constant 4 : i32
    %122 = arith.index_cast %c4_i32 : i32 to index
    %c0_47 = arith.constant 0 : index
    %c0_48 = arith.constant 0 : index
    %123 = vector.load %arg6[%122, %c0_47, %c0_48] : memref<8x16x512xf32, #tpu.memory_space<vmem>>, vector<1x16x512xf32>
    %124 = vector.shape_cast %123 : vector<1x16x512xf32> to vector<16x512xf32>
    %125 = arith.truncf %116 : vector<16x128xf32> to vector<16x128xbf16>
    %c0_49 = arith.constant 0 : index
    %c0_50 = arith.constant 0 : index
    %126 = vector.load %arg3[%c0_49, %c0_50] : memref<128x512xbf16, #tpu.memory_space<vmem>>, vector<128x512xbf16>
    %cst_51 = arith.constant dense<0.000000e+00> : vector<16x512xf32>
    %127 = tpu.matmul %125, %126, %cst_51 {dimension_numbers = #tpu.dot_dimension_numbers<[1], [0], [0], [1], [0, 0, 1, 1], [], []>} : vector<16x128xbf16>, vector<128x512xbf16>, vector<16x512xf32> -> vector<16x512xf32>
    %128 = arith.addf %124, %127 : vector<16x512xf32>
    %129 = arith.negf %128 : vector<16x512xf32>
    %130 = math.exp %129 : vector<16x512xf32>
    %cst_52 = arith.constant 1.000000e+00 : f32
    %131 = vector.broadcast %cst_52 : f32 to vector<16x512xf32>
    %132 = arith.addf %131, %130 : vector<16x512xf32>
    %133 = arith.divf %131, %132 : vector<16x512xf32>
    %134 = vector.extract_strided_slice %128 {offsets = [0, 256], sizes = [16, 128], strides = [1, 1]} : vector<16x512xf32> to vector<16x128xf32>
    %135 = math.tanh %134 : vector<16x128xf32>
    %136 = vector.extract_strided_slice %133 {offsets = [0, 128], sizes = [16, 128], strides = [1, 1]} : vector<16x512xf32> to vector<16x128xf32>
    %137 = arith.mulf %136, %113 : vector<16x128xf32>
    %138 = vector.extract_strided_slice %133 {offsets = [0, 0], sizes = [16, 128], strides = [1, 1]} : vector<16x512xf32> to vector<16x128xf32>
    %139 = arith.mulf %138, %135 : vector<16x128xf32>
    %140 = arith.addf %137, %139 : vector<16x128xf32>
    %141 = vector.extract_strided_slice %133 {offsets = [0, 384], sizes = [16, 128], strides = [1, 1]} : vector<16x512xf32> to vector<16x128xf32>
    %142 = math.tanh %140 : vector<16x128xf32>
    %143 = arith.mulf %141, %142 : vector<16x128xf32>
    %144 = arith.truncf %143 : vector<16x128xf32> to vector<16x128xbf16>
    %145 = arith.index_cast %c4_i32 : i32 to index
    %c0_53 = arith.constant 0 : index
    %c0_54 = arith.constant 0 : index
    %146 = vector.load %arg5[%145, %c0_53, %c0_54] : memref<8x16x128xbf16, #tpu.memory_space<vmem>>, vector<1x16x128xbf16>
    %147 = vector.shape_cast %146 : vector<1x16x128xbf16> to vector<16x128xbf16>
    %148 = vector.shape_cast %144 : vector<16x128xbf16> to vector<1x16x128xbf16>
    tpu.vector_store %arg5[%145, %c0_53, %c0_54], %148 {strides = array<i32>} : memref<8x16x128xbf16, #tpu.memory_space<vmem>>, vector<1x16x128xbf16>,
    %c5_i32 = arith.constant 5 : i32
    %149 = arith.index_cast %c5_i32 : i32 to index
    %c0_55 = arith.constant 0 : index
    %c0_56 = arith.constant 0 : index
    %150 = vector.load %arg6[%149, %c0_55, %c0_56] : memref<8x16x512xf32, #tpu.memory_space<vmem>>, vector<1x16x512xf32>
    %151 = vector.shape_cast %150 : vector<1x16x512xf32> to vector<16x512xf32>
    %152 = arith.truncf %143 : vector<16x128xf32> to vector<16x128xbf16>
    %c0_57 = arith.constant 0 : index
    %c0_58 = arith.constant 0 : index
    %153 = vector.load %arg3[%c0_57, %c0_58] : memref<128x512xbf16, #tpu.memory_space<vmem>>, vector<128x512xbf16>
    %cst_59 = arith.constant dense<0.000000e+00> : vector<16x512xf32>
    %154 = tpu.matmul %152, %153, %cst_59 {dimension_numbers = #tpu.dot_dimension_numbers<[1], [0], [0], [1], [0, 0, 1, 1], [], []>} : vector<16x128xbf16>, vector<128x512xbf16>, vector<16x512xf32> -> vector<16x512xf32>
    %155 = arith.addf %151, %154 : vector<16x512xf32>
    %156 = arith.negf %155 : vector<16x512xf32>
    %157 = math.exp %156 : vector<16x512xf32>
    %cst_60 = arith.constant 1.000000e+00 : f32
    %158 = vector.broadcast %cst_60 : f32 to vector<16x512xf32>
    %159 = arith.addf %158, %157 : vector<16x512xf32>
    %160 = arith.divf %158, %159 : vector<16x512xf32>
    %161 = vector.extract_strided_slice %155 {offsets = [0, 256], sizes = [16, 128], strides = [1, 1]} : vector<16x512xf32> to vector<16x128xf32>
    %162 = math.tanh %161 : vector<16x128xf32>
    %163 = vector.extract_strided_slice %160 {offsets = [0, 128], sizes = [16, 128], strides = [1, 1]} : vector<16x512xf32> to vector<16x128xf32>
    %164 = arith.mulf %163, %140 : vector<16x128xf32>
    %165 = vector.extract_strided_slice %160 {offsets = [0, 0], sizes = [16, 128], strides = [1, 1]} : vector<16x512xf32> to vector<16x128xf32>
    %166 = arith.mulf %165, %162 : vector<16x128xf32>
    %167 = arith.addf %164, %166 : vector<16x128xf32>
    %168 = vector.extract_strided_slice %160 {offsets = [0, 384], sizes = [16, 128], strides = [1, 1]} : vector<16x512xf32> to vector<16x128xf32>
    %169 = math.tanh %167 : vector<16x128xf32>
    %170 = arith.mulf %168, %169 : vector<16x128xf32>
    %171 = arith.truncf %170 : vector<16x128xf32> to vector<16x128xbf16>
    %172 = arith.index_cast %c5_i32 : i32 to index
    %c0_61 = arith.constant 0 : index
    %c0_62 = arith.constant 0 : index
    %173 = vector.load %arg5[%172, %c0_61, %c0_62] : memref<8x16x128xbf16, #tpu.memory_space<vmem>>, vector<1x16x128xbf16>
    %174 = vector.shape_cast %173 : vector<1x16x128xbf16> to vector<16x128xbf16>
    %175 = vector.shape_cast %171 : vector<16x128xbf16> to vector<1x16x128xbf16>
    tpu.vector_store %arg5[%172, %c0_61, %c0_62], %175 {strides = array<i32>} : memref<8x16x128xbf16, #tpu.memory_space<vmem>>, vector<1x16x128xbf16>,
    %c6_i32 = arith.constant 6 : i32
    %176 = arith.index_cast %c6_i32 : i32 to index
    %c0_63 = arith.constant 0 : index
    %c0_64 = arith.constant 0 : index
    %177 = vector.load %arg6[%176, %c0_63, %c0_64] : memref<8x16x512xf32, #tpu.memory_space<vmem>>, vector<1x16x512xf32>
    %178 = vector.shape_cast %177 : vector<1x16x512xf32> to vector<16x512xf32>
    %179 = arith.truncf %170 : vector<16x128xf32> to vector<16x128xbf16>
    %c0_65 = arith.constant 0 : index
    %c0_66 = arith.constant 0 : index
    %180 = vector.load %arg3[%c0_65, %c0_66] : memref<128x512xbf16, #tpu.memory_space<vmem>>, vector<128x512xbf16>
    %cst_67 = arith.constant dense<0.000000e+00> : vector<16x512xf32>
    %181 = tpu.matmul %179, %180, %cst_67 {dimension_numbers = #tpu.dot_dimension_numbers<[1], [0], [0], [1], [0, 0, 1, 1], [], []>} : vector<16x128xbf16>, vector<128x512xbf16>, vector<16x512xf32> -> vector<16x512xf32>
    %182 = arith.addf %178, %181 : vector<16x512xf32>
    %183 = arith.negf %182 : vector<16x512xf32>
    %184 = math.exp %183 : vector<16x512xf32>
    %cst_68 = arith.constant 1.000000e+00 : f32
    %185 = vector.broadcast %cst_68 : f32 to vector<16x512xf32>
    %186 = arith.addf %185, %184 : vector<16x512xf32>
    %187 = arith.divf %185, %186 : vector<16x512xf32>
    %188 = vector.extract_strided_slice %182 {offsets = [0, 256], sizes = [16, 128], strides = [1, 1]} : vector<16x512xf32> to vector<16x128xf32>
    %189 = math.tanh %188 : vector<16x128xf32>
    %190 = vector.extract_strided_slice %187 {offsets = [0, 128], sizes = [16, 128], strides = [1, 1]} : vector<16x512xf32> to vector<16x128xf32>
    %191 = arith.mulf %190, %167 : vector<16x128xf32>
    %192 = vector.extract_strided_slice %187 {offsets = [0, 0], sizes = [16, 128], strides = [1, 1]} : vector<16x512xf32> to vector<16x128xf32>
    %193 = arith.mulf %192, %189 : vector<16x128xf32>
    %194 = arith.addf %191, %193 : vector<16x128xf32>
    %195 = vector.extract_strided_slice %187 {offsets = [0, 384], sizes = [16, 128], strides = [1, 1]} : vector<16x512xf32> to vector<16x128xf32>
    %196 = math.tanh %194 : vector<16x128xf32>
    %197 = arith.mulf %195, %196 : vector<16x128xf32>
    %198 = arith.truncf %197 : vector<16x128xf32> to vector<16x128xbf16>
    %199 = arith.index_cast %c6_i32 : i32 to index
    %c0_69 = arith.constant 0 : index
    %c0_70 = arith.constant 0 : index
    %200 = vector.load %arg5[%199, %c0_69, %c0_70] : memref<8x16x128xbf16, #tpu.memory_space<vmem>>, vector<1x16x128xbf16>
    %201 = vector.shape_cast %200 : vector<1x16x128xbf16> to vector<16x128xbf16>
    %202 = vector.shape_cast %198 : vector<16x128xbf16> to vector<1x16x128xbf16>
    tpu.vector_store %arg5[%199, %c0_69, %c0_70], %202 {strides = array<i32>} : memref<8x16x128xbf16, #tpu.memory_space<vmem>>, vector<1x16x128xbf16>,
    %c7_i32 = arith.constant 7 : i32
    %203 = arith.index_cast %c7_i32 : i32 to index
    %c0_71 = arith.constant 0 : index
    %c0_72 = arith.constant 0 : index
    %204 = vector.load %arg6[%203, %c0_71, %c0_72] : memref<8x16x512xf32, #tpu.memory_space<vmem>>, vector<1x16x512xf32>
    %205 = vector.shape_cast %204 : vector<1x16x512xf32> to vector<16x512xf32>
    %206 = arith.truncf %197 : vector<16x128xf32> to vector<16x128xbf16>
    %c0_73 = arith.constant 0 : index
    %c0_74 = arith.constant 0 : index
    %207 = vector.load %arg3[%c0_73, %c0_74] : memref<128x512xbf16, #tpu.memory_space<vmem>>, vector<128x512xbf16>
    %cst_75 = arith.constant dense<0.000000e+00> : vector<16x512xf32>
    %208 = tpu.matmul %206, %207, %cst_75 {dimension_numbers = #tpu.dot_dimension_numbers<[1], [0], [0], [1], [0, 0, 1, 1], [], []>} : vector<16x128xbf16>, vector<128x512xbf16>, vector<16x512xf32> -> vector<16x512xf32>
    %209 = arith.addf %205, %208 : vector<16x512xf32>
    %210 = arith.negf %209 : vector<16x512xf32>
    %211 = math.exp %210 : vector<16x512xf32>
    %cst_76 = arith.constant 1.000000e+00 : f32
    %212 = vector.broadcast %cst_76 : f32 to vector<16x512xf32>
    %213 = arith.addf %212, %211 : vector<16x512xf32>
    %214 = arith.divf %212, %213 : vector<16x512xf32>
    %215 = vector.extract_strided_slice %209 {offsets = [0, 256], sizes = [16, 128], strides = [1, 1]} : vector<16x512xf32> to vector<16x128xf32>
    %216 = math.tanh %215 : vector<16x128xf32>
    %217 = vector.extract_strided_slice %214 {offsets = [0, 128], sizes = [16, 128], strides = [1, 1]} : vector<16x512xf32> to vector<16x128xf32>
    %218 = arith.mulf %217, %194 : vector<16x128xf32>
    %219 = vector.extract_strided_slice %214 {offsets = [0, 0], sizes = [16, 128], strides = [1, 1]} : vector<16x512xf32> to vector<16x128xf32>
    %220 = arith.mulf %219, %216 : vector<16x128xf32>
    %221 = arith.addf %218, %220 : vector<16x128xf32>
    %222 = vector.extract_strided_slice %214 {offsets = [0, 384], sizes = [16, 128], strides = [1, 1]} : vector<16x512xf32> to vector<16x128xf32>
    %223 = math.tanh %221 : vector<16x128xf32>
    %224 = arith.mulf %222, %223 : vector<16x128xf32>
    %225 = arith.truncf %224 : vector<16x128xf32> to vector<16x128xbf16>
    %226 = arith.index_cast %c7_i32 : i32 to index
    %c0_77 = arith.constant 0 : index
    %c0_78 = arith.constant 0 : index
    %227 = vector.load %arg5[%226, %c0_77, %c0_78] : memref<8x16x128xbf16, #tpu.memory_space<vmem>>, vector<1x16x128xbf16>
    %228 = vector.shape_cast %227 : vector<1x16x128xbf16> to vector<16x128xbf16>
    %229 = vector.shape_cast %225 : vector<16x128xbf16> to vector<1x16x128xbf16>
    tpu.vector_store %arg5[%226, %c0_77, %c0_78], %229 {strides = array<i32>} : memref<8x16x128xbf16, #tpu.memory_space<vmem>>, vector<1x16x128xbf16>,
    %c8_i32 = arith.constant 8 : i32
    %c0_79 = arith.constant 0 : index
    %c0_80 = arith.constant 0 : index
    %230 = vector.load %arg7[%c0_79, %c0_80] : memref<16x128xf32, #tpu.memory_space<vmem>>, vector<16x128xf32>
    tpu.vector_store %arg7[%c0_79, %c0_80], %224 {strides = array<i32>} : memref<16x128xf32, #tpu.memory_space<vmem>>, vector<16x128xf32>,
    %c0_81 = arith.constant 0 : index
    %c0_82 = arith.constant 0 : index
    %231 = vector.load %arg8[%c0_81, %c0_82] : memref<16x128xf32, #tpu.memory_space<vmem>>, vector<16x128xf32>
    tpu.vector_store %arg8[%c0_81, %c0_82], %221 {strides = array<i32>} : memref<16x128xf32, #tpu.memory_space<vmem>>, vector<16x128xf32>,
    return
  }
  func.func @transform_0(%arg0: i32) -> (i32, i32, i32) {
    %c0_i32 = arith.constant 0 : i32
    %c0_i32_0 = arith.constant 0 : i32
    %c0_i32_1 = arith.constant 0 : i32
    return %arg0, %c0_i32, %c0_i32_0 : i32, i32, i32
  }
  func.func @transform_1(%arg0: i32) -> (i32, i32) {
    %c0_i32 = arith.constant 0 : i32
    %c0_i32_0 = arith.constant 0 : i32
    %c0_i32_1 = arith.constant 0 : i32
    return %c0_i32, %c0_i32_0 : i32, i32
  }
  func.func @transform_2(%arg0: i32) -> (i32, i32) {
    %c0_i32 = arith.constant 0 : i32
    %c0_i32_0 = arith.constant 0 : i32
    %c0_i32_1 = arith.constant 0 : i32
    return %c0_i32, %c0_i32_0 : i32, i32
  }
  func.func @transform_3(%arg0: i32) -> (i32, i32) {
    %c0_i32 = arith.constant 0 : i32
    %c0_i32_0 = arith.constant 0 : i32
    %c0_i32_1 = arith.constant 0 : i32
    return %c0_i32, %c0_i32_0 : i32, i32
  }
  func.func @transform_4(%arg0: i32) -> (i32, i32, i32) {
    %c0_i32 = arith.constant 0 : i32
    %c0_i32_0 = arith.constant 0 : i32
    %c0_i32_1 = arith.constant 0 : i32
    return %arg0, %c0_i32, %c0_i32_0 : i32, i32, i32
  }
}

module attributes {stable_mosaic.version = 11 : i64} {
  func.func @_lstm_fc_kernel(%arg0: i32, %arg1: memref<8x16x128xbf16, #tpu.memory_space<vmem>>, %arg2: memref<128x512xbf16, #tpu.memory_space<vmem>>, %arg3: memref<128x512xbf16, #tpu.memory_space<vmem>>, %arg4: memref<1x512xf32, #tpu.memory_space<vmem>>, %arg5: memref<8x128x128xbf16, #tpu.memory_space<vmem>>, %arg6: memref<1x128xf32, #tpu.memory_space<vmem>>, %arg7: memref<16x128xf32, #tpu.memory_space<vmem>>, %arg8: memref<8x16x512xf32, #tpu.memory_space<vmem>>, %arg9: memref<16x128xf32, #tpu.memory_space<vmem>>, %arg10: memref<16x128xf32, #tpu.memory_space<vmem>>, %arg11: memref<8x16x128xbf16, #tpu.memory_space<vmem>>) attributes {dimension_semantics = [#tpu.dimension_semantics<arbitrary>], iteration_bounds = array<i64: 1>, scalar_prefetch = 0 : i64, scratch_operands = 4 : i64, tpu.core_type = #tpu.core_type<tc>, window_params = [{transform_indices = @transform_0, window_bounds = array<i64: 8, 16, 128>}, {pipeline_mode = #tpu.pipeline_mode<synchronous>, transform_indices = @transform_1, window_bounds = array<i64: 128, 512>}, {pipeline_mode = #tpu.pipeline_mode<synchronous>, transform_indices = @transform_2, window_bounds = array<i64: 128, 512>}, {pipeline_mode = #tpu.pipeline_mode<synchronous>, transform_indices = @transform_3, window_bounds = array<i64: 1, 512>}, {transform_indices = @transform_4, window_bounds = array<i64: 8, 128, 128>}, {pipeline_mode = #tpu.pipeline_mode<synchronous>, transform_indices = @transform_5, window_bounds = array<i64: 1, 128>}, {pipeline_mode = #tpu.pipeline_mode<synchronous>, transform_indices = @transform_6, window_bounds = array<i64: 16, 128>}]} {
    %c0_i32 = arith.constant 0 : i32
    %0 = arith.cmpi eq, %arg0, %c0_i32 : i32
    %c0_i32_0 = arith.constant 0 : i32
    %1 = arith.cmpi eq, %arg0, %c0_i32_0 : i32
    %2 = arith.extui %0 : i1 to i32
    %c0_i32_1 = arith.constant 0 : i32
    %3 = arith.cmpi ne, %2, %c0_i32_1 : i32
    scf.if %3 {
      %cst_147 = arith.constant 0.000000e+00 : f32
      %295 = vector.broadcast %cst_147 : f32 to vector<16x128xf32>
      %c0_148 = arith.constant 0 : index
      %c0_149 = arith.constant 0 : index
      %296 = vector.load %arg9[%c0_148, %c0_149] : memref<16x128xf32, #tpu.memory_space<vmem>>, vector<16x128xf32>
      tpu.vector_store %arg9[%c0_148, %c0_149], %295 {strides = array<i32>} : memref<16x128xf32, #tpu.memory_space<vmem>>, vector<16x128xf32>,
      %cst_150 = arith.constant 0.000000e+00 : f32
      %297 = vector.broadcast %cst_150 : f32 to vector<16x128xf32>
      %c0_151 = arith.constant 0 : index
      %c0_152 = arith.constant 0 : index
      %298 = vector.load %arg10[%c0_151, %c0_152] : memref<16x128xf32, #tpu.memory_space<vmem>>, vector<16x128xf32>
      tpu.vector_store %arg10[%c0_151, %c0_152], %297 {strides = array<i32>} : memref<16x128xf32, #tpu.memory_space<vmem>>, vector<16x128xf32>,
      %cst_153 = arith.constant 0.000000e+00 : f32
      %299 = vector.broadcast %cst_153 : f32 to vector<16x128xf32>
      %c0_154 = arith.constant 0 : index
      %c0_155 = arith.constant 0 : index
      %300 = vector.load %arg7[%c0_154, %c0_155] : memref<16x128xf32, #tpu.memory_space<vmem>>, vector<16x128xf32>
      tpu.vector_store %arg7[%c0_154, %c0_155], %299 {strides = array<i32>} : memref<16x128xf32, #tpu.memory_space<vmem>>, vector<16x128xf32>,
    } else {
    }
    %c0 = arith.constant 0 : index
    %c0_2 = arith.constant 0 : index
    %c0_3 = arith.constant 0 : index
    %4 = vector.load %arg1[%c0, %c0_2, %c0_3] : memref<8x16x128xbf16, #tpu.memory_space<vmem>>, vector<8x16x128xbf16>
    %5 = vector.shape_cast %4 : vector<8x16x128xbf16> to vector<128x128xbf16>
    %c0_4 = arith.constant 0 : index
    %c0_5 = arith.constant 0 : index
    %6 = vector.load %arg2[%c0_4, %c0_5] : memref<128x512xbf16, #tpu.memory_space<vmem>>, vector<128x512xbf16>
    %cst = arith.constant dense<0.000000e+00> : vector<128x512xf32>
    %7 = tpu.matmul %5, %6, %cst {dimension_numbers = #tpu.dot_dimension_numbers<[1], [0], [0], [1], [0, 0, 1, 1], [], []>} : vector<128x128xbf16>, vector<128x512xbf16>, vector<128x512xf32> -> vector<128x512xf32>
    %c0_6 = arith.constant 0 : index
    %c0_7 = arith.constant 0 : index
    %8 = vector.load %arg4[%c0_6, %c0_7] : memref<1x512xf32, #tpu.memory_space<vmem>>, vector<1x512xf32>
    %9 = vector.broadcast %8 : vector<1x512xf32> to vector<128x512xf32>
    %10 = arith.addf %7, %9 : vector<128x512xf32>
    %11 = vector.shape_cast %10 : vector<128x512xf32> to vector<8x16x512xf32>
    %c0_8 = arith.constant 0 : index
    %c0_9 = arith.constant 0 : index
    %c0_10 = arith.constant 0 : index
    %12 = vector.load %arg8[%c0_8, %c0_9, %c0_10] : memref<8x16x512xf32, #tpu.memory_space<vmem>>, vector<8x16x512xf32>
    tpu.vector_store %arg8[%c0_8, %c0_9, %c0_10], %11 {strides = array<i32>} : memref<8x16x512xf32, #tpu.memory_space<vmem>>, vector<8x16x512xf32>,
    %c0_11 = arith.constant 0 : index
    %c0_12 = arith.constant 0 : index
    %13 = vector.load %arg9[%c0_11, %c0_12] : memref<16x128xf32, #tpu.memory_space<vmem>>, vector<16x128xf32>
    %c0_13 = arith.constant 0 : index
    %c0_14 = arith.constant 0 : index
    %14 = vector.load %arg10[%c0_13, %c0_14] : memref<16x128xf32, #tpu.memory_space<vmem>>, vector<16x128xf32>
    %c0_i32_15 = arith.constant 0 : i32
    %c7_i32 = arith.constant 7 : i32
    %15 = arith.subi %c7_i32, %c0_i32_15 : i32
    %16 = arith.index_cast %15 : i32 to index
    %c0_16 = arith.constant 0 : index
    %c0_17 = arith.constant 0 : index
    %17 = vector.load %arg8[%16, %c0_16, %c0_17] : memref<8x16x512xf32, #tpu.memory_space<vmem>>, vector<1x16x512xf32>
    %18 = vector.shape_cast %17 : vector<1x16x512xf32> to vector<16x512xf32>
    %19 = arith.truncf %13 : vector<16x128xf32> to vector<16x128xbf16>
    %c0_18 = arith.constant 0 : index
    %c0_19 = arith.constant 0 : index
    %20 = vector.load %arg3[%c0_18, %c0_19] : memref<128x512xbf16, #tpu.memory_space<vmem>>, vector<128x512xbf16>
    %cst_20 = arith.constant dense<0.000000e+00> : vector<16x512xf32>
    %21 = tpu.matmul %19, %20, %cst_20 {dimension_numbers = #tpu.dot_dimension_numbers<[1], [0], [0], [1], [0, 0, 1, 1], [], []>} : vector<16x128xbf16>, vector<128x512xbf16>, vector<16x512xf32> -> vector<16x512xf32>
    %22 = arith.addf %18, %21 : vector<16x512xf32>
    %23 = arith.negf %22 : vector<16x512xf32>
    %24 = math.exp %23 : vector<16x512xf32>
    %cst_21 = arith.constant 1.000000e+00 : f32
    %25 = vector.broadcast %cst_21 : f32 to vector<16x512xf32>
    %26 = arith.addf %25, %24 : vector<16x512xf32>
    %27 = arith.divf %25, %26 : vector<16x512xf32>
    %28 = vector.extract_strided_slice %22 {offsets = [0, 256], sizes = [16, 128], strides = [1, 1]} : vector<16x512xf32> to vector<16x128xf32>
    %29 = math.tanh %28 : vector<16x128xf32>
    %30 = vector.extract_strided_slice %27 {offsets = [0, 128], sizes = [16, 128], strides = [1, 1]} : vector<16x512xf32> to vector<16x128xf32>
    %31 = arith.mulf %30, %14 : vector<16x128xf32>
    %32 = vector.extract_strided_slice %27 {offsets = [0, 0], sizes = [16, 128], strides = [1, 1]} : vector<16x512xf32> to vector<16x128xf32>
    %33 = arith.mulf %32, %29 : vector<16x128xf32>
    %34 = arith.addf %31, %33 : vector<16x128xf32>
    %35 = vector.extract_strided_slice %27 {offsets = [0, 384], sizes = [16, 128], strides = [1, 1]} : vector<16x512xf32> to vector<16x128xf32>
    %36 = math.tanh %34 : vector<16x128xf32>
    %37 = arith.mulf %35, %36 : vector<16x128xf32>
    %38 = arith.truncf %37 : vector<16x128xf32> to vector<16x128xbf16>
    %39 = arith.index_cast %15 : i32 to index
    %c0_22 = arith.constant 0 : index
    %c0_23 = arith.constant 0 : index
    %40 = vector.load %arg11[%39, %c0_22, %c0_23] : memref<8x16x128xbf16, #tpu.memory_space<vmem>>, vector<1x16x128xbf16>
    %41 = vector.shape_cast %40 : vector<1x16x128xbf16> to vector<16x128xbf16>
    %42 = vector.shape_cast %38 : vector<16x128xbf16> to vector<1x16x128xbf16>
    tpu.vector_store %arg11[%39, %c0_22, %c0_23], %42 {strides = array<i32>} : memref<8x16x128xbf16, #tpu.memory_space<vmem>>, vector<1x16x128xbf16>,
    %c1_i32 = arith.constant 1 : i32
    %c7_i32_24 = arith.constant 7 : i32
    %43 = arith.subi %c7_i32_24, %c1_i32 : i32
    %44 = arith.index_cast %43 : i32 to index
    %c0_25 = arith.constant 0 : index
    %c0_26 = arith.constant 0 : index
    %45 = vector.load %arg8[%44, %c0_25, %c0_26] : memref<8x16x512xf32, #tpu.memory_space<vmem>>, vector<1x16x512xf32>
    %46 = vector.shape_cast %45 : vector<1x16x512xf32> to vector<16x512xf32>
    %47 = arith.truncf %37 : vector<16x128xf32> to vector<16x128xbf16>
    %c0_27 = arith.constant 0 : index
    %c0_28 = arith.constant 0 : index
    %48 = vector.load %arg3[%c0_27, %c0_28] : memref<128x512xbf16, #tpu.memory_space<vmem>>, vector<128x512xbf16>
    %cst_29 = arith.constant dense<0.000000e+00> : vector<16x512xf32>
    %49 = tpu.matmul %47, %48, %cst_29 {dimension_numbers = #tpu.dot_dimension_numbers<[1], [0], [0], [1], [0, 0, 1, 1], [], []>} : vector<16x128xbf16>, vector<128x512xbf16>, vector<16x512xf32> -> vector<16x512xf32>
    %50 = arith.addf %46, %49 : vector<16x512xf32>
    %51 = arith.negf %50 : vector<16x512xf32>
    %52 = math.exp %51 : vector<16x512xf32>
    %cst_30 = arith.constant 1.000000e+00 : f32
    %53 = vector.broadcast %cst_30 : f32 to vector<16x512xf32>
    %54 = arith.addf %53, %52 : vector<16x512xf32>
    %55 = arith.divf %53, %54 : vector<16x512xf32>
    %56 = vector.extract_strided_slice %50 {offsets = [0, 256], sizes = [16, 128], strides = [1, 1]} : vector<16x512xf32> to vector<16x128xf32>
    %57 = math.tanh %56 : vector<16x128xf32>
    %58 = vector.extract_strided_slice %55 {offsets = [0, 128], sizes = [16, 128], strides = [1, 1]} : vector<16x512xf32> to vector<16x128xf32>
    %59 = arith.mulf %58, %34 : vector<16x128xf32>
    %60 = vector.extract_strided_slice %55 {offsets = [0, 0], sizes = [16, 128], strides = [1, 1]} : vector<16x512xf32> to vector<16x128xf32>
    %61 = arith.mulf %60, %57 : vector<16x128xf32>
    %62 = arith.addf %59, %61 : vector<16x128xf32>
    %63 = vector.extract_strided_slice %55 {offsets = [0, 384], sizes = [16, 128], strides = [1, 1]} : vector<16x512xf32> to vector<16x128xf32>
    %64 = math.tanh %62 : vector<16x128xf32>
    %65 = arith.mulf %63, %64 : vector<16x128xf32>
    %66 = arith.truncf %65 : vector<16x128xf32> to vector<16x128xbf16>
    %67 = arith.index_cast %43 : i32 to index
    %c0_31 = arith.constant 0 : index
    %c0_32 = arith.constant 0 : index
    %68 = vector.load %arg11[%67, %c0_31, %c0_32] : memref<8x16x128xbf16, #tpu.memory_space<vmem>>, vector<1x16x128xbf16>
    %69 = vector.shape_cast %68 : vector<1x16x128xbf16> to vector<16x128xbf16>
    %70 = vector.shape_cast %66 : vector<16x128xbf16> to vector<1x16x128xbf16>
    tpu.vector_store %arg11[%67, %c0_31, %c0_32], %70 {strides = array<i32>} : memref<8x16x128xbf16, #tpu.memory_space<vmem>>, vector<1x16x128xbf16>,
    %c2_i32 = arith.constant 2 : i32
    %c7_i32_33 = arith.constant 7 : i32
    %71 = arith.subi %c7_i32_33, %c2_i32 : i32
    %72 = arith.index_cast %71 : i32 to index
    %c0_34 = arith.constant 0 : index
    %c0_35 = arith.constant 0 : index
    %73 = vector.load %arg8[%72, %c0_34, %c0_35] : memref<8x16x512xf32, #tpu.memory_space<vmem>>, vector<1x16x512xf32>
    %74 = vector.shape_cast %73 : vector<1x16x512xf32> to vector<16x512xf32>
    %75 = arith.truncf %65 : vector<16x128xf32> to vector<16x128xbf16>
    %c0_36 = arith.constant 0 : index
    %c0_37 = arith.constant 0 : index
    %76 = vector.load %arg3[%c0_36, %c0_37] : memref<128x512xbf16, #tpu.memory_space<vmem>>, vector<128x512xbf16>
    %cst_38 = arith.constant dense<0.000000e+00> : vector<16x512xf32>
    %77 = tpu.matmul %75, %76, %cst_38 {dimension_numbers = #tpu.dot_dimension_numbers<[1], [0], [0], [1], [0, 0, 1, 1], [], []>} : vector<16x128xbf16>, vector<128x512xbf16>, vector<16x512xf32> -> vector<16x512xf32>
    %78 = arith.addf %74, %77 : vector<16x512xf32>
    %79 = arith.negf %78 : vector<16x512xf32>
    %80 = math.exp %79 : vector<16x512xf32>
    %cst_39 = arith.constant 1.000000e+00 : f32
    %81 = vector.broadcast %cst_39 : f32 to vector<16x512xf32>
    %82 = arith.addf %81, %80 : vector<16x512xf32>
    %83 = arith.divf %81, %82 : vector<16x512xf32>
    %84 = vector.extract_strided_slice %78 {offsets = [0, 256], sizes = [16, 128], strides = [1, 1]} : vector<16x512xf32> to vector<16x128xf32>
    %85 = math.tanh %84 : vector<16x128xf32>
    %86 = vector.extract_strided_slice %83 {offsets = [0, 128], sizes = [16, 128], strides = [1, 1]} : vector<16x512xf32> to vector<16x128xf32>
    %87 = arith.mulf %86, %62 : vector<16x128xf32>
    %88 = vector.extract_strided_slice %83 {offsets = [0, 0], sizes = [16, 128], strides = [1, 1]} : vector<16x512xf32> to vector<16x128xf32>
    %89 = arith.mulf %88, %85 : vector<16x128xf32>
    %90 = arith.addf %87, %89 : vector<16x128xf32>
    %91 = vector.extract_strided_slice %83 {offsets = [0, 384], sizes = [16, 128], strides = [1, 1]} : vector<16x512xf32> to vector<16x128xf32>
    %92 = math.tanh %90 : vector<16x128xf32>
    %93 = arith.mulf %91, %92 : vector<16x128xf32>
    %94 = arith.truncf %93 : vector<16x128xf32> to vector<16x128xbf16>
    %95 = arith.index_cast %71 : i32 to index
    %c0_40 = arith.constant 0 : index
    %c0_41 = arith.constant 0 : index
    %96 = vector.load %arg11[%95, %c0_40, %c0_41] : memref<8x16x128xbf16, #tpu.memory_space<vmem>>, vector<1x16x128xbf16>
    %97 = vector.shape_cast %96 : vector<1x16x128xbf16> to vector<16x128xbf16>
    %98 = vector.shape_cast %94 : vector<16x128xbf16> to vector<1x16x128xbf16>
    tpu.vector_store %arg11[%95, %c0_40, %c0_41], %98 {strides = array<i32>} : memref<8x16x128xbf16, #tpu.memory_space<vmem>>, vector<1x16x128xbf16>,
    %c3_i32 = arith.constant 3 : i32
    %c7_i32_42 = arith.constant 7 : i32
    %99 = arith.subi %c7_i32_42, %c3_i32 : i32
    %100 = arith.index_cast %99 : i32 to index
    %c0_43 = arith.constant 0 : index
    %c0_44 = arith.constant 0 : index
    %101 = vector.load %arg8[%100, %c0_43, %c0_44] : memref<8x16x512xf32, #tpu.memory_space<vmem>>, vector<1x16x512xf32>
    %102 = vector.shape_cast %101 : vector<1x16x512xf32> to vector<16x512xf32>
    %103 = arith.truncf %93 : vector<16x128xf32> to vector<16x128xbf16>
    %c0_45 = arith.constant 0 : index
    %c0_46 = arith.constant 0 : index
    %104 = vector.load %arg3[%c0_45, %c0_46] : memref<128x512xbf16, #tpu.memory_space<vmem>>, vector<128x512xbf16>
    %cst_47 = arith.constant dense<0.000000e+00> : vector<16x512xf32>
    %105 = tpu.matmul %103, %104, %cst_47 {dimension_numbers = #tpu.dot_dimension_numbers<[1], [0], [0], [1], [0, 0, 1, 1], [], []>} : vector<16x128xbf16>, vector<128x512xbf16>, vector<16x512xf32> -> vector<16x512xf32>
    %106 = arith.addf %102, %105 : vector<16x512xf32>
    %107 = arith.negf %106 : vector<16x512xf32>
    %108 = math.exp %107 : vector<16x512xf32>
    %cst_48 = arith.constant 1.000000e+00 : f32
    %109 = vector.broadcast %cst_48 : f32 to vector<16x512xf32>
    %110 = arith.addf %109, %108 : vector<16x512xf32>
    %111 = arith.divf %109, %110 : vector<16x512xf32>
    %112 = vector.extract_strided_slice %106 {offsets = [0, 256], sizes = [16, 128], strides = [1, 1]} : vector<16x512xf32> to vector<16x128xf32>
    %113 = math.tanh %112 : vector<16x128xf32>
    %114 = vector.extract_strided_slice %111 {offsets = [0, 128], sizes = [16, 128], strides = [1, 1]} : vector<16x512xf32> to vector<16x128xf32>
    %115 = arith.mulf %114, %90 : vector<16x128xf32>
    %116 = vector.extract_strided_slice %111 {offsets = [0, 0], sizes = [16, 128], strides = [1, 1]} : vector<16x512xf32> to vector<16x128xf32>
    %117 = arith.mulf %116, %113 : vector<16x128xf32>
    %118 = arith.addf %115, %117 : vector<16x128xf32>
    %119 = vector.extract_strided_slice %111 {offsets = [0, 384], sizes = [16, 128], strides = [1, 1]} : vector<16x512xf32> to vector<16x128xf32>
    %120 = math.tanh %118 : vector<16x128xf32>
    %121 = arith.mulf %119, %120 : vector<16x128xf32>
    %122 = arith.truncf %121 : vector<16x128xf32> to vector<16x128xbf16>
    %123 = arith.index_cast %99 : i32 to index
    %c0_49 = arith.constant 0 : index
    %c0_50 = arith.constant 0 : index
    %124 = vector.load %arg11[%123, %c0_49, %c0_50] : memref<8x16x128xbf16, #tpu.memory_space<vmem>>, vector<1x16x128xbf16>
    %125 = vector.shape_cast %124 : vector<1x16x128xbf16> to vector<16x128xbf16>
    %126 = vector.shape_cast %122 : vector<16x128xbf16> to vector<1x16x128xbf16>
    tpu.vector_store %arg11[%123, %c0_49, %c0_50], %126 {strides = array<i32>} : memref<8x16x128xbf16, #tpu.memory_space<vmem>>, vector<1x16x128xbf16>,
    %c4_i32 = arith.constant 4 : i32
    %c7_i32_51 = arith.constant 7 : i32
    %127 = arith.subi %c7_i32_51, %c4_i32 : i32
    %128 = arith.index_cast %127 : i32 to index
    %c0_52 = arith.constant 0 : index
    %c0_53 = arith.constant 0 : index
    %129 = vector.load %arg8[%128, %c0_52, %c0_53] : memref<8x16x512xf32, #tpu.memory_space<vmem>>, vector<1x16x512xf32>
    %130 = vector.shape_cast %129 : vector<1x16x512xf32> to vector<16x512xf32>
    %131 = arith.truncf %121 : vector<16x128xf32> to vector<16x128xbf16>
    %c0_54 = arith.constant 0 : index
    %c0_55 = arith.constant 0 : index
    %132 = vector.load %arg3[%c0_54, %c0_55] : memref<128x512xbf16, #tpu.memory_space<vmem>>, vector<128x512xbf16>
    %cst_56 = arith.constant dense<0.000000e+00> : vector<16x512xf32>
    %133 = tpu.matmul %131, %132, %cst_56 {dimension_numbers = #tpu.dot_dimension_numbers<[1], [0], [0], [1], [0, 0, 1, 1], [], []>} : vector<16x128xbf16>, vector<128x512xbf16>, vector<16x512xf32> -> vector<16x512xf32>
    %134 = arith.addf %130, %133 : vector<16x512xf32>
    %135 = arith.negf %134 : vector<16x512xf32>
    %136 = math.exp %135 : vector<16x512xf32>
    %cst_57 = arith.constant 1.000000e+00 : f32
    %137 = vector.broadcast %cst_57 : f32 to vector<16x512xf32>
    %138 = arith.addf %137, %136 : vector<16x512xf32>
    %139 = arith.divf %137, %138 : vector<16x512xf32>
    %140 = vector.extract_strided_slice %134 {offsets = [0, 256], sizes = [16, 128], strides = [1, 1]} : vector<16x512xf32> to vector<16x128xf32>
    %141 = math.tanh %140 : vector<16x128xf32>
    %142 = vector.extract_strided_slice %139 {offsets = [0, 128], sizes = [16, 128], strides = [1, 1]} : vector<16x512xf32> to vector<16x128xf32>
    %143 = arith.mulf %142, %118 : vector<16x128xf32>
    %144 = vector.extract_strided_slice %139 {offsets = [0, 0], sizes = [16, 128], strides = [1, 1]} : vector<16x512xf32> to vector<16x128xf32>
    %145 = arith.mulf %144, %141 : vector<16x128xf32>
    %146 = arith.addf %143, %145 : vector<16x128xf32>
    %147 = vector.extract_strided_slice %139 {offsets = [0, 384], sizes = [16, 128], strides = [1, 1]} : vector<16x512xf32> to vector<16x128xf32>
    %148 = math.tanh %146 : vector<16x128xf32>
    %149 = arith.mulf %147, %148 : vector<16x128xf32>
    %150 = arith.truncf %149 : vector<16x128xf32> to vector<16x128xbf16>
    %151 = arith.index_cast %127 : i32 to index
    %c0_58 = arith.constant 0 : index
    %c0_59 = arith.constant 0 : index
    %152 = vector.load %arg11[%151, %c0_58, %c0_59] : memref<8x16x128xbf16, #tpu.memory_space<vmem>>, vector<1x16x128xbf16>
    %153 = vector.shape_cast %152 : vector<1x16x128xbf16> to vector<16x128xbf16>
    %154 = vector.shape_cast %150 : vector<16x128xbf16> to vector<1x16x128xbf16>
    tpu.vector_store %arg11[%151, %c0_58, %c0_59], %154 {strides = array<i32>} : memref<8x16x128xbf16, #tpu.memory_space<vmem>>, vector<1x16x128xbf16>,
    %c5_i32 = arith.constant 5 : i32
    %c7_i32_60 = arith.constant 7 : i32
    %155 = arith.subi %c7_i32_60, %c5_i32 : i32
    %156 = arith.index_cast %155 : i32 to index
    %c0_61 = arith.constant 0 : index
    %c0_62 = arith.constant 0 : index
    %157 = vector.load %arg8[%156, %c0_61, %c0_62] : memref<8x16x512xf32, #tpu.memory_space<vmem>>, vector<1x16x512xf32>
    %158 = vector.shape_cast %157 : vector<1x16x512xf32> to vector<16x512xf32>
    %159 = arith.truncf %149 : vector<16x128xf32> to vector<16x128xbf16>
    %c0_63 = arith.constant 0 : index
    %c0_64 = arith.constant 0 : index
    %160 = vector.load %arg3[%c0_63, %c0_64] : memref<128x512xbf16, #tpu.memory_space<vmem>>, vector<128x512xbf16>
    %cst_65 = arith.constant dense<0.000000e+00> : vector<16x512xf32>
    %161 = tpu.matmul %159, %160, %cst_65 {dimension_numbers = #tpu.dot_dimension_numbers<[1], [0], [0], [1], [0, 0, 1, 1], [], []>} : vector<16x128xbf16>, vector<128x512xbf16>, vector<16x512xf32> -> vector<16x512xf32>
    %162 = arith.addf %158, %161 : vector<16x512xf32>
    %163 = arith.negf %162 : vector<16x512xf32>
    %164 = math.exp %163 : vector<16x512xf32>
    %cst_66 = arith.constant 1.000000e+00 : f32
    %165 = vector.broadcast %cst_66 : f32 to vector<16x512xf32>
    %166 = arith.addf %165, %164 : vector<16x512xf32>
    %167 = arith.divf %165, %166 : vector<16x512xf32>
    %168 = vector.extract_strided_slice %162 {offsets = [0, 256], sizes = [16, 128], strides = [1, 1]} : vector<16x512xf32> to vector<16x128xf32>
    %169 = math.tanh %168 : vector<16x128xf32>
    %170 = vector.extract_strided_slice %167 {offsets = [0, 128], sizes = [16, 128], strides = [1, 1]} : vector<16x512xf32> to vector<16x128xf32>
    %171 = arith.mulf %170, %146 : vector<16x128xf32>
    %172 = vector.extract_strided_slice %167 {offsets = [0, 0], sizes = [16, 128], strides = [1, 1]} : vector<16x512xf32> to vector<16x128xf32>
    %173 = arith.mulf %172, %169 : vector<16x128xf32>
    %174 = arith.addf %171, %173 : vector<16x128xf32>
    %175 = vector.extract_strided_slice %167 {offsets = [0, 384], sizes = [16, 128], strides = [1, 1]} : vector<16x512xf32> to vector<16x128xf32>
    %176 = math.tanh %174 : vector<16x128xf32>
    %177 = arith.mulf %175, %176 : vector<16x128xf32>
    %178 = arith.truncf %177 : vector<16x128xf32> to vector<16x128xbf16>
    %179 = arith.index_cast %155 : i32 to index
    %c0_67 = arith.constant 0 : index
    %c0_68 = arith.constant 0 : index
    %180 = vector.load %arg11[%179, %c0_67, %c0_68] : memref<8x16x128xbf16, #tpu.memory_space<vmem>>, vector<1x16x128xbf16>
    %181 = vector.shape_cast %180 : vector<1x16x128xbf16> to vector<16x128xbf16>
    %182 = vector.shape_cast %178 : vector<16x128xbf16> to vector<1x16x128xbf16>
    tpu.vector_store %arg11[%179, %c0_67, %c0_68], %182 {strides = array<i32>} : memref<8x16x128xbf16, #tpu.memory_space<vmem>>, vector<1x16x128xbf16>,
    %c6_i32 = arith.constant 6 : i32
    %c7_i32_69 = arith.constant 7 : i32
    %183 = arith.subi %c7_i32_69, %c6_i32 : i32
    %184 = arith.index_cast %183 : i32 to index
    %c0_70 = arith.constant 0 : index
    %c0_71 = arith.constant 0 : index
    %185 = vector.load %arg8[%184, %c0_70, %c0_71] : memref<8x16x512xf32, #tpu.memory_space<vmem>>, vector<1x16x512xf32>
    %186 = vector.shape_cast %185 : vector<1x16x512xf32> to vector<16x512xf32>
    %187 = arith.truncf %177 : vector<16x128xf32> to vector<16x128xbf16>
    %c0_72 = arith.constant 0 : index
    %c0_73 = arith.constant 0 : index
    %188 = vector.load %arg3[%c0_72, %c0_73] : memref<128x512xbf16, #tpu.memory_space<vmem>>, vector<128x512xbf16>
    %cst_74 = arith.constant dense<0.000000e+00> : vector<16x512xf32>
    %189 = tpu.matmul %187, %188, %cst_74 {dimension_numbers = #tpu.dot_dimension_numbers<[1], [0], [0], [1], [0, 0, 1, 1], [], []>} : vector<16x128xbf16>, vector<128x512xbf16>, vector<16x512xf32> -> vector<16x512xf32>
    %190 = arith.addf %186, %189 : vector<16x512xf32>
    %191 = arith.negf %190 : vector<16x512xf32>
    %192 = math.exp %191 : vector<16x512xf32>
    %cst_75 = arith.constant 1.000000e+00 : f32
    %193 = vector.broadcast %cst_75 : f32 to vector<16x512xf32>
    %194 = arith.addf %193, %192 : vector<16x512xf32>
    %195 = arith.divf %193, %194 : vector<16x512xf32>
    %196 = vector.extract_strided_slice %190 {offsets = [0, 256], sizes = [16, 128], strides = [1, 1]} : vector<16x512xf32> to vector<16x128xf32>
    %197 = math.tanh %196 : vector<16x128xf32>
    %198 = vector.extract_strided_slice %195 {offsets = [0, 128], sizes = [16, 128], strides = [1, 1]} : vector<16x512xf32> to vector<16x128xf32>
    %199 = arith.mulf %198, %174 : vector<16x128xf32>
    %200 = vector.extract_strided_slice %195 {offsets = [0, 0], sizes = [16, 128], strides = [1, 1]} : vector<16x512xf32> to vector<16x128xf32>
    %201 = arith.mulf %200, %197 : vector<16x128xf32>
    %202 = arith.addf %199, %201 : vector<16x128xf32>
    %203 = vector.extract_strided_slice %195 {offsets = [0, 384], sizes = [16, 128], strides = [1, 1]} : vector<16x512xf32> to vector<16x128xf32>
    %204 = math.tanh %202 : vector<16x128xf32>
    %205 = arith.mulf %203, %204 : vector<16x128xf32>
    %206 = arith.truncf %205 : vector<16x128xf32> to vector<16x128xbf16>
    %207 = arith.index_cast %183 : i32 to index
    %c0_76 = arith.constant 0 : index
    %c0_77 = arith.constant 0 : index
    %208 = vector.load %arg11[%207, %c0_76, %c0_77] : memref<8x16x128xbf16, #tpu.memory_space<vmem>>, vector<1x16x128xbf16>
    %209 = vector.shape_cast %208 : vector<1x16x128xbf16> to vector<16x128xbf16>
    %210 = vector.shape_cast %206 : vector<16x128xbf16> to vector<1x16x128xbf16>
    tpu.vector_store %arg11[%207, %c0_76, %c0_77], %210 {strides = array<i32>} : memref<8x16x128xbf16, #tpu.memory_space<vmem>>, vector<1x16x128xbf16>,
    %c7_i32_78 = arith.constant 7 : i32
    %c7_i32_79 = arith.constant 7 : i32
    %211 = arith.subi %c7_i32_79, %c7_i32_78 : i32
    %212 = arith.index_cast %211 : i32 to index
    %c0_80 = arith.constant 0 : index
    %c0_81 = arith.constant 0 : index
    %213 = vector.load %arg8[%212, %c0_80, %c0_81] : memref<8x16x512xf32, #tpu.memory_space<vmem>>, vector<1x16x512xf32>
    %214 = vector.shape_cast %213 : vector<1x16x512xf32> to vector<16x512xf32>
    %215 = arith.truncf %205 : vector<16x128xf32> to vector<16x128xbf16>
    %c0_82 = arith.constant 0 : index
    %c0_83 = arith.constant 0 : index
    %216 = vector.load %arg3[%c0_82, %c0_83] : memref<128x512xbf16, #tpu.memory_space<vmem>>, vector<128x512xbf16>
    %cst_84 = arith.constant dense<0.000000e+00> : vector<16x512xf32>
    %217 = tpu.matmul %215, %216, %cst_84 {dimension_numbers = #tpu.dot_dimension_numbers<[1], [0], [0], [1], [0, 0, 1, 1], [], []>} : vector<16x128xbf16>, vector<128x512xbf16>, vector<16x512xf32> -> vector<16x512xf32>
    %218 = arith.addf %214, %217 : vector<16x512xf32>
    %219 = arith.negf %218 : vector<16x512xf32>
    %220 = math.exp %219 : vector<16x512xf32>
    %cst_85 = arith.constant 1.000000e+00 : f32
    %221 = vector.broadcast %cst_85 : f32 to vector<16x512xf32>
    %222 = arith.addf %221, %220 : vector<16x512xf32>
    %223 = arith.divf %221, %222 : vector<16x512xf32>
    %224 = vector.extract_strided_slice %218 {offsets = [0, 256], sizes = [16, 128], strides = [1, 1]} : vector<16x512xf32> to vector<16x128xf32>
    %225 = math.tanh %224 : vector<16x128xf32>
    %226 = vector.extract_strided_slice %223 {offsets = [0, 128], sizes = [16, 128], strides = [1, 1]} : vector<16x512xf32> to vector<16x128xf32>
    %227 = arith.mulf %226, %202 : vector<16x128xf32>
    %228 = vector.extract_strided_slice %223 {offsets = [0, 0], sizes = [16, 128], strides = [1, 1]} : vector<16x512xf32> to vector<16x128xf32>
    %229 = arith.mulf %228, %225 : vector<16x128xf32>
    %230 = arith.addf %227, %229 : vector<16x128xf32>
    %231 = vector.extract_strided_slice %223 {offsets = [0, 384], sizes = [16, 128], strides = [1, 1]} : vector<16x512xf32> to vector<16x128xf32>
    %232 = math.tanh %230 : vector<16x128xf32>
    %233 = arith.mulf %231, %232 : vector<16x128xf32>
    %234 = arith.truncf %233 : vector<16x128xf32> to vector<16x128xbf16>
    %235 = arith.index_cast %211 : i32 to index
    %c0_86 = arith.constant 0 : index
    %c0_87 = arith.constant 0 : index
    %236 = vector.load %arg11[%235, %c0_86, %c0_87] : memref<8x16x128xbf16, #tpu.memory_space<vmem>>, vector<1x16x128xbf16>
    %237 = vector.shape_cast %236 : vector<1x16x128xbf16> to vector<16x128xbf16>
    %238 = vector.shape_cast %234 : vector<16x128xbf16> to vector<1x16x128xbf16>
    tpu.vector_store %arg11[%235, %c0_86, %c0_87], %238 {strides = array<i32>} : memref<8x16x128xbf16, #tpu.memory_space<vmem>>, vector<1x16x128xbf16>,
    %c8_i32 = arith.constant 8 : i32
    %c0_88 = arith.constant 0 : index
    %c0_89 = arith.constant 0 : index
    %239 = vector.load %arg9[%c0_88, %c0_89] : memref<16x128xf32, #tpu.memory_space<vmem>>, vector<16x128xf32>
    tpu.vector_store %arg9[%c0_88, %c0_89], %233 {strides = array<i32>} : memref<16x128xf32, #tpu.memory_space<vmem>>, vector<16x128xf32>,
    %c0_90 = arith.constant 0 : index
    %c0_91 = arith.constant 0 : index
    %240 = vector.load %arg10[%c0_90, %c0_91] : memref<16x128xf32, #tpu.memory_space<vmem>>, vector<16x128xf32>
    tpu.vector_store %arg10[%c0_90, %c0_91], %230 {strides = array<i32>} : memref<16x128xf32, #tpu.memory_space<vmem>>, vector<16x128xf32>,
    %cst_92 = arith.constant 0.000000e+00 : f32
    %241 = vector.broadcast %cst_92 : f32 to vector<16x128xf32>
    %c0_93 = arith.constant 0 : index
    %c0_94 = arith.constant 0 : index
    %c0_95 = arith.constant 0 : index
    %242 = vector.load %arg11[%c0_93, %c0_94, %c0_95] : memref<8x16x128xbf16, #tpu.memory_space<vmem>>, vector<1x16x128xbf16>
    %243 = vector.shape_cast %242 : vector<1x16x128xbf16> to vector<16x128xbf16>
    %c0_96 = arith.constant 0 : index
    %c0_97 = arith.constant 0 : index
    %c0_98 = arith.constant 0 : index
    %244 = vector.load %arg5[%c0_96, %c0_97, %c0_98] : memref<8x128x128xbf16, #tpu.memory_space<vmem>>, vector<1x128x128xbf16>
    %245 = vector.shape_cast %244 : vector<1x128x128xbf16> to vector<128x128xbf16>
    %cst_99 = arith.constant dense<0.000000e+00> : vector<16x128xf32>
    %246 = tpu.matmul %243, %245, %cst_99 {dimension_numbers = #tpu.dot_dimension_numbers<[1], [0], [0], [1], [0, 0, 1, 1], [], []>} : vector<16x128xbf16>, vector<128x128xbf16>, vector<16x128xf32> -> vector<16x128xf32>
    %247 = arith.addf %241, %246 : vector<16x128xf32>
    %c1 = arith.constant 1 : index
    %c0_100 = arith.constant 0 : index
    %c0_101 = arith.constant 0 : index
    %248 = vector.load %arg11[%c1, %c0_100, %c0_101] : memref<8x16x128xbf16, #tpu.memory_space<vmem>>, vector<1x16x128xbf16>
    %249 = vector.shape_cast %248 : vector<1x16x128xbf16> to vector<16x128xbf16>
    %c1_102 = arith.constant 1 : index
    %c0_103 = arith.constant 0 : index
    %c0_104 = arith.constant 0 : index
    %250 = vector.load %arg5[%c1_102, %c0_103, %c0_104] : memref<8x128x128xbf16, #tpu.memory_space<vmem>>, vector<1x128x128xbf16>
    %251 = vector.shape_cast %250 : vector<1x128x128xbf16> to vector<128x128xbf16>
    %cst_105 = arith.constant dense<0.000000e+00> : vector<16x128xf32>
    %252 = tpu.matmul %249, %251, %cst_105 {dimension_numbers = #tpu.dot_dimension_numbers<[1], [0], [0], [1], [0, 0, 1, 1], [], []>} : vector<16x128xbf16>, vector<128x128xbf16>, vector<16x128xf32> -> vector<16x128xf32>
    %253 = arith.addf %247, %252 : vector<16x128xf32>
    %c2 = arith.constant 2 : index
    %c0_106 = arith.constant 0 : index
    %c0_107 = arith.constant 0 : index
    %254 = vector.load %arg11[%c2, %c0_106, %c0_107] : memref<8x16x128xbf16, #tpu.memory_space<vmem>>, vector<1x16x128xbf16>
    %255 = vector.shape_cast %254 : vector<1x16x128xbf16> to vector<16x128xbf16>
    %c2_108 = arith.constant 2 : index
    %c0_109 = arith.constant 0 : index
    %c0_110 = arith.constant 0 : index
    %256 = vector.load %arg5[%c2_108, %c0_109, %c0_110] : memref<8x128x128xbf16, #tpu.memory_space<vmem>>, vector<1x128x128xbf16>
    %257 = vector.shape_cast %256 : vector<1x128x128xbf16> to vector<128x128xbf16>
    %cst_111 = arith.constant dense<0.000000e+00> : vector<16x128xf32>
    %258 = tpu.matmul %255, %257, %cst_111 {dimension_numbers = #tpu.dot_dimension_numbers<[1], [0], [0], [1], [0, 0, 1, 1], [], []>} : vector<16x128xbf16>, vector<128x128xbf16>, vector<16x128xf32> -> vector<16x128xf32>
    %259 = arith.addf %253, %258 : vector<16x128xf32>
    %c3 = arith.constant 3 : index
    %c0_112 = arith.constant 0 : index
    %c0_113 = arith.constant 0 : index
    %260 = vector.load %arg11[%c3, %c0_112, %c0_113] : memref<8x16x128xbf16, #tpu.memory_space<vmem>>, vector<1x16x128xbf16>
    %261 = vector.shape_cast %260 : vector<1x16x128xbf16> to vector<16x128xbf16>
    %c3_114 = arith.constant 3 : index
    %c0_115 = arith.constant 0 : index
    %c0_116 = arith.constant 0 : index
    %262 = vector.load %arg5[%c3_114, %c0_115, %c0_116] : memref<8x128x128xbf16, #tpu.memory_space<vmem>>, vector<1x128x128xbf16>
    %263 = vector.shape_cast %262 : vector<1x128x128xbf16> to vector<128x128xbf16>
    %cst_117 = arith.constant dense<0.000000e+00> : vector<16x128xf32>
    %264 = tpu.matmul %261, %263, %cst_117 {dimension_numbers = #tpu.dot_dimension_numbers<[1], [0], [0], [1], [0, 0, 1, 1], [], []>} : vector<16x128xbf16>, vector<128x128xbf16>, vector<16x128xf32> -> vector<16x128xf32>
    %265 = arith.addf %259, %264 : vector<16x128xf32>
    %c4 = arith.constant 4 : index
    %c0_118 = arith.constant 0 : index
    %c0_119 = arith.constant 0 : index
    %266 = vector.load %arg11[%c4, %c0_118, %c0_119] : memref<8x16x128xbf16, #tpu.memory_space<vmem>>, vector<1x16x128xbf16>
    %267 = vector.shape_cast %266 : vector<1x16x128xbf16> to vector<16x128xbf16>
    %c4_120 = arith.constant 4 : index
    %c0_121 = arith.constant 0 : index
    %c0_122 = arith.constant 0 : index
    %268 = vector.load %arg5[%c4_120, %c0_121, %c0_122] : memref<8x128x128xbf16, #tpu.memory_space<vmem>>, vector<1x128x128xbf16>
    %269 = vector.shape_cast %268 : vector<1x128x128xbf16> to vector<128x128xbf16>
    %cst_123 = arith.constant dense<0.000000e+00> : vector<16x128xf32>
    %270 = tpu.matmul %267, %269, %cst_123 {dimension_numbers = #tpu.dot_dimension_numbers<[1], [0], [0], [1], [0, 0, 1, 1], [], []>} : vector<16x128xbf16>, vector<128x128xbf16>, vector<16x128xf32> -> vector<16x128xf32>
    %271 = arith.addf %265, %270 : vector<16x128xf32>
    %c5 = arith.constant 5 : index
    %c0_124 = arith.constant 0 : index
    %c0_125 = arith.constant 0 : index
    %272 = vector.load %arg11[%c5, %c0_124, %c0_125] : memref<8x16x128xbf16, #tpu.memory_space<vmem>>, vector<1x16x128xbf16>
    %273 = vector.shape_cast %272 : vector<1x16x128xbf16> to vector<16x128xbf16>
    %c5_126 = arith.constant 5 : index
    %c0_127 = arith.constant 0 : index
    %c0_128 = arith.constant 0 : index
    %274 = vector.load %arg5[%c5_126, %c0_127, %c0_128] : memref<8x128x128xbf16, #tpu.memory_space<vmem>>, vector<1x128x128xbf16>
    %275 = vector.shape_cast %274 : vector<1x128x128xbf16> to vector<128x128xbf16>
    %cst_129 = arith.constant dense<0.000000e+00> : vector<16x128xf32>
    %276 = tpu.matmul %273, %275, %cst_129 {dimension_numbers = #tpu.dot_dimension_numbers<[1], [0], [0], [1], [0, 0, 1, 1], [], []>} : vector<16x128xbf16>, vector<128x128xbf16>, vector<16x128xf32> -> vector<16x128xf32>
    %277 = arith.addf %271, %276 : vector<16x128xf32>
    %c6 = arith.constant 6 : index
    %c0_130 = arith.constant 0 : index
    %c0_131 = arith.constant 0 : index
    %278 = vector.load %arg11[%c6, %c0_130, %c0_131] : memref<8x16x128xbf16, #tpu.memory_space<vmem>>, vector<1x16x128xbf16>
    %279 = vector.shape_cast %278 : vector<1x16x128xbf16> to vector<16x128xbf16>
    %c6_132 = arith.constant 6 : index
    %c0_133 = arith.constant 0 : index
    %c0_134 = arith.constant 0 : index
    %280 = vector.load %arg5[%c6_132, %c0_133, %c0_134] : memref<8x128x128xbf16, #tpu.memory_space<vmem>>, vector<1x128x128xbf16>
    %281 = vector.shape_cast %280 : vector<1x128x128xbf16> to vector<128x128xbf16>
    %cst_135 = arith.constant dense<0.000000e+00> : vector<16x128xf32>
    %282 = tpu.matmul %279, %281, %cst_135 {dimension_numbers = #tpu.dot_dimension_numbers<[1], [0], [0], [1], [0, 0, 1, 1], [], []>} : vector<16x128xbf16>, vector<128x128xbf16>, vector<16x128xf32> -> vector<16x128xf32>
    %283 = arith.addf %277, %282 : vector<16x128xf32>
    %c7 = arith.constant 7 : index
    %c0_136 = arith.constant 0 : index
    %c0_137 = arith.constant 0 : index
    %284 = vector.load %arg11[%c7, %c0_136, %c0_137] : memref<8x16x128xbf16, #tpu.memory_space<vmem>>, vector<1x16x128xbf16>
    %285 = vector.shape_cast %284 : vector<1x16x128xbf16> to vector<16x128xbf16>
    %c7_138 = arith.constant 7 : index
    %c0_139 = arith.constant 0 : index
    %c0_140 = arith.constant 0 : index
    %286 = vector.load %arg5[%c7_138, %c0_139, %c0_140] : memref<8x128x128xbf16, #tpu.memory_space<vmem>>, vector<1x128x128xbf16>
    %287 = vector.shape_cast %286 : vector<1x128x128xbf16> to vector<128x128xbf16>
    %cst_141 = arith.constant dense<0.000000e+00> : vector<16x128xf32>
    %288 = tpu.matmul %285, %287, %cst_141 {dimension_numbers = #tpu.dot_dimension_numbers<[1], [0], [0], [1], [0, 0, 1, 1], [], []>} : vector<16x128xbf16>, vector<128x128xbf16>, vector<16x128xf32> -> vector<16x128xf32>
    %289 = arith.addf %283, %288 : vector<16x128xf32>
    %c0_142 = arith.constant 0 : index
    %c0_143 = arith.constant 0 : index
    %290 = vector.load %arg7[%c0_142, %c0_143] : memref<16x128xf32, #tpu.memory_space<vmem>>, vector<16x128xf32>
    %291 = arith.addf %290, %289 : vector<16x128xf32>
    %c0_144 = arith.constant 0 : index
    %c0_145 = arith.constant 0 : index
    %292 = vector.load %arg7[%c0_144, %c0_145] : memref<16x128xf32, #tpu.memory_space<vmem>>, vector<16x128xf32>
    tpu.vector_store %arg7[%c0_144, %c0_145], %291 {strides = array<i32>} : memref<16x128xf32, #tpu.memory_space<vmem>>, vector<16x128xf32>,
    %293 = arith.extui %1 : i1 to i32
    %c0_i32_146 = arith.constant 0 : i32
    %294 = arith.cmpi ne, %293, %c0_i32_146 : i32
    scf.if %294 {
      %c0_147 = arith.constant 0 : index
      %c0_148 = arith.constant 0 : index
      %295 = vector.load %arg7[%c0_147, %c0_148] : memref<16x128xf32, #tpu.memory_space<vmem>>, vector<16x128xf32>
      %c0_149 = arith.constant 0 : index
      %c0_150 = arith.constant 0 : index
      %296 = vector.load %arg6[%c0_149, %c0_150] : memref<1x128xf32, #tpu.memory_space<vmem>>, vector<1x128xf32>
      %297 = vector.broadcast %296 : vector<1x128xf32> to vector<16x128xf32>
      %298 = arith.addf %295, %297 : vector<16x128xf32>
      %c0_151 = arith.constant 0 : index
      %c0_152 = arith.constant 0 : index
      %299 = vector.load %arg7[%c0_151, %c0_152] : memref<16x128xf32, #tpu.memory_space<vmem>>, vector<16x128xf32>
      tpu.vector_store %arg7[%c0_151, %c0_152], %298 {strides = array<i32>} : memref<16x128xf32, #tpu.memory_space<vmem>>, vector<16x128xf32>,
    } else {
    }
    return
  }
  func.func @transform_0(%arg0: i32) -> (i32, i32, i32) {
    %c0_i32 = arith.constant 0 : i32
    %0 = arith.subi %c0_i32, %arg0 : i32
    %c0_i32_0 = arith.constant 0 : i32
    %c0_i32_1 = arith.constant 0 : i32
    %c0_i32_2 = arith.constant 0 : i32
    return %0, %c0_i32_0, %c0_i32_1 : i32, i32, i32
  }
  func.func @transform_1(%arg0: i32) -> (i32, i32) {
    %c0_i32 = arith.constant 0 : i32
    %c0_i32_0 = arith.constant 0 : i32
    %c0_i32_1 = arith.constant 0 : i32
    return %c0_i32, %c0_i32_0 : i32, i32
  }
  func.func @transform_2(%arg0: i32) -> (i32, i32) {
    %c0_i32 = arith.constant 0 : i32
    %c0_i32_0 = arith.constant 0 : i32
    %c0_i32_1 = arith.constant 0 : i32
    return %c0_i32, %c0_i32_0 : i32, i32
  }
  func.func @transform_3(%arg0: i32) -> (i32, i32) {
    %c0_i32 = arith.constant 0 : i32
    %c0_i32_0 = arith.constant 0 : i32
    %c0_i32_1 = arith.constant 0 : i32
    return %c0_i32, %c0_i32_0 : i32, i32
  }
  func.func @transform_4(%arg0: i32) -> (i32, i32, i32) {
    %c0_i32 = arith.constant 0 : i32
    %0 = arith.subi %c0_i32, %arg0 : i32
    %c0_i32_0 = arith.constant 0 : i32
    %c0_i32_1 = arith.constant 0 : i32
    %c0_i32_2 = arith.constant 0 : i32
    return %0, %c0_i32_0, %c0_i32_1 : i32, i32, i32
  }
  func.func @transform_5(%arg0: i32) -> (i32, i32) {
    %c0_i32 = arith.constant 0 : i32
    %c0_i32_0 = arith.constant 0 : i32
    %c0_i32_1 = arith.constant 0 : i32
    return %c0_i32, %c0_i32_0 : i32, i32
  }
  func.func @transform_6(%arg0: i32) -> (i32, i32) {
    %c0_i32 = arith.constant 0 : i32
    %c0_i32_0 = arith.constant 0 : i32
    %c0_i32_1 = arith.constant 0 : i32
    return %c0_i32, %c0_i32_0 : i32, i32
  }
}

</mosaic_0001>

<bundles_post_ra>
// kernel: clstm_forward.4
= control target key start
LH: loop header
LB: loop body
LE: loop exit
PB: predicated region body
PF: predicated region fallthrough
CT: control target
= control target key end

     0   :  { %v363_v12 = vmov 32.0   ;;  %s478_s1 = inlined_call_operand.vmem [shape: bf16[128,128], index: 1, kind: input, shape index: {}]   ;;  %s479_s2 = inlined_call_operand.vmem [shape: f32[1,128], index: 2, kind: input, shape index: {}]   ;;  %s480_s0 = inlined_call_operand.vmem [shape: bf16[32,128], index: 0, kind: input, shape index: {}]   ;;  %s481_s3 = inlined_call_operand.vmem [shape: f32[1,128], index: 3, kind: input, shape index: {}]   ;;  %s482_s4 = inlined_call_operand.vmem [shape: f32[1,128], index: 4, kind: input, shape index: {}]   ;;  %s483_s5 = inlined_call_operand.vmem [shape: f32[32,128], index: 5, kind: output, shape index: {}]  }
   0x1   :  { %v330_v0 = vld [vmem:[%s478_s1 + $0x38] sm:$0xff]  ;;  %v329_v1 = vld [vmem:[%s478_s1 + $0x30] sm:$0xff]  ;;  %v328_v2 = vld [vmem:[%s478_s1 + $0x28] sm:$0xff]  ;;  %343 = vrcp.f32 %v363_v12 }
   0x2   :  { %104 = vmatpush.bf16.msra.mxu0 %v330_v0  ;;  %331 = vmatpush.bf16.msra.mxu1 %v330_v0  ;;  %v327_v3 = vld [vmem:[%s478_s1 + $0x20] sm:$0xff]  ;;  %v326_v4 = vld [vmem:[%s478_s1 + $0x18] sm:$0xff]  ;;  %v325_v5 = vld [vmem:[%s478_s1 + $0x10] sm:$0xff] }
   0x3   :  { %v324_v6 = vld [vmem:[%s478_s1 + $0x8] sm:$0xff]  ;;  %v323_v7 = vld [vmem:[%s478_s1] sm:$0xff] }
   0x4   :  { %v321_v8 = vld [vmem:[%s480_s0] sm:$0xff]  ;;  %v322_v9 = vld [vmem:[%s480_s0 + $0x8] sm:$0xff] }
   0x5   :  { %v340_v13 = vld [vmem:[%s479_s2] ss:$0 sm:$0xff] }
   0x6   :  { %105 = vmatpush.bf16.msra.mxu0 %v329_v1  ;;  %332 = vmatpush.bf16.msra.mxu1 %v329_v1  ;;  %v341_v61 = vld [vmem:[%s481_s3] ss:$0 sm:$0xff] }
   0x7   :  { %v344_v14 = vpop.eup %343 }
   0x8   :  { %v133_v19 = vmul.f32 32.0, %v344_v14  ;;  %vm137_vm0 = vweird.f32 %v344_v14 }
   0xa   :  { %106 = vmatpush.bf16.msra.mxu0 %v328_v2  ;;  %333 = vmatpush.bf16.msra.mxu1 %v328_v2  ;;  %v134_v24 = vsub.f32 1.0, %v133_v19 }
   0xc   :  { %v135_v27 = vmul.f32 %v344_v14, %v134_v24 }
   0xe   :  { %107 = vmatpush.bf16.msra.mxu0 %v327_v3  ;;  %334 = vmatpush.bf16.msra.mxu1 %v327_v3  ;;  %v136_v30 = vadd.f32 %v344_v14, %v135_v27  ;;  %v342_v3 = vld [vmem:[%s482_s4] ss:$0 sm:$0xff] }
  0x10   :  { %v138_v33 = vsel %vm137_vm0, %v344_v14, %v136_v30 }
  0x12   :  { %108 = vmatpush.bf16.msra.mxu0 %v326_v4  ;;  %335 = vmatpush.bf16.msra.mxu1 %v326_v4 }
  0x16   :  { %109 = vmatpush.bf16.msra.mxu0 %v325_v5  ;;  %336 = vmatpush.bf16.msra.mxu1 %v325_v5 }
  0x1a   :  { %110 = vmatpush.bf16.msra.mxu0 %v324_v6  ;;  %337 = vmatpush.bf16.msra.mxu1 %v324_v6 }
  0x1e   :  { %111 = vmatpush.bf16.msra.mxu0 %v323_v7  ;;  %338 = vmatpush.bf16.msra.mxu1 %v323_v7 }
  0x21   :  { %112 = vmatmul.bf16.vlgmr.msra.gmra.mxu0 %v321_v8  ;;  %117 = vmatmul.bf16.vlgmr.msra.gmra.mxu1 %v322_v9 }
  0x9e   :  { %v113_v10 = vpop.f32.mrf.mxu0  ;;  %v118_v11 = vpop.f32.mrf.mxu1 }
  0x9f   :  { %v114_v16 = vadd.f32 %v340_v13, %v113_v10  ;;  %v119_v20 = vadd.f32 %v340_v13, %v118_v11 }
  0xa6   :  { %v115_v15 = vpop.f32.mrf.mxu0  ;;  %v120_v18 = vpop.f32.mrf.mxu1 }
  0xa7   :  { %v116_v17 = vadd.f32 %v340_v13, %v115_v15  ;;  %v121_v22 = vadd.f32 %v340_v13, %v120_v18 }
  0xa9   :  { %v123_v21 = vadd.f32 %v116_v17, %v114_v16 }
  0xab   :  { %v124_v23 = vadd.f32 %v123_v21, %v119_v20 }
  0xad   :  { %v125_v25 = vadd.f32 %v124_v23, %v121_v22 }
  0xaf   :  { %v126_v26 = vrot.slane %v125_v25, 4 }
  0xb1   :  { %v127_v28 = vadd.f32 %v126_v26, %v125_v25 }
  0xb3   :  { %v128_v29 = vrot.slane %v127_v28, 2 }
  0xb5   :  { %v129_v31 = vadd.f32 %v128_v29, %v127_v28 }
  0xb7   :  { %v130_v32 = vrot.slane %v129_v31, 1 }
  0xb9   :  { %v131_v34 = vadd.f32 %v130_v32, %v129_v31 }
  0xbb   :  { %v139_v35 = vmul.f32 %v138_v33, %v131_v34 }
  0xbd   :  { %v140_v36 = vsub.f32 %v114_v16, %v139_v35  ;;  %v141_v37 = vsub.f32 %v116_v17, %v139_v35  ;;  %v142_v38 = vsub.f32 %v119_v20, %v139_v35  ;;  %v143_v39 = vsub.f32 %v121_v22, %v139_v35 }
  0xbf   :  { %v144_v40 = vmul.f32 %v140_v36, %v140_v36  ;;  %v145_v41 = vmul.f32 %v141_v37, %v141_v37  ;;  %v146_v42 = vmul.f32 %v142_v38, %v142_v38  ;;  %v147_v44 = vmul.f32 %v143_v39, %v143_v39 }
  0xc1   :  { %v148_v43 = vadd.f32 %v145_v41, %v144_v40 }
  0xc3   :  { %v149_v45 = vadd.f32 %v148_v43, %v146_v42 }
  0xc5   :  { %v150_v46 = vadd.f32 %v149_v45, %v147_v44 }
  0xc7   :  { %v151_v47 = vrot.slane %v150_v46, 4 }
  0xc9   :  { %v152_v48 = vadd.f32 %v151_v47, %v150_v46 }
  0xcb   :  { %v153_v49 = vrot.slane %v152_v48, 2 }
  0xcd   :  { %v154_v50 = vadd.f32 %v153_v49, %v152_v48 }
  0xcf   :  { %v155_v51 = vrot.slane %v154_v50, 1 }
  0xd1   :  { %v156_v52 = vadd.f32 %v155_v51, %v154_v50 }
  0xd3   :  { %v157_v53 = vmul.f32 %v156_v52, %v138_v33 }
  0xd5   :  { %v158_v54 = vadd.f32 1e-05, %v157_v53 }
  0xd7   :  { %345 = vrsqrt.f32 %v158_v54  ;;  %vm165_vm2 = vweird.f32 %v158_v54 }
  0xdd   :  { %v346_v55 = vpop.eup %345 }
  0xde   :  { %v160_v56 = vmul.f32 %v346_v55, %v158_v54  ;;  %vm166_vm1 = vweird.f32 %v346_v55 }
  0xdf   :  { %vm167_vm3 = vmor %vm165_vm2, %vm166_vm1 }
  0xe0   :  { %v161_v57 = vmul.f32 %v346_v55, %v160_v56 }
  0xe2   :  { %v162_v58 = vmul.f32 0.5, %v161_v57 }
  0xe4   :  { %v163_v59 = vsub.f32 1.5, %v162_v58 }
  0xe6   :  { %v164_v60 = vmul.f32 %v346_v55, %v163_v59 }
  0xe8   :  { %v168_v62 = vsel %vm167_vm3, %v346_v55, %v164_v60 }
  0xe9   :  { %v169_v63 = vmul.f32 %v168_v62, %v140_v36  ;;  %v170_v0 = vmul.f32 %v168_v62, %v141_v37  ;;  %v171_v1 = vmul.f32 %v168_v62, %v142_v38  ;;  %v172_v2 = vmul.f32 %v168_v62, %v143_v39 }
  0xeb   :  { %v177_v4 = vmul.f32 %v341_v61, %v169_v63  ;;  %v178_v5 = vmul.f32 %v341_v61, %v170_v0  ;;  %v179_v6 = vmul.f32 %v341_v61, %v171_v1  ;;  %v180_v7 = vmul.f32 %v341_v61, %v172_v2 }
  0xed   :  { %v433_v8 = vadd.f32 %v342_v3, %v177_v4  ;;  %v435_v9 = vadd.f32 %v342_v3, %v178_v5  ;;  %v437_v10 = vadd.f32 %v342_v3, %v179_v6  ;;  %v439_v11 = vadd.f32 %v342_v3, %v180_v7 }
  0xef   :  { %v317_v12 = vmul.f32 -1.442695, %v433_v8  ;;  %v318_v13 = vmul.f32 -1.442695, %v435_v9  ;;  %v319_v14 = vmul.f32 -1.442695, %v437_v10 }
  0xf0   :  { %v320_v15 = vmul.f32 -1.442695, %v439_v11 }
  0xf1   :  { %347 = vpow2.f32 %v317_v12 }
  0xf2   :  { %349 = vpow2.f32 %v318_v13 }
  0xf3   :  { %351 = vpow2.f32 %v319_v14 }
  0xf4   :  { %353 = vpow2.f32 %v320_v15 }
  0xf7   :  { %v348_v16 = vpop.eup %347 }
  0xf8   :  { %v350_v17 = vpop.eup %349  ;;  %v201_v18 = vadd.f32 1.0, %v348_v16 }
  0xf9   :  { %v352_v19 = vpop.eup %351  ;;  %v202_v20 = vadd.f32 1.0, %v350_v17 }
  0xfa   :  { %v354_v21 = vpop.eup %353  ;;  %v203_v22 = vadd.f32 1.0, %v352_v19  ;;  %355 = vrcp.f32 %v201_v18  ;;  %v214_v24 = vand.u32 2147483647, %v201_v18  ;;  %v216_v25 = vand.u32 2147483648, %v201_v18 }
  0xfb   :  { %v204_v23 = vadd.f32 1.0, %v354_v21  ;;  %357 = vrcp.f32 %v202_v20  ;;  %vm210_vm4 = vweird.f32 %v201_v18  ;;  %vm225_vm5 = vweird.f32 %v202_v20 }
  0xfc   :  { %359 = vrcp.f32 %v203_v22  ;;  %v229_v31 = vand.u32 2147483647, %v202_v20  ;;  %v231_v32 = vand.u32 2147483648, %v202_v20  ;;  %vm445_vm6 = vcmp.eq.f32.partialorder %v214_v24, 8.507059e+37 }
  0xfd   :  { %361 = vrcp.f32 %v204_v23  ;;  %v217_v35 = vor.u32 1.1754944e-38, %v216_v25  ;;  %vm240_vm7 = vweird.f32 %v203_v22  ;;  %v244_v39 = vand.u32 2147483647, %v203_v22 }
  0xfe   :  { %v246_v40 = vand.u32 2147483648, %v203_v22  ;;  %vm449_vm10 = vcmp.eq.f32.partialorder %v229_v31, 8.507059e+37  ;;  %v232_v46 = vor.u32 1.1754944e-38, %v231_v32  ;;  %vm255_vm13 = vweird.f32 %v204_v23 }
  0xff   :  { %v259_v51 = vand.u32 2147483647, %v204_v23  ;;  %v261_v52 = vand.u32 2147483648, %v204_v23  ;;  %vm245_vm1 = vcmp.eq.f32.partialorder %v244_v39, 8.507059e+37 }
 0x100   :  { %v356_v26 = vpop.eup %355  ;;  %v247_v58 = vor.u32 1.1754944e-38, %v246_v40 }
 0x101   :  { %v358_v27 = vpop.eup %357  ;;  %v206_v28 = vmul.f32 %v356_v26, %v201_v18  ;;  %vm211_vm8 = vweird.f32 %v356_v26  ;;  %v262_v0 = vor.u32 1.1754944e-38, %v261_v52  ;;  %vm260_vm3 = vcmp.eq.f32.partialorder %v259_v51, 8.507059e+37 }
 0x102   :  { %v360_v29 = vpop.eup %359  ;;  %v221_v30 = vmul.f32 %v358_v27, %v202_v20  ;;  %vm226_vm9 = vweird.f32 %v358_v27  ;;  %vm212_vm12 = vmor %vm210_vm4, %vm211_vm8 }
 0x103   :  { %v207_v33 = vsub.f32 1.0, %v206_v28  ;;  %v236_v36 = vmul.f32 %v360_v29, %v203_v22  ;;  %v362_v37 = vpop.eup %361  ;;  %vm241_vm11 = vweird.f32 %v360_v29  ;;  %vm227_vm14 = vmor %vm225_vm5, %vm226_vm9 }
 0x104   :  { %v222_v38 = vsub.f32 1.0, %v221_v30  ;;  %v251_v43 = vmul.f32 %v362_v37, %v204_v23  ;;  %vm256_vm15 = vweird.f32 %v362_v37  ;;  %vm242_vm0 = vmor %vm240_vm7, %vm241_vm11 }
 0x105   :  { %v208_v41 = vmul.f32 %v356_v26, %v207_v33  ;;  %v237_v42 = vsub.f32 1.0, %v236_v36  ;;  %vm257_vm2 = vmor %vm255_vm13, %vm256_vm15 }
 0x106   :  { %v223_v44 = vmul.f32 %v358_v27, %v222_v38  ;;  %v252_v49 = vsub.f32 1.0, %v251_v43 }
 0x107   :  { %v209_v47 = vadd.f32 %v356_v26, %v208_v41  ;;  %v238_v48 = vmul.f32 %v360_v29, %v237_v42 }
 0x108   :  { %v224_v50 = vadd.f32 %v358_v27, %v223_v44  ;;  %v253_v55 = vmul.f32 %v362_v37, %v252_v49 }
 0x109   :  { %v213_v53 = vsel %vm212_vm12, %v356_v26, %v209_v47  ;;  %v239_v54 = vadd.f32 %v360_v29, %v238_v48 }
 0x10a   :  { %v218_v56 = vsel %vm445_vm6, %v217_v35, %v213_v53  ;;  %v228_v57 = vsel %vm227_vm14, %v358_v27, %v224_v50  ;;  %v254_v61 = vadd.f32 %v362_v37, %v253_v55 }
 0x10b   :  { %v233_v59 = vsel %vm449_vm10, %v232_v46, %v228_v57  ;;  %v243_v60 = vsel %vm242_vm0, %v360_v29, %v239_v54  ;;  %v265_v62 = vmul.f32 %v218_v56, %v433_v8 }
 0x10c   :  { %v248_v63 = vsel %vm245_vm1, %v247_v58, %v243_v60  ;;  %v266_v1 = vmul.f32 %v233_v59, %v435_v9  ;;  %v258_v2 = vsel %vm257_vm2, %v362_v37, %v254_v61 }
 0x10d   :  { %v267_v3 = vmul.f32 %v248_v63, %v437_v10  ;;  %269 = vst [vmem:[%s483_s5] sm:$0xff] %v265_v62  ;;  %v263_v4 = vsel %vm260_vm3, %v262_v0, %v258_v2 }
 0x10e   :  { %270 = vst [vmem:[%s483_s5 + $0x8] sm:$0xff] %v266_v1  ;;  %v268_v5 = vmul.f32 %v263_v4, %v439_v11 }
 0x10f   :  { %271 = vst [vmem:[%s483_s5 + $0x10] sm:$0xff] %v267_v3 }
 0x110   :  { %272 = vst [vmem:[%s483_s5 + $0x18] sm:$0xff] %v268_v5 }

// kernel: clstm_forward.5
= control target key start
LH: loop header
LB: loop body
LE: loop exit
PB: predicated region body
PF: predicated region fallthrough
CT: control target
= control target key end

     0   :  { %v234_v9 = vmov 16.0   ;;  %s304_s1 = inlined_call_operand.vmem [shape: bf16[128,128], index: 1, kind: input, shape index: {}]   ;;  %s305_s2 = inlined_call_operand.vmem [shape: f32[1,128], index: 2, kind: input, shape index: {}]   ;;  %s306_s0 = inlined_call_operand.vmem [shape: bf16[16,128], index: 0, kind: input, shape index: {}]   ;;  %s307_s3 = inlined_call_operand.vmem [shape: f32[1,128], index: 3, kind: input, shape index: {}]   ;;  %s308_s4 = inlined_call_operand.vmem [shape: f32[1,128], index: 4, kind: input, shape index: {}]   ;;  %s309_s5 = inlined_call_operand.vmem [shape: bf16[16,128], index: 5, kind: output, shape index: {}]  }
   0x1   :  { %v216_v0 = vld [vmem:[%s304_s1 + $0x38] sm:$0xff]  ;;  %v215_v1 = vld [vmem:[%s304_s1 + $0x30] sm:$0xff]  ;;  %v214_v2 = vld [vmem:[%s304_s1 + $0x28] sm:$0xff]  ;;  %226 = vrcp.f32 %v234_v9 }
   0x2   :  { %96 = vmatpush.bf16.msra.mxu0 %v216_v0  ;;  %v213_v3 = vld [vmem:[%s304_s1 + $0x20] sm:$0xff]  ;;  %v212_v4 = vld [vmem:[%s304_s1 + $0x18] sm:$0xff]  ;;  %v211_v5 = vld [vmem:[%s304_s1 + $0x10] sm:$0xff] }
   0x3   :  { %v210_v6 = vld [vmem:[%s304_s1 + $0x8] sm:$0xff]  ;;  %v209_v7 = vld [vmem:[%s304_s1] sm:$0xff] }
   0x4   :  { %v208_v8 = vld [vmem:[%s306_s0] sm:$0xff] }
   0x5   :  { %v223_v12 = vld [vmem:[%s305_s2] ss:$0 sm:$0xff] }
   0x6   :  { %97 = vmatpush.bf16.msra.mxu0 %v215_v1  ;;  %v224_v48 = vld [vmem:[%s307_s3] ss:$0 sm:$0xff] }
   0x7   :  { %v227_v11 = vpop.eup %226  ;;  %v225_v52 = vld [vmem:[%s308_s4] ss:$0 sm:$0xff] }
   0x8   :  { %v118_v13 = vmul.f32 16.0, %v227_v11  ;;  %vm122_vm0 = vweird.f32 %v227_v11 }
   0xa   :  { %98 = vmatpush.bf16.msra.mxu0 %v214_v2  ;;  %v119_v17 = vsub.f32 1.0, %v118_v13 }
   0xc   :  { %v120_v20 = vmul.f32 %v227_v11, %v119_v17 }
   0xe   :  { %99 = vmatpush.bf16.msra.mxu0 %v213_v3  ;;  %v121_v23 = vadd.f32 %v227_v11, %v120_v20 }
  0x10   :  { %v123_v26 = vsel %vm122_vm0, %v227_v11, %v121_v23 }
  0x12   :  { %100 = vmatpush.bf16.msra.mxu0 %v212_v4 }
  0x16   :  { %101 = vmatpush.bf16.msra.mxu0 %v211_v5 }
  0x1a   :  { %102 = vmatpush.bf16.msra.mxu0 %v210_v6 }
  0x1e   :  { %103 = vmatpush.bf16.msra.mxu0 %v209_v7 }
  0x21   :  { %104 = vmatmul.bf16.vlgmr.msra.gmra.mxu0 %v208_v8 }
  0x9e   :  { %v105_v10 = vpop.f32.mrf.mxu0 }
  0x9f   :  { %v106_v15 = vadd.f32 %v223_v12, %v105_v10 }
  0xa6   :  { %v107_v14 = vpop.f32.mrf.mxu0 }
  0xa7   :  { %v108_v16 = vadd.f32 %v223_v12, %v107_v14 }
  0xa9   :  { %v110_v18 = vadd.f32 %v108_v16, %v106_v15 }
  0xab   :  { %v111_v19 = vrot.slane %v110_v18, 4 }
  0xad   :  { %v112_v21 = vadd.f32 %v111_v19, %v110_v18 }
  0xaf   :  { %v113_v22 = vrot.slane %v112_v21, 2 }
  0xb1   :  { %v114_v24 = vadd.f32 %v113_v22, %v112_v21 }
  0xb3   :  { %v115_v25 = vrot.slane %v114_v24, 1 }
  0xb5   :  { %v116_v27 = vadd.f32 %v115_v25, %v114_v24 }
  0xb7   :  { %v124_v28 = vmul.f32 %v123_v26, %v116_v27 }
  0xb9   :  { %v125_v29 = vsub.f32 %v106_v15, %v124_v28  ;;  %v126_v30 = vsub.f32 %v108_v16, %v124_v28 }
  0xbb   :  { %v127_v31 = vmul.f32 %v125_v29, %v125_v29  ;;  %v128_v32 = vmul.f32 %v126_v30, %v126_v30 }
  0xbd   :  { %v129_v33 = vadd.f32 %v128_v32, %v127_v31 }
  0xbf   :  { %v130_v34 = vrot.slane %v129_v33, 4 }
  0xc1   :  { %v131_v35 = vadd.f32 %v130_v34, %v129_v33 }
  0xc3   :  { %v132_v36 = vrot.slane %v131_v35, 2 }
  0xc5   :  { %v133_v37 = vadd.f32 %v132_v36, %v131_v35 }
  0xc7   :  { %v134_v38 = vrot.slane %v133_v37, 1 }
  0xc9   :  { %v135_v39 = vadd.f32 %v134_v38, %v133_v37 }
  0xcb   :  { %v136_v40 = vmul.f32 %v135_v39, %v123_v26 }
  0xcd   :  { %v137_v41 = vadd.f32 1e-05, %v136_v40 }
  0xcf   :  { %228 = vrsqrt.f32 %v137_v41  ;;  %vm144_vm2 = vweird.f32 %v137_v41 }
  0xd5   :  { %v229_v42 = vpop.eup %228 }
  0xd6   :  { %v139_v43 = vmul.f32 %v229_v42, %v137_v41  ;;  %vm145_vm1 = vweird.f32 %v229_v42 }
  0xd7   :  { %vm146_vm3 = vmor %vm144_vm2, %vm145_vm1 }
  0xd8   :  { %v140_v44 = vmul.f32 %v229_v42, %v139_v43 }
  0xda   :  { %v141_v45 = vmul.f32 0.5, %v140_v44 }
  0xdc   :  { %v142_v46 = vsub.f32 1.5, %v141_v45 }
  0xde   :  { %v143_v47 = vmul.f32 %v229_v42, %v142_v46 }
  0xe0   :  { %v147_v49 = vsel %vm146_vm3, %v229_v42, %v143_v47 }
  0xe1   :  { %v148_v50 = vmul.f32 %v147_v49, %v125_v29  ;;  %v149_v51 = vmul.f32 %v147_v49, %v126_v30 }
  0xe3   :  { %v154_v53 = vmul.f32 %v224_v48, %v148_v50  ;;  %v155_v54 = vmul.f32 %v224_v48, %v149_v51 }
  0xe5   :  { %v160_v55 = vadd.f32 %v225_v52, %v154_v53  ;;  %v161_v56 = vadd.f32 %v225_v52, %v155_v54 }
  0xe7   :  { %230 = vtanh.f32 %v160_v55 }
  0xe8   :  { %232 = vtanh.f32 %v161_v56 }
  0xed   :  { %v231_v57 = vpop.eup %230 }
  0xee   :  { %v233_v58 = vpop.eup %232 }
  0xef   :  { %v220_v59 = vpack.c.bf16 %v233_v58, %v231_v57 }
  0xf1   :  { %221 = vst [vmem:[%s309_s5] sm:$0xff] %v220_v59  }

// kernel: clstm_forward.6
= control target key start
LH: loop header
LB: loop body
LE: loop exit
PB: predicated region body
PF: predicated region fallthrough
CT: control target
= control target key end

     0   :  { %s8709_s1 = inlined_call_operand.vmem [shape: bf16[128,512], index: 1, kind: input, shape index: {}]   ;;  %s8710_s2 = inlined_call_operand.vmem [shape: bf16[128,512], index: 2, kind: input, shape index: {}]   ;;  %s8711_s0 = inlined_call_operand.vmem [shape: bf16[8,16,128], index: 0, kind: input, shape index: {}]   ;;  %s8712_s3 = inlined_call_operand.vmem [shape: f32[1,512], index: 3, kind: input, shape index: {}]   ;;  %s8713_s4 = inlined_call_operand.vmem [shape: bf16[8,16,128], index: 4, kind: output, shape index: {}]  }
   0x1   :  { %v3918_v0 = vld [vmem:[%s8709_s1 + $0xe0] sm:$0xf]  ;;  %v5056_v1 = vld [vmem:[%s8709_s1 + $0xec] sm:$0xf0]  ;;  %v5054_v2 = vld [vmem:[%s8709_s1 + $0xe4] sm:$0xf] }
   0x2   :  { %v3919_v3 = vor.u32 %v5056_v1, %v3918_v0  ;;  %v3920_v4 = vld [vmem:[%s8709_s1 + $0xf0] sm:$0xf0]  ;;  %v3926_v5 = vld [vmem:[%s8709_s1 + $0xe8] sm:$0xf]  ;;  %v5057_v6 = vld [vmem:[%s8709_s1 + $0xf4] sm:$0xf0] }
   0x3   :  { %v3923_v7 = vor.u32 %v5054_v2, %v3920_v4  ;;  %v3927_v8 = vor.u32 %v5057_v6, %v3926_v5  ;;  %v5055_v9 = vld [vmem:[%s8709_s1 + $0xec] sm:$0xf]  ;;  %v3928_v10 = vld [vmem:[%s8709_s1 + $0xf8] sm:$0xf0]  ;;  %v3902_v11 = vld [vmem:[%s8709_s1 + $0xc0] sm:$0xf] }
   0x4   :  { %291 = vmatpush.bf16.msra.mxu0 %v3919_v3  ;;  %v3931_v12 = vor.u32 %v5055_v9, %v3928_v10  ;;  %v5052_v13 = vld [vmem:[%s8709_s1 + $0xcc] sm:$0xf0]  ;;  %v5050_v14 = vld [vmem:[%s8709_s1 + $0xc4] sm:$0xf]  ;;  %v3904_v15 = vld [vmem:[%s8709_s1 + $0xd0] sm:$0xf0] }
   0x5   :  { %340 = vmatpush.bf16.msra.mxu1 %v3923_v7  ;;  %389 = vmatpush.bf16.msra.mxu2 %v3927_v8  ;;  %v3903_v16 = vor.u32 %v5052_v13, %v3902_v11  ;;  %v3907_v17 = vor.u32 %v5050_v14, %v3904_v15  ;;  %v3910_v18 = vld [vmem:[%s8709_s1 + $0xc8] sm:$0xf]  ;;  %v5053_v19 = vld [vmem:[%s8709_s1 + $0xd4] sm:$0xf0]  ;;  %v5051_v20 = vld [vmem:[%s8709_s1 + $0xcc] sm:$0xf] }
   0x6   :  { %438 = vmatpush.bf16.msra.mxu3 %v3931_v12  ;;  %v3911_v21 = vor.u32 %v5053_v19, %v3910_v18  ;;  %v3912_v22 = vld [vmem:[%s8709_s1 + $0xd8] sm:$0xf0]  ;;  %v3886_v23 = vld [vmem:[%s8709_s1 + $0xa0] sm:$0xf]  ;;  %v5048_v24 = vld [vmem:[%s8709_s1 + $0xac] sm:$0xf0] }
   0x7   :  { %v3915_v25 = vor.u32 %v5051_v20, %v3912_v22  ;;  %v5046_v26 = vld [vmem:[%s8709_s1 + $0xa4] sm:$0xf]  ;;  %v3888_v27 = vld [vmem:[%s8709_s1 + $0xb0] sm:$0xf0]  ;;  %v3894_v28 = vld [vmem:[%s8709_s1 + $0xa8] sm:$0xf]  ;;  %v3887_v29 = vor.u32 %v5048_v24, %v3886_v23 }
   0x8   :  { %292 = vmatpush.bf16.msra.mxu0 %v3903_v16  ;;  %v5049_v30 = vld [vmem:[%s8709_s1 + $0xb4] sm:$0xf0]  ;;  %v5047_v31 = vld [vmem:[%s8709_s1 + $0xac] sm:$0xf]  ;;  %v3896_v32 = vld [vmem:[%s8709_s1 + $0xb8] sm:$0xf0]  ;;  %v3891_v33 = vor.u32 %v5046_v26, %v3888_v27 }
   0x9   :  { %341 = vmatpush.bf16.msra.mxu1 %v3907_v17  ;;  %390 = vmatpush.bf16.msra.mxu2 %v3911_v21  ;;  %v3895_v34 = vor.u32 %v5049_v30, %v3894_v28  ;;  %v3870_v35 = vld [vmem:[%s8709_s1 + $0x80] sm:$0xf]  ;;  %v5044_v36 = vld [vmem:[%s8709_s1 + $0x8c] sm:$0xf0]  ;;  %v5042_v37 = vld [vmem:[%s8709_s1 + $0x84] sm:$0xf]  ;;  %v3899_v38 = vor.u32 %v5047_v31, %v3896_v32 }
   0xa   :  { %439 = vmatpush.bf16.msra.mxu3 %v3915_v25  ;;  %v3872_v39 = vld [vmem:[%s8709_s1 + $0x90] sm:$0xf0]  ;;  %v3878_v40 = vld [vmem:[%s8709_s1 + $0x88] sm:$0xf]  ;;  %v5045_v41 = vld [vmem:[%s8709_s1 + $0x94] sm:$0xf0]  ;;  %v3871_v44 = vor.u32 %v5044_v36, %v3870_v35 }
   0xb   :  { %v5043_v42 = vld [vmem:[%s8709_s1 + $0x8c] sm:$0xf]  ;;  %v3880_v43 = vld [vmem:[%s8709_s1 + $0x98] sm:$0xf0]  ;;  %v3875_v45 = vor.u32 %v5042_v37, %v3872_v39  ;;  %v3879_v46 = vor.u32 %v5045_v41, %v3878_v40  ;;  %v3854_v47 = vld [vmem:[%s8709_s1 + $0x60] sm:$0xf] }
   0xc   :  { %293 = vmatpush.bf16.msra.mxu0 %v3887_v29  ;;  %v5040_v48 = vld [vmem:[%s8709_s1 + $0x6c] sm:$0xf0]  ;;  %v5038_v49 = vld [vmem:[%s8709_s1 + $0x64] sm:$0xf]  ;;  %v3883_v50 = vor.u32 %v5043_v42, %v3880_v43  ;;  %v3856_v51 = vld [vmem:[%s8709_s1 + $0x70] sm:$0xf0] }
   0xd   :  { %342 = vmatpush.bf16.msra.mxu1 %v3891_v33  ;;  %391 = vmatpush.bf16.msra.mxu2 %v3895_v34  ;;  %v3862_v52 = vld [vmem:[%s8709_s1 + $0x68] sm:$0xf]  ;;  %v5041_v53 = vld [vmem:[%s8709_s1 + $0x74] sm:$0xf0]  ;;  %v5039_v54 = vld [vmem:[%s8709_s1 + $0x6c] sm:$0xf]  ;;  %v3855_v56 = vor.u32 %v5040_v48, %v3854_v47  ;;  %v3859_v57 = vor.u32 %v5038_v49, %v3856_v51 }
   0xe   :  { %440 = vmatpush.bf16.msra.mxu3 %v3899_v38  ;;  %v3864_v55 = vld [vmem:[%s8709_s1 + $0x78] sm:$0xf0]  ;;  %v3863_v58 = vor.u32 %v5041_v53, %v3862_v52  ;;  %v3838_v59 = vld [vmem:[%s8709_s1 + $0x40] sm:$0xf]  ;;  %v5036_v60 = vld [vmem:[%s8709_s1 + $0x4c] sm:$0xf0] }
   0xf   :  { %v5034_v61 = vld [vmem:[%s8709_s1 + $0x44] sm:$0xf]  ;;  %v3867_v62 = vor.u32 %v5039_v54, %v3864_v55  ;;  %v3840_v63 = vld [vmem:[%s8709_s1 + $0x50] sm:$0xf0]  ;;  %v3846_v0 = vld [vmem:[%s8709_s1 + $0x48] sm:$0xf]  ;;  %v3839_v4 = vor.u32 %v5036_v60, %v3838_v59 }
  0x10   :  { %294 = vmatpush.bf16.msra.mxu0 %v3871_v44  ;;  %v5037_v1 = vld [vmem:[%s8709_s1 + $0x54] sm:$0xf0]  ;;  %v5035_v2 = vld [vmem:[%s8709_s1 + $0x4c] sm:$0xf]  ;;  %v3848_v3 = vld [vmem:[%s8709_s1 + $0x58] sm:$0xf0]  ;;  %v3843_v5 = vor.u32 %v5034_v61, %v3840_v63 }
  0x11   :  { %343 = vmatpush.bf16.msra.mxu1 %v3875_v45  ;;  %392 = vmatpush.bf16.msra.mxu2 %v3879_v46  ;;  %v3847_v6 = vor.u32 %v5037_v1, %v3846_v0  ;;  %v3822_v7 = vld [vmem:[%s8709_s1 + $0x20] sm:$0xf]  ;;  %v5032_v8 = vld [vmem:[%s8709_s1 + $0x2c] sm:$0xf0]  ;;  %v5030_v9 = vld [vmem:[%s8709_s1 + $0x24] sm:$0xf]  ;;  %v3851_v10 = vor.u32 %v5035_v2, %v3848_v3 }
  0x12   :  { %441 = vmatpush.bf16.msra.mxu3 %v3883_v50  ;;  %v3824_v11 = vld [vmem:[%s8709_s1 + $0x30] sm:$0xf0]  ;;  %v3830_v12 = vld [vmem:[%s8709_s1 + $0x28] sm:$0xf]  ;;  %v5033_v13 = vld [vmem:[%s8709_s1 + $0x34] sm:$0xf0]  ;;  %v3823_v16 = vor.u32 %v5032_v8, %v3822_v7 }
  0x13   :  { %v5031_v14 = vld [vmem:[%s8709_s1 + $0x2c] sm:$0xf]  ;;  %v3832_v15 = vld [vmem:[%s8709_s1 + $0x38] sm:$0xf0]  ;;  %v3806_v17 = vld [vmem:[%s8709_s1] sm:$0xf]  ;;  %v3827_v18 = vor.u32 %v5030_v9, %v3824_v11  ;;  %v3831_v19 = vor.u32 %v5033_v13, %v3830_v12 }
  0x14   :  { %295 = vmatpush.bf16.msra.mxu0 %v3855_v56  ;;  %v5028_v20 = vld [vmem:[%s8709_s1 + $0xc] sm:$0xf0]  ;;  %v5026_v21 = vld [vmem:[%s8709_s1 + $0x4] sm:$0xf]  ;;  %v3808_v22 = vld [vmem:[%s8709_s1 + $0x10] sm:$0xf0]  ;;  %v3835_v23 = vor.u32 %v5031_v14, %v3832_v15 }
  0x15   :  { %344 = vmatpush.bf16.msra.mxu1 %v3859_v57  ;;  %393 = vmatpush.bf16.msra.mxu2 %v3863_v58  ;;  %v3814_v24 = vld [vmem:[%s8709_s1 + $0x8] sm:$0xf]  ;;  %v5029_v25 = vld [vmem:[%s8709_s1 + $0x14] sm:$0xf0]  ;;  %v5027_v26 = vld [vmem:[%s8709_s1 + $0xc] sm:$0xf]  ;;  %v3807_v30 = vor.u32 %v5028_v20, %v3806_v17  ;;  %v3811_v33 = vor.u32 %v5026_v21, %v3808_v22 }
  0x16   :  { %442 = vmatpush.bf16.msra.mxu3 %v3867_v62  ;;  %v3816_v27 = vld [vmem:[%s8709_s1 + $0x18] sm:$0xf0]  ;;  %v4046_v28 = vld [vmem:[%s8710_s2 + $0xe0] sm:$0xf]  ;;  %v5088_v29 = vld [vmem:[%s8710_s2 + $0xec] sm:$0xf0]  ;;  %v3815_v34 = vor.u32 %v5029_v25, %v3814_v24 }
  0x17   :  { %v5086_v31 = vld [vmem:[%s8710_s2 + $0xe4] sm:$0xf]  ;;  %v4048_v32 = vld [vmem:[%s8710_s2 + $0xf0] sm:$0xf0]  ;;  %v3819_v36 = vor.u32 %v5027_v26, %v3816_v27  ;;  %v4047_v37 = vor.u32 %v5088_v29, %v4046_v28  ;;  %v5087_v38 = vld [vmem:[%s8710_s2 + $0xec] sm:$0xf] }
  0x18   :  { %296 = vmatpush.bf16.msra.mxu0 %v3839_v4  ;;  %v5018_v35 = vld [vmem:[%s8711_s0] sm:$0xff]  ;;  %v4054_v39 = vld [vmem:[%s8710_s2 + $0xe8] sm:$0xf]  ;;  %v5089_v40 = vld [vmem:[%s8710_s2 + $0xf4] sm:$0xf0]  ;;  %v4051_v41 = vor.u32 %v5086_v31, %v4048_v32 }
  0x19   :  { %345 = vmatpush.bf16.msra.mxu1 %v3843_v5  ;;  %394 = vmatpush.bf16.msra.mxu2 %v3847_v6  ;;  %v4056_v42 = vld [vmem:[%s8710_s2 + $0xf8] sm:$0xf0]  ;;  %v4030_v43 = vld [vmem:[%s8710_s2 + $0xc0] sm:$0xf]  ;;  %v5084_v44 = vld [vmem:[%s8710_s2 + $0xcc] sm:$0xf0]  ;;  %v4055_v47 = vor.u32 %v5089_v40, %v4054_v39 }
  0x1a   :  { %443 = vmatpush.bf16.msra.mxu3 %v3851_v10  ;;  %v5082_v45 = vld [vmem:[%s8710_s2 + $0xc4] sm:$0xf]  ;;  %v4032_v46 = vld [vmem:[%s8710_s2 + $0xd0] sm:$0xf0]  ;;  %v4059_v48 = vor.u32 %v5087_v38, %v4056_v42  ;;  %v4031_v49 = vor.u32 %v5084_v44, %v4030_v43  ;;  %v4038_v50 = vld [vmem:[%s8710_s2 + $0xc8] sm:$0xf] }
  0x1b   :  { %v5085_v51 = vld [vmem:[%s8710_s2 + $0xd4] sm:$0xf0]  ;;  %v4035_v52 = vor.u32 %v5082_v45, %v4032_v46  ;;  %v5083_v53 = vld [vmem:[%s8710_s2 + $0xcc] sm:$0xf]  ;;  %v4040_v54 = vld [vmem:[%s8710_s2 + $0xd8] sm:$0xf0] }
  0x1c   :  { %297 = vmatpush.bf16.msra.mxu0 %v3823_v16  ;;  %v4039_v55 = vor.u32 %v5085_v51, %v4038_v50  ;;  %v4014_v56 = vld [vmem:[%s8710_s2 + $0xa0] sm:$0xf]  ;;  %v5080_v57 = vld [vmem:[%s8710_s2 + $0xac] sm:$0xf0]  ;;  %v5078_v58 = vld [vmem:[%s8710_s2 + $0xa4] sm:$0xf]  ;;  %v4043_v59 = vor.u32 %v5083_v53, %v4040_v54 }
  0x1d   :  { %346 = vmatpush.bf16.msra.mxu1 %v3827_v18  ;;  %395 = vmatpush.bf16.msra.mxu2 %v3831_v19  ;;  %v4015_v60 = vor.u32 %v5080_v57, %v4014_v56  ;;  %v4016_v61 = vld [vmem:[%s8710_s2 + $0xb0] sm:$0xf0]  ;;  %v5079_v62 = vld [vmem:[%s8710_s2 + $0xac] sm:$0xf]  ;;  %v4024_v0 = vld [vmem:[%s8710_s2 + $0xb8] sm:$0xf0] }
  0x1e   :  { %444 = vmatpush.bf16.msra.mxu3 %v3835_v23  ;;  %v4019_v63 = vor.u32 %v5078_v58, %v4016_v61  ;;  %v4022_v1 = vld [vmem:[%s8710_s2 + $0xa8] sm:$0xf]  ;;  %v5081_v2 = vld [vmem:[%s8710_s2 + $0xb4] sm:$0xf0]  ;;  %v4027_v4 = vor.u32 %v5079_v62, %v4024_v0  ;;  %v3998_v6 = vld [vmem:[%s8710_s2 + $0x80] sm:$0xf] }
  0x1f   :  { %v4023_v3 = vor.u32 %v5081_v2, %v4022_v1  ;;  %v5019_v5 = vld [vmem:[%s8711_s0 + $0x8] sm:$0xff]  ;;  %v5076_v7 = vld [vmem:[%s8710_s2 + $0x8c] sm:$0xf0]  ;;  %v5074_v8 = vld [vmem:[%s8710_s2 + $0x84] sm:$0xf] }
  0x20   :  { %298 = vmatpush.bf16.msra.mxu0 %v3807_v30  ;;  %v3999_v9 = vor.u32 %v5076_v7, %v3998_v6  ;;  %v4000_v10 = vld [vmem:[%s8710_s2 + $0x90] sm:$0xf0]  ;;  %v5075_v11 = vld [vmem:[%s8710_s2 + $0x8c] sm:$0xf]  ;;  %v4008_v12 = vld [vmem:[%s8710_s2 + $0x98] sm:$0xf0] }
  0x21   :  { %347 = vmatpush.bf16.msra.mxu1 %v3811_v33  ;;  %396 = vmatpush.bf16.msra.mxu2 %v3815_v34  ;;  %v4003_v13 = vor.u32 %v5074_v8, %v4000_v10  ;;  %v4011_v14 = vor.u32 %v5075_v11, %v4008_v12  ;;  %v4006_v15 = vld [vmem:[%s8710_s2 + $0x88] sm:$0xf]  ;;  %v5077_v16 = vld [vmem:[%s8710_s2 + $0x94] sm:$0xf0]  ;;  %v5020_v18 = vld [vmem:[%s8711_s0 + $0x10] sm:$0xff]  ;;  %v5618_v10 = vmov 0.0|0.0  }
  0x22   :  { %445 = vmatpush.bf16.msra.mxu3 %v3819_v36  ;;  %v4007_v17 = vor.u32 %v5077_v16, %v4006_v15  ;;  %v3982_v19 = vld [vmem:[%s8710_s2 + $0x60] sm:$0xf]  ;;  %v5072_v20 = vld [vmem:[%s8710_s2 + $0x6c] sm:$0xf0]  ;;  %v5070_v21 = vld [vmem:[%s8710_s2 + $0x64] sm:$0xf] }
  0x23   :  { %299 = vmatmul.bf16.vlgmr.msra.gmra.mxu0 %v5018_v35  ;;  %v3983_v22 = vor.u32 %v5072_v20, %v3982_v19  ;;  %v3984_v23 = vld [vmem:[%s8710_s2 + $0x70] sm:$0xf0]  ;;  %v5071_v24 = vld [vmem:[%s8710_s2 + $0x6c] sm:$0xf]  ;;  %v3992_v25 = vld [vmem:[%s8710_s2 + $0x78] sm:$0xf0] }
  0x24   :  { %756 = vmatpush.bf16.msrb.mxu0 %v4047_v37  ;;  %348 = vmatmul.bf16.vlgmr.msra.gmra.mxu1 %v5018_v35  ;;  %v3987_v26 = vor.u32 %v5070_v21, %v3984_v23  ;;  %v3995_v27 = vor.u32 %v5071_v24, %v3992_v25  ;;  %v3990_v28 = vld [vmem:[%s8710_s2 + $0x68] sm:$0xf]  ;;  %v5073_v29 = vld [vmem:[%s8710_s2 + $0x74] sm:$0xf0]  ;;  %v3966_v32 = vld [vmem:[%s8710_s2 + $0x40] sm:$0xf] }
  0x25   :  { %770 = vmatpush.bf16.msrb.mxu1 %v4051_v41  ;;  %397 = vmatmul.bf16.vlgmr.msra.gmra.mxu2 %v5018_v35  ;;  %v3991_v30 = vor.u32 %v5073_v29, %v3990_v28  ;;  %v5021_v31 = vld [vmem:[%s8711_s0 + $0x18] sm:$0xff]  ;;  %v5068_v33 = vld [vmem:[%s8710_s2 + $0x4c] sm:$0xf0]  ;;  %v5066_v34 = vld [vmem:[%s8710_s2 + $0x44] sm:$0xf] }
  0x26   :  { %446 = vmatmul.bf16.vlgmr.msra.gmra.mxu3 %v5018_v35  ;;  %784 = vmatpush.bf16.msrb.mxu2 %v4055_v47  ;;  %v3967_v35 = vor.u32 %v5068_v33, %v3966_v32  ;;  %v3968_v36 = vld [vmem:[%s8710_s2 + $0x50] sm:$0xf0]  ;;  %v5067_v37 = vld [vmem:[%s8710_s2 + $0x4c] sm:$0xf]  ;;  %v3976_v38 = vld [vmem:[%s8710_s2 + $0x58] sm:$0xf0] }
  0x27   :  { %798 = vmatpush.bf16.msrb.mxu3 %v4059_v48  ;;  %v3971_v39 = vor.u32 %v5066_v34, %v3968_v36  ;;  %v3979_v40 = vor.u32 %v5067_v37, %v3976_v38  ;;  %v3974_v41 = vld [vmem:[%s8710_s2 + $0x48] sm:$0xf]  ;;  %v5069_v42 = vld [vmem:[%s8710_s2 + $0x54] sm:$0xf0]  ;;  %v5022_v44 = vld [vmem:[%s8711_s0 + $0x20] sm:$0xff] }
  0x28   :  { %757 = vmatpush.bf16.msrb.mxu0 %v4031_v49  ;;  %v3975_v43 = vor.u32 %v5069_v42, %v3974_v41  ;;  %v3950_v45 = vld [vmem:[%s8710_s2 + $0x20] sm:$0xf]  ;;  %v5064_v46 = vld [vmem:[%s8710_s2 + $0x2c] sm:$0xf0]  ;;  %v5062_v47 = vld [vmem:[%s8710_s2 + $0x24] sm:$0xf] }
  0x29   :  { %771 = vmatpush.bf16.msrb.mxu1 %v4035_v52  ;;  %v3951_v48 = vor.u32 %v5064_v46, %v3950_v45  ;;  %v3952_v49 = vld [vmem:[%s8710_s2 + $0x30] sm:$0xf0]  ;;  %v5063_v50 = vld [vmem:[%s8710_s2 + $0x2c] sm:$0xf]  ;;  %v3960_v51 = vld [vmem:[%s8710_s2 + $0x38] sm:$0xf0] }
  0x2a   :  { %785 = vmatpush.bf16.msrb.mxu2 %v4039_v55  ;;  %v3955_v52 = vor.u32 %v5062_v47, %v3952_v49  ;;  %v3963_v53 = vor.u32 %v5063_v50, %v3960_v51  ;;  %v3958_v54 = vld [vmem:[%s8710_s2 + $0x28] sm:$0xf]  ;;  %v5065_v55 = vld [vmem:[%s8710_s2 + $0x34] sm:$0xf0]  ;;  %v3934_v58 = vld [vmem:[%s8710_s2] sm:$0xf] }
  0x2b   :  { %799 = vmatpush.bf16.msrb.mxu3 %v4043_v59  ;;  %v3959_v56 = vor.u32 %v5065_v55, %v3958_v54  ;;  %v5023_v57 = vld [vmem:[%s8711_s0 + $0x28] sm:$0xff]  ;;  %v5060_v59 = vld [vmem:[%s8710_s2 + $0xc] sm:$0xf0]  ;;  %v3936_v62 = vld [vmem:[%s8710_s2 + $0x10] sm:$0xf0] }
  0x2c   :  { %758 = vmatpush.bf16.msrb.mxu0 %v4015_v60  ;;  %v5058_v60 = vld [vmem:[%s8710_s2 + $0x4] sm:$0xf]  ;;  %v3935_v61 = vor.u32 %v5060_v59, %v3934_v58  ;;  %v3944_v0 = vld [vmem:[%s8710_s2 + $0x18] sm:$0xf0] }
  0x2d   :  { %772 = vmatpush.bf16.msrb.mxu1 %v4019_v63  ;;  %v5059_v63 = vld [vmem:[%s8710_s2 + $0xc] sm:$0xf]  ;;  %v3939_v1 = vor.u32 %v5058_v60, %v3936_v62  ;;  %v5025_v7 = vld [vmem:[%s8711_s0 + $0x38] sm:$0xff] }
  0x2e   :  { %786 = vmatpush.bf16.msrb.mxu2 %v4023_v3  ;;  %v3947_v2 = vor.u32 %v5059_v63, %v3944_v0  ;;  %v5024_v3 = vld [vmem:[%s8711_s0 + $0x30] sm:$0xff] }
  0x2f   :  { %800 = vmatpush.bf16.msrb.mxu3 %v4027_v4  ;;  %v3942_v4 = vld [vmem:[%s8710_s2 + $0x8] sm:$0xf] }
  0x30   :  { %759 = vmatpush.bf16.msrb.mxu0 %v3999_v9 }
  0x31   :  { %773 = vmatpush.bf16.msrb.mxu1 %v4003_v13 }
  0x32   :  { %787 = vmatpush.bf16.msrb.mxu2 %v4007_v17 }
  0x33   :  { %304 = vmatmul.bf16.gmra.mxu0 %v5019_v5  ;;  %801 = vmatpush.bf16.msrb.mxu3 %v4011_v14 }
  0x34   :  { %353 = vmatmul.bf16.gmra.mxu1 %v5019_v5  ;;  %760 = vmatpush.bf16.msrb.mxu0 %v3983_v22 }
  0x35   :  { %402 = vmatmul.bf16.gmra.mxu2 %v5019_v5  ;;  %774 = vmatpush.bf16.msrb.mxu1 %v3987_v26 }
  0x36   :  { %451 = vmatmul.bf16.gmra.mxu3 %v5019_v5  ;;  %788 = vmatpush.bf16.msrb.mxu2 %v3991_v30  ;;  %v5061_v5 = vld [vmem:[%s8710_s2 + $0x14] sm:$0xf0] }
  0x37   :  { %802 = vmatpush.bf16.msrb.mxu3 %v3995_v27  ;;  %v3943_v6 = vor.u32 %v5061_v5, %v3942_v4 }
  0x38   :  { %761 = vmatpush.bf16.msrb.mxu0 %v3967_v35 }
  0x39   :  { %775 = vmatpush.bf16.msrb.mxu1 %v3971_v39 }
  0x3a   :  { %789 = vmatpush.bf16.msrb.mxu2 %v3975_v43 }
  0x3b   :  { %803 = vmatpush.bf16.msrb.mxu3 %v3979_v40 }
  0x3c   :  { %762 = vmatpush.bf16.msrb.mxu0 %v3951_v48 }
  0x3d   :  { %776 = vmatpush.bf16.msrb.mxu1 %v3955_v52 }
  0x3e   :  { %790 = vmatpush.bf16.msrb.mxu2 %v3959_v56 }
  0x3f   :  { %804 = vmatpush.bf16.msrb.mxu3 %v3963_v53 }
  0x40   :  { %763 = vmatpush.bf16.msrb.mxu0 %v3935_v61 }
  0x41   :  { %777 = vmatpush.bf16.msrb.mxu1 %v3939_v1 }
  0x42   :  { %791 = vmatpush.bf16.msrb.mxu2 %v3943_v6 }
  0x43   :  { %309 = vmatmul.bf16.gmra.mxu0 %v5020_v18  ;;  %805 = vmatpush.bf16.msrb.mxu3 %v3947_v2 }
  0x44   :  { %358 = vmatmul.bf16.gmra.mxu1 %v5020_v18 }
  0x45   :  { %407 = vmatmul.bf16.gmra.mxu2 %v5020_v18 }
  0x46   :  { %456 = vmatmul.bf16.gmra.mxu3 %v5020_v18 }
  0x53   :  { %314 = vmatmul.bf16.gmra.mxu0 %v5021_v31 }
  0x54   :  { %363 = vmatmul.bf16.gmra.mxu1 %v5021_v31 }
  0x55   :  { %412 = vmatmul.bf16.gmra.mxu2 %v5021_v31 }
  0x56   :  { %461 = vmatmul.bf16.gmra.mxu3 %v5021_v31 }
  0x63   :  { %319 = vmatmul.bf16.gmra.mxu0 %v5022_v44 }
  0x64   :  { %368 = vmatmul.bf16.gmra.mxu1 %v5022_v44 }
  0x65   :  { %417 = vmatmul.bf16.gmra.mxu2 %v5022_v44 }
  0x66   :  { %466 = vmatmul.bf16.gmra.mxu3 %v5022_v44 }
  0x73   :  { %324 = vmatmul.bf16.gmra.mxu0 %v5023_v57 }
  0x74   :  { %373 = vmatmul.bf16.gmra.mxu1 %v5023_v57 }
  0x75   :  { %422 = vmatmul.bf16.gmra.mxu2 %v5023_v57 }
  0x76   :  { %471 = vmatmul.bf16.gmra.mxu3 %v5023_v57 }
  0x83   :  { %329 = vmatmul.bf16.gmra.mxu0 %v5024_v3 }
  0x84   :  { %378 = vmatmul.bf16.gmra.mxu1 %v5024_v3 }
  0x85   :  { %427 = vmatmul.bf16.gmra.mxu2 %v5024_v3 }
  0x86   :  { %476 = vmatmul.bf16.gmra.mxu3 %v5024_v3  ;;  %v6171_v3 = vld [vmem:[%s8712_s3] sm:$0xf] }
  0x93   :  { %334 = vmatmul.bf16.gmra.mxu0 %v5025_v7 }
  0x94   :  { %383 = vmatmul.bf16.gmra.mxu1 %v5025_v7 }
  0x95   :  { %432 = vmatmul.bf16.gmra.mxu2 %v5025_v7 }
  0x96   :  { %481 = vmatmul.bf16.gmra.mxu3 %v5025_v7 }
  0xa0   :  { %v6052_v8 = vpop.f32.mrf.mxu0 }
  0xa1   :  { %v6054_v9 = vpop.f32.mrf.mxu1 }
  0xa3   :  { %764 = vmatmul.bf16.vlgmr.msrb.gmra.mxu0 %v5618_v10 }
  0xa4   :  { %778 = vmatmul.bf16.vlgmr.msrb.gmra.mxu1 %v5618_v10 }
  0xa5   :  { %792 = vmatmul.bf16.vlgmr.msrb.gmra.mxu2 %v5618_v10 }
  0xa6   :  { %806 = vmatmul.bf16.vlgmr.msrb.gmra.mxu3 %v5618_v10  ;;  %v6182_v10 = vperm.slane %v6171_v3, 0 }
  0xa8   :  { %v6056_v11 = vpop.f32.mrf.mxu2  ;;  %v6060_v13 = vpop.f32.mrf.mxu0 }
  0xa9   :  { %v6058_v12 = vpop.f32.mrf.mxu3  ;;  %v6062_v14 = vpop.f32.mrf.mxu1 }
  0xb0   :  { %v6064_v15 = vpop.f32.mrf.mxu2  ;;  %v6068_v17 = vpop.f32.mrf.mxu0 }
  0xb1   :  { %v6066_v16 = vpop.f32.mrf.mxu3  ;;  %v6070_v18 = vpop.f32.mrf.mxu1 }
  0xb8   :  { %v6072_v19 = vpop.f32.mrf.mxu2  ;;  %v6076_v21 = vpop.f32.mrf.mxu0 }
  0xb9   :  { %v6074_v20 = vpop.f32.mrf.mxu3  ;;  %v6078_v22 = vpop.f32.mrf.mxu1 }
  0xc0   :  { %v6080_v23 = vpop.f32.mrf.mxu2  ;;  %v6084_v25 = vpop.f32.mrf.mxu0 }
  0xc1   :  { %v6082_v24 = vpop.f32.mrf.mxu3  ;;  %v6086_v26 = vpop.f32.mrf.mxu1 }
  0xc8   :  { %v6088_v27 = vpop.f32.mrf.mxu2  ;;  %v6092_v29 = vpop.f32.mrf.mxu0 }
  0xc9   :  { %v6090_v28 = vpop.f32.mrf.mxu3  ;;  %v6094_v30 = vpop.f32.mrf.mxu1 }
  0xd0   :  { %v6096_v31 = vpop.f32.mrf.mxu2  ;;  %v6100_v33 = vpop.f32.mrf.mxu0 }
  0xd1   :  { %v6098_v32 = vpop.f32.mrf.mxu3  ;;  %v6102_v34 = vpop.f32.mrf.mxu1 }
  0xd8   :  { %v6104_v35 = vpop.f32.mrf.mxu2  ;;  %v6108_v37 = vpop.f32.mrf.mxu0 }
  0xd9   :  { %8714 = vst [vmem:[#allocation5_spill] sm:$0xff] %v6104_v35  ;;  %v6106_v36 = vpop.f32.mrf.mxu3  ;;  %v6110_v38 = vpop.f32.mrf.mxu1 }
  0xe0   :  { %v6112_v39 = vpop.f32.mrf.mxu2  ;;  %v6116_v41 = vpop.f32.mrf.mxu0 }
  0xe1   :  { %8715 = vst [vmem:[#allocation6_spill] sm:$0xff] %v6112_v39  ;;  %v6114_v40 = vpop.f32.mrf.mxu3  ;;  %v6118_v42 = vpop.f32.mrf.mxu1 }
  0xe2   :  { %8716 = vst [vmem:[#allocation7_spill] sm:$0xff] %v6114_v40 }
  0xe3   :  { %8717 = vst [vmem:[#allocation8_spill] sm:$0xff] %v6116_v41 }
  0xe4   :  { %8718 = vst [vmem:[#allocation9_spill] sm:$0xff] %v6118_v42 }
  0xe8   :  { %v6120_v43 = vpop.f32.mrf.mxu2  ;;  %v6124_v45 = vpop.f32.mrf.mxu0 }
  0xe9   :  { %8719 = vst [vmem:[#allocation10_spill] sm:$0xff] %v6120_v43  ;;  %v6122_v44 = vpop.f32.mrf.mxu3  ;;  %v6126_v46 = vpop.f32.mrf.mxu1 }
  0xea   :  { %8720 = vst [vmem:[#allocation11_spill] sm:$0xff] %v6122_v44 }
  0xeb   :  { %8721 = vst [vmem:[#allocation12_spill] sm:$0xff] %v6124_v45 }
  0xec   :  { %8722 = vst [vmem:[#allocation13_spill] sm:$0xff] %v6126_v46 }
  0xf0   :  { %v6128_v47 = vpop.f32.mrf.mxu2  ;;  %v6132_v49 = vpop.f32.mrf.mxu0 }
  0xf1   :  { %8723 = vst [vmem:[#allocation14_spill] sm:$0xff] %v6128_v47  ;;  %v6130_v48 = vpop.f32.mrf.mxu3  ;;  %v6134_v50 = vpop.f32.mrf.mxu1 }
  0xf2   :  { %8724 = vst [vmem:[#allocation15_spill] sm:$0xff] %v6130_v48 }
  0xf3   :  { %8725 = vst [vmem:[#allocation16_spill] sm:$0xff] %v6132_v49 }
  0xf4   :  { %8726 = vst [vmem:[#allocation17_spill] sm:$0xff] %v6134_v50 }
  0xf8   :  { %v6136_v51 = vpop.f32.mrf.mxu2  ;;  %v6140_v53 = vpop.f32.mrf.mxu0 }
  0xf9   :  { %8727 = vst [vmem:[#allocation18_spill] sm:$0xff] %v6136_v51  ;;  %v6138_v52 = vpop.f32.mrf.mxu3  ;;  %v6142_v54 = vpop.f32.mrf.mxu1 }
  0xfa   :  { %8728 = vst [vmem:[#allocation19_spill] sm:$0xff] %v6138_v52 }
  0xfb   :  { %8729 = vst [vmem:[#allocation20_spill] sm:$0xff] %v6140_v53  ;;  %v5096_v53 = vld [vmem:[%s8710_s2 + $0x2c] sm:$0xf0] }
  0xfc   :  { %8730 = vst [vmem:[#allocation21_spill] sm:$0xff] %v6142_v54 }
 0x100   :  { %v6144_v55 = vpop.f32.mrf.mxu2  ;;  %v6148_v57 = vpop.f32.mrf.mxu0 }
 0x101   :  { %8731 = vst [vmem:[#allocation22_spill] sm:$0xff] %v6144_v55  ;;  %v6146_v56 = vpop.f32.mrf.mxu3  ;;  %v6150_v58 = vpop.f32.mrf.mxu1 }
 0x102   :  { %8732 = vst [vmem:[#allocation23_spill] sm:$0xff] %v6146_v56 }
 0x103   :  { %8733 = vst [vmem:[#allocation24_spill] sm:$0xff] %v6148_v57  ;;  %v6218_v57 = vperm.slane %v6171_v3, 3 }
 0x104   :  { %8734 = vst [vmem:[#allocation25_spill] sm:$0xff] %v6150_v58  ;;  %v4190_v58 = vld [vmem:[%s8710_s2 + $0xf8] sm:$0xf0] }
 0x108   :  { %v6152_v59 = vpop.f32.mrf.mxu2  ;;  %v6156_v61 = vpop.f32.mrf.mxu0 }
 0x109   :  { %8735 = vst [vmem:[#allocation26_spill] sm:$0xff] %v6152_v59  ;;  %v6154_v60 = vpop.f32.mrf.mxu3  ;;  %v6158_v62 = vpop.f32.mrf.mxu1  ;;  %v5121_v59 = vld [vmem:[%s8710_s2 + $0xf4] sm:$0xf0] }
 0x10a   :  { %8736 = vst [vmem:[#allocation27_spill] sm:$0xff] %v6154_v60 }
 0x10b   :  { %8737 = vst [vmem:[#allocation28_spill] sm:$0xff] %v6156_v61 }
 0x10c   :  { %8738 = vst [vmem:[#allocation29_spill] sm:$0xff] %v6158_v62 }
 0x110   :  { %v6160_v63 = vpop.f32.mrf.mxu2  ;;  %v6164_v1 = vpop.f32.mrf.mxu0 }
 0x111   :  { %8739 = vst [vmem:[#allocation30_spill] sm:$0xff] %v6160_v63  ;;  %v6162_v0 = vpop.f32.mrf.mxu3  ;;  %v6166_v2 = vpop.f32.mrf.mxu1  ;;  %v4182_v63 = vld [vmem:[%s8710_s2 + $0xf0] sm:$0xf0] }
 0x112   :  { %8740 = vst [vmem:[#allocation31_spill] sm:$0xff] %v6162_v0  ;;  %v4188_v0 = vld [vmem:[%s8710_s2 + $0xe8] sm:$0xf] }
 0x113   :  { %8741 = vst [vmem:[#allocation32_spill] sm:$0xff] %v6164_v1  ;;  %v6185_v1 = vperm.slane %v6171_v3, 1 }
 0x114   :  { %8742 = vst [vmem:[#allocation33_spill] sm:$0xff] %v6166_v2  ;;  %v4180_v2 = vld [vmem:[%s8710_s2 + $0xe0] sm:$0xf] }
 0x115   :  { %v350_v62 = vadd.f32 %v6054_v9, %v6185_v1 }
 0x118   :  { %v6175_v5 = vpop.f32.mrf.mxu0  ;;  %v6177_v6 = vpop.f32.mrf.mxu2 }
 0x119   :  { %v6173_v4 = vpop.f32.mrf.mxu3  ;;  %8744 = vst [vmem:[#allocation35_spill] sm:$0xff] %v6175_v5  ;;  %v6179_v7 = vpop.f32.mrf.mxu1 }
 0x11a   :  { %8743 = vst [vmem:[#allocation34_spill] sm:$0xff] %v6173_v4  ;;  %v5120_v4 = vld [vmem:[%s8710_s2 + $0xec] sm:$0xf0] }
 0x11b   :  { %8745 = vst [vmem:[#allocation36_spill] sm:$0xff] %v6177_v6  ;;  %v5118_v6 = vld [vmem:[%s8710_s2 + $0xe4] sm:$0xf]  ;;  %v4181_v5 = vor.u32 %v5120_v4, %v4180_v2  ;;  %v4189_v2 = vor.u32 %v5121_v59, %v4188_v0  ;;  %v5119_v4 = vld [vmem:[%s8710_s2 + $0xec] sm:$0xf] }
 0x11c   :  { %8746 = vst [vmem:[#allocation37_spill] sm:$0xff] %v6179_v7  ;;  %v301_v7 = vadd.f32 %v6052_v8, %v6182_v10  ;;  %v4185_v8 = vor.u32 %v5118_v6, %v4182_v63  ;;  %v4193_v9 = vor.u32 %v5119_v4, %v4190_v58  ;;  %v4164_v59 = vld [vmem:[%s8710_s2 + $0xc0] sm:$0xf]  ;;  %v5116_v63 = vld [vmem:[%s8710_s2 + $0xcc] sm:$0xf0] }
 0x11d   :  { %1157 = vmatpush.bf16.msra.mxu0 %v4181_v5  ;;  %1185 = vmatpush.bf16.msra.mxu2 %v4189_v2  ;;  %v5114_v0 = vld [vmem:[%s8710_s2 + $0xc4] sm:$0xf]  ;;  %v4165_v58 = vor.u32 %v5116_v63, %v4164_v59  ;;  %v4174_v4 = vld [vmem:[%s8710_s2 + $0xd8] sm:$0xf0]  ;;  %v5112_v59 = vld [vmem:[%s8710_s2 + $0xac] sm:$0xf0] }
 0x11e   :  { %1171 = vmatpush.bf16.msra.mxu1 %v4185_v8  ;;  %1199 = vmatpush.bf16.msra.mxu3 %v4193_v9  ;;  %v5117_v8 = vld [vmem:[%s8710_s2 + $0xd4] sm:$0xf0]  ;;  %v5110_v63 = vld [vmem:[%s8710_s2 + $0xa4] sm:$0xf] }
 0x120   :  { %v765_v60 = vpop.f32.mrf.mxu0  ;;  %v6229_v6 = vpop.f32.mrf.mxu2 }
 0x121   :  { %v6209_v61 = vpop.f32.mrf.mxu3  ;;  %v812_v55 = vadd.f32 %v765_v60, %v301_v7  ;;  %v779_v56 = vpop.f32.mrf.mxu1  ;;  %8748 = vst [vmem:[#allocation39_spill] sm:$0xff] %v6229_v6  ;;  %1158 = vmatpush.bf16.msra.mxu0 %v4165_v58 }
 0x122   :  { %8747 = vst [vmem:[#allocation38_spill] sm:$0xff] %v6209_v61  ;;  %v813_v51 = vadd.f32 %v779_v56, %v350_v62  ;;  %v4166_v56 = vld [vmem:[%s8710_s2 + $0xd0] sm:$0xf0]  ;;  %v4172_v62 = vld [vmem:[%s8710_s2 + $0xc8] sm:$0xf] }
 0x123   :  { %v4060_v60 = vmul.f32 -1.442695, %v812_v55  ;;  %v4169_v7 = vor.u32 %v5114_v0, %v4166_v56  ;;  %v5115_v55 = vld [vmem:[%s8710_s2 + $0xcc] sm:$0xf]  ;;  %v4173_v2 = vor.u32 %v5117_v8, %v4172_v62  ;;  %v448_v0 = vadd.f32 %v6058_v12, %v6218_v57  ;;  %v4150_v56 = vld [vmem:[%s8710_s2 + $0xb0] sm:$0xf0] }
 0x124   :  { %v4061_v5 = vmul.f32 -1.442695, %v813_v51  ;;  %v4177_v9 = vor.u32 %v5115_v55, %v4174_v4  ;;  %v4148_v51 = vld [vmem:[%s8710_s2 + $0xa0] sm:$0xf]  ;;  %v4156_v62 = vld [vmem:[%s8710_s2 + $0xa8] sm:$0xf]  ;;  %v352_v12 = vadd.f32 %v6062_v14, %v6185_v1 }
 0x125   :  { %5362 = vpow2.f32 %v4060_v60  ;;  %1172 = vmatpush.bf16.msra.mxu1 %v4169_v7  ;;  %v303_v60 = vadd.f32 %v6060_v13, %v6182_v10  ;;  %1186 = vmatpush.bf16.msra.mxu2 %v4173_v2  ;;  %v4149_v58 = vor.u32 %v5112_v59, %v4148_v51  ;;  %v4153_v13 = vor.u32 %v5110_v63, %v4150_v56  ;;  %v5111_v2 = vld [vmem:[%s8710_s2 + $0xac] sm:$0xf]  ;;  %v4158_v4 = vld [vmem:[%s8710_s2 + $0xb8] sm:$0xf0]  ;;  %v5108_v63 = vld [vmem:[%s8710_s2 + $0x8c] sm:$0xf0] }
 0x126   :  { %5364 = vpow2.f32 %v4061_v5  ;;  %v5113_v5 = vld [vmem:[%s8710_s2 + $0xb4] sm:$0xf0]  ;;  %1200 = vmatpush.bf16.msra.mxu3 %v4177_v9  ;;  %v6277_v51 = vperm.slane %v6171_v3, 2  ;;  %v4161_v14 = vor.u32 %v5111_v2, %v4158_v4  ;;  %v4132_v9 = vld [vmem:[%s8710_s2 + $0x80] sm:$0xf]  ;;  %v450_v4 = vadd.f32 %v6066_v16, %v6218_v57 }
 0x127   :  { %v4157_v55 = vor.u32 %v5113_v5, %v4156_v62  ;;  %1159 = vmatpush.bf16.msra.mxu0 %v4149_v58  ;;  %v5106_v3 = vld [vmem:[%s8710_s2 + $0x84] sm:$0xf]  ;;  %v4140_v2 = vld [vmem:[%s8710_s2 + $0x88] sm:$0xf]  ;;  %v5104_v16 = vld [vmem:[%s8710_s2 + $0x6c] sm:$0xf0] }
 0x128   :  { %v767_v8 = vpop.f32.mrf.mxu0 }
 0x129   :  { %v807_v7 = vpop.f32.mrf.mxu3  ;;  %v816_v6 = vadd.f32 %v767_v8, %v303_v60  ;;  %v781_v61 = vpop.f32.mrf.mxu1  ;;  %1173 = vmatpush.bf16.msra.mxu1 %v4153_v13  ;;  %1187 = vmatpush.bf16.msra.mxu2 %v4157_v55  ;;  %v4133_v60 = vor.u32 %v5108_v63, %v4132_v9  ;;  %v399_v55 = vadd.f32 %v6056_v11, %v6277_v51  ;;  %v5107_v11 = vld [vmem:[%s8710_s2 + $0x8c] sm:$0xf]  ;;  %v5102_v63 = vld [vmem:[%s8710_s2 + $0x64] sm:$0xf] }
 0x12a   :  { %v815_v59 = vadd.f32 %v807_v7, %v448_v0  ;;  %v817_v54 = vadd.f32 %v781_v61, %v352_v12  ;;  %v4134_v61 = vld [vmem:[%s8710_s2 + $0x90] sm:$0xf0]  ;;  %1201 = vmatpush.bf16.msra.mxu3 %v4161_v14  ;;  %v793_v8 = vpop.f32.mrf.mxu2 }
 0x12b   :  { %v5363_v56 = vpop.eup %5362  ;;  %v4063_v5 = vmul.f32 -1.442695, %v816_v6  ;;  %v4137_v12 = vor.u32 %v5106_v3, %v4134_v61  ;;  %1160 = vmatpush.bf16.msra.mxu0 %v4133_v60  ;;  %v5109_v6 = vld [vmem:[%s8710_s2 + $0x94] sm:$0xf0]  ;;  %v814_v14 = vadd.f32 %v793_v8, %v399_v55  ;;  %v4124_v60 = vld [vmem:[%s8710_s2 + $0x68] sm:$0xf] }
 0x12c   :  { %v4062_v0 = vmul.f32 -1.442695, %v815_v59  ;;  %v5365_v58 = vpop.eup %5364  ;;  %v6291_v62 = vadd.f32 1.0, %v5363_v56  ;;  %v4064_v13 = vmul.f32 -1.442695, %v817_v54  ;;  %v4141_v61 = vor.u32 %v5109_v6, %v4140_v2 }
 0x12d   :  { %v6293_v7 = vadd.f32 1.0, %v5365_v58  ;;  %1174 = vmatpush.bf16.msra.mxu1 %v4137_v12  ;;  %v4142_v54 = vld [vmem:[%s8710_s2 + $0x98] sm:$0xf0]  ;;  %v4116_v59 = vld [vmem:[%s8710_s2 + $0x60] sm:$0xf] }
 0x12e   :  { %5366 = vpow2.f32 %v4062_v0  ;;  %v4118_v0 = vld [vmem:[%s8710_s2 + $0x70] sm:$0xf0]  ;;  %v4145_v58 = vor.u32 %v5107_v11, %v4142_v54  ;;  %v5105_v12 = vld [vmem:[%s8710_s2 + $0x74] sm:$0xf0]  ;;  %v5103_v8 = vld [vmem:[%s8710_s2 + $0x6c] sm:$0xf]  ;;  %1188 = vmatpush.bf16.msra.mxu2 %v4141_v61  ;;  %vm849_vm3 = vweird.f32 %v6291_v62 }
 0x12f   :  { %5368 = vrcp.f32 %v6291_v62  ;;  %v4121_v6 = vor.u32 %v5102_v63, %v4118_v0  ;;  %v4100_v11 = vld [vmem:[%s8710_s2 + $0x40] sm:$0xf]  ;;  %v5100_v54 = vld [vmem:[%s8710_s2 + $0x4c] sm:$0xf0]  ;;  %v5098_v63 = vld [vmem:[%s8710_s2 + $0x44] sm:$0xf]  ;;  %vm864_vm2 = vweird.f32 %v6293_v7 }
 0x130   :  { %5370 = vrcp.f32 %v6293_v7  ;;  %1202 = vmatpush.bf16.msra.mxu3 %v4145_v58  ;;  %v5101_v58 = vld [vmem:[%s8710_s2 + $0x54] sm:$0xf0] }
 0x131   :  { %5372 = vpow2.f32 %v4063_v5  ;;  %v809_v9 = vpop.f32.mrf.mxu3  ;;  %v4117_v5 = vor.u32 %v5104_v16, %v4116_v59  ;;  %v4125_v16 = vor.u32 %v5105_v12, %v4124_v60  ;;  %1175 = vmatpush.bf16.msra.mxu1 %v4121_v6  ;;  %v4108_v60 = vld [vmem:[%s8710_s2 + $0x48] sm:$0xf]  ;;  %v5099_v12 = vld [vmem:[%s8710_s2 + $0x4c] sm:$0xf]  ;;  %v4084_v6 = vld [vmem:[%s8710_s2 + $0x20] sm:$0xf] }
 0x132   :  { %5374 = vpow2.f32 %v4064_v13  ;;  %v819_v56 = vadd.f32 %v809_v9, %v450_v4  ;;  %v4126_v13 = vld [vmem:[%s8710_s2 + $0x78] sm:$0xf0]  ;;  %v6340_v4 = vadd.f32 %v6064_v15, %v6277_v51  ;;  %v4109_v49 = vor.u32 %v5101_v58, %v4108_v60 }
 0x133   :  { %5376 = vtanh.f32 %v814_v14  ;;  %v4129_v15 = vor.u32 %v5103_v8, %v4126_v13  ;;  %1161 = vmatpush.bf16.msra.mxu0 %v4117_v5  ;;  %v4101_v14 = vor.u32 %v5100_v54, %v4100_v11  ;;  %v870_v5 = vand.u32 2147483648, %v6293_v7  ;;  %1189 = vmatpush.bf16.msra.mxu2 %v4125_v16  ;;  %v4086_v16 = vld [vmem:[%s8710_s2 + $0x30] sm:$0xf0] }
 0x134   :  { %v5367_v55 = vpop.eup %5366  ;;  %v4065_v2 = vmul.f32 -1.442695, %v819_v56  ;;  %v4102_v56 = vld [vmem:[%s8710_s2 + $0x50] sm:$0xf0] }
 0x135   :  { %v6348_v59 = vpop.eup %5368  ;;  %v6350_v9 = vadd.f32 1.0, %v5367_v55  ;;  %v4105_v61 = vor.u32 %v5098_v63, %v4102_v56  ;;  %v855_v55 = vand.u32 2147483648, %v6291_v62  ;;  %v868_v63 = vand.u32 2147483647, %v6293_v7  ;;  %1203 = vmatpush.bf16.msra.mxu3 %v4129_v15 }
 0x136   :  { %v6358_v0 = vpop.eup %5370  ;;  %v845_v3 = vmul.f32 %v6348_v59, %v6291_v62  ;;  %5378 = vpow2.f32 %v4065_v2  ;;  %v4110_v2 = vld [vmem:[%s8710_s2 + $0x58] sm:$0xf0]  ;;  %vm850_vm0 = vweird.f32 %v6348_v59 }
 0x137   :  { %v5373_v8 = vpop.eup %5372  ;;  %v860_v13 = vmul.f32 %v6358_v0, %v6293_v7  ;;  %5380 = vrcp.f32 %v6350_v9  ;;  %v4113_v47 = vor.u32 %v5099_v12, %v4110_v2  ;;  %vm865_vm1 = vweird.f32 %v6358_v0  ;;  %1162 = vmatpush.bf16.msra.mxu0 %v4101_v14  ;;  %1176 = vmatpush.bf16.msra.mxu1 %v4105_v61  ;;  %v795_v14 = vpop.f32.mrf.mxu2  ;;  %vm6407_vm4 = vmor %vm849_vm3, %vm850_vm0  ;;  %v5090_v12 = vld [vmem:[%s8710_s2 + $0x4] sm:$0xf] }
 0x138   :  { %v5375_v11 = vpop.eup %5374  ;;  %v846_v54 = vsub.f32 1.0, %v845_v3  ;;  %v6384_v56 = vadd.f32 1.0, %v5373_v8  ;;  %v4085_v3 = vor.u32 %v5096_v53, %v4084_v6  ;;  %v5094_v8 = vld [vmem:[%s8710_s2 + $0x24] sm:$0xf]  ;;  %v871_v53 = vor.u32 1.1754944e-38, %v870_v5  ;;  %vm6422_vm6 = vmor %vm864_vm2, %vm865_vm1  ;;  %1190 = vmatpush.bf16.msra.mxu2 %v4109_v49 }
 0x139   :  { %v861_v52 = vsub.f32 1.0, %v860_v13  ;;  %v6389_v50 = vadd.f32 1.0, %v5375_v11  ;;  %v5377_v15 = vpop.eup %5376  ;;  %v8751_v13 = vand.u32 2147483647, %v6291_v62  ;;  %v856_v7 = vor.u32 1.1754944e-38, %v855_v55  ;;  %1204 = vmatpush.bf16.msra.mxu3 %v4113_v47 }
 0x13a   :  { %v847_v48 = vmul.f32 %v6348_v59, %v846_v54  ;;  %5382 = vrcp.f32 %v6384_v56  ;;  %vm6426_vm7 = vcmp.eq.f32.partialorder %v868_v63, 8.507059e+37  ;;  %v4089_v11 = vor.u32 %v5094_v8, %v4086_v16  ;;  %v4092_v63 = vld [vmem:[%s8710_s2 + $0x28] sm:$0xf]  ;;  %v5097_v49 = vld [vmem:[%s8710_s2 + $0x34] sm:$0xf0] }
 0x13b   :  { %v862_v60 = vmul.f32 %v6358_v0, %v861_v52  ;;  %5384 = vrcp.f32 %v6389_v50  ;;  %vm6413_vm5 = vcmp.eq.f32.partialorder %v8751_v13, 8.507059e+37  ;;  %1163 = vmatpush.bf16.msra.mxu0 %v4085_v3  ;;  %v5095_v47 = vld [vmem:[%s8710_s2 + $0x2c] sm:$0xf]  ;;  %v898_v3 = vand.u32 2147483647, %v6384_v56 }
 0x13c   :  { %v5379_v61 = vpop.eup %5378  ;;  %v848_v58 = vadd.f32 %v6348_v59, %v847_v48  ;;  %1177 = vmatpush.bf16.msra.mxu1 %v4089_v11  ;;  %v4094_v8 = vld [vmem:[%s8710_s2 + $0x38] sm:$0xf0]  ;;  %v4068_v16 = vld [vmem:[%s8710_s2] sm:$0xf]  ;;  %v4070_v13 = vld [vmem:[%s8710_s2 + $0x10] sm:$0xf0]  ;;  %v4093_v43 = vor.u32 %v5097_v49, %v4092_v63  ;;  %vm894_vm10 = vweird.f32 %v6384_v56  ;;  %vm909_vm11 = vweird.f32 %v6389_v50 }
 0x13d   :  { %v6417_v2 = vpop.eup %5380  ;;  %v863_v6 = vadd.f32 %v6358_v0, %v862_v60  ;;  %v6430_v62 = vadd.f32 1.0, %v5379_v61  ;;  %v818_v60 = vadd.f32 %v795_v14, %v6340_v4  ;;  %v915_v11 = vand.u32 2147483648, %v6389_v50 }
 0x13e   :  { %v852_v55 = vsel %vm6407_vm4, %v6348_v59, %v848_v58  ;;  %v875_v54 = vmul.f32 %v6417_v2, %v6350_v9  ;;  %v4097_v46 = vor.u32 %v5095_v47, %v4094_v8  ;;  %v4073_v42 = vor.u32 %v5090_v12, %v4070_v13  ;;  %1191 = vmatpush.bf16.msra.mxu2 %v4093_v43 }
 0x13f   :  { %v857_v59 = vsel %vm6413_vm5, %v856_v7, %v852_v55  ;;  %v867_v4 = vsel %vm6422_vm6, %v6358_v0, %v863_v6  ;;  %5386 = vrcp.f32 %v6430_v62  ;;  %v5092_v0 = vld [vmem:[%s8710_s2 + $0xc] sm:$0xf0]  ;;  %v5091_v55 = vld [vmem:[%s8710_s2 + $0xc] sm:$0xf]  ;;  %v916_v43 = vor.u32 1.1754944e-38, %v915_v11 }
 0x140   :  { %v5383_v14 = vpop.eup %5382  ;;  %v872_v61 = vsel %vm6426_vm7, %v871_v53, %v867_v4  ;;  %v938_v58 = vmul.f32 %v5377_v15, %v857_v59  ;;  %v4076_v15 = vld [vmem:[%s8710_s2 + $0x8] sm:$0xf]  ;;  %v5093_v53 = vld [vmem:[%s8710_s2 + $0x14] sm:$0xf0]  ;;  %v876_v48 = vsub.f32 1.0, %v875_v54  ;;  %5388 = vtanh.f32 %v818_v60  ;;  %1205 = vmatpush.bf16.msra.mxu3 %v4097_v46  ;;  %1178 = vmatpush.bf16.msra.mxu1 %v4073_v42 }
 0x141   :  { %v5385_v52 = vpop.eup %5384  ;;  %v936_v7 = vmul.f32 0.0, %v872_v61  ;;  %v890_v6 = vmul.f32 %v5383_v14, %v6384_v56  ;;  %v4078_v59 = vld [vmem:[%s8710_s2 + $0x18] sm:$0xf0]  ;;  %v900_v54 = vand.u32 2147483648, %v6384_v56  ;;  %v4069_v44 = vor.u32 %v5092_v0, %v4068_v16 }
 0x142   :  { %v905_v5 = vmul.f32 %v5385_v52, %v6389_v50  ;;  %vm895_vm8 = vweird.f32 %v5383_v14  ;;  %v4077_v60 = vor.u32 %v5093_v53, %v4076_v15  ;;  %v4081_v39 = vor.u32 %v5091_v55, %v4078_v59 }
 0x143   :  { %v6486_v4 = vadd.f32 %v938_v58, %v936_v7  ;;  %v891_v61 = vsub.f32 1.0, %v890_v6  ;;  %vm910_vm9 = vweird.f32 %v5385_v52  ;;  %v913_v58 = vand.u32 2147483647, %v6389_v50  ;;  %1164 = vmatpush.bf16.msra.mxu0 %v4069_v44  ;;  %vm896_vm12 = vmor %vm894_vm10, %vm895_vm8 }
 0x144   :  { %v906_v45 = vsub.f32 1.0, %v905_v5  ;;  %v877_v63 = vmul.f32 %v6417_v2, %v876_v48  ;;  %v901_v46 = vor.u32 1.1754944e-38, %v900_v54  ;;  %vm880_vm13 = vweird.f32 %v6417_v2  ;;  %vm911_vm15 = vmor %vm909_vm11, %vm910_vm9  ;;  %1192 = vmatpush.bf16.msra.mxu2 %v4077_v60  ;;  %1206 = vmatpush.bf16.msra.mxu3 %v4081_v39 }
 0x145   :  { %v892_v41 = vmul.f32 %v5383_v14, %v891_v61  ;;  %v5387_v40 = vpop.eup %5386  ;;  %vm899_vm14 = vcmp.eq.f32.partialorder %v898_v3, 8.507059e+37  ;;  %5390 = vtanh.f32 %v6486_v4  ;;  %vm914_vm0 = vcmp.eq.f32.partialorder %v913_v58, 8.507059e+37 }
 0x146   :  { %v907_v35 = vmul.f32 %v5385_v52, %v906_v45  ;;  %v920_v47 = vmul.f32 %v5387_v40, %v6430_v62  ;;  %v5389_v8 = vpop.eup %5388  ;;  %v878_v12 = vadd.f32 %v6417_v2, %v877_v63  ;;  %vm879_vm1 = vweird.f32 %v6350_v9 }
 0x147   :  { %v893_v49 = vadd.f32 %v5383_v14, %v892_v41  ;;  %v883_v3 = vand.u32 2147483647, %v6350_v9  ;;  %vm881_vm2 = vmor %vm879_vm1, %vm880_vm13  ;;  %vm925_vm3 = vweird.f32 %v5387_v40  ;;  %v930_v15 = vand.u32 2147483648, %v6430_v62 }
 0x148   :  { %v908_v45 = vadd.f32 %v5385_v52, %v907_v35  ;;  %v921_v42 = vsub.f32 1.0, %v920_v47  ;;  %v885_v35 = vand.u32 2147483648, %v6350_v9  ;;  %vm924_vm4 = vweird.f32 %v6430_v62 }
 0x149   :  { %v897_v16 = vsel %vm896_vm12, %v5383_v14, %v893_v49  ;;  %v882_v14 = vsel %vm881_vm2, %v6417_v2, %v878_v12  ;;  %vm884_vm5 = vcmp.eq.f32.partialorder %v883_v3, 8.507059e+37  ;;  %v928_v9 = vand.u32 2147483647, %v6430_v62  ;;  %vm926_vm6 = vmor %vm924_vm4, %vm925_vm3 }
 0x14a   :  { %v902_v41 = vsel %vm899_vm14, %v901_v46, %v897_v16  ;;  %v912_v44 = vsel %vm911_vm15, %v5385_v52, %v908_v45  ;;  %v922_v0 = vmul.f32 %v5387_v40, %v921_v42  ;;  %v886_v6 = vor.u32 1.1754944e-38, %v885_v35  ;;  %v4316_v42 = vld [vmem:[%s8710_s2 + $0xe0] sm:$0xf] }
 0x14b   :  { %v917_v50 = vsel %vm914_vm0, %v916_v43, %v912_v44  ;;  %v939_v56 = vmul.f32 %v5389_v8, %v902_v41  ;;  %v5391_v7 = vpop.eup %5390  ;;  %v931_v11 = vor.u32 1.1754944e-38, %v930_v15  ;;  %vm929_vm7 = vcmp.eq.f32.partialorder %v928_v9, 8.507059e+37  ;;  %v5152_v41 = vld [vmem:[%s8710_s2 + $0xec] sm:$0xf0] }
 0x14c   :  { %v937_v13 = vmul.f32 0.0, %v917_v50  ;;  %v923_v52 = vadd.f32 %v5387_v40, %v922_v0  ;;  %v887_v53 = vsel %vm884_vm5, %v886_v6, %v882_v14  ;;  %v355_v62 = vadd.f32 %v6070_v18, %v6185_v1  ;;  %v4318_v50 = vld [vmem:[%s8710_s2 + $0xf0] sm:$0xf0]  ;;  %v5153_v0 = vld [vmem:[%s8710_s2 + $0xf4] sm:$0xf0] }
 0x14d   :  { %v944_v5 = vmul.f32 %v5391_v7, %v887_v53  ;;  %v453_v18 = vadd.f32 %v6074_v20, %v6218_v57  ;;  %v4317_v44 = vor.u32 %v5152_v41, %v4316_v42  ;;  %v308_v12 = vadd.f32 %v6076_v21, %v6182_v10  ;;  %v5151_v14 = vld [vmem:[%s8710_s2 + $0xec] sm:$0xf]  ;;  %v5144_v42 = vld [vmem:[%s8710_s2 + $0xac] sm:$0xf0] }
 0x14e   :  { %v6504_v39 = vadd.f32 %v939_v56, %v937_v13  ;;  %v927_v48 = vsel %vm926_vm6, %v5387_v40, %v923_v52  ;;  %v306_v40 = vadd.f32 %v6068_v17, %v6182_v10  ;;  %v5150_v17 = vld [vmem:[%s8710_s2 + $0xe4] sm:$0xf]  ;;  %v4324_v56 = vld [vmem:[%s8710_s2 + $0xe8] sm:$0xf]  ;;  %v357_v20 = vadd.f32 %v6078_v22, %v6185_v1  ;;  %v4326_v52 = vld [vmem:[%s8710_s2 + $0xf8] sm:$0xf0] }
 0x14f   :  { %v932_v2 = vsel %vm929_vm7, %v931_v11, %v927_v48  ;;  %v946_v61 = vpack.c.bf16 %v944_v5, %v944_v5  ;;  %v4321_v13 = vor.u32 %v5150_v17, %v4318_v50  ;;  %v4325_v3 = vor.u32 %v5153_v0, %v4324_v56  ;;  %1559 = vmatpush.bf16.msrb.mxu0 %v4317_v44  ;;  %v4300_v22 = vld [vmem:[%s8710_s2 + $0xc0] sm:$0xf]  ;;  %v5148_v48 = vld [vmem:[%s8710_s2 + $0xcc] sm:$0xf0]  ;;  %v4286_v44 = vld [vmem:[%s8710_s2 + $0xb0] sm:$0xf0] }
 0x150   :  { %5392 = vtanh.f32 %v6504_v39  ;;  %v4329_v9 = vor.u32 %v5151_v14, %v4326_v52  ;;  %v455_v41 = vadd.f32 %v6082_v24, %v6218_v57  ;;  %v4292_v56 = vld [vmem:[%s8710_s2 + $0xa8] sm:$0xf]  ;;  %v5145_v24 = vld [vmem:[%s8710_s2 + $0xb4] sm:$0xf0]  ;;  %v404_v0 = vadd.f32 %v6072_v19, %v6277_v51  ;;  %v4268_v19 = vld [vmem:[%s8710_s2 + $0x80] sm:$0xf] }
 0x151   :  { %v993_v58 = vunpack.c.l.b16 %v946_v61  ;;  %1573 = vmatpush.bf16.msrb.mxu1 %v4321_v13  ;;  %1587 = vmatpush.bf16.msrb.mxu2 %v4325_v3  ;;  %v5143_v13 = vld [vmem:[%s8710_s2 + $0xac] sm:$0xf]  ;;  %v4294_v3 = vld [vmem:[%s8710_s2 + $0xb8] sm:$0xf0] }
 0x152   :  { %1601 = vmatpush.bf16.msrb.mxu3 %v4329_v9  ;;  %v5138_v9 = vld [vmem:[%s8710_s2 + $0x84] sm:$0xf] }
 0x156   :  { %v5393_v55 = vpop.eup %5392 }
 0x157   :  { %v945_v59 = vmul.f32 %v5393_v55, %v932_v2  ;;  %v4301_v55 = vor.u32 %v5148_v48, %v4300_v22  ;;  %v4302_v2 = vld [vmem:[%s8710_s2 + $0xd0] sm:$0xf0] }
 0x159   :  { %v947_v54 = vpack.c.bf16 %v945_v59, %v945_v59  ;;  %v5317_v60 = vpack.c.bf16 %v945_v59, %v944_v5  ;;  %v5146_v5 = vld [vmem:[%s8710_s2 + $0xc4] sm:$0xf]  ;;  %v4308_v59 = vld [vmem:[%s8710_s2 + $0xc8] sm:$0xf]  ;;  %1560 = vmatpush.bf16.msrb.mxu0 %v4301_v55  ;;  %v406_v55 = vadd.f32 %v6080_v23, %v6277_v51 }
 0x15b   :  { %5318 = vst [vmem:[%s8713_s4] sm:$0xff] %v5317_v60   ;;  %v994_v63 = vunpack.c.l.b16 %v947_v54 }
 0x15d   :  { %v995_v49 = vpack.c.b16 %v994_v63, %v993_v58  ;;  %v4305_v58 = vor.u32 %v5146_v5, %v4302_v2  ;;  %v5149_v63 = vld [vmem:[%s8710_s2 + $0xd4] sm:$0xf0]  ;;  %v4270_v5 = vld [vmem:[%s8710_s2 + $0x90] sm:$0xf0] }
 0x15f   :  { %1165 = vmatmul.bf16.vlgmr.msra.gmra.mxu0 %v995_v49  ;;  %1179 = vmatmul.bf16.vlgmr.msra.gmra.mxu1 %v995_v49 }
 0x160   :  { %1193 = vmatmul.bf16.vlgmr.msra.gmra.mxu2 %v995_v49  ;;  %1207 = vmatmul.bf16.vlgmr.msra.gmra.mxu3 %v995_v49 }
 0x161   :  { %1574 = vmatpush.bf16.msrb.mxu1 %v4305_v58 }
 0x1dc   :  { %v1166_v47 = vpop.f32.mrf.mxu0  ;;  %v1180_v8 = vpop.f32.mrf.mxu1 }
 0x1dd   :  { %v1213_v43 = vadd.f32 %v1166_v47, %v306_v40  ;;  %v1214_v46 = vadd.f32 %v1180_v8, %v355_v62  ;;  %v4309_v47 = vor.u32 %v5149_v63, %v4308_v59  ;;  %v5147_v8 = vld [vmem:[%s8710_s2 + $0xcc] sm:$0xf] }
 0x1df   :  { %v4194_v45 = vmul.f32 -1.442695, %v1213_v43  ;;  %v4195_v16 = vmul.f32 -1.442695, %v1214_v46  ;;  %v4310_v43 = vld [vmem:[%s8710_s2 + $0xd8] sm:$0xf0]  ;;  %1588 = vmatpush.bf16.msrb.mxu2 %v4309_v47 }
 0x1e1   :  { %5394 = vpow2.f32 %v4194_v45  ;;  %v4313_v45 = vor.u32 %v5147_v8, %v4310_v43 }
 0x1e2   :  { %5396 = vpow2.f32 %v4195_v16  ;;  %v4284_v16 = vld [vmem:[%s8710_s2 + $0xa0] sm:$0xf] }
 0x1e3   :  { %v1208_v35 = vpop.f32.mrf.mxu3  ;;  %v1194_v62 = vpop.f32.mrf.mxu2  ;;  %1602 = vmatpush.bf16.msrb.mxu3 %v4313_v45 }
 0x1e4   :  { %v1216_v7 = vadd.f32 %v1208_v35, %v453_v18  ;;  %v1168_v6 = vpop.f32.mrf.mxu0  ;;  %v1182_v15 = vpop.f32.mrf.mxu1  ;;  %v5142_v18 = vld [vmem:[%s8710_s2 + $0xa4] sm:$0xf]  ;;  %v4285_v35 = vor.u32 %v5144_v42, %v4284_v16  ;;  %v4276_v16 = vld [vmem:[%s8710_s2 + $0x88] sm:$0xf]  ;;  %v5141_v42 = vld [vmem:[%s8710_s2 + $0x94] sm:$0xf0] }
 0x1e5   :  { %v1217_v21 = vadd.f32 %v1168_v6, %v308_v12  ;;  %v1218_v53 = vadd.f32 %v1182_v15, %v357_v20  ;;  %v4289_v52 = vor.u32 %v5142_v18, %v4286_v44  ;;  %v4297_v6 = vor.u32 %v5143_v13, %v4294_v3  ;;  %v5140_v15 = vld [vmem:[%s8710_s2 + $0x8c] sm:$0xf0]  ;;  %v5139_v18 = vld [vmem:[%s8710_s2 + $0x8c] sm:$0xf]  ;;  %v4278_v44 = vld [vmem:[%s8710_s2 + $0x98] sm:$0xf0] }
 0x1e6   :  { %v4196_v11 = vmul.f32 -1.442695, %v1216_v7  ;;  %v4293_v7 = vor.u32 %v5145_v24, %v4292_v56  ;;  %1561 = vmatpush.bf16.msrb.mxu0 %v4285_v35  ;;  %v4269_v48 = vor.u32 %v5140_v15, %v4268_v19  ;;  %v5136_v35 = vld [vmem:[%s8710_s2 + $0x6c] sm:$0xf0]  ;;  %v4254_v19 = vld [vmem:[%s8710_s2 + $0x70] sm:$0xf0] }
 0x1e7   :  { %v5395_v61 = vpop.eup %5394  ;;  %v4197_v54 = vmul.f32 -1.442695, %v1217_v21  ;;  %v4198_v60 = vmul.f32 -1.442695, %v1218_v53  ;;  %v1215_v53 = vadd.f32 %v1194_v62, %v404_v0  ;;  %1575 = vmatpush.bf16.msrb.mxu1 %v4289_v52  ;;  %1603 = vmatpush.bf16.msrb.mxu3 %v4297_v6  ;;  %v4277_v52 = vor.u32 %v5141_v42, %v4276_v16  ;;  %v5134_v6 = vld [vmem:[%s8710_s2 + $0x64] sm:$0xf] }
 0x1e8   :  { %v5397_v49 = vpop.eup %5396  ;;  %v6566_v40 = vadd.f32 1.0, %v5395_v61  ;;  %5398 = vpow2.f32 %v4196_v11  ;;  %1589 = vmatpush.bf16.msrb.mxu2 %v4293_v7  ;;  %v4273_v61 = vor.u32 %v5138_v9, %v4270_v5  ;;  %v4281_v7 = vor.u32 %v5139_v18, %v4278_v44 }
 0x1e9   :  { %v6574_v46 = vadd.f32 1.0, %v5397_v49  ;;  %5400 = vpow2.f32 %v4197_v54  ;;  %v4257_v42 = vor.u32 %v5134_v6, %v4254_v19 }
 0x1ea   :  { %5402 = vrcp.f32 %v6566_v40  ;;  %v1254_v50 = vand.u32 2147483647, %v6566_v40  ;;  %v1256_v12 = vand.u32 2147483648, %v6566_v40  ;;  %vm1250_vm9 = vweird.f32 %v6566_v40  ;;  %1562 = vmatpush.bf16.msrb.mxu0 %v4269_v48 }
 0x1eb   :  { %5404 = vrcp.f32 %v6574_v46  ;;  %v1210_v17 = vpop.f32.mrf.mxu3  ;;  %v1271_v58 = vand.u32 2147483648, %v6574_v46  ;;  %v1269_v63 = vand.u32 2147483647, %v6574_v46  ;;  %v1196_v8 = vpop.f32.mrf.mxu2  ;;  %vm1265_vm10 = vweird.f32 %v6574_v46  ;;  %1576 = vmatpush.bf16.msrb.mxu1 %v4273_v61  ;;  %1604 = vmatpush.bf16.msrb.mxu3 %v4281_v7  ;;  %v5128_v7 = vld [vmem:[%s8710_s2 + $0x2c] sm:$0xf0] }
 0x1ec   :  { %5406 = vpow2.f32 %v4198_v60  ;;  %v1220_v20 = vadd.f32 %v1210_v17, %v455_v41  ;;  %vm6637_vm8 = vcmp.eq.f32.partialorder %v1254_v50, 8.507059e+37  ;;  %v1257_v47 = vor.u32 1.1754944e-38, %v1256_v12  ;;  %1590 = vmatpush.bf16.msrb.mxu2 %v4277_v52  ;;  %v5133_v12 = vld [vmem:[%s8710_s2 + $0x54] sm:$0xf0]  ;;  %v4220_v52 = vld [vmem:[%s8710_s2 + $0x20] sm:$0xf] }
 0x1ed   :  { %v1219_v56 = vadd.f32 %v1196_v8, %v406_v55  ;;  %v1272_v0 = vor.u32 1.1754944e-38, %v1271_v58  ;;  %vm6664_vm13 = vcmp.eq.f32.partialorder %v1269_v63, 8.507059e+37  ;;  %v5137_v63 = vld [vmem:[%s8710_s2 + $0x74] sm:$0xf0] }
 0x1ee   :  { %v5399_v14 = vpop.eup %5398  ;;  %v4199_v59 = vmul.f32 -1.442695, %v1220_v20  ;;  %v4252_v20 = vld [vmem:[%s8710_s2 + $0x60] sm:$0xf] }
 0x1ef   :  { %v5401_v21 = vpop.eup %5400  ;;  %v6617_v22 = vadd.f32 1.0, %v5399_v14  ;;  %v4253_v58 = vor.u32 %v5136_v35, %v4252_v20  ;;  %1577 = vmatpush.bf16.msrb.mxu1 %v4257_v42 }
 0x1f0   :  { %v6622_v11 = vpop.eup %5402  ;;  %v6626_v2 = vadd.f32 1.0, %v5401_v21 }
 0x1f1   :  { %v6628_v54 = vpop.eup %5404  ;;  %v1246_v60 = vmul.f32 %v6622_v11, %v6566_v40  ;;  %5408 = vrcp.f32 %v6617_v22  ;;  %vm1251_vm11 = vweird.f32 %v6622_v11  ;;  %1563 = vmatpush.bf16.msrb.mxu0 %v4253_v58 }
 0x1f2   :  { %v5407_v49 = vpop.eup %5406  ;;  %v1261_v23 = vmul.f32 %v6628_v54, %v6574_v46  ;;  %5410 = vrcp.f32 %v6626_v2  ;;  %v1301_v17 = vand.u32 2147483648, %v6626_v2  ;;  %vm1266_vm12 = vweird.f32 %v6628_v54  ;;  %vm6690_vm14 = vmor %vm1250_vm9, %vm1251_vm11  ;;  %v4260_v46 = vld [vmem:[%s8710_s2 + $0x68] sm:$0xf] }
 0x1f3   :  { %v1247_v43 = vsub.f32 1.0, %v1246_v60  ;;  %5412 = vtanh.f32 %v1215_v53  ;;  %v6643_v45 = vadd.f32 1.0, %v5407_v49  ;;  %v1299_v14 = vand.u32 2147483647, %v6626_v2  ;;  %vm6704_vm15 = vmor %vm1265_vm10, %vm1266_vm12  ;;  %v4262_v49 = vld [vmem:[%s8710_s2 + $0x78] sm:$0xf0] }
 0x1f4   :  { %v1262_v41 = vsub.f32 1.0, %v1261_v23  ;;  %5414 = vpow2.f32 %v4199_v59  ;;  %v6698_v5 = vor.u32 1.1754944e-38, %v1301_v17  ;;  %v5132_v17 = vld [vmem:[%s8710_s2 + $0x4c] sm:$0xf0]  ;;  %vm1295_vm1 = vweird.f32 %v6626_v2 }
 0x1f5   :  { %v1248_v50 = vmul.f32 %v6622_v11, %v1247_v43  ;;  %5416 = vrcp.f32 %v6643_v45  ;;  %v1316_v48 = vand.u32 2147483648, %v6643_v45  ;;  %v1314_v60 = vand.u32 2147483647, %v6643_v45 }
 0x1f6   :  { %v1263_v24 = vmul.f32 %v6628_v54, %v1262_v41  ;;  %v4236_v41 = vld [vmem:[%s8710_s2 + $0x40] sm:$0xf]  ;;  %5418 = vtanh.f32 %v1219_v56  ;;  %v4246_v56 = vld [vmem:[%s8710_s2 + $0x58] sm:$0xf0]  ;;  %v4261_v9 = vor.u32 %v5137_v63, %v4260_v46  ;;  %v4228_v63 = vld [vmem:[%s8710_s2 + $0x28] sm:$0xf]  ;;  %vm1310_vm5 = vweird.f32 %v6643_v45 }
 0x1f7   :  { %v6674_v13 = vpop.eup %5408  ;;  %v1249_v3 = vadd.f32 %v6622_v11, %v1248_v50  ;;  %v4237_v58 = vor.u32 %v5132_v17, %v4236_v41  ;;  %vm1300_vm4 = vcmp.eq.f32.partialorder %v1299_v14, 8.507059e+37  ;;  %v4221_v41 = vor.u32 %v5128_v7, %v4220_v52  ;;  %v4214_v52 = vld [vmem:[%s8710_s2 + $0x18] sm:$0xf0] }
 0x1f8   :  { %v6684_v15 = vpop.eup %5410  ;;  %v1264_v21 = vadd.f32 %v6628_v54, %v1263_v24  ;;  %v1276_v53 = vmul.f32 %v6674_v13, %v6617_v22  ;;  %v4238_v24 = vld [vmem:[%s8710_s2 + $0x50] sm:$0xf0]  ;;  %1591 = vmatpush.bf16.msrb.mxu2 %v4261_v9  ;;  %vm1315_vm7 = vcmp.eq.f32.partialorder %v1314_v60, 8.507059e+37  ;;  %vm1280_vm9 = vweird.f32 %v6617_v22 }
 0x1f9   :  { %v5413_v55 = vpop.eup %5412  ;;  %v1253_v59 = vsel %vm6690_vm14, %v6622_v11, %v1249_v3  ;;  %v1291_v61 = vmul.f32 %v6684_v15, %v6626_v2  ;;  %v5135_v11 = vld [vmem:[%s8710_s2 + $0x6c] sm:$0xf]  ;;  %vm1296_vm0 = vweird.f32 %v6684_v15  ;;  %1564 = vmatpush.bf16.msrb.mxu0 %v4237_v58 }
 0x1fa   :  { %v5415_v23 = vpop.eup %5414  ;;  %v1258_v8 = vsel %vm6637_vm8, %v1257_v47, %v1253_v59  ;;  %v1268_v43 = vsel %vm6704_vm15, %v6628_v54, %v1264_v21  ;;  %v1277_v16 = vsub.f32 1.0, %v1276_v53  ;;  %v5130_v54 = vld [vmem:[%s8710_s2 + $0x44] sm:$0xf]  ;;  %v5131_v3 = vld [vmem:[%s8710_s2 + $0x4c] sm:$0xf]  ;;  %v4265_v21 = vor.u32 %v5135_v11, %v4262_v49  ;;  %vm6786_vm2 = vmor %vm1295_vm1, %vm1296_vm0 }
 0x1fb   :  { %v6737_v18 = vpop.eup %5416  ;;  %v1273_v62 = vsel %vm6664_vm13, %v1272_v0, %v1268_v43  ;;  %v1339_v47 = vmul.f32 %v5413_v55, %v1258_v8  ;;  %v1292_v44 = vsub.f32 1.0, %v1291_v61  ;;  %v6741_v50 = vadd.f32 1.0, %v5415_v23  ;;  %v4244_v0 = vld [vmem:[%s8710_s2 + $0x48] sm:$0xf]  ;;  %v5126_v53 = vld [vmem:[%s8710_s2 + $0x24] sm:$0xf] }
 0x1fc   :  { %v1337_v20 = vmul.f32 %v1273_v62, %v6486_v4  ;;  %v1306_v35 = vmul.f32 %v6737_v18, %v6643_v45  ;;  %v4222_v55 = vld [vmem:[%s8710_s2 + $0x30] sm:$0xf0]  ;;  %v1278_v40 = vmul.f32 %v6674_v13, %v1277_v16  ;;  %v4241_v46 = vor.u32 %v5130_v54, %v4238_v24  ;;  %1605 = vmatpush.bf16.msrb.mxu3 %v4265_v21  ;;  %v5129_v8 = vld [vmem:[%s8710_s2 + $0x34] sm:$0xf0]  ;;  %v5127_v43 = vld [vmem:[%s8710_s2 + $0x2c] sm:$0xf] }
 0x1fd   :  { %v1293_v4 = vmul.f32 %v6684_v15, %v1292_v44  ;;  %5420 = vrcp.f32 %v6741_v50  ;;  %vm1311_vm3 = vweird.f32 %v6737_v18  ;;  %v4245_v49 = vor.u32 %v5133_v12, %v4244_v0  ;;  %v4230_v16 = vld [vmem:[%s8710_s2 + $0x38] sm:$0xf0]  ;;  %v4204_v62 = vld [vmem:[%s8710_s2] sm:$0xf]  ;;  %v5419_v44 = vpop.eup %5418  ;;  %v5122_v54 = vld [vmem:[%s8710_s2 + $0x4] sm:$0xf]  ;;  %1565 = vmatpush.bf16.msrb.mxu0 %v4221_v41 }
 0x1fe   :  { %v6774_v6 = vadd.f32 %v1339_v47, %v1337_v20  ;;  %v1307_v19 = vsub.f32 1.0, %v1306_v35  ;;  %v4249_v23 = vor.u32 %v5131_v3, %v4246_v56  ;;  %1578 = vmatpush.bf16.msrb.mxu1 %v4241_v46  ;;  %v4225_v17 = vor.u32 %v5126_v53, %v4222_v55  ;;  %v5124_v47 = vld [vmem:[%s8710_s2 + $0xc] sm:$0xf0]  ;;  %v4206_v24 = vld [vmem:[%s8710_s2 + $0x10] sm:$0xf0]  ;;  %vm1312_vm6 = vmor %vm1310_vm5, %vm1311_vm3 }
 0x1ff   :  { %v1294_v59 = vadd.f32 %v6684_v15, %v1293_v4  ;;  %v4229_v35 = vor.u32 %v5129_v8, %v4228_v63  ;;  %1592 = vmatpush.bf16.msrb.mxu2 %v4245_v49  ;;  %v4205_v3 = vor.u32 %v5124_v47, %v4204_v62  ;;  %v4212_v4 = vld [vmem:[%s8710_s2 + $0x8] sm:$0xf]  ;;  %v5125_v45 = vld [vmem:[%s8710_s2 + $0x14] sm:$0xf0]  ;;  %vm1281_vm8 = vweird.f32 %v6674_v13 }
 0x200   :  { %v1308_v11 = vmul.f32 %v6737_v18, %v1307_v19  ;;  %5422 = vtanh.f32 %v6774_v6  ;;  %1606 = vmatpush.bf16.msrb.mxu3 %v4249_v23  ;;  %v4209_v56 = vor.u32 %v5122_v54, %v4206_v24  ;;  %v1279_v7 = vadd.f32 %v6674_v13, %v1278_v40  ;;  %vm6851_vm10 = vmor %vm1280_vm9, %vm1281_vm8 }
 0x201   :  { %v1298_v42 = vsel %vm6786_vm2, %v6684_v15, %v1294_v59  ;;  %v1317_v15 = vor.u32 1.1754944e-38, %v1316_v48  ;;  %v1286_v19 = vand.u32 2147483648, %v6617_v22  ;;  %v4213_v53 = vor.u32 %v5125_v45, %v4212_v4  ;;  %1566 = vmatpush.bf16.msrb.mxu0 %v4205_v3  ;;  %v4462_v59 = vld [vmem:[%s8710_s2 + $0xf8] sm:$0xf0] }
 0x202   :  { %v1303_v2 = vsel %vm1300_vm4, %v6698_v5, %v1298_v42  ;;  %v1309_v14 = vadd.f32 %v6737_v18, %v1308_v11  ;;  %v4233_v5 = vor.u32 %v5127_v43, %v4230_v16  ;;  %1579 = vmatpush.bf16.msrb.mxu1 %v4225_v17  ;;  %v1284_v55 = vand.u32 2147483647, %v6617_v22 }
 0x203   :  { %v5421_v20 = vpop.eup %5420  ;;  %v1340_v48 = vmul.f32 %v5419_v44, %v1303_v2  ;;  %1593 = vmatpush.bf16.msrb.mxu2 %v4229_v35  ;;  %v1287_v63 = vor.u32 1.1754944e-38, %v1286_v19  ;;  %v1331_v22 = vand.u32 2147483648, %v6741_v50  ;;  %vm1325_vm12 = vweird.f32 %v6741_v50  ;;  %v5185_v19 = vld [vmem:[%s8710_s2 + $0xf4] sm:$0xf0] }
 0x204   :  { %v1313_v0 = vsel %vm1312_vm6, %v6737_v18, %v1309_v14  ;;  %v1321_v12 = vmul.f32 %v5421_v20, %v6741_v50  ;;  %v5123_v18 = vld [vmem:[%s8710_s2 + $0xc] sm:$0xf]  ;;  %1607 = vmatpush.bf16.msrb.mxu3 %v4233_v5  ;;  %vm1326_vm11 = vweird.f32 %v5421_v20  ;;  %vm1285_vm13 = vcmp.eq.f32.partialorder %v1284_v55, 8.507059e+37 }
 0x205   :  { %v1318_v60 = vsel %vm1315_vm7, %v1317_v15, %v1313_v0  ;;  %v4217_v40 = vor.u32 %v5123_v18, %v4214_v52  ;;  %v1329_v49 = vand.u32 2147483647, %v6741_v50  ;;  %vm1327_vm14 = vmor %vm1325_vm12, %vm1326_vm11  ;;  %v1332_v16 = vor.u32 1.1754944e-38, %v1331_v22  ;;  %v5183_v55 = vld [vmem:[%s8710_s2 + $0xec] sm:$0xf] }
 0x206   :  { %v1338_v9 = vmul.f32 %v1318_v60, %v6504_v39  ;;  %v1322_v21 = vsub.f32 1.0, %v1321_v12  ;;  %1580 = vmatpush.bf16.msrb.mxu1 %v4209_v56  ;;  %v1283_v39 = vsel %vm6851_vm10, %v6674_v13, %v1279_v7  ;;  %v5423_v46 = vpop.eup %5422  ;;  %v311_v2 = vadd.f32 %v6084_v25, %v6182_v10  ;;  %v4452_v60 = vld [vmem:[%s8710_s2 + $0xe0] sm:$0xf]  ;;  %v5184_v56 = vld [vmem:[%s8710_s2 + $0xec] sm:$0xf0] }
 0x207   :  { %1594 = vmatpush.bf16.msrb.mxu2 %v4213_v53  ;;  %v1288_v23 = vsel %vm1285_vm13, %v1287_v63, %v1283_v39  ;;  %vm1330_vm15 = vcmp.eq.f32.partialorder %v1329_v49, 8.507059e+37  ;;  %v360_v14 = vadd.f32 %v6086_v26, %v6185_v1  ;;  %v458_v0 = vadd.f32 %v6090_v28, %v6218_v57  ;;  %v5182_v28 = vld [vmem:[%s8710_s2 + $0xe4] sm:$0xf]  ;;  %v4460_v7 = vld [vmem:[%s8710_s2 + $0xe8] sm:$0xf] }
 0x208   :  { %v6855_v61 = vadd.f32 %v1340_v48, %v1338_v9  ;;  %v1323_v58 = vmul.f32 %v5421_v20, %v1322_v21  ;;  %1608 = vmatpush.bf16.msrb.mxu3 %v4217_v40  ;;  %v1345_v43 = vmul.f32 %v5423_v46, %v1288_v23  ;;  %v313_v12 = vadd.f32 %v6092_v29, %v6182_v10  ;;  %v5180_v49 = vld [vmem:[%s8710_s2 + $0xcc] sm:$0xf0] }
 0x209   :  { %v362_v25 = vadd.f32 %v6094_v30, %v6185_v1  ;;  %v4453_v52 = vor.u32 %v5184_v56, %v4452_v60  ;;  %v4454_v30 = vld [vmem:[%s8710_s2 + $0xf0] sm:$0xf0]  ;;  %v4461_v53 = vor.u32 %v5185_v19, %v4460_v7  ;;  %v4465_v46 = vor.u32 %v5183_v55, %v4462_v59 }
 0x20a   :  { %5424 = vtanh.f32 %v6855_v61  ;;  %v1324_v11 = vadd.f32 %v5421_v20, %v1323_v58  ;;  %v1347_v17 = vpack.c.bf16 %v1345_v43, %v1345_v43  ;;  %v4457_v21 = vor.u32 %v5182_v28, %v4454_v30 }
 0x20b   :  { %1961 = vmatpush.bf16.msra.mxu0 %v4453_v52  ;;  %1989 = vmatpush.bf16.msra.mxu2 %v4461_v53  ;;  %v411_v52 = vadd.f32 %v6096_v31, %v6277_v51 }
 0x20c   :  { %v1328_v8 = vsel %vm1327_vm14, %v5421_v20, %v1324_v11  ;;  %v1395_v44 = vunpack.c.l.b16 %v1347_v17  ;;  %1975 = vmatpush.bf16.msra.mxu1 %v4457_v21  ;;  %v4436_v11 = vld [vmem:[%s8710_s2 + $0xc0] sm:$0xf]  ;;  %2003 = vmatpush.bf16.msra.mxu3 %v4465_v46  ;;  %v4444_v17 = vld [vmem:[%s8710_s2 + $0xc8] sm:$0xf] }
 0x20d   :  { %v1333_v42 = vsel %vm1330_vm15, %v1332_v16, %v1328_v8  ;;  %v5178_v16 = vld [vmem:[%s8710_s2 + $0xc4] sm:$0xf] }
 0x210   :  { %v5425_v13 = vpop.eup %5424 }
 0x211   :  { %v1346_v41 = vmul.f32 %v5425_v13, %v1333_v42  ;;  %v4438_v13 = vld [vmem:[%s8710_s2 + $0xd0] sm:$0xf0]  ;;  %v460_v42 = vadd.f32 %v6098_v32, %v6218_v57  ;;  %v4446_v32 = vld [vmem:[%s8710_s2 + $0xd8] sm:$0xf0] }
 0x213   :  { %v1348_v62 = vpack.c.bf16 %v1346_v41, %v1346_v41  ;;  %v5322_v47 = vpack.c.bf16 %v1346_v41, %v1345_v43  ;;  %v4437_v43 = vor.u32 %v5180_v49, %v4436_v11  ;;  %v5172_v11 = vld [vmem:[%s8710_s2 + $0x8c] sm:$0xf0] }
 0x215   :  { %5354 = vst [vmem:[%s8713_s4 + $0x8] sm:$0xff] %v5322_v47   ;;  %v1396_v50 = vunpack.c.l.b16 %v1348_v62  ;;  %1962 = vmatpush.bf16.msra.mxu0 %v4437_v43  ;;  %v5181_v62 = vld [vmem:[%s8710_s2 + $0xd4] sm:$0xf0]  ;;  %v5179_v47 = vld [vmem:[%s8710_s2 + $0xcc] sm:$0xf] }
 0x217   :  { %v1397_v15 = vpack.c.b16 %v1396_v50, %v1395_v44  ;;  %v409_v44 = vadd.f32 %v6088_v27, %v6277_v51  ;;  %v5174_v27 = vld [vmem:[%s8710_s2 + $0xa4] sm:$0xf] }
 0x219   :  { %1567 = vmatmul.bf16.vlgmr.msrb.gmra.mxu0 %v1397_v15  ;;  %1581 = vmatmul.bf16.vlgmr.msrb.gmra.mxu1 %v1397_v15 }
 0x21a   :  { %1595 = vmatmul.bf16.vlgmr.msrb.gmra.mxu2 %v1397_v15  ;;  %1609 = vmatmul.bf16.vlgmr.msrb.gmra.mxu3 %v1397_v15 }
 0x296   :  { %v1568_v54 = vpop.f32.mrf.mxu0  ;;  %v1582_v24 = vpop.f32.mrf.mxu1 }
 0x297   :  { %v1615_v20 = vadd.f32 %v1568_v54, %v311_v2  ;;  %v1616_v48 = vadd.f32 %v1582_v24, %v360_v14  ;;  %v4441_v2 = vor.u32 %v5178_v16, %v4438_v13  ;;  %v4420_v14 = vld [vmem:[%s8710_s2 + $0xa0] sm:$0xf]  ;;  %v5176_v54 = vld [vmem:[%s8710_s2 + $0xac] sm:$0xf0] }
 0x299   :  { %v4330_v35 = vmul.f32 -1.442695, %v1615_v20  ;;  %v4331_v5 = vmul.f32 -1.442695, %v1616_v48  ;;  %v4445_v20 = vor.u32 %v5181_v62, %v4444_v17  ;;  %v4449_v48 = vor.u32 %v5179_v47, %v4446_v32  ;;  %1976 = vmatpush.bf16.msra.mxu1 %v4441_v2 }
 0x29b   :  { %5426 = vpow2.f32 %v4330_v35  ;;  %v4421_v35 = vor.u32 %v5176_v54, %v4420_v14  ;;  %1990 = vmatpush.bf16.msra.mxu2 %v4445_v20  ;;  %2004 = vmatpush.bf16.msra.mxu3 %v4449_v48  ;;  %v5163_v14 = vld [vmem:[%s8710_s2 + $0x4c] sm:$0xf] }
 0x29c   :  { %5428 = vpow2.f32 %v4331_v5  ;;  %v4422_v5 = vld [vmem:[%s8710_s2 + $0xb0] sm:$0xf0] }
 0x29d   :  { %v1610_v3 = vpop.f32.mrf.mxu3  ;;  %v1596_v8 = vpop.f32.mrf.mxu2  ;;  %1963 = vmatpush.bf16.msra.mxu0 %v4421_v35 }
 0x29e   :  { %v1618_v4 = vadd.f32 %v1610_v3, %v458_v0  ;;  %v1570_v26 = vpop.f32.mrf.mxu0  ;;  %v1584_v45 = vpop.f32.mrf.mxu1  ;;  %v4428_v0 = vld [vmem:[%s8710_s2 + $0xa8] sm:$0xf] }
 0x29f   :  { %v1619_v29 = vadd.f32 %v1570_v26, %v313_v12  ;;  %v1620_v18 = vadd.f32 %v1584_v45, %v362_v25  ;;  %v1617_v25 = vadd.f32 %v1596_v8, %v409_v44  ;;  %v5177_v26 = vld [vmem:[%s8710_s2 + $0xb4] sm:$0xf0] }
 0x2a0   :  { %v4332_v9 = vmul.f32 -1.442695, %v1618_v4  ;;  %v4425_v4 = vor.u32 %v5174_v27, %v4422_v5 }
 0x2a1   :  { %v5427_v58 = vpop.eup %5426  ;;  %v4333_v40 = vmul.f32 -1.442695, %v1619_v29  ;;  %v4334_v39 = vmul.f32 -1.442695, %v1620_v18  ;;  %v4429_v29 = vor.u32 %v5177_v26, %v4428_v0  ;;  %v5168_v26 = vld [vmem:[%s8710_s2 + $0x6c] sm:$0xf0] }
 0x2a2   :  { %v5429_v63 = vpop.eup %5428  ;;  %v6901_v22 = vadd.f32 1.0, %v5427_v58  ;;  %5430 = vpow2.f32 %v4332_v9  ;;  %1977 = vmatpush.bf16.msra.mxu1 %v4425_v4  ;;  %v5175_v58 = vld [vmem:[%s8710_s2 + $0xac] sm:$0xf]  ;;  %v4388_v4 = vld [vmem:[%s8710_s2 + $0x60] sm:$0xf] }
 0x2a3   :  { %v6909_v23 = vadd.f32 1.0, %v5429_v63  ;;  %5432 = vpow2.f32 %v4333_v40  ;;  %v4430_v40 = vld [vmem:[%s8710_s2 + $0xb8] sm:$0xf0]  ;;  %1991 = vmatpush.bf16.msra.mxu2 %v4429_v29  ;;  %v4404_v63 = vld [vmem:[%s8710_s2 + $0x80] sm:$0xf] }
 0x2a4   :  { %5434 = vrcp.f32 %v6901_v22  ;;  %v1656_v50 = vand.u32 2147483647, %v6901_v22  ;;  %v1658_v60 = vand.u32 2147483648, %v6901_v22  ;;  %vm1652_vm1 = vweird.f32 %v6901_v22 }
 0x2a5   :  { %5436 = vrcp.f32 %v6909_v23  ;;  %v1612_v41 = vpop.f32.mrf.mxu3  ;;  %v1673_v7 = vand.u32 2147483648, %v6909_v23  ;;  %v1671_v53 = vand.u32 2147483647, %v6909_v23  ;;  %v1598_v59 = vpop.f32.mrf.mxu2  ;;  %vm1667_vm2 = vweird.f32 %v6909_v23 }
 0x2a6   :  { %5438 = vpow2.f32 %v4334_v39  ;;  %v1622_v15 = vadd.f32 %v1612_v41, %v460_v42  ;;  %vm6971_vm0 = vcmp.eq.f32.partialorder %v1656_v50, 8.507059e+37  ;;  %v1659_v46 = vor.u32 1.1754944e-38, %v1658_v60  ;;  %v5170_v42 = vld [vmem:[%s8710_s2 + $0x84] sm:$0xf]  ;;  %v4406_v41 = vld [vmem:[%s8710_s2 + $0x90] sm:$0xf0] }
 0x2a7   :  { %v1674_v16 = vor.u32 1.1754944e-38, %v1673_v7  ;;  %v1621_v13 = vadd.f32 %v1598_v59, %v411_v52  ;;  %vm7008_vm5 = vcmp.eq.f32.partialorder %v1671_v53, 8.507059e+37  ;;  %v4433_v32 = vor.u32 %v5175_v58, %v4430_v40  ;;  %v4412_v50 = vld [vmem:[%s8710_s2 + $0x88] sm:$0xf]  ;;  %v5166_v52 = vld [vmem:[%s8710_s2 + $0x64] sm:$0xf] }
 0x2a8   :  { %v5431_v24 = vpop.eup %5430  ;;  %v4335_v28 = vmul.f32 -1.442695, %v1622_v15  ;;  %v4405_v44 = vor.u32 %v5172_v11, %v4404_v63  ;;  %v5173_v15 = vld [vmem:[%s8710_s2 + $0x94] sm:$0xf0]  ;;  %v4396_v7 = vld [vmem:[%s8710_s2 + $0x68] sm:$0xf] }
 0x2a9   :  { %v5433_v12 = vpop.eup %5432  ;;  %v6951_v3 = vadd.f32 1.0, %v5431_v24  ;;  %2005 = vmatpush.bf16.msra.mxu3 %v4433_v32  ;;  %v4413_v29 = vor.u32 %v5173_v15, %v4412_v50  ;;  %v5167_v59 = vld [vmem:[%s8710_s2 + $0x6c] sm:$0xf]  ;;  %v4372_v63 = vld [vmem:[%s8710_s2 + $0x40] sm:$0xf] }
 0x2aa   :  { %v6956_v45 = vpop.eup %5434  ;;  %v6959_v56 = vadd.f32 1.0, %v5433_v12  ;;  %1964 = vmatpush.bf16.msra.mxu0 %v4405_v44  ;;  %v4409_v12 = vor.u32 %v5170_v42, %v4406_v41  ;;  %v4389_v42 = vor.u32 %v5168_v26, %v4388_v4  ;;  %v4380_v41 = vld [vmem:[%s8710_s2 + $0x48] sm:$0xf]  ;;  %v5158_v26 = vld [vmem:[%s8710_s2 + $0x24] sm:$0xf] }
 0x2ab   :  { %v6961_v18 = vpop.eup %5436  ;;  %v1648_v30 = vmul.f32 %v6956_v45, %v6901_v22  ;;  %5440 = vrcp.f32 %v6951_v3  ;;  %vm1653_vm3 = vweird.f32 %v6956_v45  ;;  %1992 = vmatpush.bf16.msra.mxu2 %v4413_v29 }
 0x2ac   :  { %v5439_v19 = vpop.eup %5438  ;;  %v1663_v9 = vmul.f32 %v6961_v18, %v6909_v23  ;;  %5442 = vrcp.f32 %v6959_v56  ;;  %v1703_v8 = vand.u32 2147483648, %v6959_v56  ;;  %vm1668_vm4 = vweird.f32 %v6961_v18  ;;  %vm7024_vm6 = vmor %vm1652_vm1, %vm1653_vm3  ;;  %v5171_v23 = vld [vmem:[%s8710_s2 + $0x8c] sm:$0xf]  ;;  %1978 = vmatpush.bf16.msra.mxu1 %v4409_v12  ;;  %v5160_v12 = vld [vmem:[%s8710_s2 + $0x2c] sm:$0xf0] }
 0x2ad   :  { %v1649_v31 = vsub.f32 1.0, %v1648_v30  ;;  %5444 = vtanh.f32 %v1617_v25  ;;  %v6978_v55 = vadd.f32 1.0, %v5439_v19  ;;  %v1701_v48 = vand.u32 2147483647, %v6959_v56  ;;  %vm7039_vm7 = vmor %vm1667_vm2, %vm1668_vm4  ;;  %v4414_v25 = vld [vmem:[%s8710_s2 + $0x98] sm:$0xf0] }
 0x2ae   :  { %v1664_v39 = vsub.f32 1.0, %v1663_v9  ;;  %5446 = vpow2.f32 %v4335_v28  ;;  %v7048_v0 = vor.u32 1.1754944e-38, %v1703_v8  ;;  %v4390_v30 = vld [vmem:[%s8710_s2 + $0x70] sm:$0xf0]  ;;  %vm1697_vm9 = vweird.f32 %v6959_v56  ;;  %1965 = vmatpush.bf16.msra.mxu0 %v4389_v42 }
 0x2af   :  { %v1650_v49 = vmul.f32 %v6956_v45, %v1649_v31  ;;  %5448 = vrcp.f32 %v6978_v55  ;;  %v1718_v20 = vand.u32 2147483648, %v6978_v55  ;;  %v5169_v31 = vld [vmem:[%s8710_s2 + $0x74] sm:$0xf0]  ;;  %v4374_v8 = vld [vmem:[%s8710_s2 + $0x50] sm:$0xf0]  ;;  %v4393_v50 = vor.u32 %v5166_v52, %v4390_v30 }
 0x2b0   :  { %v1665_v43 = vmul.f32 %v6961_v18, %v1664_v39  ;;  %5450 = vtanh.f32 %v1621_v13  ;;  %v4417_v13 = vor.u32 %v5171_v23, %v4414_v25  ;;  %v1716_v44 = vand.u32 2147483647, %v6978_v55 }
 0x2b1   :  { %v7005_v17 = vpop.eup %5440  ;;  %v1651_v62 = vadd.f32 %v6956_v45, %v1650_v49  ;;  %v5162_v49 = vld [vmem:[%s8710_s2 + $0x44] sm:$0xf]  ;;  %v4397_v15 = vor.u32 %v5169_v31, %v4396_v7  ;;  %vm1702_vm12 = vcmp.eq.f32.partialorder %v1701_v48, 8.507059e+37  ;;  %1979 = vmatpush.bf16.msra.mxu1 %v4393_v50  ;;  %vm1712_vm13 = vweird.f32 %v6978_v55  ;;  %v5161_v48 = vld [vmem:[%s8710_s2 + $0x34] sm:$0xf0] }
 0x2b2   :  { %v7018_v2 = vpop.eup %5442  ;;  %v1666_v54 = vadd.f32 %v6961_v18, %v1665_v43  ;;  %v7031_v24 = vmul.f32 %v7005_v17, %v6951_v3  ;;  %2006 = vmatpush.bf16.msra.mxu3 %v4417_v13  ;;  %v4377_v25 = vor.u32 %v5162_v49, %v4374_v8  ;;  %v1719_v52 = vor.u32 1.1754944e-38, %v1718_v20  ;;  %v4366_v20 = vld [vmem:[%s8710_s2 + $0x38] sm:$0xf0]  ;;  %v4340_v31 = vld [vmem:[%s8710_s2] sm:$0xf] }
 0x2b3   :  { %v5445_v35 = vpop.eup %5444  ;;  %v1655_v27 = vsel %vm7024_vm6, %v6956_v45, %v1651_v62  ;;  %v1693_v5 = vmul.f32 %v7018_v2, %v6959_v56  ;;  %vm1698_vm8 = vweird.f32 %v7018_v2  ;;  %v5165_v62 = vld [vmem:[%s8710_s2 + $0x54] sm:$0xf0]  ;;  %1993 = vmatpush.bf16.msra.mxu2 %v4397_v15  ;;  %v4358_v56 = vld [vmem:[%s8710_s2 + $0x30] sm:$0xf0]  ;;  %vm1717_vm15 = vcmp.eq.f32.partialorder %v1716_v44, 8.507059e+37 }
 0x2b4   :  { %v5447_v45 = vpop.eup %5446  ;;  %v1660_v60 = vsel %vm6971_vm0, %v1659_v46, %v1655_v27  ;;  %v1670_v28 = vsel %vm7039_vm7, %v6961_v18, %v1666_v54  ;;  %v1679_v40 = vsub.f32 1.0, %v7031_v24  ;;  %v4398_v46 = vld [vmem:[%s8710_s2 + $0x78] sm:$0xf0]  ;;  %vm7122_vm10 = vmor %vm1697_vm9, %vm1698_vm8  ;;  %v4381_v4 = vor.u32 %v5165_v62, %v4380_v41  ;;  %v4348_v49 = vld [vmem:[%s8710_s2 + $0x8] sm:$0xf] }
 0x2b5   :  { %v7076_v19 = vpop.eup %5448  ;;  %v1675_v9 = vsel %vm7008_vm5, %v1674_v16, %v1670_v28  ;;  %v1741_v18 = vmul.f32 %v5445_v35, %v1660_v60  ;;  %v1694_v21 = vsub.f32 1.0, %v1693_v5  ;;  %v7080_v53 = vadd.f32 1.0, %v5447_v45  ;;  %v4382_v27 = vld [vmem:[%s8710_s2 + $0x58] sm:$0xf0]  ;;  %v4356_v5 = vld [vmem:[%s8710_s2 + $0x20] sm:$0xf]  ;;  %1980 = vmatpush.bf16.msra.mxu1 %v4377_v25 }
 0x2b6   :  { %v1739_v58 = vmul.f32 %v1675_v9, %v6774_v6  ;;  %v1708_v39 = vmul.f32 %v7076_v19, %v6978_v55  ;;  %v5164_v6 = vld [vmem:[%s8710_s2 + $0x4c] sm:$0xf0]  ;;  %v5451_v54 = vpop.eup %5450  ;;  %vm1713_vm11 = vweird.f32 %v7076_v19  ;;  %v4401_v35 = vor.u32 %v5167_v59, %v4398_v46  ;;  %v5159_v55 = vld [vmem:[%s8710_s2 + $0x2c] sm:$0xf]  ;;  %v4342_v46 = vld [vmem:[%s8710_s2 + $0x10] sm:$0xf0] }
 0x2b7   :  { %v1695_v11 = vmul.f32 %v7018_v2, %v1694_v21  ;;  %5452 = vrcp.f32 %v7080_v53  ;;  %v4373_v22 = vor.u32 %v5164_v6, %v4372_v63  ;;  %v1680_v45 = vmul.f32 %v7005_v17, %v1679_v40  ;;  %vm7166_vm14 = vmor %vm1712_vm13, %vm1713_vm11  ;;  %1994 = vmatpush.bf16.msra.mxu2 %v4381_v4  ;;  %v5156_v40 = vld [vmem:[%s8710_s2 + $0xc] sm:$0xf0]  ;;  %v5157_v8 = vld [vmem:[%s8710_s2 + $0x14] sm:$0xf0] }
 0x2b8   :  { %v7111_v43 = vadd.f32 %v1741_v18, %v1739_v58  ;;  %v1709_v16 = vsub.f32 1.0, %v1708_v39  ;;  %v4385_v30 = vor.u32 %v5163_v14, %v4382_v27  ;;  %v4357_v7 = vor.u32 %v5160_v12, %v4356_v5  ;;  %2007 = vmatpush.bf16.msra.mxu3 %v4401_v35  ;;  %v5154_v39 = vld [vmem:[%s8710_s2 + $0x4] sm:$0xf]  ;;  %v4350_v50 = vld [vmem:[%s8710_s2 + $0x18] sm:$0xf0] }
 0x2b9   :  { %v1696_v47 = vadd.f32 %v7018_v2, %v1695_v11  ;;  %1966 = vmatpush.bf16.msra.mxu0 %v4373_v22  ;;  %vm1683_vm0 = vweird.f32 %v7005_v17  ;;  %v4361_v59 = vor.u32 %v5158_v26, %v4358_v56  ;;  %v1688_v63 = vand.u32 2147483648, %v6951_v3 }
 0x2ba   :  { %v1710_v24 = vmul.f32 %v7076_v19, %v1709_v16  ;;  %5454 = vtanh.f32 %v7111_v43  ;;  %v1681_v16 = vadd.f32 %v7005_v17, %v1680_v45  ;;  %vm1682_vm1 = vweird.f32 %v6951_v3 }
 0x2bb   :  { %v1700_v23 = vsel %vm7122_vm10, %v7018_v2, %v1696_v47  ;;  %v4364_v2 = vld [vmem:[%s8710_s2 + $0x28] sm:$0xf]  ;;  %v4369_v13 = vor.u32 %v5159_v55, %v4366_v20  ;;  %v1686_v42 = vand.u32 2147483647, %v6951_v3  ;;  %vm7210_vm2 = vmor %vm1682_vm1, %vm1683_vm0  ;;  %v4341_v47 = vor.u32 %v5156_v40, %v4340_v31  ;;  %1981 = vmatpush.bf16.msra.mxu1 %v4361_v59  ;;  %v5155_v3 = vld [vmem:[%s8710_s2 + $0xc] sm:$0xf] }
 0x2bc   :  { %v1705_v60 = vsel %vm1702_vm12, %v7048_v0, %v1700_v23  ;;  %v1711_v28 = vadd.f32 %v7076_v19, %v1710_v24  ;;  %v4365_v58 = vor.u32 %v5161_v48, %v4364_v2  ;;  %2008 = vmatpush.bf16.msra.mxu3 %v4385_v30  ;;  %v4345_v32 = vor.u32 %v5154_v39, %v4342_v46  ;;  %v4588_v39 = vld [vmem:[%s8710_s2 + $0xe0] sm:$0xf] }
 0x2bd   :  { %v7162_v29 = vpop.eup %5452  ;;  %v1742_v18 = vmul.f32 %v5451_v54, %v1705_v60  ;;  %1967 = vmatpush.bf16.msra.mxu0 %v4357_v7  ;;  %v4349_v44 = vor.u32 %v5157_v8, %v4348_v49  ;;  %v1685_v15 = vsel %vm7210_vm2, %v7005_v17, %v1681_v16  ;;  %v1689_v54 = vor.u32 1.1754944e-38, %v1688_v63  ;;  %v4590_v8 = vld [vmem:[%s8710_s2 + $0xf0] sm:$0xf0] }
 0x2be   :  { %v1715_v9 = vsel %vm7166_vm14, %v7076_v19, %v1711_v28  ;;  %v1723_v21 = vmul.f32 %v7162_v29, %v7080_v53  ;;  %vm1728_vm3 = vweird.f32 %v7162_v29  ;;  %1995 = vmatpush.bf16.msra.mxu2 %v4365_v58  ;;  %v1733_v24 = vand.u32 2147483648, %v7080_v53 }
 0x2bf   :  { %v1720_v19 = vsel %vm1717_vm15, %v1719_v52, %v1715_v9  ;;  %vm1727_vm4 = vweird.f32 %v7080_v53  ;;  %vm1687_vm5 = vcmp.eq.f32.partialorder %v1686_v42, 8.507059e+37  ;;  %v1731_v22 = vand.u32 2147483647, %v7080_v53  ;;  %1982 = vmatpush.bf16.msra.mxu1 %v4345_v32  ;;  %v4598_v32 = vld [vmem:[%s8710_s2 + $0xf8] sm:$0xf0] }
 0x2c0   :  { %v1740_v11 = vmul.f32 %v1720_v19, %v6855_v61  ;;  %v1724_v6 = vsub.f32 1.0, %v1723_v21  ;;  %v5455_v14 = vpop.eup %5454  ;;  %vm1729_vm6 = vmor %vm1727_vm4, %vm1728_vm3  ;;  %2009 = vmatpush.bf16.msra.mxu3 %v4369_v13  ;;  %v4353_v27 = vor.u32 %v5155_v3, %v4350_v50  ;;  %v1690_v17 = vsel %vm1687_vm5, %v1689_v54, %v1685_v15  ;;  %v4596_v61 = vld [vmem:[%s8710_s2 + $0xe8] sm:$0xf]  ;;  %v8784_v3 = vld [vmem:[#allocation5_spill] sm:$0xff] }
 0x2c1   :  { %1968 = vmatpush.bf16.msra.mxu0 %v4341_v47  ;;  %v1747_v12 = vmul.f32 %v5455_v14, %v1690_v17  ;;  %v1734_v23 = vor.u32 1.1754944e-38, %v1733_v24  ;;  %vm1732_vm7 = vcmp.eq.f32.partialorder %v1731_v22, 8.507059e+37  ;;  %v316_v48 = vadd.f32 %v6100_v33, %v6182_v10  ;;  %v5215_v47 = vld [vmem:[%s8710_s2 + $0xec] sm:$0xf]  ;;  %v5212_v14 = vld [vmem:[%s8710_s2 + $0xcc] sm:$0xf0] }
 0x2c2   :  { %v7214_v41 = vadd.f32 %v1742_v18, %v1740_v11  ;;  %v1725_v62 = vmul.f32 %v7162_v29, %v1724_v6  ;;  %1996 = vmatpush.bf16.msra.mxu2 %v4349_v44  ;;  %v463_v21 = vadd.f32 %v6106_v36, %v6218_v57  ;;  %v318_v55 = vadd.f32 %v6108_v37, %v6182_v10  ;;  %v5216_v36 = vld [vmem:[%s8710_s2 + $0xec] sm:$0xf0]  ;;  %v4572_v44 = vld [vmem:[%s8710_s2 + $0xc0] sm:$0xf]  ;;  %v5210_v54 = vld [vmem:[%s8710_s2 + $0xc4] sm:$0xf] }
 0x2c3   :  { %v1749_v45 = vpack.c.bf16 %v1747_v12, %v1747_v12  ;;  %v367_v33 = vadd.f32 %v6110_v38, %v6185_v1  ;;  %v4589_v63 = vor.u32 %v5216_v36, %v4588_v39  ;;  %v5214_v38 = vld [vmem:[%s8710_s2 + $0xe4] sm:$0xf]  ;;  %v414_v50 = vadd.f32 %v8784_v3, %v6277_v51  ;;  %v8785_v24 = vld [vmem:[#allocation7_spill] sm:$0xff] }
 0x2c4   :  { %5456 = vtanh.f32 %v7214_v41  ;;  %v1726_v35 = vadd.f32 %v7162_v29, %v1725_v62  ;;  %2010 = vmatpush.bf16.msra.mxu3 %v4353_v27  ;;  %v4593_v42 = vor.u32 %v5214_v38, %v4590_v8  ;;  %v5217_v62 = vld [vmem:[%s8710_s2 + $0xf4] sm:$0xf0]  ;;  %v4574_v17 = vld [vmem:[%s8710_s2 + $0xd0] sm:$0xf0] }
 0x2c5   :  { %v1797_v28 = vunpack.c.l.b16 %v1749_v45  ;;  %2363 = vmatpush.bf16.msrb.mxu0 %v4589_v63  ;;  %v4597_v27 = vor.u32 %v5217_v62, %v4596_v61  ;;  %v5213_v45 = vld [vmem:[%s8710_s2 + $0xd4] sm:$0xf0]  ;;  %v4564_v61 = vld [vmem:[%s8710_s2 + $0xa8] sm:$0xf] }
 0x2c6   :  { %v1730_v5 = vsel %vm1729_vm6, %v7162_v29, %v1726_v35  ;;  %v365_v29 = vadd.f32 %v6102_v34, %v6185_v1  ;;  %2377 = vmatpush.bf16.msrb.mxu1 %v4593_v42  ;;  %v465_v35 = vadd.f32 %v8785_v24, %v6218_v57  ;;  %v5209_v62 = vld [vmem:[%s8710_s2 + $0xb4] sm:$0xf0] }
 0x2c7   :  { %v1735_v4 = vsel %vm1732_vm7, %v1734_v23, %v1730_v5  ;;  %v4580_v5 = vld [vmem:[%s8710_s2 + $0xc8] sm:$0xf]  ;;  %2391 = vmatpush.bf16.msrb.mxu2 %v4597_v27  ;;  %v4540_v27 = vld [vmem:[%s8710_s2 + $0x80] sm:$0xf] }
 0x2ca   :  { %v5457_v25 = vpop.eup %5456 }
 0x2cb   :  { %v1748_v26 = vmul.f32 %v5457_v25, %v1735_v4  ;;  %v4601_v25 = vor.u32 %v5215_v47, %v4598_v32  ;;  %v4573_v4 = vor.u32 %v5212_v14, %v4572_v44  ;;  %v4534_v44 = vld [vmem:[%s8710_s2 + $0x78] sm:$0xf0] }
 0x2cd   :  { %v1750_v53 = vpack.c.bf16 %v1748_v26, %v1748_v26  ;;  %v5327_v60 = vpack.c.bf16 %v1748_v26, %v1747_v12  ;;  %v4577_v26 = vor.u32 %v5210_v54, %v4574_v17  ;;  %2405 = vmatpush.bf16.msrb.mxu3 %v4601_v25  ;;  %2364 = vmatpush.bf16.msrb.mxu0 %v4573_v4  ;;  %v5204_v4 = vld [vmem:[%s8710_s2 + $0x8c] sm:$0xf0] }
 0x2ce   :  { %v4565_v25 = vor.u32 %v5209_v62, %v4564_v61 }
 0x2cf   :  { %5355 = vst [vmem:[%s8713_s4 + $0x10] sm:$0xff] %v5327_v60   ;;  %v1798_v56 = vunpack.c.l.b16 %v1750_v53  ;;  %v5211_v53 = vld [vmem:[%s8710_s2 + $0xcc] sm:$0xf]  ;;  %v4582_v60 = vld [vmem:[%s8710_s2 + $0xd8] sm:$0xf0]  ;;  %2378 = vmatpush.bf16.msrb.mxu1 %v4577_v26 }
 0x2d0   :  { %v5202_v26 = vld [vmem:[%s8710_s2 + $0x84] sm:$0xf] }
 0x2d1   :  { %v1799_v2 = vpack.c.b16 %v1798_v56, %v1797_v28 }
 0x2d3   :  { %1969 = vmatmul.bf16.vlgmr.msra.gmra.mxu0 %v1799_v2  ;;  %1983 = vmatmul.bf16.vlgmr.msra.gmra.mxu1 %v1799_v2 }
 0x2d4   :  { %1997 = vmatmul.bf16.vlgmr.msra.gmra.mxu2 %v1799_v2  ;;  %2011 = vmatmul.bf16.vlgmr.msra.gmra.mxu3 %v1799_v2 }
 0x350   :  { %v1970_v0 = vpop.f32.mrf.mxu0  ;;  %v1984_v52 = vpop.f32.mrf.mxu1 }
 0x351   :  { %v2017_v30 = vadd.f32 %v1970_v0, %v316_v48  ;;  %v2018_v7 = vadd.f32 %v1984_v52, %v365_v29  ;;  %v4581_v48 = vor.u32 %v5213_v45, %v4580_v5  ;;  %v4542_v45 = vld [vmem:[%s8710_s2 + $0x90] sm:$0xf0] }
 0x353   :  { %v4466_v9 = vmul.f32 -1.442695, %v2017_v30  ;;  %v4467_v18 = vmul.f32 -1.442695, %v2018_v7  ;;  %v4585_v30 = vor.u32 %v5211_v53, %v4582_v60  ;;  %2392 = vmatpush.bf16.msrb.mxu2 %v4581_v48  ;;  %v4548_v48 = vld [vmem:[%s8710_s2 + $0x88] sm:$0xf] }
 0x355   :  { %5458 = vpow2.f32 %v4466_v9  ;;  %v8786_v9 = vld [vmem:[#allocation6_spill] sm:$0xff]  ;;  %2406 = vmatpush.bf16.msrb.mxu3 %v4585_v30 }
 0x356   :  { %5460 = vpow2.f32 %v4467_v18  ;;  %v416_v18 = vadd.f32 %v8786_v9, %v6277_v51 }
 0x357   :  { %v2012_v20 = vpop.f32.mrf.mxu3  ;;  %v1998_v13 = vpop.f32.mrf.mxu2  ;;  %2393 = vmatpush.bf16.msrb.mxu2 %v4565_v25 }
 0x358   :  { %v2020_v31 = vadd.f32 %v2012_v20, %v463_v21  ;;  %v1972_v34 = vpop.f32.mrf.mxu0  ;;  %v1986_v19 = vpop.f32.mrf.mxu1  ;;  %v2019_v23 = vadd.f32 %v1998_v13, %v414_v50  ;;  %v5207_v50 = vld [vmem:[%s8710_s2 + $0xac] sm:$0xf] }
 0x359   :  { %v2021_v59 = vadd.f32 %v1972_v34, %v318_v55  ;;  %v2022_v58 = vadd.f32 %v1986_v19, %v367_v33 }
 0x35a   :  { %v4468_v40 = vmul.f32 -1.442695, %v2020_v31 }
 0x35b   :  { %v5459_v46 = vpop.eup %5458  ;;  %v4469_v37 = vmul.f32 -1.442695, %v2021_v59  ;;  %v4470_v49 = vmul.f32 -1.442695, %v2022_v58 }
 0x35c   :  { %v5461_v11 = vpop.eup %5460  ;;  %v7257_v6 = vadd.f32 1.0, %v5459_v46  ;;  %5462 = vpow2.f32 %v4468_v40  ;;  %v4556_v46 = vld [vmem:[%s8710_s2 + $0xa0] sm:$0xf] }
 0x35d   :  { %v7262_v16 = vadd.f32 1.0, %v5461_v11  ;;  %5464 = vpow2.f32 %v4469_v37  ;;  %v5208_v37 = vld [vmem:[%s8710_s2 + $0xac] sm:$0xf0]  ;;  %v5206_v11 = vld [vmem:[%s8710_s2 + $0xa4] sm:$0xf] }
 0x35e   :  { %5466 = vrcp.f32 %v7257_v6  ;;  %v2058_v22 = vand.u32 2147483647, %v7257_v6  ;;  %v2060_v0 = vand.u32 2147483648, %v7257_v6  ;;  %vm2054_vm9 = vweird.f32 %v7257_v6 }
 0x35f   :  { %5468 = vrcp.f32 %v7262_v16  ;;  %v2014_v15 = vpop.f32.mrf.mxu3  ;;  %v2075_v55 = vand.u32 2147483648, %v7262_v16  ;;  %v2073_v34 = vand.u32 2147483647, %v7262_v16  ;;  %v2000_v58 = vpop.f32.mrf.mxu2  ;;  %vm2069_vm12 = vweird.f32 %v7262_v16 }
 0x360   :  { %5470 = vpow2.f32 %v4470_v49  ;;  %v2024_v2 = vadd.f32 %v2014_v15, %v465_v35  ;;  %vm7324_vm8 = vcmp.eq.f32.partialorder %v2058_v22, 8.507059e+37  ;;  %v2061_v36 = vor.u32 1.1754944e-38, %v2060_v0  ;;  %v4558_v49 = vld [vmem:[%s8710_s2 + $0xb0] sm:$0xf0]  ;;  %v4566_v15 = vld [vmem:[%s8710_s2 + $0xb8] sm:$0xf0] }
 0x361   :  { %v2076_v63 = vor.u32 1.1754944e-38, %v2075_v55  ;;  %v2023_v13 = vadd.f32 %v2000_v58, %v416_v18  ;;  %vm7369_vm14 = vcmp.eq.f32.partialorder %v2073_v34, 8.507059e+37  ;;  %v4557_v3 = vor.u32 %v5208_v37, %v4556_v46  ;;  %v5203_v0 = vld [vmem:[%s8710_s2 + $0x8c] sm:$0xf]  ;;  %v4524_v55 = vld [vmem:[%s8710_s2 + $0x60] sm:$0xf] }
 0x362   :  { %v5463_v12 = vpop.eup %5462  ;;  %v4471_v40 = vmul.f32 -1.442695, %v2024_v2  ;;  %v4569_v18 = vor.u32 %v5207_v50, %v4566_v15  ;;  %v4526_v58 = vld [vmem:[%s8710_s2 + $0x70] sm:$0xf0]  ;;  %v4545_v46 = vor.u32 %v5202_v26, %v4542_v45  ;;  %v4508_v15 = vld [vmem:[%s8710_s2 + $0x40] sm:$0xf] }
 0x363   :  { %v5465_v28 = vpop.eup %5464  ;;  %v7307_v56 = vadd.f32 1.0, %v5463_v12  ;;  %2365 = vmatpush.bf16.msrb.mxu0 %v4557_v3  ;;  %v5195_v26 = vld [vmem:[%s8710_s2 + $0x4c] sm:$0xf]  ;;  %v4518_v45 = vld [vmem:[%s8710_s2 + $0x58] sm:$0xf0] }
 0x364   :  { %v7309_v29 = vpop.eup %5466  ;;  %v7312_v52 = vadd.f32 1.0, %v5465_v28  ;;  %2407 = vmatpush.bf16.msrb.mxu3 %v4569_v18  ;;  %v4494_v2 = vld [vmem:[%s8710_s2 + $0x30] sm:$0xf0]  ;;  %v4500_v18 = vld [vmem:[%s8710_s2 + $0x28] sm:$0xf] }
 0x365   :  { %v7314_v7 = vpop.eup %5468  ;;  %v2050_v21 = vmul.f32 %v7309_v29, %v7257_v6  ;;  %5472 = vrcp.f32 %v7307_v56  ;;  %vm2055_vm10 = vweird.f32 %v7309_v29  ;;  %v5194_v6 = vld [vmem:[%s8710_s2 + $0x44] sm:$0xf] }
 0x366   :  { %v5471_v33 = vpop.eup %5470  ;;  %v2065_v20 = vmul.f32 %v7314_v7, %v7262_v16  ;;  %5474 = vtanh.f32 %v2019_v23  ;;  %vm2070_vm11 = vweird.f32 %v7314_v7  ;;  %v2103_v42 = vand.u32 2147483647, %v7312_v52  ;;  %vm7365_vm13 = vmor %vm2054_vm9, %vm2055_vm10  ;;  %v5199_v16 = vld [vmem:[%s8710_s2 + $0x6c] sm:$0xf] }
 0x367   :  { %v2051_v19 = vsub.f32 1.0, %v2050_v21  ;;  %5476 = vrcp.f32 %v7312_v52  ;;  %v7330_v59 = vadd.f32 1.0, %v5471_v33  ;;  %vm7381_vm15 = vmor %vm2069_vm12, %vm2070_vm11  ;;  %v2105_v35 = vand.u32 2147483648, %v7312_v52  ;;  %v4550_v21 = vld [vmem:[%s8710_s2 + $0x98] sm:$0xf0] }
 0x368   :  { %v2066_v39 = vsub.f32 1.0, %v2065_v20  ;;  %v4561_v23 = vor.u32 %v5206_v11, %v4558_v49  ;;  %vm7415_vm0 = vcmp.eq.f32.partialorder %v2103_v42, 8.507059e+37  ;;  %vm2099_vm1 = vweird.f32 %v7312_v52  ;;  %v5200_v33 = vld [vmem:[%s8710_s2 + $0x6c] sm:$0xf0]  ;;  %v4532_v49 = vld [vmem:[%s8710_s2 + $0x68] sm:$0xf] }
 0x369   :  { %v2052_v38 = vmul.f32 %v7309_v29, %v2051_v19  ;;  %5478 = vrcp.f32 %v7330_v59  ;;  %v2120_v24 = vand.u32 2147483648, %v7330_v59  ;;  %v2118_v22 = vand.u32 2147483647, %v7330_v59  ;;  %v5198_v19 = vld [vmem:[%s8710_s2 + $0x64] sm:$0xf] }
 0x36a   :  { %v2067_v8 = vmul.f32 %v7314_v7, %v2066_v39  ;;  %5480 = vpow2.f32 %v4471_v40  ;;  %2379 = vmatpush.bf16.msrb.mxu1 %v4561_v23  ;;  %v2106_v11 = vor.u32 1.1754944e-38, %v2105_v35  ;;  %v4553_v61 = vor.u32 %v5203_v0, %v4550_v21  ;;  %v4510_v35 = vld [vmem:[%s8710_s2 + $0x50] sm:$0xf0]  ;;  %v5193_v21 = vld [vmem:[%s8710_s2 + $0x34] sm:$0xf0] }
 0x36b   :  { %v7358_v47 = vpop.eup %5472  ;;  %v2053_v32 = vadd.f32 %v7309_v29, %v2052_v38  ;;  %5482 = vtanh.f32 %v2023_v13  ;;  %v4525_v62 = vor.u32 %v5200_v33, %v4524_v55  ;;  %vm2114_vm5 = vweird.f32 %v7330_v59  ;;  %v5189_v13 = vld [vmem:[%s8710_s2 + $0x14] sm:$0xf0] }
 0x36c   :  { %v5475_v14 = vpop.eup %5474  ;;  %v2068_v54 = vadd.f32 %v7314_v7, %v2067_v8  ;;  %v2080_v12 = vmul.f32 %v7358_v47, %v7307_v56  ;;  %v5201_v8 = vld [vmem:[%s8710_s2 + $0x74] sm:$0xf0]  ;;  %2408 = vmatpush.bf16.msrb.mxu3 %v4553_v61  ;;  %vm2119_vm7 = vcmp.eq.f32.partialorder %v2118_v22, 8.507059e+37  ;;  %v5190_v22 = vld [vmem:[%s8710_s2 + $0x24] sm:$0xf]  ;;  %vm2084_vm9 = vweird.f32 %v7307_v56 }
 0x36d   :  { %v7392_v17 = vpop.eup %5476  ;;  %v2057_v5 = vsel %vm7365_vm13, %v7309_v29, %v2053_v32  ;;  %v5205_v29 = vld [vmem:[%s8710_s2 + $0x94] sm:$0xf0]  ;;  %v4529_v32 = vor.u32 %v5198_v19, %v4526_v58  ;;  %v4533_v25 = vor.u32 %v5201_v8, %v4532_v49  ;;  %v2088_v33 = vand.u32 2147483647, %v7307_v56  ;;  %v4484_v8 = vld [vmem:[%s8710_s2 + $0x8] sm:$0xf] }
 0x36e   :  { %v2062_v53 = vsel %vm7324_vm8, %v2061_v36, %v2057_v5  ;;  %v2072_v60 = vsel %vm7381_vm15, %v7314_v7, %v2068_v54  ;;  %v2095_v28 = vmul.f32 %v7392_v17, %v7312_v52  ;;  %vm2100_vm2 = vweird.f32 %v7392_v17  ;;  %2380 = vmatpush.bf16.msrb.mxu1 %v4545_v46  ;;  %v5197_v5 = vld [vmem:[%s8710_s2 + $0x54] sm:$0xf0] }
 0x36f   :  { %v7428_v30 = vpop.eup %5478  ;;  %v2077_v7 = vsel %vm7369_vm14, %v2076_v63, %v2072_v60  ;;  %v2143_v9 = vmul.f32 %v5475_v14, %v2062_v53  ;;  %v2081_v39 = vsub.f32 1.0, %v2080_v12  ;;  %v4541_v36 = vor.u32 %v5204_v4, %v4540_v27  ;;  %vm7465_vm3 = vmor %vm2099_vm1, %vm2100_vm2  ;;  %v5196_v14 = vld [vmem:[%s8710_s2 + $0x4c] sm:$0xf0]  ;;  %v4516_v27 = vld [vmem:[%s8710_s2 + $0x48] sm:$0xf] }
 0x370   :  { %v2141_v20 = vmul.f32 %v2077_v7, %v7111_v43  ;;  %v2096_v31 = vsub.f32 1.0, %v2095_v28  ;;  %v2110_v34 = vmul.f32 %v7428_v30, %v7330_v59  ;;  %v5481_v40 = vpop.eup %5480  ;;  %v4549_v43 = vor.u32 %v5205_v29, %v4548_v48  ;;  %v4492_v48 = vld [vmem:[%s8710_s2 + $0x20] sm:$0xf]  ;;  %v5192_v59 = vld [vmem:[%s8710_s2 + $0x2c] sm:$0xf0] }
 0x371   :  { %v7469_v42 = vadd.f32 1.0, %v5481_v40  ;;  %2366 = vmatpush.bf16.msrb.mxu0 %v4541_v36  ;;  %v5483_v52 = vpop.eup %5482  ;;  %vm2115_vm4 = vweird.f32 %v7428_v30  ;;  %v2082_v54 = vmul.f32 %v7358_v47, %v2081_v39  ;;  %v4537_v4 = vor.u32 %v5199_v16, %v4534_v44  ;;  %v4476_v36 = vld [vmem:[%s8710_s2] sm:$0xf]  ;;  %v5187_v16 = vld [vmem:[%s8710_s2 + $0xc] sm:$0xf] }
 0x372   :  { %v7452_v37 = vadd.f32 %v2143_v9, %v2141_v20  ;;  %v2111_v63 = vsub.f32 1.0, %v2110_v34  ;;  %v2097_v38 = vmul.f32 %v7392_v17, %v2096_v31  ;;  %2394 = vmatpush.bf16.msrb.mxu2 %v4549_v43  ;;  %vm7513_vm6 = vmor %vm2114_vm5, %vm2115_vm4  ;;  %2381 = vmatpush.bf16.msrb.mxu1 %v4529_v32  ;;  %v4509_v28 = vor.u32 %v5196_v14, %v4508_v15  ;;  %v5191_v31 = vld [vmem:[%s8710_s2 + $0x2c] sm:$0xf]  ;;  %v4502_v34 = vld [vmem:[%s8710_s2 + $0x38] sm:$0xf0] }
 0x373   :  { %5484 = vrcp.f32 %v7469_v42  ;;  %v4517_v7 = vor.u32 %v5197_v5, %v4516_v27  ;;  %2409 = vmatpush.bf16.msrb.mxu3 %v4537_v4  ;;  %v2083_v55 = vadd.f32 %v7358_v47, %v2082_v54  ;;  %vm2085_vm8 = vweird.f32 %v7358_v47  ;;  %v4486_v44 = vld [vmem:[%s8710_s2 + $0x18] sm:$0xf0] }
 0x374   :  { %v2112_v3 = vmul.f32 %v7428_v30, %v2111_v63  ;;  %v2098_v50 = vadd.f32 %v7392_v17, %v2097_v38  ;;  %5486 = vtanh.f32 %v7452_v37  ;;  %v2090_v58 = vand.u32 2147483648, %v7307_v56  ;;  %v5188_v63 = vld [vmem:[%s8710_s2 + $0xc] sm:$0xf0]  ;;  %v5186_v38 = vld [vmem:[%s8710_s2 + $0x4] sm:$0xf]  ;;  %vm7574_vm10 = vmor %vm2084_vm9, %vm2085_vm8 }
 0x375   :  { %2367 = vmatpush.bf16.msrb.mxu0 %v4525_v62  ;;  %v4493_v40 = vor.u32 %v5192_v59, %v4492_v48  ;;  %v4497_v39 = vor.u32 %v5190_v22, %v4494_v2  ;;  %v4501_v43 = vor.u32 %v5193_v21, %v4500_v18  ;;  %v4505_v49 = vor.u32 %v5191_v31, %v4502_v34  ;;  %v8807_v21 = vld [vmem:[#allocation11_spill] sm:$0xff]  ;;  %v5246_v31 = vld [vmem:[%s8710_s2 + $0xe4] sm:$0xf]  ;;  %v8808_v34 = vld [vmem:[#allocation12_spill] sm:$0xff] }
 0x376   :  { %v2102_v12 = vsel %vm7465_vm3, %v7392_v17, %v2098_v50  ;;  %v2113_v23 = vadd.f32 %v7428_v30, %v2112_v3  ;;  %v2121_v17 = vor.u32 1.1754944e-38, %v2120_v24  ;;  %2395 = vmatpush.bf16.msrb.mxu2 %v4533_v25  ;;  %v4513_v24 = vor.u32 %v5194_v6, %v4510_v35 }
 0x377   :  { %v2107_v60 = vsel %vm7415_vm0, %v2106_v11, %v2102_v12  ;;  %v4478_v11 = vld [vmem:[%s8710_s2 + $0x10] sm:$0xf0]  ;;  %v2087_v61 = vsel %vm7574_vm10, %v7358_v47, %v2083_v55  ;;  %vm7587_vm11 = vcmp.eq.f32.partialorder %v2088_v33, 8.507059e+37  ;;  %v2091_v3 = vor.u32 1.1754944e-38, %v2090_v58  ;;  %v4724_v33 = vld [vmem:[%s8710_s2 + $0xe0] sm:$0xf] }
 0x378   :  { %v2117_v29 = vsel %vm7513_vm6, %v7428_v30, %v2113_v23  ;;  %v2144_v0 = vmul.f32 %v5483_v52, %v2107_v60  ;;  %v4521_v30 = vor.u32 %v5195_v26, %v4518_v45  ;;  %2382 = vmatpush.bf16.msrb.mxu1 %v4513_v24  ;;  %v2135_v50 = vand.u32 2147483648, %v7469_v42  ;;  %v8806_v24 = vld [vmem:[#allocation9_spill] sm:$0xff] }
 0x379   :  { %v2122_v9 = vsel %vm2119_vm7, %v2121_v17, %v2117_v29  ;;  %v5485_v19 = vpop.eup %5484  ;;  %2368 = vmatpush.bf16.msrb.mxu0 %v4509_v28  ;;  %v4477_v47 = vor.u32 %v5188_v63, %v4476_v36  ;;  %v4481_v15 = vor.u32 %v5186_v38, %v4478_v11  ;;  %v2133_v6 = vand.u32 2147483647, %v7469_v42  ;;  %v8805_v29 = vld [vmem:[#allocation8_spill] sm:$0xff]  ;;  %v8809_v58 = vld [vmem:[#allocation13_spill] sm:$0xff] }
 0x37a   :  { %v2142_v20 = vmul.f32 %v2122_v9, %v7214_v41  ;;  %v2125_v46 = vmul.f32 %v5485_v19, %v7469_v42  ;;  %2396 = vmatpush.bf16.msrb.mxu2 %v4517_v7  ;;  %2410 = vmatpush.bf16.msrb.mxu3 %v4521_v30  ;;  %v5487_v52 = vpop.eup %5486  ;;  %vm2130_vm12 = vweird.f32 %v5485_v19  ;;  %v4485_v54 = vor.u32 %v5189_v13, %v4484_v8  ;;  %v5249_v63 = vld [vmem:[%s8710_s2 + $0xf4] sm:$0xf0]  ;;  %v5247_v13 = vld [vmem:[%s8710_s2 + $0xec] sm:$0xf] }
 0x37b   :  { %v4489_v35 = vor.u32 %v5187_v16, %v4486_v44  ;;  %v2092_v27 = vsel %vm7587_vm11, %v2091_v3, %v2087_v61  ;;  %vm2129_vm13 = vweird.f32 %v7469_v42  ;;  %v2136_v23 = vor.u32 1.1754944e-38, %v2135_v50  ;;  %v4734_v61 = vld [vmem:[%s8710_s2 + $0xf8] sm:$0xf0]  ;;  %v5244_v3 = vld [vmem:[%s8710_s2 + $0xcc] sm:$0xf0] }
 0x37c   :  { %v7560_v41 = vadd.f32 %v2144_v0, %v2142_v20  ;;  %v2126_v32 = vsub.f32 1.0, %v2125_v46  ;;  %2383 = vmatpush.bf16.msrb.mxu1 %v4497_v39  ;;  %v2149_v12 = vmul.f32 %v5487_v52, %v2092_v27  ;;  %vm2131_vm14 = vmor %vm2129_vm13, %vm2130_vm12  ;;  %vm2134_vm15 = vcmp.eq.f32.partialorder %v2133_v6, 8.507059e+37  ;;  %v5248_v20 = vld [vmem:[%s8710_s2 + $0xec] sm:$0xf0]  ;;  %v4726_v46 = vld [vmem:[%s8710_s2 + $0xf0] sm:$0xf0] }
 0x37d   :  { %2369 = vmatpush.bf16.msrb.mxu0 %v4493_v40  ;;  %v321_v0 = vadd.f32 %v8805_v29, %v6182_v10  ;;  %v370_v7 = vadd.f32 %v8806_v24, %v6185_v1  ;;  %v468_v55 = vadd.f32 %v8807_v21, %v6218_v57  ;;  %v372_v40 = vadd.f32 %v8809_v58, %v6185_v1  ;;  %v4708_v52 = vld [vmem:[%s8710_s2 + $0xc0] sm:$0xf]  ;;  %v4710_v27 = vld [vmem:[%s8710_s2 + $0xd0] sm:$0xf0] }
 0x37e   :  { %5488 = vtanh.f32 %v7560_v41  ;;  %v2127_v14 = vmul.f32 %v5485_v19, %v2126_v32  ;;  %2397 = vmatpush.bf16.msrb.mxu2 %v4501_v43  ;;  %2411 = vmatpush.bf16.msrb.mxu3 %v4505_v49  ;;  %v2151_v53 = vpack.c.bf16 %v2149_v12, %v2149_v12  ;;  %v4725_v36 = vor.u32 %v5248_v20, %v4724_v33  ;;  %v4732_v43 = vld [vmem:[%s8710_s2 + $0xe8] sm:$0xf]  ;;  %v8811_v29 = vld [vmem:[#allocation15_spill] sm:$0xff]  ;;  %v5239_v33 = vld [vmem:[%s8710_s2 + $0xac] sm:$0xf] }
 0x37f   :  { %v4729_v49 = vor.u32 %v5246_v31, %v4726_v46  ;;  %v4733_v8 = vor.u32 %v5249_v63, %v4732_v43  ;;  %v4737_v16 = vor.u32 %v5247_v13, %v4734_v61  ;;  %v4702_v20 = vld [vmem:[%s8710_s2 + $0xb8] sm:$0xf0]  ;;  %v8812_v63 = vld [vmem:[#allocation14_spill] sm:$0xff] }
 0x380   :  { %v2128_v5 = vadd.f32 %v5485_v19, %v2127_v14  ;;  %2384 = vmatpush.bf16.msrb.mxu1 %v4481_v15  ;;  %v2199_v42 = vunpack.c.l.b16 %v2151_v53  ;;  %v4709_v15 = vor.u32 %v5244_v3, %v4708_v52  ;;  %v5242_v14 = vld [vmem:[%s8710_s2 + $0xc4] sm:$0xf]  ;;  %v4692_v53 = vld [vmem:[%s8710_s2 + $0xa0] sm:$0xf]  ;;  %v4705_v46 = vor.u32 %v5239_v33, %v4702_v20 }
 0x381   :  { %2370 = vmatpush.bf16.msrb.mxu0 %v4477_v47 }
 0x382   :  { %v2132_v4 = vsel %vm2131_vm14, %v5485_v19, %v2128_v5  ;;  %2398 = vmatpush.bf16.msrb.mxu2 %v4485_v54  ;;  %2412 = vmatpush.bf16.msrb.mxu3 %v4489_v35  ;;  %v323_v19 = vadd.f32 %v8808_v34, %v6182_v10 }
 0x383   :  { %v2137_v26 = vsel %vm2134_vm15, %v2136_v23, %v2132_v4  ;;  %v4713_v23 = vor.u32 %v5242_v14, %v4710_v27  ;;  %v5245_v4 = vld [vmem:[%s8710_s2 + $0xd4] sm:$0xf0] }
 0x384   :  { %v5489_v25 = vpop.eup %5488  ;;  %2779 = vmatpush.bf16.msra.mxu1 %v4729_v49 }
 0x385   :  { %v2150_v45 = vmul.f32 %v5489_v25, %v2137_v26  ;;  %2765 = vmatpush.bf16.msra.mxu0 %v4725_v36  ;;  %v4716_v25 = vld [vmem:[%s8710_s2 + $0xc8] sm:$0xf]  ;;  %v5243_v26 = vld [vmem:[%s8710_s2 + $0xcc] sm:$0xf] }
 0x386   :  { %2793 = vmatpush.bf16.msra.mxu2 %v4733_v8  ;;  %2807 = vmatpush.bf16.msra.mxu3 %v4737_v16 }
 0x387   :  { %v2152_v17 = vpack.c.bf16 %v2150_v45, %v2150_v45  ;;  %v5332_v60 = vpack.c.bf16 %v2150_v45, %v2149_v12  ;;  %v4718_v45 = vld [vmem:[%s8710_s2 + $0xd8] sm:$0xf0] }
 0x388   :  { %2780 = vmatpush.bf16.msra.mxu1 %v4713_v23 }
 0x389   :  { %5356 = vst [vmem:[%s8713_s4 + $0x18] sm:$0xff] %v5332_v60   ;;  %v2200_v28 = vunpack.c.l.b16 %v2152_v17  ;;  %2766 = vmatpush.bf16.msra.mxu0 %v4709_v15  ;;  %v8810_v17 = vld [vmem:[#allocation10_spill] sm:$0xff] }
 0x38a   :  { %v419_v60 = vadd.f32 %v8810_v17, %v6277_v51 }
 0x38b   :  { %v2201_v48 = vpack.c.b16 %v2200_v28, %v2199_v42  ;;  %v5240_v28 = vld [vmem:[%s8710_s2 + $0xac] sm:$0xf0] }
 0x38d   :  { %2371 = vmatmul.bf16.vlgmr.msrb.gmra.mxu0 %v2201_v48  ;;  %2385 = vmatmul.bf16.vlgmr.msrb.gmra.mxu1 %v2201_v48 }
 0x38e   :  { %2399 = vmatmul.bf16.vlgmr.msrb.gmra.mxu2 %v2201_v48  ;;  %2413 = vmatmul.bf16.vlgmr.msrb.gmra.mxu3 %v2201_v48  ;;  %v5238_v48 = vld [vmem:[%s8710_s2 + $0xa4] sm:$0xf] }
 0x40a   :  { %v2372_v59 = vpop.f32.mrf.mxu0  ;;  %v2386_v22 = vpop.f32.mrf.mxu1 }
 0x40b   :  { %v2419_v2 = vadd.f32 %v2372_v59, %v321_v0  ;;  %v2420_v9 = vadd.f32 %v2386_v22, %v370_v7  ;;  %v470_v0 = vadd.f32 %v8811_v29, %v6218_v57  ;;  %v4717_v7 = vor.u32 %v5245_v4, %v4716_v25  ;;  %v4694_v59 = vld [vmem:[%s8710_s2 + $0xb0] sm:$0xf0]  ;;  %v4700_v22 = vld [vmem:[%s8710_s2 + $0xa8] sm:$0xf]  ;;  %v5237_v4 = vld [vmem:[%s8710_s2 + $0x94] sm:$0xf0] }
 0x40c   :  { %v4697_v21 = vor.u32 %v5238_v48, %v4694_v59  ;;  %v4684_v25 = vld [vmem:[%s8710_s2 + $0x88] sm:$0xf] }
 0x40d   :  { %v4602_v30 = vmul.f32 -1.442695, %v2419_v2  ;;  %v4603_v18 = vmul.f32 -1.442695, %v2420_v9  ;;  %2794 = vmatpush.bf16.msra.mxu2 %v4717_v7  ;;  %v4660_v7 = vld [vmem:[%s8710_s2 + $0x60] sm:$0xf] }
 0x40e   :  { %2781 = vmatpush.bf16.msra.mxu1 %v4697_v21  ;;  %v5230_v21 = vld [vmem:[%s8710_s2 + $0x64] sm:$0xf] }
 0x40f   :  { %5490 = vpow2.f32 %v4602_v30  ;;  %v4721_v30 = vor.u32 %v5243_v26, %v4718_v45 }
 0x410   :  { %5492 = vpow2.f32 %v4603_v18  ;;  %v4693_v18 = vor.u32 %v5240_v28, %v4692_v53  ;;  %v4654_v53 = vld [vmem:[%s8710_s2 + $0x58] sm:$0xf0] }
 0x411   :  { %v2414_v39 = vpop.f32.mrf.mxu3  ;;  %v2400_v12 = vpop.f32.mrf.mxu2  ;;  %2808 = vmatpush.bf16.msra.mxu3 %v4721_v30  ;;  %v4685_v30 = vor.u32 %v5237_v4, %v4684_v25 }
 0x412   :  { %v2422_v38 = vadd.f32 %v2414_v39, %v468_v55  ;;  %v2374_v11 = vpop.f32.mrf.mxu0  ;;  %v2388_v56 = vpop.f32.mrf.mxu1  ;;  %v2421_v9 = vadd.f32 %v2400_v12, %v419_v60  ;;  %v5241_v55 = vld [vmem:[%s8710_s2 + $0xb4] sm:$0xf0]  ;;  %2767 = vmatpush.bf16.msra.mxu0 %v4693_v18  ;;  %v5235_v60 = vld [vmem:[%s8710_s2 + $0x8c] sm:$0xf]  ;;  %v5232_v18 = vld [vmem:[%s8710_s2 + $0x6c] sm:$0xf0] }
 0x413   :  { %v2423_v62 = vadd.f32 %v2374_v11, %v323_v19  ;;  %v2424_v32 = vadd.f32 %v2388_v56, %v372_v40  ;;  %v4701_v58 = vor.u32 %v5241_v55, %v4700_v22  ;;  %v4662_v55 = vld [vmem:[%s8710_s2 + $0x70] sm:$0xf0] }
 0x414   :  { %v4604_v44 = vmul.f32 -1.442695, %v2422_v38  ;;  %v421_v38 = vadd.f32 %v8812_v63, %v6277_v51 }
 0x415   :  { %v5491_v50 = vpop.eup %5490  ;;  %v4605_v47 = vmul.f32 -1.442695, %v2423_v62  ;;  %v4606_v35 = vmul.f32 -1.442695, %v2424_v32  ;;  %2795 = vmatpush.bf16.msra.mxu2 %v4701_v58  ;;  %2809 = vmatpush.bf16.msra.mxu3 %v4705_v46  ;;  %v4668_v58 = vld [vmem:[%s8710_s2 + $0x68] sm:$0xf] }
 0x416   :  { %v5493_v6 = vpop.eup %5492  ;;  %v7649_v54 = vadd.f32 1.0, %v5491_v50  ;;  %5494 = vpow2.f32 %v4604_v44  ;;  %v4676_v50 = vld [vmem:[%s8710_s2 + $0x80] sm:$0xf] }
 0x417   :  { %v7654_v5 = vadd.f32 1.0, %v5493_v6  ;;  %5496 = vpow2.f32 %v4605_v47  ;;  %v5236_v47 = vld [vmem:[%s8710_s2 + $0x8c] sm:$0xf0]  ;;  %v5234_v6 = vld [vmem:[%s8710_s2 + $0x84] sm:$0xf] }
 0x418   :  { %5498 = vrcp.f32 %v7649_v54  ;;  %v2460_v24 = vand.u32 2147483647, %v7649_v54  ;;  %v2462_v39 = vand.u32 2147483648, %v7649_v54  ;;  %vm2456_vm1 = vweird.f32 %v7649_v54 }
 0x419   :  { %5500 = vrcp.f32 %v7654_v5  ;;  %v2416_v42 = vpop.f32.mrf.mxu3  ;;  %v2477_v56 = vand.u32 2147483648, %v7654_v5  ;;  %v2475_v61 = vand.u32 2147483647, %v7654_v5  ;;  %v2402_v16 = vpop.f32.mrf.mxu2  ;;  %vm2471_vm4 = vweird.f32 %v7654_v5  ;;  %2796 = vmatpush.bf16.msra.mxu2 %v4685_v30 }
 0x41a   :  { %5502 = vpow2.f32 %v4606_v35  ;;  %v2426_v19 = vadd.f32 %v2416_v42, %v470_v0  ;;  %vm7716_vm0 = vcmp.eq.f32.partialorder %v2460_v24, 8.507059e+37  ;;  %v2463_v3 = vor.u32 1.1754944e-38, %v2462_v39  ;;  %v4678_v35 = vld [vmem:[%s8710_s2 + $0x90] sm:$0xf0]  ;;  %v4686_v42 = vld [vmem:[%s8710_s2 + $0x98] sm:$0xf0] }
 0x41b   :  { %v2478_v15 = vor.u32 1.1754944e-38, %v2477_v56  ;;  %v2425_v12 = vadd.f32 %v2402_v16, %v421_v38  ;;  %vm7761_vm6 = vcmp.eq.f32.partialorder %v2475_v61, 8.507059e+37  ;;  %v4677_v17 = vor.u32 %v5236_v47, %v4676_v50  ;;  %v5231_v39 = vld [vmem:[%s8710_s2 + $0x6c] sm:$0xf]  ;;  %v4644_v56 = vld [vmem:[%s8710_s2 + $0x40] sm:$0xf] }
 0x41c   :  { %v5495_v2 = vpop.eup %5494  ;;  %v4607_v44 = vmul.f32 -1.442695, %v2426_v19  ;;  %v4689_v38 = vor.u32 %v5235_v60, %v4686_v42  ;;  %v4646_v16 = vld [vmem:[%s8710_s2 + $0x50] sm:$0xf0]  ;;  %v4665_v50 = vor.u32 %v5230_v21, %v4662_v55  ;;  %v4628_v42 = vld [vmem:[%s8710_s2 + $0x20] sm:$0xf] }
 0x41d   :  { %v5497_v31 = vpop.eup %5496  ;;  %v7699_v34 = vadd.f32 1.0, %v5495_v2  ;;  %2768 = vmatpush.bf16.msra.mxu0 %v4677_v17  ;;  %v5223_v21 = vld [vmem:[%s8710_s2 + $0x2c] sm:$0xf]  ;;  %v4638_v55 = vld [vmem:[%s8710_s2 + $0x38] sm:$0xf0] }
 0x41e   :  { %v7701_v40 = vpop.eup %5498  ;;  %v7704_v36 = vadd.f32 1.0, %v5497_v31  ;;  %2810 = vmatpush.bf16.msra.mxu3 %v4689_v38  ;;  %v4614_v19 = vld [vmem:[%s8710_s2 + $0x10] sm:$0xf0]  ;;  %v4620_v38 = vld [vmem:[%s8710_s2 + $0x8] sm:$0xf] }
 0x41f   :  { %v7706_v43 = vpop.eup %5500  ;;  %v2452_v11 = vmul.f32 %v7701_v40, %v7649_v54  ;;  %5504 = vrcp.f32 %v7699_v34  ;;  %vm2457_vm2 = vweird.f32 %v7701_v40  ;;  %v5222_v54 = vld [vmem:[%s8710_s2 + $0x24] sm:$0xf] }
 0x420   :  { %v5503_v49 = vpop.eup %5502  ;;  %v2467_v8 = vmul.f32 %v7706_v43, %v7654_v5  ;;  %5506 = vtanh.f32 %v2421_v9  ;;  %vm2472_vm3 = vweird.f32 %v7706_v43  ;;  %v2505_v23 = vand.u32 2147483647, %v7704_v36  ;;  %vm7757_vm5 = vmor %vm2456_vm1, %vm2457_vm2  ;;  %v5227_v5 = vld [vmem:[%s8710_s2 + $0x4c] sm:$0xf] }
 0x421   :  { %v2453_v62 = vsub.f32 1.0, %v2452_v11  ;;  %5508 = vrcp.f32 %v7704_v36  ;;  %v7722_v32 = vadd.f32 1.0, %v5503_v49  ;;  %vm7773_vm7 = vmor %vm2471_vm4, %vm2472_vm3  ;;  %v2507_v0 = vand.u32 2147483648, %v7704_v36  ;;  %v4670_v11 = vld [vmem:[%s8710_s2 + $0x78] sm:$0xf0] }
 0x422   :  { %v2468_v52 = vsub.f32 1.0, %v2467_v8  ;;  %v4681_v9 = vor.u32 %v5234_v6, %v4678_v35  ;;  %vm7807_vm8 = vcmp.eq.f32.partialorder %v2505_v23, 8.507059e+37  ;;  %vm2501_vm9 = vweird.f32 %v7704_v36  ;;  %v5228_v49 = vld [vmem:[%s8710_s2 + $0x4c] sm:$0xf0]  ;;  %v4652_v35 = vld [vmem:[%s8710_s2 + $0x48] sm:$0xf] }
 0x423   :  { %v2454_v14 = vmul.f32 %v7701_v40, %v2453_v62  ;;  %5510 = vrcp.f32 %v7722_v32  ;;  %v2522_v29 = vand.u32 2147483648, %v7722_v32  ;;  %v2520_v24 = vand.u32 2147483647, %v7722_v32  ;;  %v5226_v62 = vld [vmem:[%s8710_s2 + $0x44] sm:$0xf] }
 0x424   :  { %v2469_v27 = vmul.f32 %v7706_v43, %v2468_v52  ;;  %5512 = vpow2.f32 %v4607_v44  ;;  %2782 = vmatpush.bf16.msra.mxu1 %v4681_v9  ;;  %v2508_v6 = vor.u32 1.1754944e-38, %v2507_v0  ;;  %v4673_v25 = vor.u32 %v5231_v39, %v4670_v11  ;;  %v4630_v0 = vld [vmem:[%s8710_s2 + $0x30] sm:$0xf0]  ;;  %v5221_v11 = vld [vmem:[%s8710_s2 + $0x14] sm:$0xf0] }
 0x425   :  { %v7750_v26 = vpop.eup %5504  ;;  %v2455_v45 = vadd.f32 %v7701_v40, %v2454_v14  ;;  %5514 = vtanh.f32 %v2425_v12  ;;  %v4645_v4 = vor.u32 %v5228_v49, %v4644_v56  ;;  %vm2516_vm13 = vweird.f32 %v7722_v32 }
 0x426   :  { %v5507_v28 = vpop.eup %5506  ;;  %v2470_v48 = vadd.f32 %v7706_v43, %v2469_v27  ;;  %v2482_v2 = vmul.f32 %v7750_v26, %v7699_v34  ;;  %v5229_v27 = vld [vmem:[%s8710_s2 + $0x54] sm:$0xf0]  ;;  %2811 = vmatpush.bf16.msra.mxu3 %v4673_v25  ;;  %vm2521_vm15 = vcmp.eq.f32.partialorder %v2520_v24, 8.507059e+37  ;;  %v5218_v24 = vld [vmem:[%s8710_s2 + $0x4] sm:$0xf]  ;;  %vm2486_vm1 = vweird.f32 %v7699_v34 }
 0x427   :  { %v7784_v59 = vpop.eup %5508  ;;  %v2459_v22 = vsel %vm7757_vm5, %v7701_v40, %v2455_v45  ;;  %v5233_v40 = vld [vmem:[%s8710_s2 + $0x74] sm:$0xf0]  ;;  %v4649_v45 = vor.u32 %v5226_v62, %v4646_v16  ;;  %v4653_v30 = vor.u32 %v5229_v27, %v4652_v35  ;;  %v2492_v62 = vand.u32 2147483648, %v7699_v34 }
 0x428   :  { %v2464_v33 = vsel %vm7716_vm0, %v2463_v3, %v2459_v22  ;;  %v2474_v20 = vsel %vm7773_vm7, %v7706_v43, %v2470_v48  ;;  %v2497_v31 = vmul.f32 %v7784_v59, %v7704_v36  ;;  %vm2502_vm10 = vweird.f32 %v7784_v59  ;;  %2783 = vmatpush.bf16.msra.mxu1 %v4665_v50  ;;  %v5225_v22 = vld [vmem:[%s8710_s2 + $0x34] sm:$0xf0] }
 0x429   :  { %v7820_v46 = vpop.eup %5510  ;;  %v2479_v43 = vsel %vm7761_vm6, %v2478_v15, %v2474_v20  ;;  %v2545_v63 = vmul.f32 %v5507_v28, %v2464_v33  ;;  %v2483_v52 = vsub.f32 1.0, %v2482_v2  ;;  %v4661_v3 = vor.u32 %v5232_v18, %v4660_v7  ;;  %vm7857_vm11 = vmor %vm2501_vm9, %vm2502_vm10  ;;  %v5224_v28 = vld [vmem:[%s8710_s2 + $0x2c] sm:$0xf0]  ;;  %v4636_v7 = vld [vmem:[%s8710_s2 + $0x28] sm:$0xf] }
 0x42a   :  { %v2543_v8 = vmul.f32 %v2479_v43, %v7452_v37  ;;  %v2498_v13 = vsub.f32 1.0, %v2497_v31  ;;  %v2512_v61 = vmul.f32 %v7820_v46, %v7722_v32  ;;  %v5513_v44 = vpop.eup %5512  ;;  %v4669_v37 = vor.u32 %v5233_v40, %v4668_v58  ;;  %v4612_v58 = vld [vmem:[%s8710_s2] sm:$0xf]  ;;  %v5220_v32 = vld [vmem:[%s8710_s2 + $0xc] sm:$0xf0] }
 0x42b   :  { %v7861_v23 = vadd.f32 1.0, %v5513_v44  ;;  %2769 = vmatpush.bf16.msra.mxu0 %v4661_v3  ;;  %v5515_v36 = vpop.eup %5514  ;;  %vm2517_vm12 = vweird.f32 %v7820_v46  ;;  %v2484_v48 = vmul.f32 %v7750_v26, %v2483_v52  ;;  %v4657_v18 = vor.u32 %v5227_v5, %v4654_v53  ;;  %v4860_v33 = vld [vmem:[%s8710_s2 + $0xe0] sm:$0xf] }
 0x42c   :  { %v7844_v47 = vadd.f32 %v2545_v63, %v2543_v8  ;;  %v2513_v15 = vsub.f32 1.0, %v2512_v61  ;;  %v2499_v14 = vmul.f32 %v7784_v59, %v2498_v13  ;;  %2797 = vmatpush.bf16.msra.mxu2 %v4669_v37  ;;  %vm7905_vm14 = vmor %vm2516_vm13, %vm2517_vm12  ;;  %2784 = vmatpush.bf16.msra.mxu1 %v4649_v45  ;;  %v4629_v31 = vor.u32 %v5224_v28, %v4628_v42  ;;  %v5219_v8 = vld [vmem:[%s8710_s2 + $0xc] sm:$0xf]  ;;  %v4622_v13 = vld [vmem:[%s8710_s2 + $0x18] sm:$0xf0] }
 0x42d   :  { %5516 = vrcp.f32 %v7861_v23  ;;  %v4637_v43 = vor.u32 %v5225_v22, %v4636_v7  ;;  %2812 = vmatpush.bf16.msra.mxu3 %v4657_v18  ;;  %v2485_v56 = vadd.f32 %v7750_v26, %v2484_v48  ;;  %vm2487_vm0 = vweird.f32 %v7750_v26  ;;  %v5277_v37 = vld [vmem:[%s8710_s2 + $0xd4] sm:$0xf0] }
 0x42e   :  { %v2514_v17 = vmul.f32 %v7820_v46, %v2513_v15  ;;  %v2500_v60 = vadd.f32 %v7784_v59, %v2499_v14  ;;  %5518 = vtanh.f32 %v7844_v47  ;;  %v4613_v16 = vor.u32 %v5220_v32, %v4612_v58  ;;  %vm7954_vm2 = vmor %vm2486_vm1, %vm2487_vm0  ;;  %v5281_v32 = vld [vmem:[%s8710_s2 + $0xf4] sm:$0xf0] }
 0x42f   :  { %2770 = vmatpush.bf16.msra.mxu0 %v4645_v4  ;;  %v4617_v44 = vor.u32 %v5218_v24, %v4614_v19  ;;  %v2490_v52 = vand.u32 2147483647, %v7699_v34  ;;  %v4621_v50 = vor.u32 %v5221_v11, %v4620_v38  ;;  %v4625_v15 = vor.u32 %v5219_v8, %v4622_v13  ;;  %v5279_v24 = vld [vmem:[%s8710_s2 + $0xec] sm:$0xf]  ;;  %v5274_v8 = vld [vmem:[%s8710_s2 + $0xc4] sm:$0xf] }
 0x430   :  { %v2504_v2 = vsel %vm7857_vm11, %v7784_v59, %v2500_v60  ;;  %v2515_v9 = vadd.f32 %v7820_v46, %v2514_v17  ;;  %v2523_v59 = vor.u32 1.1754944e-38, %v2522_v29  ;;  %2798 = vmatpush.bf16.msra.mxu2 %v4653_v30  ;;  %v4633_v29 = vor.u32 %v5222_v54, %v4630_v0  ;;  %v8832_v13 = vld [vmem:[#allocation20_spill] sm:$0xff] }
 0x431   :  { %v2509_v20 = vsel %vm7807_vm8, %v2508_v6, %v2504_v2  ;;  %v2489_v14 = vsel %vm7954_vm2, %v7750_v26, %v2485_v56  ;;  %v2493_v35 = vor.u32 1.1754944e-38, %v2492_v62  ;;  %v2537_v27 = vand.u32 2147483648, %v7861_v23  ;;  %v8830_v2 = vld [vmem:[#allocation17_spill] sm:$0xff] }
 0x432   :  { %v2519_v40 = vsel %vm7905_vm14, %v7820_v46, %v2515_v9  ;;  %v2546_v39 = vmul.f32 %v5515_v36, %v2509_v20  ;;  %v4641_v46 = vor.u32 %v5223_v21, %v4638_v55  ;;  %2785 = vmatpush.bf16.msra.mxu1 %v4633_v29  ;;  %vm2491_vm3 = vcmp.eq.f32.partialorder %v2490_v52, 8.507059e+37  ;;  %v5278_v20 = vld [vmem:[%s8710_s2 + $0xe4] sm:$0xf]  ;;  %v4844_v56 = vld [vmem:[%s8710_s2 + $0xc0] sm:$0xf] }
 0x433   :  { %v2524_v63 = vsel %vm2521_vm15, %v2523_v59, %v2519_v40  ;;  %v5517_v61 = vpop.eup %5516  ;;  %2771 = vmatpush.bf16.msra.mxu0 %v4629_v31  ;;  %v2535_v25 = vand.u32 2147483647, %v7861_v23  ;;  %v2494_v4 = vsel %vm2491_vm3, %v2493_v35, %v2489_v14  ;;  %vm2531_vm5 = vweird.f32 %v7861_v23  ;;  %v5280_v59 = vld [vmem:[%s8710_s2 + $0xec] sm:$0xf0]  ;;  %v8833_v62 = vld [vmem:[#allocation21_spill] sm:$0xff] }
 0x434   :  { %v2544_v49 = vmul.f32 %v2524_v63, %v7560_v41  ;;  %v2527_v3 = vmul.f32 %v5517_v61, %v7861_v23  ;;  %2799 = vmatpush.bf16.msra.mxu2 %v4637_v43  ;;  %2813 = vmatpush.bf16.msra.mxu3 %v4641_v46  ;;  %v5519_v6 = vpop.eup %5518  ;;  %vm2532_vm4 = vweird.f32 %v5517_v61  ;;  %v2538_v5 = vor.u32 1.1754944e-38, %v2537_v27  ;;  %v8829_v23 = vld [vmem:[#allocation16_spill] sm:$0xff]  ;;  %v4868_v43 = vld [vmem:[%s8710_s2 + $0xe8] sm:$0xf]  ;;  %v8831_v46 = vld [vmem:[#allocation19_spill] sm:$0xff] }
 0x435   :  { %v2551_v26 = vmul.f32 %v5519_v6, %v2494_v4  ;;  %vm2533_vm6 = vmor %vm2531_vm5, %vm2532_vm4  ;;  %vm2536_vm7 = vcmp.eq.f32.partialorder %v2535_v25, 8.507059e+37  ;;  %v326_v22 = vadd.f32 %v8829_v23, %v6182_v10  ;;  %v375_v9 = vadd.f32 %v8830_v2, %v6185_v1  ;;  %v4870_v63 = vld [vmem:[%s8710_s2 + $0xf8] sm:$0xf0]  ;;  %v5275_v27 = vld [vmem:[%s8710_s2 + $0xcc] sm:$0xf] }
 0x436   :  { %v7949_v41 = vadd.f32 %v2546_v39, %v2544_v49  ;;  %v2528_v34 = vsub.f32 1.0, %v2527_v3  ;;  %2786 = vmatpush.bf16.msra.mxu1 %v4617_v44  ;;  %v4861_v40 = vor.u32 %v5280_v59, %v4860_v33  ;;  %v4862_v39 = vld [vmem:[%s8710_s2 + $0xf0] sm:$0xf0]  ;;  %v4869_v19 = vor.u32 %v5281_v32, %v4868_v43  ;;  %v5276_v49 = vld [vmem:[%s8710_s2 + $0xcc] sm:$0xf0] }
 0x437   :  { %2772 = vmatpush.bf16.msra.mxu0 %v4613_v16  ;;  %v2553_v42 = vpack.c.bf16 %v2551_v26, %v2551_v26  ;;  %v4865_v29 = vor.u32 %v5278_v20, %v4862_v39  ;;  %v473_v38 = vadd.f32 %v8831_v46, %v6218_v57  ;;  %v4873_v11 = vor.u32 %v5279_v24, %v4870_v63  ;;  %v4846_v3 = vld [vmem:[%s8710_s2 + $0xd0] sm:$0xf0]  ;;  %v4836_v2 = vld [vmem:[%s8710_s2 + $0xa8] sm:$0xf]  ;;  %v5268_v20 = vld [vmem:[%s8710_s2 + $0x8c] sm:$0xf0] }
 0x438   :  { %5520 = vtanh.f32 %v7949_v41  ;;  %v2529_v12 = vmul.f32 %v5517_v61, %v2528_v34  ;;  %2800 = vmatpush.bf16.msra.mxu2 %v4621_v50  ;;  %2814 = vmatpush.bf16.msra.mxu3 %v4625_v15  ;;  %v377_v16 = vadd.f32 %v8833_v62, %v6185_v1  ;;  %v4845_v52 = vor.u32 %v5276_v49, %v4844_v56  ;;  %v4852_v50 = vld [vmem:[%s8710_s2 + $0xc8] sm:$0xf]  ;;  %v4814_v43 = vld [vmem:[%s8710_s2 + $0x90] sm:$0xf0]  ;;  %v5267_v56 = vld [vmem:[%s8710_s2 + $0x8c] sm:$0xf] }
 0x439   :  { %v2601_v48 = vunpack.c.l.b16 %v2553_v42  ;;  %v4849_v6 = vor.u32 %v5274_v8, %v4846_v3  ;;  %v4853_v35 = vor.u32 %v5277_v37, %v4852_v50  ;;  %v5270_v42 = vld [vmem:[%s8710_s2 + $0xa4] sm:$0xf]  ;;  %v4820_v32 = vld [vmem:[%s8710_s2 + $0x88] sm:$0xf]  ;;  %v4822_v49 = vld [vmem:[%s8710_s2 + $0x98] sm:$0xf0] }
 0x43a   :  { %v2530_v45 = vadd.f32 %v5517_v61, %v2529_v12  ;;  %3181 = vmatpush.bf16.msrb.mxu1 %v4865_v29  ;;  %v4854_v12 = vld [vmem:[%s8710_s2 + $0xd8] sm:$0xf0]  ;;  %v4825_v3 = vor.u32 %v5267_v56, %v4822_v49  ;;  %v8836_v37 = vld [vmem:[#allocation22_spill] sm:$0xff] }
 0x43b   :  { %3167 = vmatpush.bf16.msrb.mxu0 %v4861_v40 }
 0x43c   :  { %v2534_v36 = vsel %vm2533_vm6, %v5517_v61, %v2530_v45  ;;  %v328_v61 = vadd.f32 %v8832_v13, %v6182_v10  ;;  %3195 = vmatpush.bf16.msrb.mxu2 %v4869_v19  ;;  %3209 = vmatpush.bf16.msrb.mxu3 %v4873_v11  ;;  %v4857_v45 = vor.u32 %v5275_v27, %v4854_v12  ;;  %v5269_v11 = vld [vmem:[%s8710_s2 + $0x94] sm:$0xf0] }
 0x43d   :  { %v2539_v17 = vsel %vm2536_vm7, %v2538_v5, %v2534_v36  ;;  %v4828_v5 = vld [vmem:[%s8710_s2 + $0xa0] sm:$0xf]  ;;  %v4821_v62 = vor.u32 %v5269_v11, %v4820_v32  ;;  %v4782_v11 = vld [vmem:[%s8710_s2 + $0x50] sm:$0xf0] }
 0x43e   :  { %v5521_v53 = vpop.eup %5520  ;;  %3182 = vmatpush.bf16.msrb.mxu1 %v4849_v6 }
 0x43f   :  { %v2552_v60 = vmul.f32 %v5521_v53, %v2539_v17  ;;  %3168 = vmatpush.bf16.msrb.mxu0 %v4845_v52  ;;  %v5272_v53 = vld [vmem:[%s8710_s2 + $0xac] sm:$0xf0] }
 0x440   :  { %3196 = vmatpush.bf16.msrb.mxu2 %v4853_v35  ;;  %3210 = vmatpush.bf16.msrb.mxu3 %v4857_v45 }
 0x441   :  { %v2554_v28 = vpack.c.bf16 %v2552_v60, %v2552_v60  ;;  %v5337_v54 = vpack.c.bf16 %v2552_v60, %v2551_v26  ;;  %v4829_v60 = vor.u32 %v5272_v53, %v4828_v5 }
 0x443   :  { %5357 = vst [vmem:[%s8713_s4 + $0x20] sm:$0xff] %v5337_v54   ;;  %v2602_v0 = vunpack.c.l.b16 %v2554_v28  ;;  %3169 = vmatpush.bf16.msrb.mxu0 %v4829_v60 }
 0x445   :  { %v2603_v7 = vpack.c.b16 %v2602_v0, %v2601_v48  ;;  %v4830_v0 = vld [vmem:[%s8710_s2 + $0xb0] sm:$0xf0] }
 0x447   :  { %2773 = vmatmul.bf16.vlgmr.msra.gmra.mxu0 %v2603_v7  ;;  %2787 = vmatmul.bf16.vlgmr.msra.gmra.mxu1 %v2603_v7 }
 0x448   :  { %2801 = vmatmul.bf16.vlgmr.msra.gmra.mxu2 %v2603_v7  ;;  %2815 = vmatmul.bf16.vlgmr.msra.gmra.mxu3 %v2603_v7 }
 0x4c4   :  { %v2774_v30 = vpop.f32.mrf.mxu0  ;;  %v2788_v18 = vpop.f32.mrf.mxu1 }
 0x4c5   :  { %v2821_v21 = vadd.f32 %v2774_v30, %v326_v22  ;;  %v2822_v55 = vadd.f32 %v2788_v18, %v375_v9  ;;  %v4833_v22 = vor.u32 %v5270_v42, %v4830_v0  ;;  %v5273_v9 = vld [vmem:[%s8710_s2 + $0xb4] sm:$0xf0]  ;;  %v5271_v30 = vld [vmem:[%s8710_s2 + $0xac] sm:$0xf]  ;;  %v4838_v18 = vld [vmem:[%s8710_s2 + $0xb8] sm:$0xf0] }
 0x4c6   :  { %v4837_v29 = vor.u32 %v5273_v9, %v4836_v2  ;;  %v4841_v63 = vor.u32 %v5271_v30, %v4838_v18  ;;  %v4804_v2 = vld [vmem:[%s8710_s2 + $0x68] sm:$0xf]  ;;  %v5265_v9 = vld [vmem:[%s8710_s2 + $0x74] sm:$0xf0] }
 0x4c7   :  { %v4738_v31 = vmul.f32 -1.442695, %v2821_v21  ;;  %v4739_v58 = vmul.f32 -1.442695, %v2822_v55  ;;  %3183 = vmatpush.bf16.msrb.mxu1 %v4833_v22  ;;  %v4812_v21 = vld [vmem:[%s8710_s2 + $0x80] sm:$0xf] }
 0x4c8   :  { %v8834_v55 = vld [vmem:[#allocation18_spill] sm:$0xff]  ;;  %v4813_v46 = vor.u32 %v5268_v20, %v4812_v21  ;;  %3197 = vmatpush.bf16.msrb.mxu2 %v4837_v29  ;;  %3211 = vmatpush.bf16.msrb.mxu3 %v4841_v63  ;;  %v4780_v29 = vld [vmem:[%s8710_s2 + $0x40] sm:$0xf]  ;;  %v4805_v63 = vor.u32 %v5265_v9, %v4804_v2  ;;  %v4774_v21 = vld [vmem:[%s8710_s2 + $0x38] sm:$0xf0] }
 0x4c9   :  { %5522 = vpow2.f32 %v4738_v31  ;;  %v424_v33 = vadd.f32 %v8834_v55, %v6277_v51  ;;  %v5266_v31 = vld [vmem:[%s8710_s2 + $0x84] sm:$0xf] }
 0x4ca   :  { %5524 = vpow2.f32 %v4739_v58  ;;  %v8835_v58 = vld [vmem:[#allocation23_spill] sm:$0xff]  ;;  %3170 = vmatpush.bf16.msrb.mxu0 %v4813_v46 }
 0x4cb   :  { %v2816_v44 = vpop.f32.mrf.mxu3  ;;  %v2802_v23 = vpop.f32.mrf.mxu2  ;;  %v475_v40 = vadd.f32 %v8835_v58, %v6218_v57  ;;  %v5260_v46 = vld [vmem:[%s8710_s2 + $0x4c] sm:$0xf0] }
 0x4cc   :  { %v2824_v15 = vadd.f32 %v2816_v44, %v473_v38  ;;  %v2776_v14 = vpop.f32.mrf.mxu0  ;;  %v2790_v34 = vpop.f32.mrf.mxu1  ;;  %v2823_v19 = vadd.f32 %v2802_v23, %v424_v33  ;;  %v4817_v38 = vor.u32 %v5266_v31, %v4814_v43  ;;  %3198 = vmatpush.bf16.msrb.mxu2 %v4821_v62  ;;  %3212 = vmatpush.bf16.msrb.mxu3 %v4825_v3  ;;  %v5263_v33 = vld [vmem:[%s8710_s2 + $0x6c] sm:$0xf]  ;;  %v4788_v62 = vld [vmem:[%s8710_s2 + $0x48] sm:$0xf] }
 0x4cd   :  { %v2825_v25 = vadd.f32 %v2776_v14, %v328_v61  ;;  %v2826_v4 = vadd.f32 %v2790_v34, %v377_v16 }
 0x4ce   :  { %v4740_v26 = vmul.f32 -1.442695, %v2824_v15  ;;  %v426_v15 = vadd.f32 %v8836_v37, %v6277_v51  ;;  %3184 = vmatpush.bf16.msrb.mxu1 %v4817_v38  ;;  %v5258_v38 = vld [vmem:[%s8710_s2 + $0x44] sm:$0xf] }
 0x4cf   :  { %v5523_v36 = vpop.eup %5522  ;;  %v4741_v17 = vmul.f32 -1.442695, %v2825_v25  ;;  %v4742_v48 = vmul.f32 -1.442695, %v2826_v4 }
 0x4d0   :  { %v5525_v28 = vpop.eup %5524  ;;  %v8035_v54 = vadd.f32 1.0, %v5523_v36  ;;  %5526 = vpow2.f32 %v4740_v26  ;;  %v4796_v36 = vld [vmem:[%s8710_s2 + $0x60] sm:$0xf]  ;;  %3199 = vmatpush.bf16.msrb.mxu2 %v4805_v63 }
 0x4d1   :  { %v8040_v7 = vadd.f32 1.0, %v5525_v28  ;;  %5528 = vpow2.f32 %v4741_v17  ;;  %v5264_v17 = vld [vmem:[%s8710_s2 + $0x6c] sm:$0xf0]  ;;  %v5262_v28 = vld [vmem:[%s8710_s2 + $0x64] sm:$0xf] }
 0x4d2   :  { %5530 = vrcp.f32 %v8035_v54  ;;  %v2862_v39 = vand.u32 2147483647, %v8035_v54  ;;  %v2864_v44 = vand.u32 2147483648, %v8035_v54  ;;  %vm2858_vm9 = vweird.f32 %v8035_v54 }
 0x4d3   :  { %5532 = vrcp.f32 %v8040_v7  ;;  %v2818_v59 = vpop.f32.mrf.mxu3  ;;  %v2879_v34 = vand.u32 2147483648, %v8040_v7  ;;  %v2877_v12 = vand.u32 2147483647, %v8040_v7  ;;  %v2804_v45 = vpop.f32.mrf.mxu2  ;;  %vm2873_vm12 = vweird.f32 %v8040_v7 }
 0x4d4   :  { %5534 = vpow2.f32 %v4742_v48  ;;  %v2828_v61 = vadd.f32 %v2818_v59, %v475_v40  ;;  %vm8102_vm8 = vcmp.eq.f32.partialorder %v2862_v39, 8.507059e+37  ;;  %v2865_v53 = vor.u32 1.1754944e-38, %v2864_v44  ;;  %v4798_v48 = vld [vmem:[%s8710_s2 + $0x70] sm:$0xf0]  ;;  %v4806_v59 = vld [vmem:[%s8710_s2 + $0x78] sm:$0xf0] }
 0x4d5   :  { %v2880_v60 = vor.u32 1.1754944e-38, %v2879_v34  ;;  %v2827_v23 = vadd.f32 %v2804_v45, %v426_v15  ;;  %vm8147_vm14 = vcmp.eq.f32.partialorder %v2877_v12, 8.507059e+37  ;;  %v4797_v55 = vor.u32 %v5264_v17, %v4796_v36  ;;  %v5259_v44 = vld [vmem:[%s8710_s2 + $0x4c] sm:$0xf]  ;;  %v4764_v34 = vld [vmem:[%s8710_s2 + $0x20] sm:$0xf] }
 0x4d6   :  { %v5527_v24 = vpop.eup %5526  ;;  %v4743_v26 = vmul.f32 -1.442695, %v2828_v61  ;;  %v4809_v15 = vor.u32 %v5263_v33, %v4806_v59  ;;  %v4766_v45 = vld [vmem:[%s8710_s2 + $0x30] sm:$0xf0]  ;;  %v4785_v36 = vor.u32 %v5258_v38, %v4782_v11  ;;  %v4748_v59 = vld [vmem:[%s8710_s2] sm:$0xf] }
 0x4d7   :  { %v5529_v8 = vpop.eup %5528  ;;  %v8085_v13 = vadd.f32 1.0, %v5527_v24  ;;  %3171 = vmatpush.bf16.msrb.mxu0 %v4797_v55  ;;  %v5251_v38 = vld [vmem:[%s8710_s2 + $0xc] sm:$0xf]  ;;  %v4758_v11 = vld [vmem:[%s8710_s2 + $0x18] sm:$0xf0] }
 0x4d8   :  { %v8087_v16 = vpop.eup %5530  ;;  %v8090_v52 = vadd.f32 1.0, %v5529_v8  ;;  %3213 = vmatpush.bf16.msrb.mxu3 %v4809_v15 }
 0x4d9   :  { %v8092_v50 = vpop.eup %5532  ;;  %v2854_v14 = vmul.f32 %v8087_v16, %v8035_v54  ;;  %5536 = vrcp.f32 %v8085_v13  ;;  %vm2859_vm10 = vweird.f32 %v8087_v16  ;;  %v5250_v54 = vld [vmem:[%s8710_s2 + $0x4] sm:$0xf] }
 0x4da   :  { %v5535_v6 = vpop.eup %5534  ;;  %v2869_v35 = vmul.f32 %v8092_v50, %v8040_v7  ;;  %5538 = vtanh.f32 %v2823_v19  ;;  %vm2874_vm11 = vweird.f32 %v8092_v50  ;;  %v2907_v22 = vand.u32 2147483647, %v8090_v52  ;;  %vm8143_vm13 = vmor %vm2858_vm9, %vm2859_vm10  ;;  %v5255_v7 = vld [vmem:[%s8710_s2 + $0x2c] sm:$0xf] }
 0x4db   :  { %v2855_v25 = vsub.f32 1.0, %v2854_v14  ;;  %5540 = vrcp.f32 %v8090_v52  ;;  %v8108_v4 = vadd.f32 1.0, %v5535_v6  ;;  %vm8159_vm15 = vmor %vm2873_vm12, %vm2874_vm11  ;;  %v2909_v40 = vand.u32 2147483648, %v8090_v52  ;;  %v4790_v14 = vld [vmem:[%s8710_s2 + $0x58] sm:$0xf0] }
 0x4dc   :  { %v2870_v5 = vsub.f32 1.0, %v2869_v35  ;;  %v4801_v19 = vor.u32 %v5262_v28, %v4798_v48  ;;  %vm8193_vm0 = vcmp.eq.f32.partialorder %v2907_v22, 8.507059e+37  ;;  %vm2903_vm1 = vweird.f32 %v8090_v52  ;;  %v5256_v6 = vld [vmem:[%s8710_s2 + $0x2c] sm:$0xf0]  ;;  %v4772_v48 = vld [vmem:[%s8710_s2 + $0x28] sm:$0xf] }
 0x4dd   :  { %v2856_v42 = vmul.f32 %v8087_v16, %v2855_v25  ;;  %5542 = vrcp.f32 %v8108_v4  ;;  %v2924_v58 = vand.u32 2147483648, %v8108_v4  ;;  %v2922_v39 = vand.u32 2147483647, %v8108_v4  ;;  %v5254_v25 = vld [vmem:[%s8710_s2 + $0x24] sm:$0xf] }
 0x4de   :  { %v2871_v0 = vmul.f32 %v8092_v50, %v2870_v5  ;;  %5544 = vpow2.f32 %v4743_v26  ;;  %3185 = vmatpush.bf16.msrb.mxu1 %v4801_v19  ;;  %v2910_v28 = vor.u32 1.1754944e-38, %v2909_v40  ;;  %v4793_v2 = vor.u32 %v5259_v44, %v4790_v14  ;;  %v4750_v40 = vld [vmem:[%s8710_s2 + $0x10] sm:$0xf0] }
 0x4df   :  { %v8136_v30 = vpop.eup %5536  ;;  %v2857_v18 = vadd.f32 %v8087_v16, %v2856_v42  ;;  %5546 = vtanh.f32 %v2827_v23  ;;  %v4765_v9 = vor.u32 %v5256_v6, %v4764_v34  ;;  %vm2918_vm5 = vweird.f32 %v8108_v4 }
 0x4e0   :  { %v5539_v20 = vpop.eup %5538  ;;  %v2872_v31 = vadd.f32 %v8092_v50, %v2871_v0  ;;  %v2884_v24 = vmul.f32 %v8136_v30, %v8085_v13  ;;  %v5257_v0 = vld [vmem:[%s8710_s2 + $0x34] sm:$0xf0]  ;;  %3214 = vmatpush.bf16.msrb.mxu3 %v4793_v2  ;;  %vm2923_vm7 = vcmp.eq.f32.partialorder %v2922_v39, 8.507059e+37  ;;  %vm2888_vm9 = vweird.f32 %v8085_v13 }
 0x4e1   :  { %v8170_v43 = vpop.eup %5540  ;;  %v2861_v32 = vsel %vm8143_vm13, %v8087_v16, %v2857_v18  ;;  %v5261_v16 = vld [vmem:[%s8710_s2 + $0x54] sm:$0xf0]  ;;  %v4769_v18 = vor.u32 %v5254_v25, %v4766_v45  ;;  %v4773_v63 = vor.u32 %v5257_v0, %v4772_v48 }
 0x4e2   :  { %v2866_v56 = vsel %vm8102_vm8, %v2865_v53, %v2861_v32  ;;  %v2876_v49 = vsel %vm8159_vm15, %v8092_v50, %v2872_v31  ;;  %v2899_v8 = vmul.f32 %v8170_v43, %v8090_v52  ;;  %vm2904_vm2 = vweird.f32 %v8170_v43  ;;  %3186 = vmatpush.bf16.msrb.mxu1 %v4785_v36  ;;  %v5253_v32 = vld [vmem:[%s8710_s2 + $0x14] sm:$0xf0] }
 0x4e3   :  { %v8206_v3 = vpop.eup %5542  ;;  %v2881_v50 = vsel %vm8147_vm14, %v2880_v60, %v2876_v49  ;;  %v2947_v37 = vmul.f32 %v5539_v20, %v2866_v56  ;;  %v2885_v5 = vsub.f32 1.0, %v2884_v24  ;;  %v4781_v53 = vor.u32 %v5260_v46, %v4780_v29  ;;  %vm8243_vm3 = vmor %vm2903_vm1, %vm2904_vm2  ;;  %v5252_v20 = vld [vmem:[%s8710_s2 + $0xc] sm:$0xf0]  ;;  %v4756_v29 = vld [vmem:[%s8710_s2 + $0x8] sm:$0xf] }
 0x4e4   :  { %v2945_v35 = vmul.f32 %v2881_v50, %v7844_v47  ;;  %v2900_v27 = vsub.f32 1.0, %v2899_v8  ;;  %v2914_v12 = vmul.f32 %v8206_v3, %v8108_v4  ;;  %v5545_v26 = vpop.eup %5544  ;;  %v4789_v47 = vor.u32 %v5261_v16, %v4788_v62 }
 0x4e5   :  { %v8247_v22 = vadd.f32 1.0, %v5545_v26  ;;  %3172 = vmatpush.bf16.msrb.mxu0 %v4781_v53  ;;  %v5547_v52 = vpop.eup %5546  ;;  %vm2919_vm4 = vweird.f32 %v8206_v3  ;;  %v2886_v31 = vmul.f32 %v8136_v30, %v2885_v5  ;;  %v4777_v46 = vor.u32 %v5255_v7, %v4774_v21 }
 0x4e6   :  { %v8230_v17 = vadd.f32 %v2947_v37, %v2945_v35  ;;  %v2915_v60 = vsub.f32 1.0, %v2914_v12  ;;  %v2901_v42 = vmul.f32 %v8170_v43, %v2900_v27  ;;  %3200 = vmatpush.bf16.msrb.mxu2 %v4789_v47  ;;  %vm2920_vm6 = vmor %vm2918_vm5, %vm2919_vm4  ;;  %v2925_v56 = vor.u32 1.1754944e-38, %v2924_v58  ;;  %3187 = vmatpush.bf16.msrb.mxu1 %v4769_v18 }
 0x4e7   :  { %5548 = vrcp.f32 %v8247_v22  ;;  %v4749_v49 = vor.u32 %v5252_v20, %v4748_v59  ;;  %v4753_v16 = vor.u32 %v5250_v54, %v4750_v40  ;;  %v4757_v44 = vor.u32 %v5253_v32, %v4756_v29  ;;  %3215 = vmatpush.bf16.msrb.mxu3 %v4777_v46  ;;  %v5312_v59 = vld [vmem:[%s8710_s2 + $0xec] sm:$0xf0]  ;;  %v5310_v20 = vld [vmem:[%s8710_s2 + $0xe4] sm:$0xf]  ;;  %v5004_v40 = vld [vmem:[%s8710_s2 + $0xe8] sm:$0xf] }
 0x4e8   :  { %v2916_v55 = vmul.f32 %v8206_v3, %v2915_v60  ;;  %v2902_v33 = vadd.f32 %v8170_v43, %v2901_v42  ;;  %5550 = vtanh.f32 %v8230_v17  ;;  %v4761_v58 = vor.u32 %v5251_v38, %v4758_v11  ;;  %v5313_v29 = vld [vmem:[%s8710_s2 + $0xf4] sm:$0xf0]  ;;  %v5311_v46 = vld [vmem:[%s8710_s2 + $0xec] sm:$0xf]  ;;  %v5006_v38 = vld [vmem:[%s8710_s2 + $0xf8] sm:$0xf0] }
 0x4e9   :  { %3173 = vmatpush.bf16.msrb.mxu0 %v4765_v9  ;;  %v2887_v61 = vadd.f32 %v8136_v30, %v2886_v31  ;;  %vm2889_vm8 = vweird.f32 %v8136_v30  ;;  %v2894_v37 = vand.u32 2147483648, %v8085_v13  ;;  %v2939_v27 = vand.u32 2147483648, %v8247_v22  ;;  %v8850_v9 = vld [vmem:[#allocation25_spill] sm:$0xff]  ;;  %v4998_v31 = vld [vmem:[%s8710_s2 + $0xf0] sm:$0xf0] }
 0x4ea   :  { %v2906_v24 = vsel %vm8243_vm3, %v8170_v43, %v2902_v33  ;;  %v2917_v19 = vadd.f32 %v8206_v3, %v2916_v55  ;;  %3201 = vmatpush.bf16.msrb.mxu2 %v4773_v63  ;;  %3188 = vmatpush.bf16.msrb.mxu1 %v4753_v16  ;;  %vm2890_vm10 = vmor %vm2888_vm9, %vm2889_vm8  ;;  %vm2933_vm13 = vweird.f32 %v8247_v22  ;;  %v380_v18 = vadd.f32 %v8850_v9, %v6185_v1  ;;  %v4996_v33 = vld [vmem:[%s8710_s2 + $0xe0] sm:$0xf] }
 0x4eb   :  { %v2911_v43 = vsel %vm8193_vm0, %v2910_v28, %v2906_v24  ;;  %3216 = vmatpush.bf16.msrb.mxu3 %v4761_v58  ;;  %v2891_v34 = vsel %vm2890_vm10, %v8136_v30, %v2887_v61  ;;  %v2895_v35 = vor.u32 1.1754944e-38, %v2894_v37  ;;  %v2940_v5 = vor.u32 1.1754944e-38, %v2939_v27  ;;  %v5309_v58 = vld [vmem:[%s8710_s2 + $0xd4] sm:$0xf0] }
 0x4ec   :  { %v2921_v8 = vsel %vm2920_vm6, %v8206_v3, %v2917_v19  ;;  %v2948_v62 = vmul.f32 %v5547_v52, %v2911_v43  ;;  %v2892_v3 = vand.u32 2147483647, %v8085_v13  ;;  %v2937_v13 = vand.u32 2147483647, %v8247_v22  ;;  %v5308_v43 = vld [vmem:[%s8710_s2 + $0xcc] sm:$0xf0] }
 0x4ed   :  { %v2926_v50 = vsel %vm2923_vm7, %v2925_v56, %v2921_v8  ;;  %v5549_v39 = vpop.eup %5548  ;;  %3174 = vmatpush.bf16.msrb.mxu0 %v4749_v49  ;;  %v4997_v54 = vor.u32 %v5312_v59, %v4996_v33  ;;  %v5001_v19 = vor.u32 %v5310_v20, %v4998_v31  ;;  %v5005_v63 = vor.u32 %v5313_v29, %v5004_v40  ;;  %v4980_v56 = vld [vmem:[%s8710_s2 + $0xc0] sm:$0xf]  ;;  %v5306_v49 = vld [vmem:[%s8710_s2 + $0xc4] sm:$0xf]  ;;  %v8851_v8 = vld [vmem:[#allocation27_spill] sm:$0xff] }
 0x4ee   :  { %v2946_v4 = vmul.f32 %v2926_v50, %v7949_v41  ;;  %v2929_v14 = vmul.f32 %v5549_v39, %v8247_v22  ;;  %3202 = vmatpush.bf16.msrb.mxu2 %v4757_v44  ;;  %v5551_v6 = vpop.eup %5550  ;;  %vm2893_vm11 = vcmp.eq.f32.partialorder %v2892_v3, 8.507059e+37  ;;  %vm2934_vm12 = vweird.f32 %v5549_v39  ;;  %v8849_v22 = vld [vmem:[#allocation24_spill] sm:$0xff]  ;;  %v4982_v44 = vld [vmem:[%s8710_s2 + $0xd0] sm:$0xf0]  ;;  %v4988_v50 = vld [vmem:[%s8710_s2 + $0xc8] sm:$0xf] }
 0x4ef   :  { %v2896_v25 = vsel %vm2893_vm11, %v2895_v35, %v2891_v34  ;;  %vm2935_vm14 = vmor %vm2933_vm13, %vm2934_vm12  ;;  %vm2938_vm15 = vcmp.eq.f32.partialorder %v2937_v13, 8.507059e+37  ;;  %v331_v2 = vadd.f32 %v8849_v22, %v6182_v10  ;;  %3583 = vmatpush.bf16.msra.mxu1 %v5001_v19  ;;  %v5009_v11 = vor.u32 %v5311_v46, %v5006_v38  ;;  %v8852_v61 = vld [vmem:[#allocation28_spill] sm:$0xff]  ;;  %v4948_v33 = vld [vmem:[%s8710_s2 + $0x80] sm:$0xf] }
 0x4f0   :  { %v8305_v15 = vadd.f32 %v2948_v62, %v2946_v4  ;;  %v2930_v41 = vsub.f32 1.0, %v2929_v14  ;;  %v2953_v26 = vmul.f32 %v5551_v6, %v2896_v25  ;;  %v478_v62 = vadd.f32 %v8851_v8, %v6218_v57  ;;  %v4990_v6 = vld [vmem:[%s8710_s2 + $0xd8] sm:$0xf0]  ;;  %v5305_v22 = vld [vmem:[%s8710_s2 + $0xb4] sm:$0xf0]  ;;  %v8854_v31 = vld [vmem:[#allocation26_spill] sm:$0xff] }
 0x4f1   :  { %3569 = vmatpush.bf16.msra.mxu0 %v4997_v54  ;;  %v4981_v16 = vor.u32 %v5308_v43, %v4980_v56  ;;  %v333_v4 = vadd.f32 %v8852_v61, %v6182_v10  ;;  %3611 = vmatpush.bf16.msra.mxu3 %v5009_v11  ;;  %v4985_v14 = vor.u32 %v5306_v49, %v4982_v44  ;;  %v5300_v59 = vld [vmem:[%s8710_s2 + $0x8c] sm:$0xf0]  ;;  %v5298_v20 = vld [vmem:[%s8710_s2 + $0x84] sm:$0xf]  ;;  %v4950_v54 = vld [vmem:[%s8710_s2 + $0x90] sm:$0xf0] }
 0x4f2   :  { %5552 = vtanh.f32 %v8305_v15  ;;  %v2931_v12 = vmul.f32 %v5549_v39, %v2930_v41  ;;  %v2955_v60 = vpack.c.bf16 %v2953_v26, %v2953_v26  ;;  %3597 = vmatpush.bf16.msra.mxu2 %v5005_v63  ;;  %v4989_v34 = vor.u32 %v5309_v58, %v4988_v50  ;;  %v5307_v41 = vld [vmem:[%s8710_s2 + $0xcc] sm:$0xf]  ;;  %v8855_v19 = vld [vmem:[#allocation31_spill] sm:$0xff]  ;;  %v4958_v56 = vld [vmem:[%s8710_s2 + $0x98] sm:$0xf0] }
 0x4f3   :  { %v4993_v13 = vor.u32 %v5307_v41, %v4990_v6  ;;  %3584 = vmatpush.bf16.msra.mxu1 %v4985_v14  ;;  %v429_v40 = vadd.f32 %v8854_v31, %v6277_v51  ;;  %v480_v63 = vadd.f32 %v8855_v19, %v6218_v57  ;;  %v4949_v38 = vor.u32 %v5300_v59, %v4948_v33  ;;  %v5299_v11 = vld [vmem:[%s8710_s2 + $0x8c] sm:$0xf]  ;;  %v4932_v44 = vld [vmem:[%s8710_s2 + $0x60] sm:$0xf]  ;;  %v5296_v50 = vld [vmem:[%s8710_s2 + $0x6c] sm:$0xf0] }
 0x4f4   :  { %v2932_v45 = vadd.f32 %v5549_v39, %v2931_v12  ;;  %v3003_v48 = vunpack.c.l.b16 %v2955_v60  ;;  %v4972_v60 = vld [vmem:[%s8710_s2 + $0xa8] sm:$0xf]  ;;  %v4953_v8 = vor.u32 %v5298_v20, %v4950_v54  ;;  %v5294_v58 = vld [vmem:[%s8710_s2 + $0x64] sm:$0xf]  ;;  %v5292_v33 = vld [vmem:[%s8710_s2 + $0x4c] sm:$0xf0] }
 0x4f5   :  { %3570 = vmatpush.bf16.msra.mxu0 %v4981_v16  ;;  %3612 = vmatpush.bf16.msra.mxu3 %v4993_v13  ;;  %v4961_v16 = vor.u32 %v5299_v11, %v4958_v56  ;;  %v5290_v31 = vld [vmem:[%s8710_s2 + $0x44] sm:$0xf] }
 0x4f6   :  { %v2936_v53 = vsel %vm2935_vm14, %v5549_v39, %v2932_v45  ;;  %v8853_v39 = vld [vmem:[#allocation29_spill] sm:$0xff]  ;;  %3598 = vmatpush.bf16.msra.mxu2 %v4989_v34 }
 0x4f7   :  { %v2941_v36 = vsel %vm2938_vm15, %v2940_v5, %v2936_v53  ;;  %v382_v37 = vadd.f32 %v8853_v39, %v6185_v1  ;;  %v5304_v5 = vld [vmem:[%s8710_s2 + $0xac] sm:$0xf0] }
 0x4f8   :  { %v5553_v30 = vpop.eup %5552 }
 0x4f9   :  { %v2954_v47 = vmul.f32 %v5553_v30, %v2941_v36  ;;  %v5302_v30 = vld [vmem:[%s8710_s2 + $0xa4] sm:$0xf] }
 0x4fb   :  { %v2956_v42 = vpack.c.bf16 %v2954_v47, %v2954_v47  ;;  %v5342_v28 = vpack.c.bf16 %v2954_v47, %v2953_v26  ;;  %v4964_v26 = vld [vmem:[%s8710_s2 + $0xa0] sm:$0xf]  ;;  %v4966_v47 = vld [vmem:[%s8710_s2 + $0xb0] sm:$0xf0] }
 0x4fc   :  { %v4965_v36 = vor.u32 %v5304_v5, %v4964_v26 }
 0x4fd   :  { %5358 = vst [vmem:[%s8713_s4 + $0x28] sm:$0xff] %v5342_v28   ;;  %v3004_v0 = vunpack.c.l.b16 %v2956_v42 }
 0x4fe   :  { %3571 = vmatpush.bf16.msra.mxu0 %v4965_v36 }
 0x4ff   :  { %v3005_v23 = vpack.c.b16 %v3004_v0, %v3003_v48 }
 0x501   :  { %3175 = vmatmul.bf16.vlgmr.msrb.gmra.mxu0 %v3005_v23  ;;  %3189 = vmatmul.bf16.vlgmr.msrb.gmra.mxu1 %v3005_v23 }
 0x502   :  { %3203 = vmatmul.bf16.vlgmr.msrb.gmra.mxu2 %v3005_v23  ;;  %3217 = vmatmul.bf16.vlgmr.msrb.gmra.mxu3 %v3005_v23  ;;  %v4969_v23 = vor.u32 %v5302_v30, %v4966_v47  ;;  %v4910_v30 = vld [vmem:[%s8710_s2 + $0x38] sm:$0xf0] }
 0x503   :  { %3572 = vmatpush.bf16.msra.mxu0 %v4949_v38 }
 0x504   :  { %3585 = vmatpush.bf16.msra.mxu1 %v4969_v23  ;;  %v5297_v23 = vld [vmem:[%s8710_s2 + $0x74] sm:$0xf0] }
 0x508   :  { %3586 = vmatpush.bf16.msra.mxu1 %v4953_v8  ;;  %v5293_v8 = vld [vmem:[%s8710_s2 + $0x54] sm:$0xf0] }
 0x57e   :  { %v3176_v7 = vpop.f32.mrf.mxu0  ;;  %v3190_v21 = vpop.f32.mrf.mxu1 }
 0x57f   :  { %v3223_v52 = vadd.f32 %v3176_v7, %v331_v2  ;;  %v3224_v55 = vadd.f32 %v3190_v21, %v380_v18  ;;  %v4973_v18 = vor.u32 %v5305_v22, %v4972_v60  ;;  %v5303_v7 = vld [vmem:[%s8710_s2 + $0xac] sm:$0xf]  ;;  %v4974_v21 = vld [vmem:[%s8710_s2 + $0xb8] sm:$0xf0] }
 0x581   :  { %v4874_v32 = vmul.f32 -1.442695, %v3223_v52  ;;  %v4875_v24 = vmul.f32 -1.442695, %v3224_v55  ;;  %v4977_v55 = vor.u32 %v5303_v7, %v4974_v21  ;;  %3599 = vmatpush.bf16.msra.mxu2 %v4973_v18  ;;  %v5295_v18 = vld [vmem:[%s8710_s2 + $0x6c] sm:$0xf] }
 0x582   :  { %v4942_v21 = vld [vmem:[%s8710_s2 + $0x78] sm:$0xf0] }
 0x583   :  { %5554 = vpow2.f32 %v4874_v32  ;;  %3613 = vmatpush.bf16.msra.mxu3 %v4977_v55  ;;  %v4956_v32 = vld [vmem:[%s8710_s2 + $0x88] sm:$0xf]  ;;  %v4916_v55 = vld [vmem:[%s8710_s2 + $0x40] sm:$0xf] }
 0x584   :  { %5556 = vpow2.f32 %v4875_v24  ;;  %v5301_v24 = vld [vmem:[%s8710_s2 + $0x94] sm:$0xf0] }
 0x585   :  { %v3218_v3 = vpop.f32.mrf.mxu3  ;;  %v3204_v28 = vpop.f32.mrf.mxu2 }
 0x586   :  { %v3226_v35 = vadd.f32 %v3218_v3, %v478_v62  ;;  %v3178_v27 = vpop.f32.mrf.mxu0  ;;  %v3192_v12 = vpop.f32.mrf.mxu1  ;;  %v3225_v49 = vadd.f32 %v3204_v28, %v429_v40  ;;  %v4957_v62 = vor.u32 %v5301_v24, %v4956_v32  ;;  %v4934_v3 = vld [vmem:[%s8710_s2 + $0x70] sm:$0xf0] }
 0x587   :  { %v3227_v25 = vadd.f32 %v3178_v27, %v333_v4  ;;  %v3228_v45 = vadd.f32 %v3192_v12, %v382_v37  ;;  %v4933_v37 = vor.u32 %v5296_v50, %v4932_v44  ;;  %v4937_v6 = vor.u32 %v5294_v58, %v4934_v3  ;;  %v8856_v27 = vld [vmem:[#allocation30_spill] sm:$0xff]  ;;  %3614 = vmatpush.bf16.msra.mxu3 %v4961_v16  ;;  %v4918_v40 = vld [vmem:[%s8710_s2 + $0x50] sm:$0xf0]  ;;  %v4926_v16 = vld [vmem:[%s8710_s2 + $0x58] sm:$0xf0] }
 0x588   :  { %v4876_v53 = vmul.f32 -1.442695, %v3226_v35  ;;  %3600 = vmatpush.bf16.msra.mxu2 %v4957_v62  ;;  %v431_v12 = vadd.f32 %v8856_v27, %v6277_v51  ;;  %v5291_v62 = vld [vmem:[%s8710_s2 + $0x4c] sm:$0xf]  ;;  %v4908_v27 = vld [vmem:[%s8710_s2 + $0x28] sm:$0xf] }
 0x589   :  { %v5555_v42 = vpop.eup %5554  ;;  %v4877_v48 = vmul.f32 -1.442695, %v3227_v25  ;;  %v4878_v0 = vmul.f32 -1.442695, %v3228_v45  ;;  %3573 = vmatpush.bf16.msra.mxu0 %v4933_v37  ;;  %3587 = vmatpush.bf16.msra.mxu1 %v4937_v6  ;;  %v5286_v37 = vld [vmem:[%s8710_s2 + $0x24] sm:$0xf]  ;;  %v4921_v6 = vor.u32 %v5290_v31, %v4918_v40 }
 0x58a   :  { %v5557_v2 = vpop.eup %5556  ;;  %v8392_v9 = vadd.f32 1.0, %v5555_v42  ;;  %5558 = vpow2.f32 %v4876_v53  ;;  %v4892_v31 = vld [vmem:[%s8710_s2 + $0x8] sm:$0xf]  ;;  %v5285_v40 = vld [vmem:[%s8710_s2 + $0x14] sm:$0xf0] }
 0x58b   :  { %v8400_v52 = vadd.f32 1.0, %v5557_v2  ;;  %5560 = vpow2.f32 %v4877_v48 }
 0x58c   :  { %5562 = vrcp.f32 %v8392_v9  ;;  %v3264_v46 = vand.u32 2147483647, %v8392_v9  ;;  %v3266_v34 = vand.u32 2147483648, %v8392_v9  ;;  %vm3260_vm4 = vweird.f32 %v8392_v9 }
 0x58d   :  { %5564 = vrcp.f32 %v8400_v52  ;;  %v3220_v29 = vpop.f32.mrf.mxu3  ;;  %v3281_v25 = vand.u32 2147483648, %v8400_v52  ;;  %v3206_v45 = vpop.f32.mrf.mxu2  ;;  %v3279_v53 = vand.u32 2147483647, %v8400_v52  ;;  %vm3275_vm3 = vweird.f32 %v8400_v52  ;;  %3588 = vmatpush.bf16.msra.mxu1 %v4921_v6 }
 0x58e   :  { %5566 = vpow2.f32 %v4878_v0  ;;  %v3230_v39 = vadd.f32 %v3220_v29, %v480_v63  ;;  %vm8462_vm0 = vcmp.eq.f32.partialorder %v3264_v46, 8.507059e+37  ;;  %v3267_v28 = vor.u32 1.1754944e-38, %v3266_v34  ;;  %v4940_v0 = vld [vmem:[%s8710_s2 + $0x68] sm:$0xf] }
 0x58f   :  { %v3229_v48 = vadd.f32 %v3206_v45, %v431_v12  ;;  %v3282_v22 = vor.u32 1.1754944e-38, %v3281_v25  ;;  %vm8504_vm6 = vcmp.eq.f32.partialorder %v3279_v53, 8.507059e+37  ;;  %v4941_v54 = vor.u32 %v5297_v23, %v4940_v0  ;;  %v4924_v46 = vld [vmem:[%s8710_s2 + $0x48] sm:$0xf]  ;;  %v5289_v12 = vld [vmem:[%s8710_s2 + $0x34] sm:$0xf0] }
 0x590   :  { %v5559_v43 = vpop.eup %5558  ;;  %v4879_v60 = vmul.f32 -1.442695, %v3230_v39  ;;  %v5288_v39 = vld [vmem:[%s8710_s2 + $0x2c] sm:$0xf0] }
 0x591   :  { %v5561_v61 = vpop.eup %5560  ;;  %v8442_v4 = vadd.f32 1.0, %v5559_v43  ;;  %3601 = vmatpush.bf16.msra.mxu2 %v4941_v54  ;;  %v4945_v43 = vor.u32 %v5295_v18, %v4942_v21  ;;  %v4909_v21 = vor.u32 %v5289_v12, %v4908_v27 }
 0x592   :  { %v8447_v14 = vpop.eup %5562  ;;  %v8450_v41 = vadd.f32 1.0, %v5561_v61  ;;  %v4900_v61 = vld [vmem:[%s8710_s2 + $0x20] sm:$0xf] }
 0x593   :  { %v8452_v35 = vpop.eup %5564  ;;  %v3256_v13 = vmul.f32 %v8447_v14, %v8392_v9  ;;  %5568 = vrcp.f32 %v8442_v4  ;;  %vm3261_vm1 = vweird.f32 %v8447_v14  ;;  %3615 = vmatpush.bf16.msra.mxu3 %v4945_v43 }
 0x594   :  { %v5567_v26 = vpop.eup %5566  ;;  %v3271_v5 = vmul.f32 %v8452_v35, %v8400_v52  ;;  %5570 = vtanh.f32 %v3225_v49  ;;  %vm3276_vm2 = vweird.f32 %v8452_v35  ;;  %vm8500_vm5 = vmor %vm3260_vm4, %vm3261_vm1  ;;  %v3309_v63 = vand.u32 2147483647, %v8450_v41 }
 0x595   :  { %v3257_v36 = vsub.f32 1.0, %v3256_v13  ;;  %5572 = vrcp.f32 %v8450_v41  ;;  %v8468_v47 = vadd.f32 1.0, %v5567_v26  ;;  %vm8516_vm7 = vmor %vm3275_vm3, %vm3276_vm2  ;;  %v4917_v49 = vor.u32 %v5292_v33, %v4916_v55  ;;  %v5282_v33 = vld [vmem:[%s8710_s2 + $0x4] sm:$0xf] }
 0x596   :  { %v3272_v42 = vsub.f32 1.0, %v3271_v5  ;;  %vm3305_vm8 = vweird.f32 %v8450_v41  ;;  %v3311_v26 = vand.u32 2147483648, %v8450_v41  ;;  %v5287_v5 = vld [vmem:[%s8710_s2 + $0x2c] sm:$0xf]  ;;  %vm3310_vm13 = vcmp.eq.f32.partialorder %v3309_v63, 8.507059e+37 }
 0x597   :  { %v3258_v2 = vmul.f32 %v8447_v14, %v3257_v36  ;;  %5574 = vrcp.f32 %v8468_v47  ;;  %v3326_v19 = vand.u32 2147483648, %v8468_v47  ;;  %vm3320_vm9 = vweird.f32 %v8468_v47  ;;  %3574 = vmatpush.bf16.msra.mxu0 %v4917_v49 }
 0x598   :  { %v3273_v7 = vmul.f32 %v8452_v35, %v3272_v42  ;;  %5576 = vpow2.f32 %v4879_v60  ;;  %v4925_v60 = vor.u32 %v5293_v8, %v4924_v46  ;;  %v4929_v42 = vor.u32 %v5291_v62, %v4926_v16  ;;  %v4894_v46 = vld [vmem:[%s8710_s2 + $0x18] sm:$0xf0] }
 0x599   :  { %v8495_v59 = vpop.eup %5568  ;;  %v3259_v20 = vadd.f32 %v8447_v14, %v3258_v2  ;;  %5578 = vtanh.f32 %v3229_v48  ;;  %v5284_v2 = vld [vmem:[%s8710_s2 + $0xc] sm:$0xf0]  ;;  %v4913_v55 = vor.u32 %v5287_v5, %v4910_v30  ;;  %v3324_v54 = vand.u32 2147483647, %v8468_v47 }
 0x59a   :  { %v5571_v29 = vpop.eup %5570  ;;  %v3274_v24 = vadd.f32 %v8452_v35, %v3273_v7  ;;  %v3286_v56 = vmul.f32 %v8495_v59, %v8442_v4  ;;  %3602 = vmatpush.bf16.msra.mxu2 %v4925_v60  ;;  %3616 = vmatpush.bf16.msra.mxu3 %v4929_v42  ;;  %v3312_v32 = vor.u32 1.1754944e-38, %v3311_v26  ;;  %v4893_v8 = vor.u32 %v5285_v40, %v4892_v31  ;;  %v8869_v31 = vld [vmem:[#allocation37_spill] sm:$0xff] }
 0x59b   :  { %v8526_v38 = vpop.eup %5572  ;;  %v3263_v11 = vsel %vm8500_vm5, %v8447_v14, %v3259_v20  ;;  %v4886_v20 = vld [vmem:[%s8710_s2 + $0x10] sm:$0xf0]  ;;  %vm3325_vm15 = vcmp.eq.f32.partialorder %v3324_v54, 8.507059e+37  ;;  %vm3290_vm1 = vweird.f32 %v8442_v4  ;;  %v387_v40 = vadd.f32 %v8869_v31, %v6185_v1 }
 0x59c   :  { %v3268_v44 = vsel %vm8462_vm0, %v3267_v28, %v3263_v11  ;;  %v3278_v50 = vsel %vm8516_vm7, %v8452_v35, %v3274_v24  ;;  %v3301_v58 = vmul.f32 %v8526_v38, %v8450_v41  ;;  %v4902_v35 = vld [vmem:[%s8710_s2 + $0x30] sm:$0xf0]  ;;  %v3287_v36 = vsub.f32 1.0, %v3286_v56  ;;  %v5283_v24 = vld [vmem:[%s8710_s2 + $0xc] sm:$0xf] }
 0x59d   :  { %v8559_v3 = vpop.eup %5574  ;;  %v3283_v14 = vsel %vm8504_vm6, %v3282_v22, %v3278_v50  ;;  %v3349_v34 = vmul.f32 %v5571_v29, %v3268_v44  ;;  %vm3306_vm10 = vweird.f32 %v8526_v38  ;;  %v4884_v22 = vld [vmem:[%s8710_s2] sm:$0xf]  ;;  %v4905_v7 = vor.u32 %v5286_v37, %v4902_v35 }
 0x59e   :  { %v3347_v13 = vmul.f32 %v3283_v14, %v8230_v17  ;;  %v3302_v25 = vsub.f32 1.0, %v3301_v58  ;;  %v3316_v45 = vmul.f32 %v8559_v3, %v8468_v47  ;;  %v5577_v53 = vpop.eup %5576  ;;  %v4901_v17 = vor.u32 %v5288_v39, %v4900_v61  ;;  %vm3307_vm12 = vmor %vm3305_vm8, %vm3306_vm10  ;;  %3603 = vmatpush.bf16.msra.mxu2 %v4909_v21  ;;  %3617 = vmatpush.bf16.msra.mxu3 %v4913_v55 }
 0x59f   :  { %v5579_v28 = vpop.eup %5578  ;;  %v8593_v18 = vadd.f32 1.0, %v5577_v53  ;;  %vm3321_vm11 = vweird.f32 %v8559_v3  ;;  %v3288_v29 = vmul.f32 %v8495_v59, %v3287_v36  ;;  %3589 = vmatpush.bf16.msra.mxu1 %v4905_v7  ;;  %v4885_v43 = vor.u32 %v5284_v2, %v4884_v22 }
 0x5a0   :  { %v8583_v48 = vadd.f32 %v3349_v34, %v3347_v13  ;;  %v3317_v0 = vsub.f32 1.0, %v3316_v45  ;;  %v3303_v23 = vmul.f32 %v8526_v38, %v3302_v25  ;;  %3575 = vmatpush.bf16.msra.mxu0 %v4901_v17  ;;  %v4889_v49 = vor.u32 %v5282_v33, %v4886_v20  ;;  %vm3322_vm14 = vmor %vm3320_vm9, %vm3321_vm11  ;;  %v8867_v20 = vld [vmem:[#allocation34_spill] sm:$0xff] }
 0x5a1   :  { %5580 = vrcp.f32 %v8593_v18  ;;  %v3327_v41 = vor.u32 1.1754944e-38, %v3326_v19  ;;  %v4897_v16 = vor.u32 %v5283_v24, %v4894_v46  ;;  %v3289_v50 = vadd.f32 %v8495_v59, %v3288_v29 }
 0x5a2   :  { %v3318_v9 = vmul.f32 %v8559_v3, %v3317_v0  ;;  %v3304_v52 = vadd.f32 %v8526_v38, %v3303_v23  ;;  %5582 = vtanh.f32 %v8583_v48  ;;  %vm3291_vm0 = vweird.f32 %v8495_v59  ;;  %3604 = vmatpush.bf16.msra.mxu2 %v4893_v8  ;;  %v8866_v23 = vld [vmem:[#allocation33_spill] sm:$0xff] }
 0x5a3   :  { %3590 = vmatpush.bf16.msra.mxu1 %v4889_v49  ;;  %v3296_v58 = vand.u32 2147483648, %v8442_v4  ;;  %3618 = vmatpush.bf16.msra.mxu3 %v4897_v16  ;;  %v3294_v61 = vand.u32 2147483647, %v8442_v4  ;;  %vm3292_vm2 = vmor %vm3290_vm1, %vm3291_vm0  ;;  %v3341_v6 = vand.u32 2147483648, %v8593_v18  ;;  %v3339_v27 = vand.u32 2147483647, %v8593_v18 }
 0x5a4   :  { %v3308_v11 = vsel %vm3307_vm12, %v8526_v38, %v3304_v52  ;;  %v3319_v56 = vadd.f32 %v8559_v3, %v3318_v9  ;;  %3576 = vmatpush.bf16.msra.mxu0 %v4885_v43  ;;  %vm3335_vm5 = vweird.f32 %v8593_v18  ;;  %v385_v22 = vadd.f32 %v8866_v23, %v6185_v1  ;;  %v8868_v52 = vld [vmem:[#allocation35_spill] sm:$0xff]  ;;  %v8870_v1 = vld [vmem:[#allocation36_spill] sm:$0xff] }
 0x5a5   :  { %v3313_v63 = vsel %vm3310_vm13, %v3312_v32, %v3308_v11  ;;  %v3297_v34 = vor.u32 1.1754944e-38, %v3296_v58  ;;  %vm3295_vm3 = vcmp.eq.f32.partialorder %v3294_v61, 8.507059e+37  ;;  %v3342_v25 = vor.u32 1.1754944e-38, %v3341_v6 }
 0x5a6   :  { %v3323_v62 = vsel %vm3322_vm14, %v8559_v3, %v3319_v56  ;;  %v3350_v38 = vmul.f32 %v5579_v28, %v3313_v63  ;;  %v3293_v3 = vsel %vm3292_vm2, %v8495_v59, %v3289_v50  ;;  %vm3340_vm7 = vcmp.eq.f32.partialorder %v3339_v27, 8.507059e+37  ;;  %v8865_v28 = vld [vmem:[#allocation32_spill] sm:$0xff]  ;;  %v8871_v50 = vld [vmem:[#allocation38_spill] sm:$0xff]  ;;  %v8872_v27 = vld [vmem:[#allocation39_spill] sm:$0xff] }
 0x5a7   :  { %v3328_v44 = vsel %vm3325_vm15, %v3327_v41, %v3323_v62  ;;  %v5581_v19 = vpop.eup %5580  ;;  %v3298_v4 = vsel %vm3295_vm3, %v3297_v34, %v3293_v3  ;;  %v336_v0 = vadd.f32 %v8865_v28, %v6182_v10  ;;  %v483_v9 = vadd.f32 %v8867_v20, %v6218_v57 }
 0x5a8   :  { %v3348_v47 = vmul.f32 %v3328_v44, %v8305_v15  ;;  %v3331_v37 = vmul.f32 %v5581_v19, %v8593_v18  ;;  %v5583_v15 = vpop.eup %5582  ;;  %vm3336_vm4 = vweird.f32 %v5581_v19  ;;  %v338_v54 = vadd.f32 %v8868_v52, %v6182_v10 }
 0x5a9   :  { %v3355_v13 = vmul.f32 %v5583_v15, %v3298_v4  ;;  %vm3337_vm6 = vmor %vm3335_vm5, %vm3336_vm4  ;;  %v434_v16 = vadd.f32 %v8870_v1, %v6277_v51  ;;  %v436_v4 = vadd.f32 %v8872_v27, %v6277_v51 }
 0x5aa   :  { %v8641_v39 = vadd.f32 %v3350_v38, %v3348_v47  ;;  %v3332_v14 = vsub.f32 1.0, %v3331_v37  ;;  %v485_v47 = vadd.f32 %v8871_v50, %v6218_v57 }
 0x5ab   :  { %v3357_v30 = vpack.c.bf16 %v3355_v13, %v3355_v13 }
 0x5ac   :  { %5584 = vtanh.f32 %v8641_v39  ;;  %v3333_v35 = vmul.f32 %v5581_v19, %v3332_v14 }
 0x5ad   :  { %v3405_v60 = vunpack.c.l.b16 %v3357_v30 }
 0x5ae   :  { %v3334_v12 = vadd.f32 %v5581_v19, %v3333_v35 }
 0x5b0   :  { %v3338_v45 = vsel %vm3337_vm6, %v5581_v19, %v3334_v12 }
 0x5b1   :  { %v3343_v26 = vsel %vm3340_vm7, %v3342_v25, %v3338_v45 }
 0x5b2   :  { %v5585_v59 = vpop.eup %5584 }
 0x5b3   :  { %v3356_v5 = vmul.f32 %v5585_v59, %v3343_v26 }
 0x5b5   :  { %v3358_v53 = vpack.c.bf16 %v3356_v5, %v3356_v5  ;;  %v5347_v36 = vpack.c.bf16 %v3356_v5, %v3355_v13 }
 0x5b7   :  { %5359 = vst [vmem:[%s8713_s4 + $0x30] sm:$0xff] %v5347_v36   ;;  %v3406_v42 = vunpack.c.l.b16 %v3358_v53 }
 0x5b9   :  { %v3407_v17 = vpack.c.b16 %v3406_v42, %v3405_v60 }
 0x5bb   :  { %3577 = vmatmul.bf16.vlgmr.msra.gmra.mxu0 %v3407_v17  ;;  %3591 = vmatmul.bf16.vlgmr.msra.gmra.mxu1 %v3407_v17 }
 0x5bc   :  { %3605 = vmatmul.bf16.vlgmr.msra.gmra.mxu2 %v3407_v17  ;;  %3619 = vmatmul.bf16.vlgmr.msra.gmra.mxu3 %v3407_v17 }
 0x638   :  { %v3578_v2 = vpop.f32.mrf.mxu0  ;;  %v3592_v18 = vpop.f32.mrf.mxu1 }
 0x639   :  { %v3625_v7 = vadd.f32 %v3578_v2, %v336_v0  ;;  %v3626_v21 = vadd.f32 %v3592_v18, %v385_v22 }
 0x63b   :  { %v5010_v55 = vmul.f32 -1.442695, %v3625_v7  ;;  %v5011_v33 = vmul.f32 -1.442695, %v3626_v21 }
 0x63d   :  { %5586 = vpow2.f32 %v5010_v55 }
 0x63e   :  { %5588 = vpow2.f32 %v5011_v33 }
 0x63f   :  { %v3620_v29 = vpop.f32.mrf.mxu3  ;;  %v3606_v10 = vpop.f32.mrf.mxu2 }
 0x640   :  { %v3628_v32 = vadd.f32 %v3620_v29, %v483_v9  ;;  %v3580_v24 = vpop.f32.mrf.mxu0  ;;  %v3594_v46 = vpop.f32.mrf.mxu1  ;;  %v3627_v58 = vadd.f32 %v3606_v10, %v434_v16 }
 0x641   :  { %v3629_v11 = vadd.f32 %v3580_v24, %v338_v54  ;;  %v3630_v56 = vadd.f32 %v3594_v46, %v387_v40 }
 0x642   :  { %v5012_v43 = vmul.f32 -1.442695, %v3628_v32 }
 0x643   :  { %v5587_v49 = vpop.eup %5586  ;;  %v5013_v41 = vmul.f32 -1.442695, %v3629_v11  ;;  %v5014_v62 = vmul.f32 -1.442695, %v3630_v56 }
 0x644   :  { %v5589_v63 = vpop.eup %5588  ;;  %v3651_v8 = vadd.f32 1.0, %v5587_v49  ;;  %5590 = vpow2.f32 %v5012_v43 }
 0x645   :  { %v3652_v38 = vadd.f32 1.0, %v5589_v63  ;;  %5592 = vpow2.f32 %v5013_v41 }
 0x646   :  { %5594 = vrcp.f32 %v3651_v8  ;;  %v3666_v26 = vand.u32 2147483647, %v3651_v8  ;;  %v3668_v5 = vand.u32 2147483648, %v3651_v8  ;;  %vm3662_vm10 = vweird.f32 %v3651_v8 }
 0x647   :  { %5596 = vrcp.f32 %v3652_v38  ;;  %v3622_v44 = vpop.f32.mrf.mxu3  ;;  %v3683_v45 = vand.u32 2147483648, %v3652_v38  ;;  %v3608_v30 = vpop.f32.mrf.mxu2  ;;  %v3681_v36 = vand.u32 2147483647, %v3652_v38  ;;  %vm3677_vm11 = vweird.f32 %v3652_v38 }
 0x648   :  { %5598 = vpow2.f32 %v5014_v62  ;;  %v3632_v3 = vadd.f32 %v3622_v44, %v485_v47  ;;  %v3631_v17 = vadd.f32 %v3608_v30, %v436_v4  ;;  %v3669_v0 = vor.u32 1.1754944e-38, %v3668_v5 }
 0x649   :  { %v3684_v18 = vor.u32 1.1754944e-38, %v3683_v45  ;;  %vm3667_vm14 = vcmp.eq.f32.partialorder %v3666_v26, 8.507059e+37  ;;  %vm3682_vm15 = vcmp.eq.f32.partialorder %v3681_v36, 8.507059e+37 }
 0x64a   :  { %v5591_v19 = vpop.eup %5590  ;;  %v5015_v25 = vmul.f32 -1.442695, %v3632_v3 }
 0x64b   :  { %v5593_v61 = vpop.eup %5592  ;;  %v8666_v37 = vadd.f32 1.0, %v5591_v19 }
 0x64c   :  { %v5595_v14 = vpop.eup %5594  ;;  %v8668_v15 = vadd.f32 1.0, %v5593_v61 }
 0x64d   :  { %v5597_v34 = vpop.eup %5596  ;;  %v3658_v6 = vmul.f32 %v5595_v14, %v3651_v8  ;;  %5600 = vrcp.f32 %v8666_v37  ;;  %vm3663_vm8 = vweird.f32 %v5595_v14  ;;  %v3698_v31 = vand.u32 2147483648, %v8666_v37 }
 0x64e   :  { %v5599_v35 = vpop.eup %5598  ;;  %v3673_v12 = vmul.f32 %v5597_v34, %v3652_v38  ;;  %5602 = vtanh.f32 %v3627_v58  ;;  %vm3678_vm9 = vweird.f32 %v5597_v34  ;;  %vm3664_vm12 = vmor %vm3662_vm10, %vm3663_vm8  ;;  %vm3707_vm0 = vweird.f32 %v8668_v15 }
 0x64f   :  { %v3659_v57 = vsub.f32 1.0, %v3658_v6  ;;  %5604 = vrcp.f32 %v8668_v15  ;;  %v8674_v13 = vadd.f32 1.0, %v5599_v35  ;;  %vm3679_vm13 = vmor %vm3677_vm11, %vm3678_vm9  ;;  %v3711_v56 = vand.u32 2147483647, %v8668_v15 }
 0x650   :  { %v3674_v59 = vsub.f32 1.0, %v3673_v12  ;;  %v3713_v43 = vand.u32 2147483648, %v8668_v15  ;;  %vm3692_vm4 = vweird.f32 %v8666_v37  ;;  %v3696_v16 = vand.u32 2147483647, %v8666_v37 }
 0x651   :  { %v3660_v53 = vmul.f32 %v5595_v14, %v3659_v57  ;;  %5606 = vrcp.f32 %v8674_v13  ;;  %v3728_v11 = vand.u32 2147483648, %v8674_v13  ;;  %v3726_v8 = vand.u32 2147483647, %v8674_v13 }
 0x652   :  { %v3675_v60 = vmul.f32 %v5597_v34, %v3674_v59  ;;  %5608 = vpow2.f32 %v5015_v25  ;;  %v3714_v44 = vor.u32 1.1754944e-38, %v3713_v43  ;;  %vm3722_vm7 = vweird.f32 %v8674_v13 }
 0x653   :  { %v8677_v51 = vpop.eup %5600  ;;  %v3661_v42 = vadd.f32 %v5595_v14, %v3660_v53  ;;  %5610 = vtanh.f32 %v3631_v17  ;;  %vm3712_vm8 = vcmp.eq.f32.partialorder %v3711_v56, 8.507059e+37  ;;  %v3729_v61 = vor.u32 1.1754944e-38, %v3728_v11 }
 0x654   :  { %v5603_v28 = vpop.eup %5602  ;;  %v3676_v23 = vadd.f32 %v5597_v34, %v3675_v60  ;;  %v3688_v22 = vmul.f32 %v8677_v51, %v8666_v37  ;;  %vm3693_vm2 = vweird.f32 %v8677_v51  ;;  %v3699_v3 = vor.u32 1.1754944e-38, %v3698_v31 }
 0x655   :  { %v5605_v2 = vpop.eup %5604  ;;  %v3665_v7 = vsel %vm3664_vm12, %v5595_v14, %v3661_v42  ;;  %vm8697_vm6 = vmor %vm3692_vm4, %vm3693_vm2  ;;  %vm3727_vm10 = vcmp.eq.f32.partialorder %v3726_v8, 8.507059e+37  ;;  %vm3697_vm11 = vcmp.eq.f32.partialorder %v3696_v16, 8.507059e+37 }
 0x656   :  { %v3670_v21 = vsel %vm3667_vm14, %v3669_v0, %v3665_v7  ;;  %v3680_v55 = vsel %vm3679_vm13, %v5597_v34, %v3676_v23  ;;  %v3689_v33 = vsub.f32 1.0, %v3688_v22  ;;  %v3703_v20 = vmul.f32 %v5605_v2, %v8668_v15 }
 0x657   :  { %v5607_v9 = vpop.eup %5606  ;;  %v3685_v52 = vsel %vm3682_vm15, %v3684_v18, %v3680_v55  ;;  %v3751_v54 = vmul.f32 %v5603_v28, %v3670_v21  ;;  %vm3708_vm1 = vweird.f32 %v5605_v2 }
 0x658   :  { %v3749_v40 = vmul.f32 %v3685_v52, %v8583_v48  ;;  %v3690_v29 = vmul.f32 %v8677_v51, %v3689_v33  ;;  %v3704_v32 = vsub.f32 1.0, %v3703_v20  ;;  %v3718_v24 = vmul.f32 %v5607_v9, %v8674_v13  ;;  %v5609_v46 = vpop.eup %5608  ;;  %vm3709_vm5 = vmor %vm3707_vm0, %vm3708_vm1 }
 0x659   :  { %v3656_v62 = vadd.f32 1.0, %v5609_v46  ;;  %vm3723_vm3 = vweird.f32 %v5607_v9  ;;  %v5611_v1 = vpop.eup %5610 }
 0x65a   :  { %v3753_v49 = vadd.f32 %v3751_v54, %v3749_v40  ;;  %v3719_v41 = vsub.f32 1.0, %v3718_v24  ;;  %v3705_v63 = vmul.f32 %v5605_v2, %v3704_v32  ;;  %v3691_v48 = vadd.f32 %v8677_v51, %v3690_v29  ;;  %vm3724_vm9 = vmor %vm3722_vm7, %vm3723_vm3 }
 0x65b   :  { %v3743_v59 = vand.u32 2147483648, %v3656_v62  ;;  %v3741_v26 = vand.u32 2147483647, %v3656_v62  ;;  %vm3737_vm13 = vweird.f32 %v3656_v62 }
 0x65c   :  { %5612 = vtanh.f32 %v3753_v49  ;;  %v3720_v38 = vmul.f32 %v5607_v9, %v3719_v41  ;;  %v3706_v10 = vadd.f32 %v5605_v2, %v3705_v63  ;;  %v3695_v58 = vsel %vm8697_vm6, %v8677_v51, %v3691_v48 }
 0x65d   :  { %5614 = vrcp.f32 %v3656_v62  ;;  %v3700_v35 = vsel %vm3697_vm11, %v3699_v3, %v3695_v58  ;;  %v3744_v30 = vor.u32 1.1754944e-38, %v3743_v59  ;;  %vm3742_vm15 = vcmp.eq.f32.partialorder %v3741_v26, 8.507059e+37 }
 0x65e   :  { %v3710_v47 = vsel %vm3709_vm5, %v5605_v2, %v3706_v10  ;;  %v3721_v19 = vadd.f32 %v5607_v9, %v3720_v38 }
 0x65f   :  { %v3715_v37 = vsel %vm3712_vm8, %v3714_v44, %v3710_v47 }
 0x660   :  { %v3725_v14 = vsel %vm3724_vm9, %v5607_v9, %v3721_v19  ;;  %v3752_v15 = vmul.f32 %v5611_v1, %v3715_v37 }
 0x661   :  { %v3730_v34 = vsel %vm3727_vm10, %v3729_v61, %v3725_v14 }
 0x662   :  { %v5613_v6 = vpop.eup %5612  ;;  %v3750_v27 = vmul.f32 %v3730_v34, %v8641_v39 }
 0x663   :  { %v5615_v4 = vpop.eup %5614  ;;  %v3757_v12 = vmul.f32 %v5613_v6, %v3700_v35 }
 0x664   :  { %v3754_v57 = vadd.f32 %v3752_v15, %v3750_v27  ;;  %v3733_v13 = vmul.f32 %v5615_v4, %v3656_v62  ;;  %vm3738_vm12 = vweird.f32 %v5615_v4 }
 0x665   :  { %vm3739_vm14 = vmor %vm3737_vm13, %vm3738_vm12 }
 0x666   :  { %5616 = vtanh.f32 %v3754_v57  ;;  %v3734_v25 = vsub.f32 1.0, %v3733_v13 }
 0x668   :  { %v3735_v45 = vmul.f32 %v5615_v4, %v3734_v25 }
 0x66a   :  { %v3736_v5 = vadd.f32 %v5615_v4, %v3735_v45 }
 0x66c   :  { %v5617_v53 = vpop.eup %5616  ;;  %v3740_v36 = vsel %vm3739_vm14, %v5615_v4, %v3736_v5 }
 0x66d   :  { %v3745_v60 = vsel %vm3742_vm15, %v3744_v30, %v3740_v36 }
 0x66e   :  { %v3758_v51 = vmul.f32 %v5617_v53, %v3745_v60 }
 0x670   :  { %v5352_v39 = vpack.c.bf16 %v3758_v51, %v3757_v12 }
 0x672   :  { %5360 = vst [vmem:[%s8713_s4 + $0x38] sm:$0xff] %v5352_v39  }

// kernel: clstm_forward.7
= control target key start
LH: loop header
LB: loop body
LE: loop exit
PB: predicated region body
PF: predicated region fallthrough
CT: control target
= control target key end

     0   :  { %s10103_s1 = inlined_call_operand.vmem [shape: bf16[128,512], index: 1, kind: input, shape index: {}]   ;;  %s10104_s2 = inlined_call_operand.vmem [shape: bf16[128,512], index: 2, kind: input, shape index: {}]   ;;  %s10105_s0 = inlined_call_operand.vmem [shape: bf16[8,16,128], index: 0, kind: input, shape index: {}]   ;;  %s10106_s3 = inlined_call_operand.vmem [shape: f32[1,512], index: 3, kind: input, shape index: {}]   ;;  %s10107_s4 = inlined_call_operand.vmem [shape: bf16[8,128,128], index: 4, kind: input, shape index: {}]   ;;  %s10108_s5 = inlined_call_operand.vmem [shape: f32[1,128], index: 5, kind: input, shape index: {}]   ;;  %s10109_s6 = inlined_call_operand.vmem [shape: f32[16,128], index: 6, kind: output, shape index: {}]  }
   0x1   :  { %v4714_v0 = vld [vmem:[%s10103_s1 + $0xe0] sm:$0xf]  ;;  %v6238_v1 = vld [vmem:[%s10103_s1 + $0xec] sm:$0xf0]  ;;  %v6236_v2 = vld [vmem:[%s10103_s1 + $0xe4] sm:$0xf] }
   0x2   :  { %v4715_v3 = vor.u32 %v6238_v1, %v4714_v0  ;;  %v4716_v4 = vld [vmem:[%s10103_s1 + $0xf0] sm:$0xf0]  ;;  %v4722_v5 = vld [vmem:[%s10103_s1 + $0xe8] sm:$0xf]  ;;  %v6239_v6 = vld [vmem:[%s10103_s1 + $0xf4] sm:$0xf0] }
   0x3   :  { %v4719_v7 = vor.u32 %v6236_v2, %v4716_v4  ;;  %v4723_v8 = vor.u32 %v6239_v6, %v4722_v5  ;;  %v6237_v9 = vld [vmem:[%s10103_s1 + $0xec] sm:$0xf]  ;;  %v4724_v10 = vld [vmem:[%s10103_s1 + $0xf8] sm:$0xf0]  ;;  %v4698_v11 = vld [vmem:[%s10103_s1 + $0xc0] sm:$0xf] }
   0x4   :  { %349 = vmatpush.bf16.msra.mxu0 %v4715_v3  ;;  %v4727_v12 = vor.u32 %v6237_v9, %v4724_v10  ;;  %v6234_v13 = vld [vmem:[%s10103_s1 + $0xcc] sm:$0xf0]  ;;  %v6232_v14 = vld [vmem:[%s10103_s1 + $0xc4] sm:$0xf]  ;;  %v4700_v15 = vld [vmem:[%s10103_s1 + $0xd0] sm:$0xf0] }
   0x5   :  { %398 = vmatpush.bf16.msra.mxu1 %v4719_v7  ;;  %447 = vmatpush.bf16.msra.mxu2 %v4723_v8  ;;  %v4699_v16 = vor.u32 %v6234_v13, %v4698_v11  ;;  %v4703_v17 = vor.u32 %v6232_v14, %v4700_v15  ;;  %v4706_v18 = vld [vmem:[%s10103_s1 + $0xc8] sm:$0xf]  ;;  %v6235_v19 = vld [vmem:[%s10103_s1 + $0xd4] sm:$0xf0]  ;;  %v6233_v20 = vld [vmem:[%s10103_s1 + $0xcc] sm:$0xf] }
   0x6   :  { %496 = vmatpush.bf16.msra.mxu3 %v4727_v12  ;;  %v4707_v21 = vor.u32 %v6235_v19, %v4706_v18  ;;  %v4708_v22 = vld [vmem:[%s10103_s1 + $0xd8] sm:$0xf0]  ;;  %v4682_v23 = vld [vmem:[%s10103_s1 + $0xa0] sm:$0xf]  ;;  %v6230_v24 = vld [vmem:[%s10103_s1 + $0xac] sm:$0xf0] }
   0x7   :  { %v4711_v25 = vor.u32 %v6233_v20, %v4708_v22  ;;  %v6228_v26 = vld [vmem:[%s10103_s1 + $0xa4] sm:$0xf]  ;;  %v4684_v27 = vld [vmem:[%s10103_s1 + $0xb0] sm:$0xf0]  ;;  %v4690_v28 = vld [vmem:[%s10103_s1 + $0xa8] sm:$0xf]  ;;  %v4683_v29 = vor.u32 %v6230_v24, %v4682_v23 }
   0x8   :  { %350 = vmatpush.bf16.msra.mxu0 %v4699_v16  ;;  %v6231_v30 = vld [vmem:[%s10103_s1 + $0xb4] sm:$0xf0]  ;;  %v6229_v31 = vld [vmem:[%s10103_s1 + $0xac] sm:$0xf]  ;;  %v4692_v32 = vld [vmem:[%s10103_s1 + $0xb8] sm:$0xf0]  ;;  %v4687_v33 = vor.u32 %v6228_v26, %v4684_v27 }
   0x9   :  { %399 = vmatpush.bf16.msra.mxu1 %v4703_v17  ;;  %448 = vmatpush.bf16.msra.mxu2 %v4707_v21  ;;  %v4691_v34 = vor.u32 %v6231_v30, %v4690_v28  ;;  %v4666_v35 = vld [vmem:[%s10103_s1 + $0x80] sm:$0xf]  ;;  %v6226_v36 = vld [vmem:[%s10103_s1 + $0x8c] sm:$0xf0]  ;;  %v6224_v37 = vld [vmem:[%s10103_s1 + $0x84] sm:$0xf]  ;;  %v4695_v38 = vor.u32 %v6229_v31, %v4692_v32 }
   0xa   :  { %497 = vmatpush.bf16.msra.mxu3 %v4711_v25  ;;  %v4668_v39 = vld [vmem:[%s10103_s1 + $0x90] sm:$0xf0]  ;;  %v4674_v40 = vld [vmem:[%s10103_s1 + $0x88] sm:$0xf]  ;;  %v6227_v41 = vld [vmem:[%s10103_s1 + $0x94] sm:$0xf0]  ;;  %v4667_v44 = vor.u32 %v6226_v36, %v4666_v35 }
   0xb   :  { %v6225_v42 = vld [vmem:[%s10103_s1 + $0x8c] sm:$0xf]  ;;  %v4676_v43 = vld [vmem:[%s10103_s1 + $0x98] sm:$0xf0]  ;;  %v4671_v45 = vor.u32 %v6224_v37, %v4668_v39  ;;  %v4675_v46 = vor.u32 %v6227_v41, %v4674_v40  ;;  %v4650_v47 = vld [vmem:[%s10103_s1 + $0x60] sm:$0xf] }
   0xc   :  { %351 = vmatpush.bf16.msra.mxu0 %v4683_v29  ;;  %v6222_v48 = vld [vmem:[%s10103_s1 + $0x6c] sm:$0xf0]  ;;  %v6220_v49 = vld [vmem:[%s10103_s1 + $0x64] sm:$0xf]  ;;  %v4679_v50 = vor.u32 %v6225_v42, %v4676_v43  ;;  %v4652_v51 = vld [vmem:[%s10103_s1 + $0x70] sm:$0xf0] }
   0xd   :  { %400 = vmatpush.bf16.msra.mxu1 %v4687_v33  ;;  %449 = vmatpush.bf16.msra.mxu2 %v4691_v34  ;;  %v4658_v52 = vld [vmem:[%s10103_s1 + $0x68] sm:$0xf]  ;;  %v6223_v53 = vld [vmem:[%s10103_s1 + $0x74] sm:$0xf0]  ;;  %v6221_v54 = vld [vmem:[%s10103_s1 + $0x6c] sm:$0xf]  ;;  %v4651_v56 = vor.u32 %v6222_v48, %v4650_v47  ;;  %v4655_v57 = vor.u32 %v6220_v49, %v4652_v51 }
   0xe   :  { %498 = vmatpush.bf16.msra.mxu3 %v4695_v38  ;;  %v4660_v55 = vld [vmem:[%s10103_s1 + $0x78] sm:$0xf0]  ;;  %v4659_v58 = vor.u32 %v6223_v53, %v4658_v52  ;;  %v4634_v59 = vld [vmem:[%s10103_s1 + $0x40] sm:$0xf]  ;;  %v6218_v60 = vld [vmem:[%s10103_s1 + $0x4c] sm:$0xf0] }
   0xf   :  { %v6216_v61 = vld [vmem:[%s10103_s1 + $0x44] sm:$0xf]  ;;  %v4663_v62 = vor.u32 %v6221_v54, %v4660_v55  ;;  %v4636_v63 = vld [vmem:[%s10103_s1 + $0x50] sm:$0xf0]  ;;  %v4642_v0 = vld [vmem:[%s10103_s1 + $0x48] sm:$0xf]  ;;  %v4635_v4 = vor.u32 %v6218_v60, %v4634_v59 }
  0x10   :  { %352 = vmatpush.bf16.msra.mxu0 %v4667_v44  ;;  %v6219_v1 = vld [vmem:[%s10103_s1 + $0x54] sm:$0xf0]  ;;  %v6217_v2 = vld [vmem:[%s10103_s1 + $0x4c] sm:$0xf]  ;;  %v4644_v3 = vld [vmem:[%s10103_s1 + $0x58] sm:$0xf0]  ;;  %v4639_v5 = vor.u32 %v6216_v61, %v4636_v63 }
  0x11   :  { %401 = vmatpush.bf16.msra.mxu1 %v4671_v45  ;;  %450 = vmatpush.bf16.msra.mxu2 %v4675_v46  ;;  %v4643_v6 = vor.u32 %v6219_v1, %v4642_v0  ;;  %v4618_v7 = vld [vmem:[%s10103_s1 + $0x20] sm:$0xf]  ;;  %v6214_v8 = vld [vmem:[%s10103_s1 + $0x2c] sm:$0xf0]  ;;  %v6212_v9 = vld [vmem:[%s10103_s1 + $0x24] sm:$0xf]  ;;  %v4647_v10 = vor.u32 %v6217_v2, %v4644_v3 }
  0x12   :  { %499 = vmatpush.bf16.msra.mxu3 %v4679_v50  ;;  %v4620_v11 = vld [vmem:[%s10103_s1 + $0x30] sm:$0xf0]  ;;  %v4626_v12 = vld [vmem:[%s10103_s1 + $0x28] sm:$0xf]  ;;  %v6215_v13 = vld [vmem:[%s10103_s1 + $0x34] sm:$0xf0]  ;;  %v4619_v16 = vor.u32 %v6214_v8, %v4618_v7 }
  0x13   :  { %v6213_v14 = vld [vmem:[%s10103_s1 + $0x2c] sm:$0xf]  ;;  %v4628_v15 = vld [vmem:[%s10103_s1 + $0x38] sm:$0xf0]  ;;  %v4602_v17 = vld [vmem:[%s10103_s1] sm:$0xf]  ;;  %v4623_v18 = vor.u32 %v6212_v9, %v4620_v11  ;;  %v4627_v19 = vor.u32 %v6215_v13, %v4626_v12 }
  0x14   :  { %353 = vmatpush.bf16.msra.mxu0 %v4651_v56  ;;  %v6210_v20 = vld [vmem:[%s10103_s1 + $0xc] sm:$0xf0]  ;;  %v6208_v21 = vld [vmem:[%s10103_s1 + $0x4] sm:$0xf]  ;;  %v4604_v22 = vld [vmem:[%s10103_s1 + $0x10] sm:$0xf0]  ;;  %v4631_v23 = vor.u32 %v6213_v14, %v4628_v15 }
  0x15   :  { %402 = vmatpush.bf16.msra.mxu1 %v4655_v57  ;;  %451 = vmatpush.bf16.msra.mxu2 %v4659_v58  ;;  %v4610_v24 = vld [vmem:[%s10103_s1 + $0x8] sm:$0xf]  ;;  %v6211_v25 = vld [vmem:[%s10103_s1 + $0x14] sm:$0xf0]  ;;  %v6209_v26 = vld [vmem:[%s10103_s1 + $0xc] sm:$0xf]  ;;  %v4603_v30 = vor.u32 %v6210_v20, %v4602_v17  ;;  %v4607_v33 = vor.u32 %v6208_v21, %v4604_v22 }
  0x16   :  { %500 = vmatpush.bf16.msra.mxu3 %v4663_v62  ;;  %v4612_v27 = vld [vmem:[%s10103_s1 + $0x18] sm:$0xf0]  ;;  %v4842_v28 = vld [vmem:[%s10104_s2 + $0xe0] sm:$0xf]  ;;  %v6270_v29 = vld [vmem:[%s10104_s2 + $0xec] sm:$0xf0]  ;;  %v4611_v34 = vor.u32 %v6211_v25, %v4610_v24 }
  0x17   :  { %v6268_v31 = vld [vmem:[%s10104_s2 + $0xe4] sm:$0xf]  ;;  %v4844_v32 = vld [vmem:[%s10104_s2 + $0xf0] sm:$0xf0]  ;;  %v4615_v36 = vor.u32 %v6209_v26, %v4612_v27  ;;  %v4843_v37 = vor.u32 %v6270_v29, %v4842_v28  ;;  %v6269_v38 = vld [vmem:[%s10104_s2 + $0xec] sm:$0xf] }
  0x18   :  { %354 = vmatpush.bf16.msra.mxu0 %v4635_v4  ;;  %v6200_v35 = vld [vmem:[%s10105_s0] sm:$0xff]  ;;  %v4850_v39 = vld [vmem:[%s10104_s2 + $0xe8] sm:$0xf]  ;;  %v6271_v40 = vld [vmem:[%s10104_s2 + $0xf4] sm:$0xf0]  ;;  %v4847_v41 = vor.u32 %v6268_v31, %v4844_v32 }
  0x19   :  { %403 = vmatpush.bf16.msra.mxu1 %v4639_v5  ;;  %452 = vmatpush.bf16.msra.mxu2 %v4643_v6  ;;  %v4852_v42 = vld [vmem:[%s10104_s2 + $0xf8] sm:$0xf0]  ;;  %v4826_v43 = vld [vmem:[%s10104_s2 + $0xc0] sm:$0xf]  ;;  %v6266_v44 = vld [vmem:[%s10104_s2 + $0xcc] sm:$0xf0]  ;;  %v4851_v47 = vor.u32 %v6271_v40, %v4850_v39 }
  0x1a   :  { %501 = vmatpush.bf16.msra.mxu3 %v4647_v10  ;;  %v6264_v45 = vld [vmem:[%s10104_s2 + $0xc4] sm:$0xf]  ;;  %v4828_v46 = vld [vmem:[%s10104_s2 + $0xd0] sm:$0xf0]  ;;  %v4855_v48 = vor.u32 %v6269_v38, %v4852_v42  ;;  %v4827_v49 = vor.u32 %v6266_v44, %v4826_v43  ;;  %v4834_v50 = vld [vmem:[%s10104_s2 + $0xc8] sm:$0xf] }
  0x1b   :  { %v6267_v51 = vld [vmem:[%s10104_s2 + $0xd4] sm:$0xf0]  ;;  %v4831_v52 = vor.u32 %v6264_v45, %v4828_v46  ;;  %v6265_v53 = vld [vmem:[%s10104_s2 + $0xcc] sm:$0xf]  ;;  %v4836_v54 = vld [vmem:[%s10104_s2 + $0xd8] sm:$0xf0] }
  0x1c   :  { %355 = vmatpush.bf16.msra.mxu0 %v4619_v16  ;;  %v4835_v55 = vor.u32 %v6267_v51, %v4834_v50  ;;  %v4810_v56 = vld [vmem:[%s10104_s2 + $0xa0] sm:$0xf]  ;;  %v6262_v57 = vld [vmem:[%s10104_s2 + $0xac] sm:$0xf0]  ;;  %v6260_v58 = vld [vmem:[%s10104_s2 + $0xa4] sm:$0xf]  ;;  %v4839_v59 = vor.u32 %v6265_v53, %v4836_v54 }
  0x1d   :  { %404 = vmatpush.bf16.msra.mxu1 %v4623_v18  ;;  %453 = vmatpush.bf16.msra.mxu2 %v4627_v19  ;;  %v4811_v60 = vor.u32 %v6262_v57, %v4810_v56  ;;  %v4812_v61 = vld [vmem:[%s10104_s2 + $0xb0] sm:$0xf0]  ;;  %v6261_v62 = vld [vmem:[%s10104_s2 + $0xac] sm:$0xf]  ;;  %v4820_v0 = vld [vmem:[%s10104_s2 + $0xb8] sm:$0xf0] }
  0x1e   :  { %502 = vmatpush.bf16.msra.mxu3 %v4631_v23  ;;  %v4815_v63 = vor.u32 %v6260_v58, %v4812_v61  ;;  %v4818_v1 = vld [vmem:[%s10104_s2 + $0xa8] sm:$0xf]  ;;  %v6263_v2 = vld [vmem:[%s10104_s2 + $0xb4] sm:$0xf0]  ;;  %v4823_v4 = vor.u32 %v6261_v62, %v4820_v0  ;;  %v4794_v6 = vld [vmem:[%s10104_s2 + $0x80] sm:$0xf] }
  0x1f   :  { %v4819_v3 = vor.u32 %v6263_v2, %v4818_v1  ;;  %v6201_v5 = vld [vmem:[%s10105_s0 + $0x8] sm:$0xff]  ;;  %v6258_v7 = vld [vmem:[%s10104_s2 + $0x8c] sm:$0xf0]  ;;  %v6256_v8 = vld [vmem:[%s10104_s2 + $0x84] sm:$0xf] }
  0x20   :  { %356 = vmatpush.bf16.msra.mxu0 %v4603_v30  ;;  %v4795_v9 = vor.u32 %v6258_v7, %v4794_v6  ;;  %v4796_v10 = vld [vmem:[%s10104_s2 + $0x90] sm:$0xf0]  ;;  %v6257_v11 = vld [vmem:[%s10104_s2 + $0x8c] sm:$0xf]  ;;  %v4804_v12 = vld [vmem:[%s10104_s2 + $0x98] sm:$0xf0] }
  0x21   :  { %405 = vmatpush.bf16.msra.mxu1 %v4607_v33  ;;  %454 = vmatpush.bf16.msra.mxu2 %v4611_v34  ;;  %v4799_v13 = vor.u32 %v6256_v8, %v4796_v10  ;;  %v4807_v14 = vor.u32 %v6257_v11, %v4804_v12  ;;  %v4802_v15 = vld [vmem:[%s10104_s2 + $0x88] sm:$0xf]  ;;  %v6259_v16 = vld [vmem:[%s10104_s2 + $0x94] sm:$0xf0]  ;;  %v6202_v18 = vld [vmem:[%s10105_s0 + $0x10] sm:$0xff]  ;;  %v6867_v10 = vmov 0.0|0.0  }
  0x22   :  { %503 = vmatpush.bf16.msra.mxu3 %v4615_v36  ;;  %v4803_v17 = vor.u32 %v6259_v16, %v4802_v15  ;;  %v4778_v19 = vld [vmem:[%s10104_s2 + $0x60] sm:$0xf]  ;;  %v6254_v20 = vld [vmem:[%s10104_s2 + $0x6c] sm:$0xf0]  ;;  %v6252_v21 = vld [vmem:[%s10104_s2 + $0x64] sm:$0xf] }
  0x23   :  { %357 = vmatmul.bf16.vlgmr.msra.gmra.mxu0 %v6200_v35  ;;  %v4779_v22 = vor.u32 %v6254_v20, %v4778_v19  ;;  %v4780_v23 = vld [vmem:[%s10104_s2 + $0x70] sm:$0xf0]  ;;  %v6253_v24 = vld [vmem:[%s10104_s2 + $0x6c] sm:$0xf]  ;;  %v4788_v25 = vld [vmem:[%s10104_s2 + $0x78] sm:$0xf0] }
  0x24   :  { %815 = vmatpush.bf16.msrb.mxu0 %v4843_v37  ;;  %406 = vmatmul.bf16.vlgmr.msra.gmra.mxu1 %v6200_v35  ;;  %v4783_v26 = vor.u32 %v6252_v21, %v4780_v23  ;;  %v4791_v27 = vor.u32 %v6253_v24, %v4788_v25  ;;  %v4786_v28 = vld [vmem:[%s10104_s2 + $0x68] sm:$0xf]  ;;  %v6255_v29 = vld [vmem:[%s10104_s2 + $0x74] sm:$0xf0]  ;;  %v4762_v32 = vld [vmem:[%s10104_s2 + $0x40] sm:$0xf] }
  0x25   :  { %829 = vmatpush.bf16.msrb.mxu1 %v4847_v41  ;;  %455 = vmatmul.bf16.vlgmr.msra.gmra.mxu2 %v6200_v35  ;;  %v4787_v30 = vor.u32 %v6255_v29, %v4786_v28  ;;  %v6203_v31 = vld [vmem:[%s10105_s0 + $0x18] sm:$0xff]  ;;  %v6250_v33 = vld [vmem:[%s10104_s2 + $0x4c] sm:$0xf0]  ;;  %v6248_v34 = vld [vmem:[%s10104_s2 + $0x44] sm:$0xf] }
  0x26   :  { %504 = vmatmul.bf16.vlgmr.msra.gmra.mxu3 %v6200_v35  ;;  %843 = vmatpush.bf16.msrb.mxu2 %v4851_v47  ;;  %v4763_v35 = vor.u32 %v6250_v33, %v4762_v32  ;;  %v4764_v36 = vld [vmem:[%s10104_s2 + $0x50] sm:$0xf0]  ;;  %v6249_v37 = vld [vmem:[%s10104_s2 + $0x4c] sm:$0xf]  ;;  %v4772_v38 = vld [vmem:[%s10104_s2 + $0x58] sm:$0xf0] }
  0x27   :  { %857 = vmatpush.bf16.msrb.mxu3 %v4855_v48  ;;  %v4767_v39 = vor.u32 %v6248_v34, %v4764_v36  ;;  %v4775_v40 = vor.u32 %v6249_v37, %v4772_v38  ;;  %v4770_v41 = vld [vmem:[%s10104_s2 + $0x48] sm:$0xf]  ;;  %v6251_v42 = vld [vmem:[%s10104_s2 + $0x54] sm:$0xf0]  ;;  %v6204_v44 = vld [vmem:[%s10105_s0 + $0x20] sm:$0xff] }
  0x28   :  { %816 = vmatpush.bf16.msrb.mxu0 %v4827_v49  ;;  %v4771_v43 = vor.u32 %v6251_v42, %v4770_v41  ;;  %v4746_v45 = vld [vmem:[%s10104_s2 + $0x20] sm:$0xf]  ;;  %v6246_v46 = vld [vmem:[%s10104_s2 + $0x2c] sm:$0xf0]  ;;  %v6244_v47 = vld [vmem:[%s10104_s2 + $0x24] sm:$0xf] }
  0x29   :  { %830 = vmatpush.bf16.msrb.mxu1 %v4831_v52  ;;  %v4747_v48 = vor.u32 %v6246_v46, %v4746_v45  ;;  %v4748_v49 = vld [vmem:[%s10104_s2 + $0x30] sm:$0xf0]  ;;  %v6245_v50 = vld [vmem:[%s10104_s2 + $0x2c] sm:$0xf]  ;;  %v4756_v51 = vld [vmem:[%s10104_s2 + $0x38] sm:$0xf0] }
  0x2a   :  { %844 = vmatpush.bf16.msrb.mxu2 %v4835_v55  ;;  %v4751_v52 = vor.u32 %v6244_v47, %v4748_v49  ;;  %v4759_v53 = vor.u32 %v6245_v50, %v4756_v51  ;;  %v4754_v54 = vld [vmem:[%s10104_s2 + $0x28] sm:$0xf]  ;;  %v6247_v55 = vld [vmem:[%s10104_s2 + $0x34] sm:$0xf0]  ;;  %v4730_v58 = vld [vmem:[%s10104_s2] sm:$0xf] }
  0x2b   :  { %858 = vmatpush.bf16.msrb.mxu3 %v4839_v59  ;;  %v4755_v56 = vor.u32 %v6247_v55, %v4754_v54  ;;  %v6205_v57 = vld [vmem:[%s10105_s0 + $0x28] sm:$0xff]  ;;  %v6242_v59 = vld [vmem:[%s10104_s2 + $0xc] sm:$0xf0]  ;;  %v4732_v62 = vld [vmem:[%s10104_s2 + $0x10] sm:$0xf0] }
  0x2c   :  { %817 = vmatpush.bf16.msrb.mxu0 %v4811_v60  ;;  %v6240_v60 = vld [vmem:[%s10104_s2 + $0x4] sm:$0xf]  ;;  %v4731_v61 = vor.u32 %v6242_v59, %v4730_v58  ;;  %v4740_v0 = vld [vmem:[%s10104_s2 + $0x18] sm:$0xf0] }
  0x2d   :  { %831 = vmatpush.bf16.msrb.mxu1 %v4815_v63  ;;  %v6241_v63 = vld [vmem:[%s10104_s2 + $0xc] sm:$0xf]  ;;  %v4735_v1 = vor.u32 %v6240_v60, %v4732_v62  ;;  %v6207_v7 = vld [vmem:[%s10105_s0 + $0x38] sm:$0xff] }
  0x2e   :  { %845 = vmatpush.bf16.msrb.mxu2 %v4819_v3  ;;  %v4743_v2 = vor.u32 %v6241_v63, %v4740_v0  ;;  %v6206_v3 = vld [vmem:[%s10105_s0 + $0x30] sm:$0xff] }
  0x2f   :  { %859 = vmatpush.bf16.msrb.mxu3 %v4823_v4  ;;  %v4738_v4 = vld [vmem:[%s10104_s2 + $0x8] sm:$0xf] }
  0x30   :  { %818 = vmatpush.bf16.msrb.mxu0 %v4795_v9 }
  0x31   :  { %832 = vmatpush.bf16.msrb.mxu1 %v4799_v13 }
  0x32   :  { %846 = vmatpush.bf16.msrb.mxu2 %v4803_v17 }
  0x33   :  { %362 = vmatmul.bf16.gmra.mxu0 %v6201_v5  ;;  %860 = vmatpush.bf16.msrb.mxu3 %v4807_v14 }
  0x34   :  { %411 = vmatmul.bf16.gmra.mxu1 %v6201_v5  ;;  %819 = vmatpush.bf16.msrb.mxu0 %v4779_v22 }
  0x35   :  { %460 = vmatmul.bf16.gmra.mxu2 %v6201_v5  ;;  %833 = vmatpush.bf16.msrb.mxu1 %v4783_v26 }
  0x36   :  { %509 = vmatmul.bf16.gmra.mxu3 %v6201_v5  ;;  %847 = vmatpush.bf16.msrb.mxu2 %v4787_v30  ;;  %v6243_v5 = vld [vmem:[%s10104_s2 + $0x14] sm:$0xf0] }
  0x37   :  { %861 = vmatpush.bf16.msrb.mxu3 %v4791_v27  ;;  %v4739_v6 = vor.u32 %v6243_v5, %v4738_v4 }
  0x38   :  { %820 = vmatpush.bf16.msrb.mxu0 %v4763_v35 }
  0x39   :  { %834 = vmatpush.bf16.msrb.mxu1 %v4767_v39 }
  0x3a   :  { %848 = vmatpush.bf16.msrb.mxu2 %v4771_v43 }
  0x3b   :  { %862 = vmatpush.bf16.msrb.mxu3 %v4775_v40 }
  0x3c   :  { %821 = vmatpush.bf16.msrb.mxu0 %v4747_v48 }
  0x3d   :  { %835 = vmatpush.bf16.msrb.mxu1 %v4751_v52 }
  0x3e   :  { %849 = vmatpush.bf16.msrb.mxu2 %v4755_v56 }
  0x3f   :  { %863 = vmatpush.bf16.msrb.mxu3 %v4759_v53 }
  0x40   :  { %822 = vmatpush.bf16.msrb.mxu0 %v4731_v61 }
  0x41   :  { %836 = vmatpush.bf16.msrb.mxu1 %v4735_v1 }
  0x42   :  { %850 = vmatpush.bf16.msrb.mxu2 %v4739_v6  ;;  %v7426_v6 = vld [vmem:[%s10106_s3] sm:$0xf] }
  0x43   :  { %367 = vmatmul.bf16.gmra.mxu0 %v6202_v18  ;;  %864 = vmatpush.bf16.msrb.mxu3 %v4743_v2 }
  0x44   :  { %416 = vmatmul.bf16.gmra.mxu1 %v6202_v18 }
  0x45   :  { %465 = vmatmul.bf16.gmra.mxu2 %v6202_v18 }
  0x46   :  { %514 = vmatmul.bf16.gmra.mxu3 %v6202_v18 }
  0x53   :  { %372 = vmatmul.bf16.gmra.mxu0 %v6203_v31 }
  0x54   :  { %421 = vmatmul.bf16.gmra.mxu1 %v6203_v31 }
  0x55   :  { %470 = vmatmul.bf16.gmra.mxu2 %v6203_v31 }
  0x56   :  { %519 = vmatmul.bf16.gmra.mxu3 %v6203_v31 }
  0x63   :  { %377 = vmatmul.bf16.gmra.mxu0 %v6204_v44 }
  0x64   :  { %426 = vmatmul.bf16.gmra.mxu1 %v6204_v44 }
  0x65   :  { %475 = vmatmul.bf16.gmra.mxu2 %v6204_v44 }
  0x66   :  { %524 = vmatmul.bf16.gmra.mxu3 %v6204_v44 }
  0x73   :  { %382 = vmatmul.bf16.gmra.mxu0 %v6205_v57 }
  0x74   :  { %431 = vmatmul.bf16.gmra.mxu1 %v6205_v57 }
  0x75   :  { %480 = vmatmul.bf16.gmra.mxu2 %v6205_v57 }
  0x76   :  { %529 = vmatmul.bf16.gmra.mxu3 %v6205_v57 }
  0x83   :  { %387 = vmatmul.bf16.gmra.mxu0 %v6206_v3 }
  0x84   :  { %436 = vmatmul.bf16.gmra.mxu1 %v6206_v3 }
  0x85   :  { %485 = vmatmul.bf16.gmra.mxu2 %v6206_v3 }
  0x86   :  { %534 = vmatmul.bf16.gmra.mxu3 %v6206_v3 }
  0x93   :  { %392 = vmatmul.bf16.gmra.mxu0 %v6207_v7 }
  0x94   :  { %441 = vmatmul.bf16.gmra.mxu1 %v6207_v7 }
  0x95   :  { %490 = vmatmul.bf16.gmra.mxu2 %v6207_v7 }
  0x96   :  { %539 = vmatmul.bf16.gmra.mxu3 %v6207_v7 }
  0xa0   :  { %v7311_v8 = vpop.f32.mrf.mxu0 }
  0xa1   :  { %10110 = vst [vmem:[#allocation6_spill] sm:$0xff] %v7311_v8  ;;  %v7313_v9 = vpop.f32.mrf.mxu1  ;;  %v4984_v8 = vld [vmem:[%s10104_s2 + $0xe8] sm:$0xf] }
  0xa2   :  { %10111 = vst [vmem:[#allocation7_spill] sm:$0xff] %v7313_v9  ;;  %v4978_v9 = vld [vmem:[%s10104_s2 + $0xf0] sm:$0xf0] }
  0xa3   :  { %823 = vmatmul.bf16.vlgmr.msrb.gmra.mxu0 %v6867_v10 }
  0xa4   :  { %837 = vmatmul.bf16.vlgmr.msrb.gmra.mxu1 %v6867_v10 }
  0xa5   :  { %851 = vmatmul.bf16.vlgmr.msrb.gmra.mxu2 %v6867_v10 }
  0xa6   :  { %865 = vmatmul.bf16.vlgmr.msrb.gmra.mxu3 %v6867_v10  ;;  %v7431_v10 = vperm.slane %v7426_v6, 0 }
  0xa8   :  { %v7315_v11 = vpop.f32.mrf.mxu2  ;;  %v7319_v13 = vpop.f32.mrf.mxu0 }
  0xa9   :  { %10112 = vst [vmem:[#allocation8_spill] sm:$0xff] %v7315_v11  ;;  %v7317_v12 = vpop.f32.mrf.mxu3  ;;  %v7321_v14 = vpop.f32.mrf.mxu1  ;;  %v6302_v11 = vld [vmem:[%s10104_s2 + $0xec] sm:$0xf0] }
  0xaa   :  { %10113 = vst [vmem:[#allocation9_spill] sm:$0xff] %v7317_v12 }
  0xab   :  { %10114 = vst [vmem:[#allocation10_spill] sm:$0xff] %v7319_v13 }
  0xac   :  { %10115 = vst [vmem:[#allocation11_spill] sm:$0xff] %v7321_v14  ;;  %v6300_v14 = vld [vmem:[%s10104_s2 + $0xe4] sm:$0xf] }
  0xb0   :  { %v7323_v15 = vpop.f32.mrf.mxu2  ;;  %v7327_v17 = vpop.f32.mrf.mxu0 }
  0xb1   :  { %10116 = vst [vmem:[#allocation12_spill] sm:$0xff] %v7323_v15  ;;  %v7325_v16 = vpop.f32.mrf.mxu3  ;;  %v7329_v18 = vpop.f32.mrf.mxu1  ;;  %v7434_v15 = vperm.slane %v7426_v6, 1 }
  0xb2   :  { %10117 = vst [vmem:[#allocation13_spill] sm:$0xff] %v7325_v16  ;;  %v4976_v16 = vld [vmem:[%s10104_s2 + $0xe0] sm:$0xf] }
  0xb3   :  { %10118 = vst [vmem:[#allocation14_spill] sm:$0xff] %v7327_v17  ;;  %v4977_v12 = vor.u32 %v6302_v11, %v4976_v16  ;;  %v6301_v11 = vld [vmem:[%s10104_s2 + $0xec] sm:$0xf]  ;;  %v4986_v16 = vld [vmem:[%s10104_s2 + $0xf8] sm:$0xf0] }
  0xb4   :  { %10119 = vst [vmem:[#allocation15_spill] sm:$0xff] %v7329_v18  ;;  %v4989_v17 = vor.u32 %v6301_v11, %v4986_v16  ;;  %v4944_v16 = vld [vmem:[%s10104_s2 + $0xa0] sm:$0xf] }
  0xb5   :  { %1217 = vmatpush.bf16.msra.mxu0 %v4977_v12  ;;  %v4962_v12 = vld [vmem:[%s10104_s2 + $0xd0] sm:$0xf0] }
  0xb6   :  { %1259 = vmatpush.bf16.msra.mxu3 %v4989_v17  ;;  %v7486_v17 = vperm.slane %v7426_v6, 3 }
  0xb8   :  { %v7331_v19 = vpop.f32.mrf.mxu2  ;;  %v7335_v21 = vpop.f32.mrf.mxu0 }
  0xb9   :  { %10120 = vst [vmem:[#allocation16_spill] sm:$0xff] %v7331_v19  ;;  %v7333_v20 = vpop.f32.mrf.mxu3  ;;  %v7337_v22 = vpop.f32.mrf.mxu1 }
  0xba   :  { %10121 = vst [vmem:[#allocation17_spill] sm:$0xff] %v7333_v20 }
  0xbb   :  { %10122 = vst [vmem:[#allocation18_spill] sm:$0xff] %v7335_v21  ;;  %v4981_v21 = vor.u32 %v6300_v14, %v4978_v9  ;;  %v4960_v9 = vld [vmem:[%s10104_s2 + $0xc0] sm:$0xf]  ;;  %v6296_v14 = vld [vmem:[%s10104_s2 + $0xc4] sm:$0xf] }
  0xbc   :  { %10123 = vst [vmem:[#allocation19_spill] sm:$0xff] %v7337_v22 }
  0xbd   :  { %1231 = vmatpush.bf16.msra.mxu1 %v4981_v21  ;;  %v4965_v21 = vor.u32 %v6296_v14, %v4962_v12  ;;  %v4946_v12 = vld [vmem:[%s10104_s2 + $0xb0] sm:$0xf0] }
  0xc0   :  { %v7339_v23 = vpop.f32.mrf.mxu2  ;;  %v7343_v25 = vpop.f32.mrf.mxu0 }
  0xc1   :  { %10124 = vst [vmem:[#allocation20_spill] sm:$0xff] %v7339_v23  ;;  %v7341_v24 = vpop.f32.mrf.mxu3  ;;  %v7345_v26 = vpop.f32.mrf.mxu1  ;;  %v6303_v23 = vld [vmem:[%s10104_s2 + $0xf4] sm:$0xf0]  ;;  %1232 = vmatpush.bf16.msra.mxu1 %v4965_v21 }
  0xc2   :  { %10125 = vst [vmem:[#allocation21_spill] sm:$0xff] %v7341_v24 }
  0xc3   :  { %10126 = vst [vmem:[#allocation22_spill] sm:$0xff] %v7343_v25 }
  0xc4   :  { %10127 = vst [vmem:[#allocation23_spill] sm:$0xff] %v7345_v26 }
  0xc8   :  { %v7347_v27 = vpop.f32.mrf.mxu2  ;;  %v7351_v29 = vpop.f32.mrf.mxu0 }
  0xc9   :  { %10128 = vst [vmem:[#allocation24_spill] sm:$0xff] %v7347_v27  ;;  %v7349_v28 = vpop.f32.mrf.mxu3  ;;  %v7353_v30 = vpop.f32.mrf.mxu1 }
  0xca   :  { %10129 = vst [vmem:[#allocation25_spill] sm:$0xff] %v7349_v28  ;;  %v6278_v28 = vld [vmem:[%s10104_s2 + $0x2c] sm:$0xf0] }
  0xcb   :  { %10130 = vst [vmem:[#allocation26_spill] sm:$0xff] %v7351_v29 }
  0xcc   :  { %10131 = vst [vmem:[#allocation27_spill] sm:$0xff] %v7353_v30 }
  0xd0   :  { %v7355_v31 = vpop.f32.mrf.mxu2  ;;  %v7359_v33 = vpop.f32.mrf.mxu0 }
  0xd1   :  { %10132 = vst [vmem:[#allocation28_spill] sm:$0xff] %v7355_v31  ;;  %v7357_v32 = vpop.f32.mrf.mxu3  ;;  %v7361_v34 = vpop.f32.mrf.mxu1 }
  0xd2   :  { %10133 = vst [vmem:[#allocation29_spill] sm:$0xff] %v7357_v32 }
  0xd3   :  { %10134 = vst [vmem:[#allocation30_spill] sm:$0xff] %v7359_v33 }
  0xd4   :  { %10135 = vst [vmem:[#allocation31_spill] sm:$0xff] %v7361_v34 }
  0xd8   :  { %v7363_v35 = vpop.f32.mrf.mxu2  ;;  %v7367_v37 = vpop.f32.mrf.mxu0 }
  0xd9   :  { %10136 = vst [vmem:[#allocation32_spill] sm:$0xff] %v7363_v35  ;;  %v7365_v36 = vpop.f32.mrf.mxu3  ;;  %v7369_v38 = vpop.f32.mrf.mxu1 }
  0xda   :  { %10137 = vst [vmem:[#allocation33_spill] sm:$0xff] %v7365_v36 }
  0xdb   :  { %10138 = vst [vmem:[#allocation34_spill] sm:$0xff] %v7367_v37 }
  0xdc   :  { %10139 = vst [vmem:[#allocation35_spill] sm:$0xff] %v7369_v38 }
  0xe0   :  { %v7371_v39 = vpop.f32.mrf.mxu2  ;;  %v7375_v41 = vpop.f32.mrf.mxu0 }
  0xe1   :  { %10140 = vst [vmem:[#allocation36_spill] sm:$0xff] %v7371_v39  ;;  %v7373_v40 = vpop.f32.mrf.mxu3  ;;  %v7377_v42 = vpop.f32.mrf.mxu1 }
  0xe2   :  { %10141 = vst [vmem:[#allocation37_spill] sm:$0xff] %v7373_v40 }
  0xe8   :  { %v7379_v43 = vpop.f32.mrf.mxu2  ;;  %v7383_v45 = vpop.f32.mrf.mxu0 }
  0xe9   :  { %10142 = vst [vmem:[#allocation38_spill] sm:$0xff] %v7379_v43  ;;  %v7381_v44 = vpop.f32.mrf.mxu3  ;;  %v7385_v46 = vpop.f32.mrf.mxu1 }
  0xea   :  { %10143 = vst [vmem:[#allocation39_spill] sm:$0xff] %v7385_v46 }
  0xf0   :  { %v7387_v47 = vpop.f32.mrf.mxu2  ;;  %v7391_v49 = vpop.f32.mrf.mxu0 }
  0xf1   :  { %10144 = vst [vmem:[#allocation40_spill] sm:$0xff] %v7387_v47  ;;  %v7389_v48 = vpop.f32.mrf.mxu3  ;;  %v7393_v50 = vpop.f32.mrf.mxu1 }
  0xf2   :  { %10145 = vst [vmem:[#allocation41_spill] sm:$0xff] %v7389_v48 }
  0xf8   :  { %v7395_v51 = vpop.f32.mrf.mxu2  ;;  %v7399_v53 = vpop.f32.mrf.mxu0 }
  0xf9   :  { %v7397_v52 = vpop.f32.mrf.mxu3  ;;  %v7401_v54 = vpop.f32.mrf.mxu1 }
 0x100   :  { %v7403_v55 = vpop.f32.mrf.mxu2  ;;  %v7407_v57 = vpop.f32.mrf.mxu0 }
 0x101   :  { %v7405_v56 = vpop.f32.mrf.mxu3  ;;  %v7409_v58 = vpop.f32.mrf.mxu1 }
 0x108   :  { %v7411_v59 = vpop.f32.mrf.mxu2  ;;  %v7415_v61 = vpop.f32.mrf.mxu0 }
 0x109   :  { %v7413_v60 = vpop.f32.mrf.mxu3  ;;  %v7417_v62 = vpop.f32.mrf.mxu1 }
 0x110   :  { %v393_v0 = vpop.f32.mrf.mxu0  ;;  %v7421_v1 = vpop.f32.mrf.mxu2 }
 0x111   :  { %v7419_v63 = vpop.f32.mrf.mxu3  ;;  %v442_v2 = vpop.f32.mrf.mxu1  ;;  %v394_v13 = vadd.f32 %v393_v0, %v7431_v10  ;;  %v4985_v0 = vor.u32 %v6303_v23, %v4984_v8  ;;  %v6298_v8 = vld [vmem:[%s10104_s2 + $0xcc] sm:$0xf0] }
 0x112   :  { %v443_v19 = vadd.f32 %v442_v2, %v7434_v15 }
 0x113   :  { %1245 = vmatpush.bf16.msra.mxu2 %v4985_v0 }
 0x118   :  { %v395_v4 = vpop.f32.mrf.mxu0  ;;  %v7428_v7 = vpop.f32.mrf.mxu2 }
 0x119   :  { %v540_v3 = vpop.f32.mrf.mxu3  ;;  %v444_v5 = vpop.f32.mrf.mxu1 }
 0x11a   :  { %v541_v14 = vadd.f32 %v540_v3, %v7486_v17  ;;  %v445_v21 = vadd.f32 %v444_v5, %v7434_v15  ;;  %v4928_v5 = vld [vmem:[%s10104_s2 + $0x80] sm:$0xf] }
 0x120   :  { %v824_v22 = vpop.f32.mrf.mxu0  ;;  %v7488_v2 = vpop.f32.mrf.mxu2 }
 0x121   :  { %v7456_v24 = vpop.f32.mrf.mxu3  ;;  %v871_v20 = vadd.f32 %v824_v22, %v394_v13  ;;  %v838_v18 = vpop.f32.mrf.mxu1  ;;  %v4961_v13 = vor.u32 %v6298_v8, %v4960_v9  ;;  %v6299_v22 = vld [vmem:[%s10104_s2 + $0xd4] sm:$0xf0]  ;;  %v6294_v9 = vld [vmem:[%s10104_s2 + $0xac] sm:$0xf0]  ;;  %v6292_v8 = vld [vmem:[%s10104_s2 + $0xa4] sm:$0xf] }
 0x122   :  { %v872_v31 = vadd.f32 %v838_v18, %v443_v19  ;;  %v4968_v18 = vld [vmem:[%s10104_s2 + $0xc8] sm:$0xf] }
 0x123   :  { %v4856_v23 = vmul.f32 -1.442695, %v871_v20  ;;  %v6297_v20 = vld [vmem:[%s10104_s2 + $0xcc] sm:$0xf]  ;;  %1218 = vmatpush.bf16.msra.mxu0 %v4961_v13  ;;  %v4969_v0 = vor.u32 %v6299_v22, %v4968_v18  ;;  %v4945_v13 = vor.u32 %v6294_v9, %v4944_v16  ;;  %v4952_v18 = vld [vmem:[%s10104_s2 + $0xa8] sm:$0xf] }
 0x124   :  { %v4857_v19 = vmul.f32 -1.442695, %v872_v31  ;;  %v4970_v31 = vld [vmem:[%s10104_s2 + $0xd8] sm:$0xf0] }
 0x125   :  { %6611 = vpow2.f32 %v4856_v23  ;;  %v4973_v11 = vor.u32 %v6297_v20, %v4970_v31  ;;  %v396_v23 = vadd.f32 %v395_v4, %v7431_v10  ;;  %1246 = vmatpush.bf16.msra.mxu2 %v4969_v0  ;;  %v4949_v4 = vor.u32 %v6292_v8, %v4946_v12  ;;  %v6293_v0 = vld [vmem:[%s10104_s2 + $0xac] sm:$0xf]  ;;  %v4954_v31 = vld [vmem:[%s10104_s2 + $0xb8] sm:$0xf0]  ;;  %v6288_v8 = vld [vmem:[%s10104_s2 + $0x84] sm:$0xf] }
 0x126   :  { %6613 = vpow2.f32 %v4857_v19  ;;  %v6295_v19 = vld [vmem:[%s10104_s2 + $0xb4] sm:$0xf0]  ;;  %v4957_v27 = vor.u32 %v6293_v0, %v4954_v31  ;;  %v543_v0 = vadd.f32 %v7456_v24, %v7486_v17  ;;  %v6289_v31 = vld [vmem:[%s10104_s2 + $0x8c] sm:$0xf]  ;;  %v6286_v24 = vld [vmem:[%s10104_s2 + $0x6c] sm:$0xf0] }
 0x127   :  { %1260 = vmatpush.bf16.msra.mxu3 %v4973_v11  ;;  %v4953_v20 = vor.u32 %v6295_v19, %v4952_v18  ;;  %1219 = vmatpush.bf16.msra.mxu0 %v4945_v13  ;;  %v6290_v11 = vld [vmem:[%s10104_s2 + $0x8c] sm:$0xf0] }
 0x128   :  { %v826_v3 = vpop.f32.mrf.mxu0  ;;  %1233 = vmatpush.bf16.msra.mxu1 %v4949_v4 }
 0x129   :  { %v866_v22 = vpop.f32.mrf.mxu3  ;;  %v875_v9 = vadd.f32 %v826_v3, %v396_v23  ;;  %v840_v32 = vpop.f32.mrf.mxu1  ;;  %1247 = vmatpush.bf16.msra.mxu2 %v4953_v20  ;;  %v4929_v23 = vor.u32 %v6290_v11, %v4928_v5  ;;  %v4936_v20 = vld [vmem:[%s10104_s2 + $0x88] sm:$0xf]  ;;  %v6284_v5 = vld [vmem:[%s10104_s2 + $0x64] sm:$0xf] }
 0x12a   :  { %v874_v16 = vadd.f32 %v866_v22, %v541_v14  ;;  %v876_v30 = vadd.f32 %v840_v32, %v445_v21  ;;  %v4930_v32 = vld [vmem:[%s10104_s2 + $0x90] sm:$0xf0]  ;;  %v7535_v22 = vperm.slane %v7426_v6, 2 }
 0x12b   :  { %v6612_v12 = vpop.eup %6611  ;;  %v4859_v19 = vmul.f32 -1.442695, %v875_v9  ;;  %1261 = vmatpush.bf16.msra.mxu3 %v4957_v27  ;;  %v4933_v21 = vor.u32 %v6288_v8, %v4930_v32  ;;  %1220 = vmatpush.bf16.msra.mxu0 %v4929_v23  ;;  %v6291_v27 = vld [vmem:[%s10104_s2 + $0x94] sm:$0xf0]  ;;  %v4912_v9 = vld [vmem:[%s10104_s2 + $0x60] sm:$0xf] }
 0x12c   :  { %v4858_v14 = vmul.f32 -1.442695, %v874_v16  ;;  %v6614_v13 = vpop.eup %6613  ;;  %v7532_v18 = vadd.f32 1.0, %v6612_v12  ;;  %v4860_v4 = vmul.f32 -1.442695, %v876_v30  ;;  %v492_v6 = vadd.f32 %v7428_v7, %v7535_v22  ;;  %v852_v30 = vpop.f32.mrf.mxu2 }
 0x12d   :  { %v7537_v3 = vadd.f32 1.0, %v6614_v13  ;;  %1234 = vmatpush.bf16.msra.mxu1 %v4933_v21  ;;  %v4938_v16 = vld [vmem:[%s10104_s2 + $0x98] sm:$0xf0]  ;;  %v4914_v12 = vld [vmem:[%s10104_s2 + $0x70] sm:$0xf0]  ;;  %v4937_v23 = vor.u32 %v6291_v27, %v4936_v20  ;;  %v4913_v13 = vor.u32 %v6286_v24, %v4912_v9 }
 0x12e   :  { %6615 = vpow2.f32 %v4858_v14  ;;  %v4920_v14 = vld [vmem:[%s10104_s2 + $0x68] sm:$0xf]  ;;  %v4941_v32 = vor.u32 %v6289_v31, %v4938_v16  ;;  %v6285_v21 = vld [vmem:[%s10104_s2 + $0x6c] sm:$0xf]  ;;  %v4917_v29 = vor.u32 %v6284_v5, %v4914_v12  ;;  %v4896_v20 = vld [vmem:[%s10104_s2 + $0x40] sm:$0xf]  ;;  %v494_v16 = vadd.f32 %v7488_v2, %v7535_v22 }
 0x12f   :  { %6617 = vrcp.f32 %v7532_v18  ;;  %v6282_v27 = vld [vmem:[%s10104_s2 + $0x4c] sm:$0xf0]  ;;  %1248 = vmatpush.bf16.msra.mxu2 %v4937_v23  ;;  %v6280_v24 = vld [vmem:[%s10104_s2 + $0x44] sm:$0xf]  ;;  %v4898_v5 = vld [vmem:[%s10104_s2 + $0x50] sm:$0xf0]  ;;  %1221 = vmatpush.bf16.msra.mxu0 %v4913_v13  ;;  %vm908_vm1 = vweird.f32 %v7532_v18  ;;  %vm923_vm3 = vweird.f32 %v7537_v3 }
 0x130   :  { %6619 = vrcp.f32 %v7537_v3  ;;  %1262 = vmatpush.bf16.msra.mxu3 %v4941_v32  ;;  %v4897_v2 = vor.u32 %v6282_v27, %v4896_v20  ;;  %v4901_v23 = vor.u32 %v6280_v24, %v4898_v5  ;;  %v6283_v32 = vld [vmem:[%s10104_s2 + $0x54] sm:$0xf0]  ;;  %v914_v13 = vand.u32 2147483648, %v7532_v18 }
 0x131   :  { %6621 = vpow2.f32 %v4859_v19  ;;  %v868_v7 = vpop.f32.mrf.mxu3  ;;  %v6287_v19 = vld [vmem:[%s10104_s2 + $0x74] sm:$0xf0]  ;;  %1235 = vmatpush.bf16.msra.mxu1 %v4917_v29  ;;  %v929_v29 = vand.u32 2147483648, %v7537_v3  ;;  %v927_v24 = vand.u32 2147483647, %v7537_v3 }
 0x132   :  { %6623 = vpow2.f32 %v4860_v4  ;;  %v878_v8 = vadd.f32 %v868_v7, %v543_v0  ;;  %v4922_v4 = vld [vmem:[%s10104_s2 + $0x78] sm:$0xf0]  ;;  %v873_v7 = vadd.f32 %v852_v30, %v492_v6  ;;  %v4921_v6 = vor.u32 %v6287_v19, %v4920_v14  ;;  %v4904_v14 = vld [vmem:[%s10104_s2 + $0x48] sm:$0xf]  ;;  %v6281_v19 = vld [vmem:[%s10104_s2 + $0x4c] sm:$0xf] }
 0x133   :  { %v4925_v30 = vor.u32 %v6285_v21, %v4922_v4  ;;  %v4906_v4 = vld [vmem:[%s10104_s2 + $0x58] sm:$0xf0]  ;;  %v4905_v39 = vor.u32 %v6283_v32, %v4904_v14  ;;  %1222 = vmatpush.bf16.msra.mxu0 %v4897_v2  ;;  %v10146_v2 = vand.u32 2147483647, %v7532_v18  ;;  %v915_v32 = vor.u32 1.1754944e-38, %v914_v13 }
 0x134   :  { %v6616_v0 = vpop.eup %6615  ;;  %v4861_v11 = vmul.f32 -1.442695, %v878_v8  ;;  %1249 = vmatpush.bf16.msra.mxu2 %v4921_v6  ;;  %v4909_v40 = vor.u32 %v6281_v19, %v4906_v4  ;;  %v4882_v6 = vld [vmem:[%s10104_s2 + $0x30] sm:$0xf0]  ;;  %vm928_vm7 = vcmp.eq.f32.partialorder %v927_v24, 8.507059e+37 }
 0x135   :  { %v7588_v31 = vpop.eup %6617  ;;  %v7592_v9 = vadd.f32 1.0, %v6616_v0  ;;  %v4880_v0 = vld [vmem:[%s10104_s2 + $0x20] sm:$0xf]  ;;  %1263 = vmatpush.bf16.msra.mxu3 %v4925_v30  ;;  %1236 = vmatpush.bf16.msra.mxu1 %v4901_v23  ;;  %vm7649_vm4 = vcmp.eq.f32.partialorder %v10146_v2, 8.507059e+37  ;;  %v4890_v24 = vld [vmem:[%s10104_s2 + $0x38] sm:$0xf0] }
 0x136   :  { %v7600_v8 = vpop.eup %6619  ;;  %v904_v12 = vmul.f32 %v7588_v31, %v7532_v18  ;;  %6625 = vpow2.f32 %v4861_v11  ;;  %vm909_vm0 = vweird.f32 %v7588_v31  ;;  %v4872_v2 = vld [vmem:[%s10104_s2 + $0x8] sm:$0xf]  ;;  %v6275_v23 = vld [vmem:[%s10104_s2 + $0x14] sm:$0xf0] }
 0x137   :  { %v6622_v21 = vpop.eup %6621  ;;  %v919_v11 = vmul.f32 %v7600_v8, %v7537_v3  ;;  %6627 = vrcp.f32 %v7592_v9  ;;  %vm924_vm2 = vweird.f32 %v7600_v8  ;;  %vm7657_vm5 = vmor %vm908_vm1, %vm909_vm0  ;;  %v4873_v33 = vor.u32 %v6275_v23, %v4872_v2 }
 0x138   :  { %v6624_v20 = vpop.eup %6623  ;;  %v905_v27 = vsub.f32 1.0, %v904_v12  ;;  %6629 = vtanh.f32 %v873_v7  ;;  %v7625_v5 = vadd.f32 1.0, %v6622_v21  ;;  %v854_v7 = vpop.f32.mrf.mxu2  ;;  %v4881_v12 = vor.u32 %v6278_v28, %v4880_v0  ;;  %v6276_v21 = vld [vmem:[%s10104_s2 + $0x24] sm:$0xf]  ;;  %1250 = vmatpush.bf16.msra.mxu2 %v4905_v39  ;;  %vm925_vm6 = vmor %vm923_vm3, %vm924_vm2  ;;  %v6279_v39 = vld [vmem:[%s10104_s2 + $0x34] sm:$0xf0] }
 0x139   :  { %v920_v26 = vsub.f32 1.0, %v919_v11  ;;  %v7630_v25 = vadd.f32 1.0, %v6624_v20  ;;  %v877_v4 = vadd.f32 %v854_v7, %v494_v16  ;;  %1264 = vmatpush.bf16.msra.mxu3 %v4909_v40  ;;  %v930_v20 = vor.u32 1.1754944e-38, %v929_v29  ;;  %v4888_v16 = vld [vmem:[%s10104_s2 + $0x28] sm:$0xf] }
 0x13a   :  { %v906_v35 = vmul.f32 %v7588_v31, %v905_v27  ;;  %6631 = vrcp.f32 %v7625_v5  ;;  %1223 = vmatpush.bf16.msra.mxu0 %v4881_v12  ;;  %v957_v3 = vand.u32 2147483647, %v7625_v5  ;;  %v6277_v27 = vld [vmem:[%s10104_s2 + $0x2c] sm:$0xf]  ;;  %v4889_v38 = vor.u32 %v6279_v39, %v4888_v16 }
 0x13b   :  { %v921_v30 = vmul.f32 %v7600_v8, %v920_v26  ;;  %6633 = vrcp.f32 %v7630_v25  ;;  %v4893_v37 = vor.u32 %v6277_v27, %v4890_v24  ;;  %vm953_vm10 = vweird.f32 %v7625_v5 }
 0x13c   :  { %v6626_v14 = vpop.eup %6625  ;;  %v907_v28 = vadd.f32 %v7588_v31, %v906_v35  ;;  %v4885_v35 = vor.u32 %v6276_v21, %v4882_v6  ;;  %v6274_v21 = vld [vmem:[%s10104_s2 + $0xc] sm:$0xf0]  ;;  %v6272_v6 = vld [vmem:[%s10104_s2 + $0x4] sm:$0xf]  ;;  %1251 = vmatpush.bf16.msra.mxu2 %v4889_v38  ;;  %vm968_vm11 = vweird.f32 %v7630_v25  ;;  %vm958_vm14 = vcmp.eq.f32.partialorder %v957_v3, 8.507059e+37 }
 0x13d   :  { %v7653_v19 = vpop.eup %6627  ;;  %v922_v11 = vadd.f32 %v7600_v8, %v921_v30  ;;  %v7662_v0 = vadd.f32 1.0, %v6626_v14  ;;  %1265 = vmatpush.bf16.msra.mxu3 %v4893_v37  ;;  %vm938_vm1 = vweird.f32 %v7592_v9  ;;  %v942_v3 = vand.u32 2147483647, %v7592_v9 }
 0x13e   :  { %v6630_v18 = vpop.eup %6629  ;;  %v911_v13 = vsel %vm7657_vm5, %v7588_v31, %v907_v28  ;;  %v934_v29 = vmul.f32 %v7653_v19, %v7592_v9  ;;  %1237 = vmatpush.bf16.msra.mxu1 %v4885_v35  ;;  %v4866_v28 = vld [vmem:[%s10104_s2 + $0x10] sm:$0xf0]  ;;  %v974_v35 = vand.u32 2147483648, %v7630_v25  ;;  %vm939_vm13 = vweird.f32 %v7653_v19 }
 0x13f   :  { %v916_v40 = vsel %vm7649_vm4, %v915_v32, %v911_v13  ;;  %v926_v31 = vsel %vm925_vm6, %v7600_v8, %v922_v11  ;;  %6635 = vrcp.f32 %v7662_v0  ;;  %v4864_v8 = vld [vmem:[%s10104_s2] sm:$0xf]  ;;  %vm940_vm2 = vmor %vm938_vm1, %vm939_vm13  ;;  %vm983_vm4 = vweird.f32 %v7662_v0 }
 0x140   :  { %v6632_v7 = vpop.eup %6631  ;;  %v931_v12 = vsel %vm928_vm7, %v930_v20, %v926_v31  ;;  %6637 = vtanh.f32 %v877_v4  ;;  %v997_v26 = vmul.f32 %v6630_v18, %v916_v40  ;;  %v6273_v4 = vld [vmem:[%s10104_s2 + $0xc] sm:$0xf]  ;;  %v4874_v20 = vld [vmem:[%s10104_s2 + $0x18] sm:$0xf0]  ;;  %v935_v13 = vsub.f32 1.0, %v934_v29  ;;  %1252 = vmatpush.bf16.msra.mxu2 %v4873_v33 }
 0x141   :  { %v6634_v30 = vpop.eup %6633  ;;  %v949_v14 = vmul.f32 %v6632_v7, %v7625_v5  ;;  %v995_v32 = vmul.f32 0.0, %v931_v12  ;;  %v959_v12 = vand.u32 2147483648, %v7625_v5  ;;  %v4865_v18 = vor.u32 %v6274_v21, %v4864_v8 }
 0x142   :  { %v964_v11 = vmul.f32 %v6634_v30, %v7630_v25  ;;  %v4869_v40 = vor.u32 %v6272_v6, %v4866_v28  ;;  %vm954_vm8 = vweird.f32 %v6632_v7  ;;  %v4877_v47 = vor.u32 %v6273_v4, %v4874_v20 }
 0x143   :  { %v950_v31 = vsub.f32 1.0, %v949_v14  ;;  %v7718_v43 = vadd.f32 %v997_v26, %v995_v32  ;;  %vm969_vm9 = vweird.f32 %v6634_v30  ;;  %v972_v29 = vand.u32 2147483647, %v7630_v25  ;;  %1224 = vmatpush.bf16.msra.mxu0 %v4865_v18  ;;  %vm955_vm12 = vmor %vm953_vm10, %vm954_vm8 }
 0x144   :  { %v965_v36 = vsub.f32 1.0, %v964_v11  ;;  %1238 = vmatpush.bf16.msra.mxu1 %v4869_v40  ;;  %v936_v39 = vmul.f32 %v7653_v19, %v935_v13  ;;  %v975_v37 = vor.u32 1.1754944e-38, %v974_v35  ;;  %v960_v24 = vor.u32 1.1754944e-38, %v959_v12  ;;  %vm970_vm15 = vmor %vm968_vm11, %vm969_vm9  ;;  %1266 = vmatpush.bf16.msra.mxu3 %v4877_v47 }
 0x145   :  { %v951_v34 = vmul.f32 %v6632_v7, %v950_v31  ;;  %v6636_v48 = vpop.eup %6635  ;;  %6639 = vtanh.f32 %v7718_v43  ;;  %vm973_vm0 = vcmp.eq.f32.partialorder %v972_v29, 8.507059e+37  ;;  %v989_v32 = vand.u32 2147483648, %v7662_v0 }
 0x146   :  { %v966_v46 = vmul.f32 %v6634_v30, %v965_v36  ;;  %v6638_v16 = vpop.eup %6637  ;;  %v979_v38 = vmul.f32 %v6636_v48, %v7662_v0  ;;  %v937_v28 = vadd.f32 %v7653_v19, %v936_v39  ;;  %vm984_vm3 = vweird.f32 %v6636_v48 }
 0x147   :  { %v952_v27 = vadd.f32 %v6632_v7, %v951_v34  ;;  %vm943_vm5 = vcmp.eq.f32.partialorder %v942_v3, 8.507059e+37  ;;  %vm985_vm6 = vmor %vm983_vm4, %vm984_vm3  ;;  %v990_v4 = vor.u32 1.1754944e-38, %v989_v32  ;;  %v6333_v3 = vld [vmem:[%s10104_s2 + $0xec] sm:$0xf] }
 0x148   :  { %v967_v36 = vadd.f32 %v6634_v30, %v966_v46  ;;  %v980_v21 = vsub.f32 1.0, %v979_v38  ;;  %v944_v46 = vand.u32 2147483648, %v7592_v9  ;;  %v941_v47 = vsel %vm940_vm2, %v7653_v19, %v937_v28 }
 0x149   :  { %v956_v8 = vsel %vm955_vm12, %v6632_v7, %v952_v27  ;;  %v987_v9 = vand.u32 2147483647, %v7662_v0  ;;  %v438_v0 = vadd.f32 %v7409_v58, %v7434_v15  ;;  %v536_v58 = vadd.f32 %v7413_v60, %v7486_v17 }
 0x14a   :  { %v961_v34 = vsel %vm958_vm14, %v960_v24, %v956_v8  ;;  %v971_v5 = vsel %vm970_vm15, %v6634_v30, %v967_v36  ;;  %v981_v14 = vmul.f32 %v6636_v48, %v980_v21  ;;  %v945_v23 = vor.u32 1.1754944e-38, %v944_v46  ;;  %v5110_v8 = vld [vmem:[%s10104_s2 + $0xe0] sm:$0xf]  ;;  %v6334_v21 = vld [vmem:[%s10104_s2 + $0xec] sm:$0xf0] }
 0x14b   :  { %v976_v25 = vsel %vm973_vm0, %v975_v37, %v971_v5  ;;  %v998_v6 = vmul.f32 %v6638_v16, %v961_v34  ;;  %v6640_v30 = vpop.eup %6639  ;;  %vm988_vm7 = vcmp.eq.f32.partialorder %v987_v9, 8.507059e+37  ;;  %v5111_v34 = vor.u32 %v6334_v21, %v5110_v8  ;;  %v5112_v5 = vld [vmem:[%s10104_s2 + $0xf0] sm:$0xf0] }
 0x14c   :  { %v996_v2 = vmul.f32 0.0, %v976_v25  ;;  %v982_v7 = vadd.f32 %v6636_v48, %v981_v14  ;;  %v946_v26 = vsel %vm943_vm5, %v945_v23, %v941_v47  ;;  %v5118_v25 = vld [vmem:[%s10104_s2 + $0xe8] sm:$0xf]  ;;  %v391_v14 = vadd.f32 %v7415_v61, %v7431_v10  ;;  %v5120_v47 = vld [vmem:[%s10104_s2 + $0xf8] sm:$0xf0] }
 0x14d   :  { %v1003_v35 = vmul.f32 %v6640_v30, %v946_v26  ;;  %v440_v60 = vadd.f32 %v7417_v62, %v7434_v15  ;;  %1619 = vmatpush.bf16.msrb.mxu0 %v5111_v34  ;;  %v5123_v32 = vor.u32 %v6333_v3, %v5120_v47  ;;  %v5094_v62 = vld [vmem:[%s10104_s2 + $0xc0] sm:$0xf]  ;;  %v6330_v26 = vld [vmem:[%s10104_s2 + $0xcc] sm:$0xf0]  ;;  %v538_v8 = vadd.f32 %v7419_v63, %v7486_v17  ;;  %v6327_v63 = vld [vmem:[%s10104_s2 + $0xb4] sm:$0xf0] }
 0x14e   :  { %v7735_v33 = vadd.f32 %v998_v6, %v996_v2  ;;  %v986_v11 = vsel %vm985_vm6, %v6636_v48, %v982_v7  ;;  %v389_v48 = vadd.f32 %v7407_v57, %v7431_v10  ;;  %v6332_v57 = vld [vmem:[%s10104_s2 + $0xe4] sm:$0xf]  ;;  %v6335_v6 = vld [vmem:[%s10104_s2 + $0xf4] sm:$0xf0] }
 0x14f   :  { %v991_v19 = vsel %vm988_vm7, %v990_v4, %v986_v11  ;;  %v1005_v31 = vpack.c.bf16 %v1003_v35, %v1003_v35  ;;  %v5115_v46 = vor.u32 %v6332_v57, %v5112_v5  ;;  %v5119_v2 = vor.u32 %v6335_v6, %v5118_v25  ;;  %v6328_v11 = vld [vmem:[%s10104_s2 + $0xc4] sm:$0xf]  ;;  %1661 = vmatpush.bf16.msrb.mxu3 %v5123_v32  ;;  %v5086_v5 = vld [vmem:[%s10104_s2 + $0xa8] sm:$0xf] }
 0x150   :  { %6641 = vtanh.f32 %v7735_v33  ;;  %v5095_v4 = vor.u32 %v6330_v26, %v5094_v62  ;;  %v6324_v57 = vld [vmem:[%s10104_s2 + $0xa4] sm:$0xf]  ;;  %v487_v25 = vadd.f32 %v7411_v59, %v7535_v22  ;;  %v5087_v47 = vor.u32 %v6327_v63, %v5086_v5  ;;  %v5062_v59 = vld [vmem:[%s10104_s2 + $0x80] sm:$0xf]  ;;  %v5064_v26 = vld [vmem:[%s10104_s2 + $0x90] sm:$0xf0] }
 0x151   :  { %v1053_v40 = vunpack.c.l.b16 %v1005_v31  ;;  %1633 = vmatpush.bf16.msrb.mxu1 %v5115_v46  ;;  %1647 = vmatpush.bf16.msrb.mxu2 %v5119_v2  ;;  %v5088_v46 = vld [vmem:[%s10104_s2 + $0xb8] sm:$0xf0] }
 0x152   :  { %1620 = vmatpush.bf16.msrb.mxu0 %v5095_v4 }
 0x156   :  { %v6642_v20 = vpop.eup %6641 }
 0x157   :  { %v1004_v13 = vmul.f32 %v6642_v20, %v991_v19  ;;  %v5096_v20 = vld [vmem:[%s10104_s2 + $0xd0] sm:$0xf0]  ;;  %v5102_v19 = vld [vmem:[%s10104_s2 + $0xc8] sm:$0xf] }
 0x159   :  { %v1006_v12 = vpack.c.bf16 %v1004_v13, %v1004_v13  ;;  %v6571_v18 = vpack.c.bf16 %v1004_v13, %v1003_v35 }
 0x15b   :  { %6572 = vst [vmem:[#allocation5 + $0x8] sm:$0xff] %v6571_v18   ;;  %v1054_v29 = vunpack.c.l.b16 %v1006_v12  ;;  %v5099_v18 = vor.u32 %v6328_v11, %v5096_v20 }
 0x15d   :  { %v1055_v16 = vpack.c.b16 %v1054_v29, %v1053_v40  ;;  %v6331_v40 = vld [vmem:[%s10104_s2 + $0xd4] sm:$0xf0]  ;;  %1634 = vmatpush.bf16.msrb.mxu1 %v5099_v18 }
 0x15f   :  { %1225 = vmatmul.bf16.vlgmr.msra.gmra.mxu0 %v1055_v16  ;;  %1239 = vmatmul.bf16.vlgmr.msra.gmra.mxu1 %v1055_v16 }
 0x160   :  { %1253 = vmatmul.bf16.vlgmr.msra.gmra.mxu2 %v1055_v16  ;;  %1267 = vmatmul.bf16.vlgmr.msra.gmra.mxu3 %v1055_v16 }
 0x1dc   :  { %v1226_v39 = vpop.f32.mrf.mxu0  ;;  %v1240_v27 = vpop.f32.mrf.mxu1 }
 0x1dd   :  { %v1273_v38 = vadd.f32 %v1226_v39, %v389_v48  ;;  %v1274_v37 = vadd.f32 %v1240_v27, %v438_v0  ;;  %v5103_v0 = vor.u32 %v6331_v40, %v5102_v19  ;;  %v6329_v39 = vld [vmem:[%s10104_s2 + $0xcc] sm:$0xf]  ;;  %v5104_v27 = vld [vmem:[%s10104_s2 + $0xd8] sm:$0xf0] }
 0x1df   :  { %v4990_v24 = vmul.f32 -1.442695, %v1273_v38  ;;  %v4991_v36 = vmul.f32 -1.442695, %v1274_v37  ;;  %v5107_v37 = vor.u32 %v6329_v39, %v5104_v27  ;;  %1648 = vmatpush.bf16.msrb.mxu2 %v5103_v0 }
 0x1e1   :  { %6643 = vpow2.f32 %v4990_v24  ;;  %v5078_v24 = vld [vmem:[%s10104_s2 + $0xa0] sm:$0xf]  ;;  %1662 = vmatpush.bf16.msrb.mxu3 %v5107_v37  ;;  %v5070_v37 = vld [vmem:[%s10104_s2 + $0x88] sm:$0xf] }
 0x1e2   :  { %6645 = vpow2.f32 %v4991_v36  ;;  %v6326_v36 = vld [vmem:[%s10104_s2 + $0xac] sm:$0xf0] }
 0x1e3   :  { %v1268_v28 = vpop.f32.mrf.mxu3  ;;  %v1254_v48 = vpop.f32.mrf.mxu2  ;;  %1649 = vmatpush.bf16.msrb.mxu2 %v5087_v47  ;;  %v6316_v47 = vld [vmem:[%s10104_s2 + $0x64] sm:$0xf] }
 0x1e4   :  { %v1276_v7 = vadd.f32 %v1268_v28, %v536_v58  ;;  %v1228_v30 = vpop.f32.mrf.mxu0  ;;  %v1242_v23 = vpop.f32.mrf.mxu1  ;;  %v5080_v58 = vld [vmem:[%s10104_s2 + $0xb0] sm:$0xf0]  ;;  %v6325_v28 = vld [vmem:[%s10104_s2 + $0xac] sm:$0xf] }
 0x1e5   :  { %v1277_v61 = vadd.f32 %v1228_v30, %v391_v14  ;;  %v1278_v9 = vadd.f32 %v1242_v23, %v440_v60  ;;  %v5079_v60 = vor.u32 %v6326_v36, %v5078_v24  ;;  %v5083_v3 = vor.u32 %v6324_v57, %v5080_v58  ;;  %v6322_v30 = vld [vmem:[%s10104_s2 + $0x8c] sm:$0xf0]  ;;  %v6320_v23 = vld [vmem:[%s10104_s2 + $0x84] sm:$0xf]  ;;  %v6323_v24 = vld [vmem:[%s10104_s2 + $0x94] sm:$0xf0] }
 0x1e6   :  { %v4992_v35 = vmul.f32 -1.442695, %v1276_v7  ;;  %v5091_v7 = vor.u32 %v6325_v28, %v5088_v46  ;;  %v5063_v62 = vor.u32 %v6322_v30, %v5062_v59  ;;  %v5067_v19 = vor.u32 %v6320_v23, %v5064_v26  ;;  %v5072_v57 = vld [vmem:[%s10104_s2 + $0x98] sm:$0xf0] }
 0x1e7   :  { %v6644_v13 = vpop.eup %6643  ;;  %v4993_v31 = vmul.f32 -1.442695, %v1277_v61  ;;  %v4994_v12 = vmul.f32 -1.442695, %v1278_v9  ;;  %v1275_v61 = vadd.f32 %v1254_v48, %v487_v25  ;;  %1621 = vmatpush.bf16.msrb.mxu0 %v5079_v60  ;;  %1635 = vmatpush.bf16.msrb.mxu1 %v5083_v3  ;;  %v6315_v25 = vld [vmem:[%s10104_s2 + $0x54] sm:$0xf0] }
 0x1e8   :  { %v6646_v29 = vpop.eup %6645  ;;  %v7794_v16 = vadd.f32 1.0, %v6644_v13  ;;  %6647 = vpow2.f32 %v4992_v35  ;;  %v489_v35 = vadd.f32 %v7421_v1, %v7535_v22  ;;  %1663 = vmatpush.bf16.msrb.mxu3 %v5091_v7  ;;  %v5048_v7 = vld [vmem:[%s10104_s2 + $0x70] sm:$0xf0] }
 0x1e9   :  { %v7802_v38 = vadd.f32 1.0, %v6646_v29  ;;  %6649 = vpow2.f32 %v4993_v31 }
 0x1ea   :  { %6651 = vrcp.f32 %v7794_v16  ;;  %v1314_v34 = vand.u32 2147483647, %v7794_v16  ;;  %v1316_v6 = vand.u32 2147483648, %v7794_v16  ;;  %vm1310_vm9 = vweird.f32 %v7794_v16 }
 0x1eb   :  { %6653 = vrcp.f32 %v7802_v38  ;;  %v1270_v21 = vpop.f32.mrf.mxu3  ;;  %v1329_v18 = vand.u32 2147483647, %v7802_v38  ;;  %v1256_v0 = vpop.f32.mrf.mxu2  ;;  %1622 = vmatpush.bf16.msrb.mxu0 %v5063_v62  ;;  %vm1325_vm10 = vweird.f32 %v7802_v38  ;;  %1636 = vmatpush.bf16.msrb.mxu1 %v5067_v19 }
 0x1ec   :  { %6655 = vpow2.f32 %v4994_v12  ;;  %v1280_v14 = vadd.f32 %v1270_v21, %v538_v8  ;;  %v1331_v12 = vand.u32 2147483648, %v7802_v38  ;;  %vm7865_vm8 = vcmp.eq.f32.partialorder %v1314_v34, 8.507059e+37  ;;  %v6321_v21 = vld [vmem:[%s10104_s2 + $0x8c] sm:$0xf] }
 0x1ed   :  { %v1317_v48 = vor.u32 1.1754944e-38, %v1316_v6  ;;  %v1279_v34 = vadd.f32 %v1256_v0, %v489_v35  ;;  %vm7892_vm13 = vcmp.eq.f32.partialorder %v1329_v18, 8.507059e+37  ;;  %v5046_v6 = vld [vmem:[%s10104_s2 + $0x60] sm:$0xf]  ;;  %v5075_v3 = vor.u32 %v6321_v21, %v5072_v57  ;;  %v5056_v18 = vld [vmem:[%s10104_s2 + $0x78] sm:$0xf0] }
 0x1ee   :  { %v6648_v2 = vpop.eup %6647  ;;  %v4995_v20 = vmul.f32 -1.442695, %v1280_v14  ;;  %v1332_v63 = vor.u32 1.1754944e-38, %v1331_v12  ;;  %v6318_v14 = vld [vmem:[%s10104_s2 + $0x6c] sm:$0xf0] }
 0x1ef   :  { %v6650_v32 = vpop.eup %6649  ;;  %v7845_v9 = vadd.f32 1.0, %v6648_v2  ;;  %v5071_v2 = vor.u32 %v6323_v24, %v5070_v37  ;;  %1664 = vmatpush.bf16.msrb.mxu3 %v5075_v3  ;;  %v6319_v12 = vld [vmem:[%s10104_s2 + $0x74] sm:$0xf0]  ;;  %v5051_v37 = vor.u32 %v6316_v47, %v5048_v7  ;;  %v5030_v24 = vld [vmem:[%s10104_s2 + $0x40] sm:$0xf] }
 0x1f0   :  { %v7850_v11 = vpop.eup %6651  ;;  %v7854_v4 = vadd.f32 1.0, %v6650_v32 }
 0x1f1   :  { %v7856_v13 = vpop.eup %6653  ;;  %v1306_v31 = vmul.f32 %v7850_v11, %v7794_v16  ;;  %6657 = vrcp.f32 %v7845_v9  ;;  %vm1311_vm11 = vweird.f32 %v7850_v11  ;;  %1650 = vmatpush.bf16.msrb.mxu2 %v5071_v2  ;;  %1637 = vmatpush.bf16.msrb.mxu1 %v5051_v37  ;;  %v6310_v2 = vld [vmem:[%s10104_s2 + $0x2c] sm:$0xf0] }
 0x1f2   :  { %v6656_v40 = vpop.eup %6655  ;;  %v1321_v1 = vmul.f32 %v7856_v13, %v7802_v38  ;;  %6659 = vrcp.f32 %v7854_v4  ;;  %v1361_v8 = vand.u32 2147483648, %v7854_v4  ;;  %vm1326_vm12 = vweird.f32 %v7856_v13  ;;  %vm7918_vm14 = vmor %vm1310_vm9, %vm1311_vm11  ;;  %v5054_v38 = vld [vmem:[%s10104_s2 + $0x68] sm:$0xf] }
 0x1f3   :  { %v1307_v39 = vsub.f32 1.0, %v1306_v31  ;;  %6661 = vtanh.f32 %v1275_v61  ;;  %v7871_v27 = vadd.f32 1.0, %v6656_v40  ;;  %v1359_v46 = vand.u32 2147483647, %v7854_v4  ;;  %vm7932_vm15 = vmor %vm1325_vm10, %vm1326_vm12 }
 0x1f4   :  { %v1322_v36 = vsub.f32 1.0, %v1321_v1  ;;  %6663 = vpow2.f32 %v4995_v20  ;;  %v7926_v62 = vor.u32 1.1754944e-38, %v1361_v8  ;;  %v5047_v31 = vor.u32 %v6318_v14, %v5046_v6  ;;  %v6313_v14 = vld [vmem:[%s10104_s2 + $0x4c] sm:$0xf] }
 0x1f5   :  { %v1308_v58 = vmul.f32 %v7850_v11, %v1307_v39  ;;  %6665 = vrcp.f32 %v7871_v27  ;;  %v1376_v61 = vand.u32 2147483648, %v7871_v27  ;;  %v1374_v19 = vand.u32 2147483647, %v7871_v27 }
 0x1f6   :  { %v1323_v5 = vmul.f32 %v7856_v13, %v1322_v36  ;;  %v6314_v36 = vld [vmem:[%s10104_s2 + $0x4c] sm:$0xf0]  ;;  %1623 = vmatpush.bf16.msrb.mxu0 %v5047_v31  ;;  %6667 = vtanh.f32 %v1279_v34  ;;  %vm1355_vm1 = vweird.f32 %v7854_v4  ;;  %v5040_v34 = vld [vmem:[%s10104_s2 + $0x58] sm:$0xf0]  ;;  %v5055_v7 = vor.u32 %v6319_v12, %v5054_v38  ;;  %v5022_v38 = vld [vmem:[%s10104_s2 + $0x28] sm:$0xf] }
 0x1f7   :  { %v7902_v60 = vpop.eup %6657  ;;  %v1309_v28 = vadd.f32 %v7850_v11, %v1308_v58  ;;  %v5032_v58 = vld [vmem:[%s10104_s2 + $0x50] sm:$0xf0]  ;;  %vm1360_vm4 = vcmp.eq.f32.partialorder %v1359_v46, 8.507059e+37  ;;  %vm1370_vm5 = vweird.f32 %v7871_v27  ;;  %vm1375_vm7 = vcmp.eq.f32.partialorder %v1374_v19, 8.507059e+37 }
 0x1f8   :  { %v7912_v59 = vpop.eup %6659  ;;  %v1324_v23 = vadd.f32 %v7856_v13, %v1323_v5  ;;  %v1336_v32 = vmul.f32 %v7902_v60, %v7845_v9  ;;  %1651 = vmatpush.bf16.msrb.mxu2 %v5055_v7  ;;  %vm1340_vm9 = vweird.f32 %v7845_v9 }
 0x1f9   :  { %v6662_v26 = vpop.eup %6661  ;;  %v1313_v35 = vsel %vm7918_vm14, %v7850_v11, %v1309_v28  ;;  %v1351_v20 = vmul.f32 %v7912_v59, %v7854_v4  ;;  %v6317_v11 = vld [vmem:[%s10104_s2 + $0x6c] sm:$0xf]  ;;  %vm1356_vm0 = vweird.f32 %v7912_v59  ;;  %v5014_v28 = vld [vmem:[%s10104_s2 + $0x20] sm:$0xf] }
 0x1fa   :  { %v6664_v40 = vpop.eup %6663  ;;  %v1318_v1 = vsel %vm7865_vm8, %v1317_v48, %v1313_v35  ;;  %v1328_v0 = vsel %vm7932_vm15, %v7856_v13, %v1324_v23  ;;  %v1337_v39 = vsub.f32 1.0, %v1336_v32  ;;  %v6312_v13 = vld [vmem:[%s10104_s2 + $0x44] sm:$0xf]  ;;  %v5059_v30 = vor.u32 %v6317_v11, %v5056_v18  ;;  %v5016_v32 = vld [vmem:[%s10104_s2 + $0x30] sm:$0xf0]  ;;  %vm8014_vm2 = vmor %vm1355_vm1, %vm1356_vm0 }
 0x1fb   :  { %v7965_v8 = vpop.eup %6665  ;;  %v1333_v29 = vsel %vm7892_vm13, %v1332_v63, %v1328_v0  ;;  %v1399_v48 = vmul.f32 %v6662_v26, %v1318_v1  ;;  %v1352_v21 = vsub.f32 1.0, %v1351_v20  ;;  %v7969_v57 = vadd.f32 1.0, %v6664_v40  ;;  %v5038_v63 = vld [vmem:[%s10104_s2 + $0x48] sm:$0xf]  ;;  %v6308_v23 = vld [vmem:[%s10104_s2 + $0x24] sm:$0xf] }
 0x1fc   :  { %v1397_v5 = vmul.f32 %v1333_v29, %v7718_v43  ;;  %v1366_v6 = vmul.f32 %v7965_v8, %v7871_v27  ;;  %v1338_v26 = vmul.f32 %v7902_v60, %v1337_v39  ;;  %v5031_v20 = vor.u32 %v6314_v36, %v5030_v24  ;;  %1665 = vmatpush.bf16.msrb.mxu3 %v5059_v30  ;;  %v6311_v40 = vld [vmem:[%s10104_s2 + $0x34] sm:$0xf0]  ;;  %v6309_v1 = vld [vmem:[%s10104_s2 + $0x2c] sm:$0xf]  ;;  %v5024_v0 = vld [vmem:[%s10104_s2 + $0x38] sm:$0xf0] }
 0x1fd   :  { %v1353_v43 = vmul.f32 %v7912_v59, %v1352_v21  ;;  %6669 = vrcp.f32 %v7969_v57  ;;  %v5035_v31 = vor.u32 %v6312_v13, %v5032_v58  ;;  %vm1371_vm3 = vweird.f32 %v7965_v8  ;;  %v4998_v36 = vld [vmem:[%s10104_s2] sm:$0xf]  ;;  %v6306_v29 = vld [vmem:[%s10104_s2 + $0xc] sm:$0xf0]  ;;  %v6304_v21 = vld [vmem:[%s10104_s2 + $0x4] sm:$0xf] }
 0x1fe   :  { %v8002_v3 = vadd.f32 %v1399_v48, %v1397_v5  ;;  %v1367_v47 = vsub.f32 1.0, %v1366_v6  ;;  %v5039_v11 = vor.u32 %v6315_v25, %v5038_v63  ;;  %v5043_v18 = vor.u32 %v6313_v14, %v5040_v34  ;;  %1624 = vmatpush.bf16.msrb.mxu0 %v5031_v20  ;;  %v6668_v48 = vpop.eup %6667  ;;  %v5000_v13 = vld [vmem:[%s10104_s2 + $0x10] sm:$0xf0]  ;;  %vm1372_vm6 = vmor %vm1370_vm5, %vm1371_vm3  ;;  %v5006_v14 = vld [vmem:[%s10104_s2 + $0x8] sm:$0xf] }
 0x1ff   :  { %v1354_v16 = vadd.f32 %v7912_v59, %v1353_v43  ;;  %1638 = vmatpush.bf16.msrb.mxu1 %v5035_v31  ;;  %v5015_v37 = vor.u32 %v6310_v2, %v5014_v28  ;;  %v5019_v24 = vor.u32 %v6308_v23, %v5016_v32  ;;  %v5023_v5 = vor.u32 %v6311_v40, %v5022_v38  ;;  %v6307_v27 = vld [vmem:[%s10104_s2 + $0x14] sm:$0xf0]  ;;  %v5008_v34 = vld [vmem:[%s10104_s2 + $0x18] sm:$0xf0] }
 0x200   :  { %v1368_v12 = vmul.f32 %v7965_v8, %v1367_v47  ;;  %6671 = vtanh.f32 %v8002_v3  ;;  %1652 = vmatpush.bf16.msrb.mxu2 %v5039_v11  ;;  %1666 = vmatpush.bf16.msrb.mxu3 %v5043_v18  ;;  %v4999_v25 = vor.u32 %v6306_v29, %v4998_v36  ;;  %vm1341_vm8 = vweird.f32 %v7902_v60 }
 0x201   :  { %v1358_v39 = vsel %vm8014_vm2, %v7912_v59, %v1354_v16  ;;  %v1377_v59 = vor.u32 1.1754944e-38, %v1376_v61  ;;  %v5003_v43 = vor.u32 %v6304_v21, %v5000_v13  ;;  %v1339_v28 = vadd.f32 %v7902_v60, %v1338_v26  ;;  %vm8079_vm10 = vmor %vm1340_vm9, %vm1341_vm8 }
 0x202   :  { %v1363_v4 = vsel %vm1360_vm4, %v7926_v62, %v1358_v39  ;;  %v1369_v46 = vadd.f32 %v7965_v8, %v1368_v12  ;;  %v5027_v62 = vor.u32 %v6309_v1, %v5024_v0  ;;  %1625 = vmatpush.bf16.msrb.mxu0 %v5015_v37  ;;  %v1346_v2 = vand.u32 2147483648, %v7845_v9 }
 0x203   :  { %v6670_v58 = vpop.eup %6669  ;;  %v1400_v61 = vmul.f32 %v6668_v48, %v1363_v4  ;;  %1639 = vmatpush.bf16.msrb.mxu1 %v5019_v24  ;;  %v5007_v30 = vor.u32 %v6307_v27, %v5006_v14  ;;  %v1344_v23 = vand.u32 2147483647, %v7845_v9  ;;  %v1391_v9 = vand.u32 2147483648, %v7969_v57  ;;  %v5244_v27 = vld [vmem:[%s10104_s2 + $0xe0] sm:$0xf] }
 0x204   :  { %v1373_v6 = vsel %vm1372_vm6, %v7965_v8, %v1369_v46  ;;  %v1381_v63 = vmul.f32 %v6670_v58, %v7969_v57  ;;  %v6305_v8 = vld [vmem:[%s10104_s2 + $0xc] sm:$0xf]  ;;  %1653 = vmatpush.bf16.msrb.mxu2 %v5023_v5  ;;  %1667 = vmatpush.bf16.msrb.mxu3 %v5027_v62  ;;  %vm1386_vm11 = vweird.f32 %v6670_v58  ;;  %v1347_v31 = vor.u32 1.1754944e-38, %v1346_v2 }
 0x205   :  { %v1378_v19 = vsel %vm1375_vm7, %v1377_v59, %v1373_v6  ;;  %v5011_v26 = vor.u32 %v6305_v8, %v5008_v34  ;;  %vm1385_vm12 = vweird.f32 %v7969_v57  ;;  %vm1345_vm13 = vcmp.eq.f32.partialorder %v1344_v23, 8.507059e+37  ;;  %v5252_v34 = vld [vmem:[%s10104_s2 + $0xe8] sm:$0xf]  ;;  %v5254_v23 = vld [vmem:[%s10104_s2 + $0xf8] sm:$0xf0] }
 0x206   :  { %v1398_v47 = vmul.f32 %v1378_v19, %v7735_v33  ;;  %v1382_v7 = vsub.f32 1.0, %v1381_v63  ;;  %1626 = vmatpush.bf16.msrb.mxu0 %v4999_v25  ;;  %v1343_v33 = vsel %vm8079_vm10, %v7902_v60, %v1339_v28  ;;  %v6672_v20 = vpop.eup %6671  ;;  %v1389_v12 = vand.u32 2147483647, %v7969_v57  ;;  %vm1387_vm14 = vmor %vm1385_vm12, %vm1386_vm11  ;;  %v6366_v19 = vld [vmem:[%s10104_s2 + $0xec] sm:$0xf0] }
 0x207   :  { %1640 = vmatpush.bf16.msrb.mxu1 %v5003_v43  ;;  %v1348_v11 = vsel %vm1345_vm13, %v1347_v31, %v1343_v33  ;;  %v1392_v1 = vor.u32 1.1754944e-38, %v1391_v9  ;;  %v384_v57 = vadd.f32 %v7391_v49, %v7431_v10  ;;  %v433_v4 = vadd.f32 %v7393_v50, %v7434_v15  ;;  %v6367_v28 = vld [vmem:[%s10104_s2 + $0xf4] sm:$0xf0]  ;;  %v5228_v9 = vld [vmem:[%s10104_s2 + $0xc0] sm:$0xf] }
 0x208   :  { %v8083_v16 = vadd.f32 %v1400_v61, %v1398_v47  ;;  %v1383_v35 = vmul.f32 %v6670_v58, %v1382_v7  ;;  %1654 = vmatpush.bf16.msrb.mxu2 %v5007_v30  ;;  %1668 = vmatpush.bf16.msrb.mxu3 %v5011_v26  ;;  %v1405_v40 = vmul.f32 %v6672_v20, %v1348_v11  ;;  %vm1390_vm15 = vcmp.eq.f32.partialorder %v1389_v12, 8.507059e+37  ;;  %v6365_v30 = vld [vmem:[%s10104_s2 + $0xec] sm:$0xf] }
 0x209   :  { %v531_v62 = vadd.f32 %v7397_v52, %v7486_v17  ;;  %v386_v6 = vadd.f32 %v7399_v53, %v7431_v10  ;;  %v435_v49 = vadd.f32 %v7401_v54, %v7434_v15  ;;  %v6364_v52 = vld [vmem:[%s10104_s2 + $0xe4] sm:$0xf]  ;;  %v5245_v8 = vor.u32 %v6366_v19, %v5244_v27  ;;  %v5246_v54 = vld [vmem:[%s10104_s2 + $0xf0] sm:$0xf0] }
 0x20a   :  { %6673 = vtanh.f32 %v8083_v16  ;;  %v1384_v38 = vadd.f32 %v6670_v58, %v1383_v35  ;;  %v1407_v37 = vpack.c.bf16 %v1405_v40, %v1405_v40  ;;  %v5249_v47 = vor.u32 %v6364_v52, %v5246_v54 }
 0x20b   :  { %v5253_v7 = vor.u32 %v6367_v28, %v5252_v34  ;;  %2021 = vmatpush.bf16.msra.mxu0 %v5245_v8  ;;  %v5257_v33 = vor.u32 %v6365_v30, %v5254_v23  ;;  %v6357_v23 = vld [vmem:[%s10104_s2 + $0xac] sm:$0xf] }
 0x20c   :  { %v1388_v18 = vsel %vm1387_vm14, %v6670_v58, %v1384_v38  ;;  %v1455_v29 = vunpack.c.l.b16 %v1407_v37  ;;  %2035 = vmatpush.bf16.msra.mxu1 %v5249_v47  ;;  %v6362_v38 = vld [vmem:[%s10104_s2 + $0xcc] sm:$0xf0]  ;;  %v6363_v37 = vld [vmem:[%s10104_s2 + $0xd4] sm:$0xf0] }
 0x20d   :  { %v1393_v0 = vsel %vm1390_vm15, %v1392_v1, %v1388_v18  ;;  %2049 = vmatpush.bf16.msra.mxu2 %v5253_v7  ;;  %2063 = vmatpush.bf16.msra.mxu3 %v5257_v33  ;;  %v5229_v18 = vor.u32 %v6362_v38, %v5228_v9  ;;  %v5230_v1 = vld [vmem:[%s10104_s2 + $0xd0] sm:$0xf0]  ;;  %v5196_v33 = vld [vmem:[%s10104_s2 + $0x80] sm:$0xf] }
 0x20f   :  { %2022 = vmatpush.bf16.msra.mxu0 %v5229_v18 }
 0x210   :  { %v6674_v60 = vpop.eup %6673 }
 0x211   :  { %v1406_v39 = vmul.f32 %v6674_v60, %v1393_v0  ;;  %v533_v60 = vadd.f32 %v7405_v56, %v7486_v17  ;;  %v5238_v56 = vld [vmem:[%s10104_s2 + $0xd8] sm:$0xf0] }
 0x213   :  { %v1408_v24 = vpack.c.bf16 %v1406_v39, %v1406_v39  ;;  %v6576_v36 = vpack.c.bf16 %v1406_v39, %v1405_v40  ;;  %v6360_v40 = vld [vmem:[%s10104_s2 + $0xc4] sm:$0xf]  ;;  %v5236_v39 = vld [vmem:[%s10104_s2 + $0xc8] sm:$0xf] }
 0x215   :  { %6577 = vst [vmem:[#allocation5 + $0x38] sm:$0xff] %v6576_v36   ;;  %v1456_v48 = vunpack.c.l.b16 %v1408_v24  ;;  %v6361_v24 = vld [vmem:[%s10104_s2 + $0xcc] sm:$0xf]  ;;  %v482_v36 = vadd.f32 %v7395_v51, %v7535_v22  ;;  %v6356_v51 = vld [vmem:[%s10104_s2 + $0xa4] sm:$0xf] }
 0x217   :  { %v1457_v59 = vpack.c.b16 %v1456_v48, %v1455_v29 }
 0x219   :  { %1627 = vmatmul.bf16.vlgmr.msrb.gmra.mxu0 %v1457_v59  ;;  %1641 = vmatmul.bf16.vlgmr.msrb.gmra.mxu1 %v1457_v59 }
 0x21a   :  { %1655 = vmatmul.bf16.vlgmr.msrb.gmra.mxu2 %v1457_v59  ;;  %1669 = vmatmul.bf16.vlgmr.msrb.gmra.mxu3 %v1457_v59  ;;  %v5233_v59 = vor.u32 %v6360_v40, %v5230_v1  ;;  %v6352_v1 = vld [vmem:[%s10104_s2 + $0x84] sm:$0xf] }
 0x21c   :  { %2036 = vmatpush.bf16.msra.mxu1 %v5233_v59 }
 0x296   :  { %v1628_v46 = vpop.f32.mrf.mxu0  ;;  %v1642_v21 = vpop.f32.mrf.mxu1 }
 0x297   :  { %v1675_v13 = vadd.f32 %v1628_v46, %v384_v57  ;;  %v1676_v58 = vadd.f32 %v1642_v21, %v433_v4  ;;  %v5212_v57 = vld [vmem:[%s10104_s2 + $0xa0] sm:$0xf]  ;;  %v6358_v4 = vld [vmem:[%s10104_s2 + $0xac] sm:$0xf0]  ;;  %v5237_v21 = vor.u32 %v6363_v37, %v5236_v39 }
 0x299   :  { %v5124_v61 = vmul.f32 -1.442695, %v1675_v13  ;;  %v5125_v5 = vmul.f32 -1.442695, %v1676_v58  ;;  %v5241_v13 = vor.u32 %v6361_v24, %v5238_v56  ;;  %v5213_v58 = vor.u32 %v6358_v4, %v5212_v57  ;;  %2050 = vmatpush.bf16.msra.mxu2 %v5237_v21 }
 0x29b   :  { %6675 = vpow2.f32 %v5124_v61  ;;  %v5214_v61 = vld [vmem:[%s10104_s2 + $0xb0] sm:$0xf0]  ;;  %2064 = vmatpush.bf16.msra.mxu3 %v5241_v13  ;;  %2023 = vmatpush.bf16.msra.mxu0 %v5213_v58 }
 0x29c   :  { %6677 = vpow2.f32 %v5125_v5  ;;  %v5220_v5 = vld [vmem:[%s10104_s2 + $0xa8] sm:$0xf] }
 0x29d   :  { %v1670_v63 = vpop.f32.mrf.mxu3  ;;  %v1656_v11 = vpop.f32.mrf.mxu2 }
 0x29e   :  { %v1678_v25 = vadd.f32 %v1670_v63, %v531_v62  ;;  %v1630_v50 = vpop.f32.mrf.mxu0  ;;  %v1644_v14 = vpop.f32.mrf.mxu1  ;;  %v5217_v63 = vor.u32 %v6356_v51, %v5214_v61 }
 0x29f   :  { %v1679_v53 = vadd.f32 %v1630_v50, %v386_v6  ;;  %v1680_v43 = vadd.f32 %v1644_v14, %v435_v49  ;;  %v1677_v6 = vadd.f32 %v1656_v11, %v482_v36  ;;  %v5204_v36 = vld [vmem:[%s10104_s2 + $0x88] sm:$0xf] }
 0x2a0   :  { %v5126_v2 = vmul.f32 -1.442695, %v1678_v25  ;;  %v6359_v25 = vld [vmem:[%s10104_s2 + $0xb4] sm:$0xf0]  ;;  %2037 = vmatpush.bf16.msra.mxu1 %v5217_v63  ;;  %v6350_v63 = vld [vmem:[%s10104_s2 + $0x6c] sm:$0xf0] }
 0x2a1   :  { %v6676_v32 = vpop.eup %6675  ;;  %v5127_v35 = vmul.f32 -1.442695, %v1679_v53  ;;  %v5128_v26 = vmul.f32 -1.442695, %v1680_v43  ;;  %v5221_v52 = vor.u32 %v6359_v25, %v5220_v5  ;;  %v484_v43 = vadd.f32 %v7403_v55, %v7535_v22 }
 0x2a2   :  { %v6678_v20 = vpop.eup %6677  ;;  %v8126_v31 = vadd.f32 1.0, %v6676_v32  ;;  %6679 = vpow2.f32 %v5126_v2  ;;  %v5222_v32 = vld [vmem:[%s10104_s2 + $0xb8] sm:$0xf0] }
 0x2a3   :  { %v8134_v12 = vadd.f32 1.0, %v6678_v20  ;;  %6681 = vpow2.f32 %v5127_v35  ;;  %2051 = vmatpush.bf16.msra.mxu2 %v5221_v52  ;;  %v6354_v20 = vld [vmem:[%s10104_s2 + $0x8c] sm:$0xf0]  ;;  %v5225_v24 = vor.u32 %v6357_v23, %v5222_v32  ;;  %v6348_v52 = vld [vmem:[%s10104_s2 + $0x64] sm:$0xf] }
 0x2a4   :  { %6683 = vrcp.f32 %v8126_v31  ;;  %v1716_v29 = vand.u32 2147483647, %v8126_v31  ;;  %v1718_v14 = vand.u32 2147483648, %v8126_v31  ;;  %vm1712_vm1 = vweird.f32 %v8126_v31 }
 0x2a5   :  { %6685 = vrcp.f32 %v8134_v12  ;;  %v1672_v0 = vpop.f32.mrf.mxu3  ;;  %v1733_v54 = vand.u32 2147483648, %v8134_v12  ;;  %v1731_v47 = vand.u32 2147483647, %v8134_v12  ;;  %v1658_v30 = vpop.f32.mrf.mxu2  ;;  %vm1727_vm2 = vweird.f32 %v8134_v12  ;;  %2065 = vmatpush.bf16.msra.mxu3 %v5225_v24 }
 0x2a6   :  { %6687 = vpow2.f32 %v5128_v26  ;;  %v1682_v48 = vadd.f32 %v1672_v0, %v533_v60  ;;  %vm8196_vm0 = vcmp.eq.f32.partialorder %v1716_v29, 8.507059e+37  ;;  %v1719_v26 = vor.u32 1.1754944e-38, %v1718_v14  ;;  %v5198_v60 = vld [vmem:[%s10104_s2 + $0x90] sm:$0xf0]  ;;  %v6355_v29 = vld [vmem:[%s10104_s2 + $0x94] sm:$0xf0] }
 0x2a7   :  { %v1734_v18 = vor.u32 1.1754944e-38, %v1733_v54  ;;  %v1681_v40 = vadd.f32 %v1658_v30, %v484_v43  ;;  %vm8233_vm5 = vcmp.eq.f32.partialorder %v1731_v47, 8.507059e+37  ;;  %v5197_v56 = vor.u32 %v6354_v20, %v5196_v33  ;;  %v5182_v43 = vld [vmem:[%s10104_s2 + $0x70] sm:$0xf0]  ;;  %v6351_v47 = vld [vmem:[%s10104_s2 + $0x74] sm:$0xf0] }
 0x2a8   :  { %v6680_v46 = vpop.eup %6679  ;;  %v5129_v19 = vmul.f32 -1.442695, %v1682_v48  ;;  %v5201_v5 = vor.u32 %v6352_v1, %v5198_v60  ;;  %v6344_v20 = vld [vmem:[%s10104_s2 + $0x44] sm:$0xf]  ;;  %v5172_v1 = vld [vmem:[%s10104_s2 + $0x48] sm:$0xf] }
 0x2a9   :  { %v6682_v62 = vpop.eup %6681  ;;  %v8176_v49 = vadd.f32 1.0, %v6680_v46  ;;  %2024 = vmatpush.bf16.msra.mxu0 %v5197_v56  ;;  %v6347_v60 = vld [vmem:[%s10104_s2 + $0x54] sm:$0xf0]  ;;  %v5185_v56 = vor.u32 %v6348_v52, %v5182_v43 }
 0x2aa   :  { %v8181_v50 = vpop.eup %6683  ;;  %v8184_v27 = vadd.f32 1.0, %v6682_v62  ;;  %v5206_v62 = vld [vmem:[%s10104_s2 + $0x98] sm:$0xf0]  ;;  %2038 = vmatpush.bf16.msra.mxu1 %v5201_v5 }
 0x2ab   :  { %v8186_v53 = vpop.eup %6685  ;;  %v1708_v8 = vmul.f32 %v8181_v50, %v8126_v31  ;;  %6689 = vrcp.f32 %v8176_v49  ;;  %vm1713_vm3 = vweird.f32 %v8181_v50  ;;  %v5174_v31 = vld [vmem:[%s10104_s2 + $0x58] sm:$0xf0] }
 0x2ac   :  { %v6688_v34 = vpop.eup %6687  ;;  %v1723_v28 = vmul.f32 %v8186_v53, %v8134_v12  ;;  %6691 = vrcp.f32 %v8184_v27  ;;  %v1763_v38 = vand.u32 2147483648, %v8184_v27  ;;  %vm1728_vm4 = vweird.f32 %v8186_v53  ;;  %vm8249_vm6 = vmor %vm1712_vm1, %vm1713_vm3  ;;  %v6353_v12 = vld [vmem:[%s10104_s2 + $0x8c] sm:$0xf] }
 0x2ad   :  { %v1709_v55 = vsub.f32 1.0, %v1708_v8  ;;  %6693 = vtanh.f32 %v1677_v6  ;;  %v8203_v7 = vadd.f32 1.0, %v6688_v34  ;;  %v1761_v21 = vand.u32 2147483647, %v8184_v27  ;;  %vm8264_vm7 = vmor %vm1727_vm2, %vm1728_vm4  ;;  %v5180_v6 = vld [vmem:[%s10104_s2 + $0x60] sm:$0xf] }
 0x2ae   :  { %v1724_v35 = vsub.f32 1.0, %v1723_v28  ;;  %6695 = vpow2.f32 %v5129_v19  ;;  %v8273_v61 = vor.u32 1.1754944e-38, %v1763_v38  ;;  %v5205_v19 = vor.u32 %v6355_v29, %v5204_v36  ;;  %v5188_v8 = vld [vmem:[%s10104_s2 + $0x68] sm:$0xf]  ;;  %v6345_v29 = vld [vmem:[%s10104_s2 + $0x4c] sm:$0xf]  ;;  %2039 = vmatpush.bf16.msra.mxu1 %v5185_v56 }
 0x2af   :  { %v1710_v9 = vmul.f32 %v8181_v50, %v1709_v55  ;;  %6697 = vrcp.f32 %v8203_v7  ;;  %v1778_v46 = vand.u32 2147483648, %v8203_v7  ;;  %v6349_v55 = vld [vmem:[%s10104_s2 + $0x6c] sm:$0xf]  ;;  %vm1757_vm9 = vweird.f32 %v8184_v27 }
 0x2b0   :  { %v1725_v11 = vmul.f32 %v8186_v53, %v1724_v35  ;;  %6699 = vtanh.f32 %v1681_v40  ;;  %2052 = vmatpush.bf16.msra.mxu2 %v5205_v19  ;;  %v5190_v35 = vld [vmem:[%s10104_s2 + $0x78] sm:$0xf0]  ;;  %v5181_v40 = vor.u32 %v6350_v63, %v5180_v6  ;;  %v1776_v24 = vand.u32 2147483647, %v8203_v7  ;;  %v6340_v6 = vld [vmem:[%s10104_s2 + $0x24] sm:$0xf] }
 0x2b1   :  { %v8230_v0 = vpop.eup %6689  ;;  %v1711_v39 = vadd.f32 %v8181_v50, %v1710_v9  ;;  %v5166_v9 = vld [vmem:[%s10104_s2 + $0x50] sm:$0xf0]  ;;  %v5189_v36 = vor.u32 %v6351_v47, %v5188_v8  ;;  %vm1762_vm12 = vcmp.eq.f32.partialorder %v1761_v21, 8.507059e+37  ;;  %vm1772_vm13 = vweird.f32 %v8203_v7  ;;  %v6343_v21 = vld [vmem:[%s10104_s2 + $0x34] sm:$0xf0] }
 0x2b2   :  { %v8243_v48 = vpop.eup %6691  ;;  %v1726_v57 = vadd.f32 %v8186_v53, %v1725_v11  ;;  %v8256_v4 = vmul.f32 %v8230_v0, %v8176_v49  ;;  %2025 = vmatpush.bf16.msra.mxu0 %v5181_v40  ;;  %v1779_v19 = vor.u32 1.1754944e-38, %v1778_v46  ;;  %vm1777_vm15 = vcmp.eq.f32.partialorder %v1776_v24, 8.507059e+37  ;;  %v5158_v46 = vld [vmem:[%s10104_s2 + $0x38] sm:$0xf0] }
 0x2b3   :  { %v6694_v13 = vpop.eup %6693  ;;  %v1715_v58 = vsel %vm8249_vm6, %v8181_v50, %v1711_v39  ;;  %v1753_v51 = vmul.f32 %v8243_v48, %v8184_v27  ;;  %vm1758_vm8 = vweird.f32 %v8243_v48  ;;  %v5150_v27 = vld [vmem:[%s10104_s2 + $0x30] sm:$0xf0]  ;;  %v5177_v52 = vor.u32 %v6345_v29, %v5174_v31  ;;  %v5142_v24 = vld [vmem:[%s10104_s2 + $0x18] sm:$0xf0] }
 0x2b4   :  { %v6696_v25 = vpop.eup %6695  ;;  %v1720_v50 = vsel %vm8196_vm0, %v1719_v26, %v1715_v58  ;;  %v1730_v14 = vsel %vm8264_vm7, %v8186_v53, %v1726_v57  ;;  %v1739_v23 = vsub.f32 1.0, %v8256_v4  ;;  %v5164_v26 = vld [vmem:[%s10104_s2 + $0x40] sm:$0xf]  ;;  %vm8347_vm10 = vmor %vm1757_vm9, %vm1758_vm8  ;;  %v5193_v4 = vor.u32 %v6349_v55, %v5190_v35  ;;  %2053 = vmatpush.bf16.msra.mxu2 %v5189_v36 }
 0x2b5   :  { %v8301_v54 = vpop.eup %6697  ;;  %v1735_v34 = vsel %vm8233_vm5, %v1734_v18, %v1730_v14  ;;  %v1801_v53 = vmul.f32 %v6694_v13, %v1720_v50  ;;  %v1754_v28 = vsub.f32 1.0, %v1753_v51  ;;  %v8305_v2 = vadd.f32 1.0, %v6696_v25  ;;  %v5148_v58 = vld [vmem:[%s10104_s2 + $0x20] sm:$0xf]  ;;  %v6342_v51 = vld [vmem:[%s10104_s2 + $0x2c] sm:$0xf0] }
 0x2b6   :  { %v1799_v30 = vmul.f32 %v1735_v34, %v8002_v3  ;;  %v1768_v32 = vmul.f32 %v8301_v54, %v8203_v7  ;;  %v6346_v3 = vld [vmem:[%s10104_s2 + $0x4c] sm:$0xf0]  ;;  %v5209_v18 = vor.u32 %v6353_v12, %v5206_v62  ;;  %v6700_v59 = vpop.eup %6699  ;;  %vm1773_vm11 = vweird.f32 %v8301_v54  ;;  %v6341_v7 = vld [vmem:[%s10104_s2 + $0x2c] sm:$0xf] }
 0x2b7   :  { %v1755_v33 = vmul.f32 %v8243_v48, %v1754_v28  ;;  %6701 = vrcp.f32 %v8305_v2  ;;  %v5165_v13 = vor.u32 %v6346_v3, %v5164_v26  ;;  %v5169_v12 = vor.u32 %v6344_v20, %v5166_v9  ;;  %vm8391_vm14 = vmor %vm1772_vm13, %vm1773_vm11  ;;  %v5132_v28 = vld [vmem:[%s10104_s2] sm:$0xf]  ;;  %v5140_v3 = vld [vmem:[%s10104_s2 + $0x8] sm:$0xf] }
 0x2b8   :  { %v8336_v38 = vadd.f32 %v1801_v53, %v1799_v30  ;;  %v1769_v11 = vsub.f32 1.0, %v1768_v32  ;;  %2066 = vmatpush.bf16.msra.mxu3 %v5209_v18  ;;  %v5173_v62 = vor.u32 %v6347_v60, %v5172_v1  ;;  %v1740_v63 = vmul.f32 %v8230_v0, %v1739_v23  ;;  %v6338_v30 = vld [vmem:[%s10104_s2 + $0xc] sm:$0xf0]  ;;  %v6336_v23 = vld [vmem:[%s10104_s2 + $0x4] sm:$0xf] }
 0x2b9   :  { %v1756_v39 = vadd.f32 %v8243_v48, %v1755_v33  ;;  %v5149_v43 = vor.u32 %v6342_v51, %v5148_v58  ;;  %2026 = vmatpush.bf16.msra.mxu0 %v5165_v13  ;;  %vm1743_vm0 = vweird.f32 %v8230_v0  ;;  %2040 = vmatpush.bf16.msra.mxu1 %v5169_v12  ;;  %v5153_v47 = vor.u32 %v6340_v6, %v5150_v27  ;;  %v5134_v32 = vld [vmem:[%s10104_s2 + $0x10] sm:$0xf0]  ;;  %v6339_v20 = vld [vmem:[%s10104_s2 + $0x14] sm:$0xf0] }
 0x2ba   :  { %v1770_v57 = vmul.f32 %v8301_v54, %v1769_v11  ;;  %6703 = vtanh.f32 %v8336_v38  ;;  %2054 = vmatpush.bf16.msra.mxu2 %v5173_v62  ;;  %v1748_v35 = vand.u32 2147483648, %v8176_v49  ;;  %v1741_v9 = vadd.f32 %v8230_v0, %v1740_v63 }
 0x2bb   :  { %v1760_v5 = vsel %vm8347_vm10, %v8243_v48, %v1756_v39  ;;  %v5156_v48 = vld [vmem:[%s10104_s2 + $0x28] sm:$0xf]  ;;  %vm1742_vm1 = vweird.f32 %v8176_v49  ;;  %v5161_v11 = vor.u32 %v6341_v7, %v5158_v46  ;;  %v1746_v18 = vand.u32 2147483647, %v8176_v49  ;;  %v6337_v49 = vld [vmem:[%s10104_s2 + $0xc] sm:$0xf] }
 0x2bc   :  { %v1765_v25 = vsel %vm1762_vm12, %v8273_v61, %v1760_v5  ;;  %v1771_v50 = vadd.f32 %v8301_v54, %v1770_v57  ;;  %2067 = vmatpush.bf16.msra.mxu3 %v5193_v4  ;;  %v5157_v55 = vor.u32 %v6343_v21, %v5156_v48  ;;  %vm8435_vm2 = vmor %vm1742_vm1, %vm1743_vm0  ;;  %v5133_v60 = vor.u32 %v6338_v30, %v5132_v28  ;;  %v10177_v7 = vld [vmem:[#allocation39_spill] sm:$0xff] }
 0x2bd   :  { %v8387_v14 = vpop.eup %6701  ;;  %v1802_v34 = vmul.f32 %v6700_v59, %v1765_v25  ;;  %2027 = vmatpush.bf16.msra.mxu0 %v5149_v43  ;;  %2041 = vmatpush.bf16.msra.mxu1 %v5153_v47  ;;  %v5137_v39 = vor.u32 %v6336_v23, %v5134_v32  ;;  %v5141_v37 = vor.u32 %v6339_v20, %v5140_v3  ;;  %v1749_v29 = vor.u32 1.1754944e-38, %v1748_v35  ;;  %v5378_v23 = vld [vmem:[%s10104_s2 + $0xe0] sm:$0xf] }
 0x2be   :  { %v1775_v8 = vsel %vm8391_vm14, %v8301_v54, %v1771_v50  ;;  %v1783_v53 = vmul.f32 %v8387_v14, %v8305_v2  ;;  %vm1788_vm3 = vweird.f32 %v8387_v14  ;;  %2055 = vmatpush.bf16.msra.mxu2 %v5157_v55  ;;  %v1745_v56 = vsel %vm8435_vm2, %v8230_v0, %v1741_v9  ;;  %v5380_v9 = vld [vmem:[%s10104_s2 + $0xf0] sm:$0xf0] }
 0x2bf   :  { %v1780_v54 = vsel %vm1777_vm15, %v1779_v19, %v1775_v8  ;;  %v1793_v59 = vand.u32 2147483648, %v8305_v2  ;;  %vm1787_vm4 = vweird.f32 %v8305_v2  ;;  %vm1747_vm5 = vcmp.eq.f32.partialorder %v1746_v18, 8.507059e+37 }
 0x2c0   :  { %v1800_v26 = vmul.f32 %v1780_v54, %v8083_v16  ;;  %v1784_v33 = vsub.f32 1.0, %v1783_v53  ;;  %2068 = vmatpush.bf16.msra.mxu3 %v5177_v52  ;;  %v6704_v36 = vpop.eup %6703  ;;  %v1791_v4 = vand.u32 2147483647, %v8305_v2  ;;  %vm1789_vm6 = vmor %vm1787_vm4, %vm1788_vm3  ;;  %v5145_v13 = vor.u32 %v6337_v49, %v5142_v24  ;;  %v5362_v49 = vld [vmem:[%s10104_s2 + $0xc0] sm:$0xf] }
 0x2c1   :  { %2028 = vmatpush.bf16.msra.mxu0 %v5133_v60  ;;  %v1750_v0 = vsel %vm1747_vm5, %v1749_v29, %v1745_v56  ;;  %2042 = vmatpush.bf16.msra.mxu1 %v5137_v39  ;;  %v1794_v51 = vor.u32 1.1754944e-38, %v1793_v59  ;;  %v379_v48 = vadd.f32 %v7375_v41, %v7431_v10  ;;  %v428_v21 = vadd.f32 %v7377_v42, %v7434_v15  ;;  %v6399_v60 = vld [vmem:[%s10104_s2 + $0xf4] sm:$0xf0]  ;;  %v6397_v39 = vld [vmem:[%s10104_s2 + $0xec] sm:$0xf]  ;;  %v10178_v24 = vld [vmem:[#allocation38_spill] sm:$0xff] }
 0x2c2   :  { %v8439_v40 = vadd.f32 %v1802_v34, %v1800_v26  ;;  %v1785_v1 = vmul.f32 %v8387_v14, %v1784_v33  ;;  %2056 = vmatpush.bf16.msra.mxu2 %v5141_v37  ;;  %v1807_v58 = vmul.f32 %v6704_v36, %v1750_v0  ;;  %vm1792_vm7 = vcmp.eq.f32.partialorder %v1791_v4, 8.507059e+37  ;;  %v6396_v26 = vld [vmem:[%s10104_s2 + $0xe4] sm:$0xf]  ;;  %v5388_v37 = vld [vmem:[%s10104_s2 + $0xf8] sm:$0xf0] }
 0x2c3   :  { %v526_v34 = vadd.f32 %v7381_v44, %v7486_v17  ;;  %v381_v53 = vadd.f32 %v7383_v45, %v7431_v10  ;;  %v430_v41 = vadd.f32 %v10177_v7, %v7434_v15  ;;  %v6398_v44 = vld [vmem:[%s10104_s2 + $0xec] sm:$0xf0]  ;;  %v5383_v16 = vor.u32 %v6396_v26, %v5380_v9  ;;  %v6392_v59 = vld [vmem:[%s10104_s2 + $0xc4] sm:$0xf] }
 0x2c4   :  { %6705 = vtanh.f32 %v8439_v40  ;;  %v1786_v57 = vadd.f32 %v8387_v14, %v1785_v1  ;;  %2069 = vmatpush.bf16.msra.mxu3 %v5161_v11  ;;  %v1809_v6 = vpack.c.bf16 %v1807_v58, %v1807_v58  ;;  %v5379_v35 = vor.u32 %v6398_v44, %v5378_v23  ;;  %v5386_v1 = vld [vmem:[%s10104_s2 + $0xe8] sm:$0xf]  ;;  %v6394_v29 = vld [vmem:[%s10104_s2 + $0xcc] sm:$0xf0] }
 0x2c5   :  { %2437 = vmatpush.bf16.msrb.mxu1 %v5383_v16  ;;  %v477_v56 = vadd.f32 %v10178_v24, %v7535_v22  ;;  %v5387_v0 = vor.u32 %v6399_v60, %v5386_v1  ;;  %v5354_v1 = vld [vmem:[%s10104_s2 + $0xa8] sm:$0xf]  ;;  %v6391_v60 = vld [vmem:[%s10104_s2 + $0xb4] sm:$0xf0] }
 0x2c6   :  { %v1790_v31 = vsel %vm1789_vm6, %v8387_v14, %v1786_v57  ;;  %v1857_v25 = vunpack.c.l.b16 %v1809_v6  ;;  %2423 = vmatpush.bf16.msrb.mxu0 %v5379_v35  ;;  %v10179_v57 = vld [vmem:[#allocation41_spill] sm:$0xff] }
 0x2c7   :  { %v1795_v12 = vsel %vm1792_vm7, %v1794_v51, %v1790_v31  ;;  %v528_v4 = vadd.f32 %v10179_v57, %v7486_v17  ;;  %v5364_v31 = vld [vmem:[%s10104_s2 + $0xd0] sm:$0xf0]  ;;  %2451 = vmatpush.bf16.msrb.mxu2 %v5387_v0  ;;  %v5330_v0 = vld [vmem:[%s10104_s2 + $0x80] sm:$0xf] }
 0x2c8   :  { %2070 = vmatpush.bf16.msra.mxu3 %v5145_v13  ;;  %v5367_v6 = vor.u32 %v6392_v59, %v5364_v31 }
 0x2ca   :  { %v6706_v5 = vpop.eup %6705  ;;  %2438 = vmatpush.bf16.msrb.mxu1 %v5367_v6  ;;  %v6384_v6 = vld [vmem:[%s10104_s2 + $0x84] sm:$0xf] }
 0x2cb   :  { %v1808_v62 = vmul.f32 %v6706_v5, %v1795_v12  ;;  %v5391_v12 = vor.u32 %v6397_v39, %v5388_v37 }
 0x2cd   :  { %v1810_v2 = vpack.c.bf16 %v1808_v62, %v1808_v62  ;;  %v6581_v63 = vpack.c.bf16 %v1808_v62, %v1807_v58  ;;  %v5370_v58 = vld [vmem:[%s10104_s2 + $0xc8] sm:$0xf]  ;;  %v5363_v62 = vor.u32 %v6394_v29, %v5362_v49  ;;  %2465 = vmatpush.bf16.msrb.mxu3 %v5391_v12  ;;  %v5355_v12 = vor.u32 %v6391_v60, %v5354_v1  ;;  %v5324_v49 = vld [vmem:[%s10104_s2 + $0x78] sm:$0xf0] }
 0x2cf   :  { %6582 = vst [vmem:[#allocation5 + $0x20] sm:$0xff] %v6581_v63   ;;  %v1858_v50 = vunpack.c.l.b16 %v1810_v2  ;;  %v6395_v2 = vld [vmem:[%s10104_s2 + $0xd4] sm:$0xf0]  ;;  %v6393_v63 = vld [vmem:[%s10104_s2 + $0xcc] sm:$0xf]  ;;  %2424 = vmatpush.bf16.msrb.mxu0 %v5363_v62 }
 0x2d0   :  { %v6386_v62 = vld [vmem:[%s10104_s2 + $0x8c] sm:$0xf0] }
 0x2d1   :  { %v1859_v27 = vpack.c.b16 %v1858_v50, %v1857_v25  ;;  %v5372_v25 = vld [vmem:[%s10104_s2 + $0xd8] sm:$0xf0] }
 0x2d3   :  { %2029 = vmatmul.bf16.vlgmr.msra.gmra.mxu0 %v1859_v27  ;;  %2043 = vmatmul.bf16.vlgmr.msra.gmra.mxu1 %v1859_v27 }
 0x2d4   :  { %2057 = vmatmul.bf16.vlgmr.msra.gmra.mxu2 %v1859_v27  ;;  %2071 = vmatmul.bf16.vlgmr.msra.gmra.mxu3 %v1859_v27 }
 0x350   :  { %v2030_v14 = vpop.f32.mrf.mxu0  ;;  %v2044_v61 = vpop.f32.mrf.mxu1 }
 0x351   :  { %v2077_v19 = vadd.f32 %v2030_v14, %v379_v48  ;;  %v2078_v52 = vadd.f32 %v2044_v61, %v428_v21  ;;  %v5371_v21 = vor.u32 %v6395_v2, %v5370_v58  ;;  %v5332_v2 = vld [vmem:[%s10104_s2 + $0x90] sm:$0xf0] }
 0x353   :  { %v5258_v43 = vmul.f32 -1.442695, %v2077_v19  ;;  %v5259_v8 = vmul.f32 -1.442695, %v2078_v52  ;;  %v5375_v52 = vor.u32 %v6393_v63, %v5372_v25  ;;  %2452 = vmatpush.bf16.msrb.mxu2 %v5371_v21  ;;  %v5338_v21 = vld [vmem:[%s10104_s2 + $0x88] sm:$0xf] }
 0x355   :  { %6707 = vpow2.f32 %v5258_v43  ;;  %2466 = vmatpush.bf16.msrb.mxu3 %v5375_v52 }
 0x356   :  { %6709 = vpow2.f32 %v5259_v8  ;;  %v10180_v8 = vld [vmem:[#allocation40_spill] sm:$0xff] }
 0x357   :  { %v2072_v46 = vpop.f32.mrf.mxu3  ;;  %v2058_v18 = vpop.f32.mrf.mxu2  ;;  %2453 = vmatpush.bf16.msrb.mxu2 %v5355_v12 }
 0x358   :  { %v2080_v28 = vadd.f32 %v2072_v46, %v526_v34  ;;  %v2032_v42 = vpop.f32.mrf.mxu0  ;;  %v2046_v54 = vpop.f32.mrf.mxu1  ;;  %v2079_v5 = vadd.f32 %v2058_v18, %v477_v56  ;;  %v479_v34 = vadd.f32 %v10180_v8, %v7535_v22  ;;  %v6389_v56 = vld [vmem:[%s10104_s2 + $0xac] sm:$0xf] }
 0x359   :  { %v2081_v47 = vadd.f32 %v2032_v42, %v381_v53  ;;  %v2082_v55 = vadd.f32 %v2046_v54, %v430_v41 }
 0x35a   :  { %v5260_v30 = vmul.f32 -1.442695, %v2080_v28 }
 0x35b   :  { %v6708_v32 = vpop.eup %6707  ;;  %v5261_v45 = vmul.f32 -1.442695, %v2081_v47  ;;  %v5262_v20 = vmul.f32 -1.442695, %v2082_v55 }
 0x35c   :  { %v6710_v33 = vpop.eup %6709  ;;  %v8479_v3 = vadd.f32 1.0, %v6708_v32  ;;  %6711 = vpow2.f32 %v5260_v30  ;;  %v5346_v32 = vld [vmem:[%s10104_s2 + $0xa0] sm:$0xf] }
 0x35d   :  { %v8484_v11 = vadd.f32 1.0, %v6710_v33  ;;  %6713 = vpow2.f32 %v5261_v45  ;;  %v6390_v45 = vld [vmem:[%s10104_s2 + $0xac] sm:$0xf0]  ;;  %v6388_v33 = vld [vmem:[%s10104_s2 + $0xa4] sm:$0xf] }
 0x35e   :  { %6715 = vrcp.f32 %v8479_v3  ;;  %v2118_v13 = vand.u32 2147483647, %v8479_v3  ;;  %v2120_v61 = vand.u32 2147483648, %v8479_v3  ;;  %vm2114_vm9 = vweird.f32 %v8479_v3 }
 0x35f   :  { %6717 = vrcp.f32 %v8484_v11  ;;  %v2074_v36 = vpop.f32.mrf.mxu3  ;;  %v2135_v7 = vand.u32 2147483648, %v8484_v11  ;;  %v2133_v42 = vand.u32 2147483647, %v8484_v11  ;;  %v2060_v55 = vpop.f32.mrf.mxu2  ;;  %vm2129_vm12 = vweird.f32 %v8484_v11 }
 0x360   :  { %6719 = vpow2.f32 %v5262_v20  ;;  %v2084_v48 = vadd.f32 %v2074_v36, %v528_v4  ;;  %vm8546_vm8 = vcmp.eq.f32.partialorder %v2118_v13, 8.507059e+37  ;;  %v2121_v44 = vor.u32 1.1754944e-38, %v2120_v61  ;;  %v5348_v20 = vld [vmem:[%s10104_s2 + $0xb0] sm:$0xf0]  ;;  %v5356_v36 = vld [vmem:[%s10104_s2 + $0xb8] sm:$0xf0] }
 0x361   :  { %v2136_v35 = vor.u32 1.1754944e-38, %v2135_v7  ;;  %v2083_v18 = vadd.f32 %v2060_v55, %v479_v34  ;;  %vm8591_vm14 = vcmp.eq.f32.partialorder %v2133_v42, 8.507059e+37  ;;  %v5347_v24 = vor.u32 %v6390_v45, %v5346_v32  ;;  %v6385_v61 = vld [vmem:[%s10104_s2 + $0x8c] sm:$0xf]  ;;  %v5314_v7 = vld [vmem:[%s10104_s2 + $0x60] sm:$0xf] }
 0x362   :  { %v6712_v51 = vpop.eup %6711  ;;  %v5263_v30 = vmul.f32 -1.442695, %v2084_v48  ;;  %v5359_v34 = vor.u32 %v6389_v56, %v5356_v36  ;;  %v5316_v55 = vld [vmem:[%s10104_s2 + $0x70] sm:$0xf0]  ;;  %v5335_v32 = vor.u32 %v6384_v6, %v5332_v2  ;;  %v5298_v36 = vld [vmem:[%s10104_s2 + $0x40] sm:$0xf] }
 0x363   :  { %v6714_v50 = vpop.eup %6713  ;;  %v8529_v27 = vadd.f32 1.0, %v6712_v51  ;;  %2425 = vmatpush.bf16.msrb.mxu0 %v5347_v24  ;;  %v6377_v6 = vld [vmem:[%s10104_s2 + $0x4c] sm:$0xf]  ;;  %v5308_v2 = vld [vmem:[%s10104_s2 + $0x58] sm:$0xf0] }
 0x364   :  { %v8531_v14 = vpop.eup %6715  ;;  %v8534_v19 = vadd.f32 1.0, %v6714_v50  ;;  %2467 = vmatpush.bf16.msrb.mxu3 %v5359_v34  ;;  %v5284_v48 = vld [vmem:[%s10104_s2 + $0x30] sm:$0xf0]  ;;  %v5290_v34 = vld [vmem:[%s10104_s2 + $0x28] sm:$0xf] }
 0x365   :  { %v8536_v43 = vpop.eup %6717  ;;  %v2110_v53 = vmul.f32 %v8531_v14, %v8479_v3  ;;  %6721 = vrcp.f32 %v8529_v27  ;;  %vm2115_vm10 = vweird.f32 %v8531_v14  ;;  %v6376_v3 = vld [vmem:[%s10104_s2 + $0x44] sm:$0xf] }
 0x366   :  { %v6720_v41 = vpop.eup %6719  ;;  %v2125_v46 = vmul.f32 %v8536_v43, %v8484_v11  ;;  %6723 = vtanh.f32 %v2079_v5  ;;  %vm2130_vm11 = vweird.f32 %v8536_v43  ;;  %v2163_v16 = vand.u32 2147483647, %v8534_v19  ;;  %vm8587_vm13 = vmor %vm2114_vm9, %vm2115_vm10  ;;  %v6381_v11 = vld [vmem:[%s10104_s2 + $0x6c] sm:$0xf] }
 0x367   :  { %v2111_v54 = vsub.f32 1.0, %v2110_v53  ;;  %6725 = vrcp.f32 %v8534_v19  ;;  %v8552_v47 = vadd.f32 1.0, %v6720_v41  ;;  %vm8603_vm15 = vmor %vm2129_vm12, %vm2130_vm11  ;;  %v2165_v4 = vand.u32 2147483648, %v8534_v19  ;;  %v5340_v53 = vld [vmem:[%s10104_s2 + $0x98] sm:$0xf0] }
 0x368   :  { %v2126_v23 = vsub.f32 1.0, %v2125_v46  ;;  %v5351_v5 = vor.u32 %v6388_v33, %v5348_v20  ;;  %vm8637_vm0 = vcmp.eq.f32.partialorder %v2163_v16, 8.507059e+37  ;;  %vm2159_vm1 = vweird.f32 %v8534_v19  ;;  %v6382_v41 = vld [vmem:[%s10104_s2 + $0x6c] sm:$0xf0]  ;;  %v5322_v20 = vld [vmem:[%s10104_s2 + $0x68] sm:$0xf] }
 0x369   :  { %v2112_v26 = vmul.f32 %v8531_v14, %v2111_v54  ;;  %6727 = vrcp.f32 %v8552_v47  ;;  %v2180_v57 = vand.u32 2147483648, %v8552_v47  ;;  %v2178_v13 = vand.u32 2147483647, %v8552_v47  ;;  %v6380_v54 = vld [vmem:[%s10104_s2 + $0x64] sm:$0xf] }
 0x36a   :  { %v2127_v9 = vmul.f32 %v8536_v43, %v2126_v23  ;;  %6729 = vpow2.f32 %v5263_v30  ;;  %2439 = vmatpush.bf16.msrb.mxu1 %v5351_v5  ;;  %v2166_v33 = vor.u32 1.1754944e-38, %v2165_v4  ;;  %v5343_v1 = vor.u32 %v6385_v61, %v5340_v53  ;;  %v5300_v4 = vld [vmem:[%s10104_s2 + $0x50] sm:$0xf0]  ;;  %v6375_v53 = vld [vmem:[%s10104_s2 + $0x34] sm:$0xf0] }
 0x36b   :  { %v8580_v39 = vpop.eup %6721  ;;  %v2113_v37 = vadd.f32 %v8531_v14, %v2112_v26  ;;  %6731 = vtanh.f32 %v2083_v18  ;;  %v5315_v60 = vor.u32 %v6382_v41, %v5314_v7  ;;  %vm2174_vm5 = vweird.f32 %v8552_v47  ;;  %v6371_v18 = vld [vmem:[%s10104_s2 + $0x14] sm:$0xf0] }
 0x36c   :  { %v6724_v29 = vpop.eup %6723  ;;  %v2128_v59 = vadd.f32 %v8536_v43, %v2127_v9  ;;  %v2140_v51 = vmul.f32 %v8580_v39, %v8529_v27  ;;  %v6383_v9 = vld [vmem:[%s10104_s2 + $0x74] sm:$0xf0]  ;;  %2468 = vmatpush.bf16.msrb.mxu3 %v5343_v1  ;;  %vm2179_vm7 = vcmp.eq.f32.partialorder %v2178_v13, 8.507059e+37  ;;  %v6372_v13 = vld [vmem:[%s10104_s2 + $0x24] sm:$0xf]  ;;  %vm2144_vm9 = vweird.f32 %v8529_v27 }
 0x36d   :  { %v8614_v31 = vpop.eup %6725  ;;  %v2117_v58 = vsel %vm8587_vm13, %v8531_v14, %v2113_v37  ;;  %v6387_v14 = vld [vmem:[%s10104_s2 + $0x94] sm:$0xf0]  ;;  %v5319_v37 = vor.u32 %v6380_v54, %v5316_v55  ;;  %v5323_v12 = vor.u32 %v6383_v9, %v5322_v20  ;;  %v2148_v41 = vand.u32 2147483647, %v8529_v27  ;;  %v5274_v9 = vld [vmem:[%s10104_s2 + $0x8] sm:$0xf] }
 0x36e   :  { %v2122_v63 = vsel %vm8546_vm8, %v2121_v44, %v2117_v58  ;;  %v2132_v25 = vsel %vm8603_vm15, %v8536_v43, %v2128_v59  ;;  %v2155_v50 = vmul.f32 %v8614_v31, %v8534_v19  ;;  %vm2160_vm2 = vweird.f32 %v8614_v31  ;;  %2440 = vmatpush.bf16.msrb.mxu1 %v5335_v32  ;;  %v6379_v58 = vld [vmem:[%s10104_s2 + $0x54] sm:$0xf0] }
 0x36f   :  { %v8650_v52 = vpop.eup %6727  ;;  %v2137_v43 = vsel %vm8591_vm14, %v2136_v35, %v2132_v25  ;;  %v2203_v8 = vmul.f32 %v6724_v29, %v2122_v63  ;;  %v2141_v23 = vsub.f32 1.0, %v2140_v51  ;;  %v5331_v44 = vor.u32 %v6386_v62, %v5330_v0  ;;  %vm8687_vm3 = vmor %vm2159_vm1, %vm2160_vm2  ;;  %v6378_v29 = vld [vmem:[%s10104_s2 + $0x4c] sm:$0xf0]  ;;  %v5306_v0 = vld [vmem:[%s10104_s2 + $0x48] sm:$0xf] }
 0x370   :  { %v2201_v46 = vmul.f32 %v2137_v43, %v8336_v38  ;;  %v2156_v28 = vsub.f32 1.0, %v2155_v50  ;;  %v2170_v42 = vmul.f32 %v8650_v52, %v8552_v47  ;;  %v6730_v30 = vpop.eup %6729  ;;  %v5339_v38 = vor.u32 %v6387_v14, %v5338_v21  ;;  %v5282_v21 = vld [vmem:[%s10104_s2 + $0x20] sm:$0xf]  ;;  %v6374_v47 = vld [vmem:[%s10104_s2 + $0x2c] sm:$0xf0] }
 0x371   :  { %v8691_v16 = vadd.f32 1.0, %v6730_v30  ;;  %2426 = vmatpush.bf16.msrb.mxu0 %v5331_v44  ;;  %v6732_v19 = vpop.eup %6731  ;;  %vm2175_vm4 = vweird.f32 %v8650_v52  ;;  %v2142_v59 = vmul.f32 %v8580_v39, %v2141_v23  ;;  %v5327_v62 = vor.u32 %v6381_v11, %v5324_v49  ;;  %v5266_v44 = vld [vmem:[%s10104_s2] sm:$0xf]  ;;  %v6369_v11 = vld [vmem:[%s10104_s2 + $0xc] sm:$0xf] }
 0x372   :  { %v8674_v45 = vadd.f32 %v2203_v8, %v2201_v46  ;;  %v2171_v35 = vsub.f32 1.0, %v2170_v42  ;;  %v2157_v26 = vmul.f32 %v8614_v31, %v2156_v28  ;;  %2454 = vmatpush.bf16.msrb.mxu2 %v5339_v38  ;;  %vm8735_vm6 = vmor %vm2174_vm5, %vm2175_vm4  ;;  %2441 = vmatpush.bf16.msrb.mxu1 %v5319_v37  ;;  %v5299_v50 = vor.u32 %v6378_v29, %v5298_v36  ;;  %v6373_v28 = vld [vmem:[%s10104_s2 + $0x2c] sm:$0xf]  ;;  %v5292_v42 = vld [vmem:[%s10104_s2 + $0x38] sm:$0xf0] }
 0x373   :  { %6733 = vrcp.f32 %v8691_v16  ;;  %v5307_v43 = vor.u32 %v6379_v58, %v5306_v0  ;;  %2469 = vmatpush.bf16.msrb.mxu3 %v5327_v62  ;;  %v2143_v7 = vadd.f32 %v8580_v39, %v2142_v59  ;;  %vm2145_vm8 = vweird.f32 %v8580_v39  ;;  %v5276_v49 = vld [vmem:[%s10104_s2 + $0x18] sm:$0xf0] }
 0x374   :  { %v2172_v24 = vmul.f32 %v8650_v52, %v2171_v35  ;;  %v2158_v56 = vadd.f32 %v8614_v31, %v2157_v26  ;;  %6735 = vtanh.f32 %v8674_v45  ;;  %v2150_v55 = vand.u32 2147483648, %v8529_v27  ;;  %v6370_v35 = vld [vmem:[%s10104_s2 + $0xc] sm:$0xf0]  ;;  %v6368_v26 = vld [vmem:[%s10104_s2 + $0x4] sm:$0xf]  ;;  %vm8796_vm10 = vmor %vm2144_vm9, %vm2145_vm8 }
 0x375   :  { %2427 = vmatpush.bf16.msrb.mxu0 %v5315_v60  ;;  %v5283_v30 = vor.u32 %v6374_v47, %v5282_v21  ;;  %v5287_v23 = vor.u32 %v6372_v13, %v5284_v48  ;;  %v5291_v38 = vor.u32 %v6375_v53, %v5290_v34  ;;  %v5295_v20 = vor.u32 %v6373_v28, %v5292_v42  ;;  %v10201_v53 = vld [vmem:[#allocation33_spill] sm:$0xff]  ;;  %v6428_v28 = vld [vmem:[%s10104_s2 + $0xe4] sm:$0xf] }
 0x376   :  { %v2162_v51 = vsel %vm8687_vm3, %v8614_v31, %v2158_v56  ;;  %v2173_v5 = vadd.f32 %v8650_v52, %v2172_v24  ;;  %v2181_v31 = vor.u32 1.1754944e-38, %v2180_v57  ;;  %2455 = vmatpush.bf16.msrb.mxu2 %v5323_v12  ;;  %v5303_v57 = vor.u32 %v6376_v3, %v5300_v4  ;;  %v10202_v42 = vld [vmem:[#allocation34_spill] sm:$0xff] }
 0x377   :  { %v2167_v25 = vsel %vm8637_vm0, %v2166_v33, %v2162_v51  ;;  %v5268_v33 = vld [vmem:[%s10104_s2 + $0x10] sm:$0xf0]  ;;  %v2147_v1 = vsel %vm8796_vm10, %v8580_v39, %v2143_v7  ;;  %vm8809_vm11 = vcmp.eq.f32.partialorder %v2148_v41, 8.507059e+37  ;;  %v2151_v24 = vor.u32 1.1754944e-38, %v2150_v55  ;;  %v5512_v41 = vld [vmem:[%s10104_s2 + $0xe0] sm:$0xf] }
 0x378   :  { %v2177_v14 = vsel %vm8735_vm6, %v8650_v52, %v2173_v5  ;;  %v2204_v61 = vmul.f32 %v6732_v19, %v2167_v25  ;;  %v5311_v52 = vor.u32 %v6377_v6, %v5308_v2  ;;  %2442 = vmatpush.bf16.msrb.mxu1 %v5303_v57  ;;  %v2195_v56 = vand.u32 2147483648, %v8691_v16  ;;  %v10200_v57 = vld [vmem:[#allocation31_spill] sm:$0xff] }
 0x379   :  { %v2182_v8 = vsel %vm2179_vm7, %v2181_v31, %v2177_v14  ;;  %v6734_v54 = vpop.eup %6733  ;;  %2428 = vmatpush.bf16.msrb.mxu0 %v5299_v50  ;;  %v5267_v39 = vor.u32 %v6370_v35, %v5266_v44  ;;  %v5271_v36 = vor.u32 %v6368_v26, %v5268_v33  ;;  %v2193_v3 = vand.u32 2147483647, %v8691_v16  ;;  %v10203_v55 = vld [vmem:[#allocation35_spill] sm:$0xff]  ;;  %v6431_v35 = vld [vmem:[%s10104_s2 + $0xf4] sm:$0xf0] }
 0x37a   :  { %v2202_v46 = vmul.f32 %v2182_v8, %v8439_v40  ;;  %v2185_v32 = vmul.f32 %v6734_v54, %v8691_v16  ;;  %2456 = vmatpush.bf16.msrb.mxu2 %v5307_v43  ;;  %2470 = vmatpush.bf16.msrb.mxu3 %v5311_v52  ;;  %v6736_v19 = vpop.eup %6735  ;;  %vm2190_vm12 = vweird.f32 %v6734_v54  ;;  %v5275_v59 = vor.u32 %v6371_v18, %v5274_v9  ;;  %v6429_v18 = vld [vmem:[%s10104_s2 + $0xec] sm:$0xf] }
 0x37b   :  { %v5279_v4 = vor.u32 %v6369_v11, %v5276_v49  ;;  %v2152_v0 = vsel %vm8809_vm11, %v2151_v24, %v2147_v1  ;;  %vm2189_vm13 = vweird.f32 %v8691_v16  ;;  %v2196_v5 = vor.u32 1.1754944e-38, %v2195_v56  ;;  %v10199_v16 = vld [vmem:[#allocation30_spill] sm:$0xff]  ;;  %v5522_v1 = vld [vmem:[%s10104_s2 + $0xf8] sm:$0xf0]  ;;  %v6426_v24 = vld [vmem:[%s10104_s2 + $0xcc] sm:$0xf0] }
 0x37c   :  { %v8782_v40 = vadd.f32 %v2204_v61, %v2202_v46  ;;  %v2186_v37 = vsub.f32 1.0, %v2185_v32  ;;  %2443 = vmatpush.bf16.msrb.mxu1 %v5287_v23  ;;  %v2209_v51 = vmul.f32 %v6736_v19, %v2152_v0  ;;  %vm2191_vm14 = vmor %vm2189_vm13, %vm2190_vm12  ;;  %vm2194_vm15 = vcmp.eq.f32.partialorder %v2193_v3, 8.507059e+37  ;;  %v6430_v46 = vld [vmem:[%s10104_s2 + $0xec] sm:$0xf0]  ;;  %v5514_v32 = vld [vmem:[%s10104_s2 + $0xf0] sm:$0xf0] }
 0x37d   :  { %2429 = vmatpush.bf16.msrb.mxu0 %v5283_v30  ;;  %v374_v61 = vadd.f32 %v10199_v16, %v7431_v10  ;;  %v423_v43 = vadd.f32 %v10200_v57, %v7434_v15  ;;  %v521_v7 = vadd.f32 %v10201_v53, %v7486_v17  ;;  %v425_v30 = vadd.f32 %v10203_v55, %v7434_v15  ;;  %v5496_v19 = vld [vmem:[%s10104_s2 + $0xc0] sm:$0xf]  ;;  %v5498_v0 = vld [vmem:[%s10104_s2 + $0xd0] sm:$0xf0]  ;;  %v10205_v16 = vld [vmem:[#allocation37_spill] sm:$0xff] }
 0x37e   :  { %6737 = vtanh.f32 %v8782_v40  ;;  %v2187_v29 = vmul.f32 %v6734_v54, %v2186_v37  ;;  %2457 = vmatpush.bf16.msrb.mxu2 %v5291_v38  ;;  %2471 = vmatpush.bf16.msrb.mxu3 %v5295_v20  ;;  %v2211_v63 = vpack.c.bf16 %v2209_v51, %v2209_v51  ;;  %v5513_v44 = vor.u32 %v6430_v46, %v5512_v41  ;;  %v5520_v38 = vld [vmem:[%s10104_s2 + $0xe8] sm:$0xf]  ;;  %v6421_v41 = vld [vmem:[%s10104_s2 + $0xac] sm:$0xf]  ;;  %v5490_v46 = vld [vmem:[%s10104_s2 + $0xb8] sm:$0xf0] }
 0x37f   :  { %v5517_v20 = vor.u32 %v6428_v28, %v5514_v32  ;;  %v5521_v9 = vor.u32 %v6431_v35, %v5520_v38  ;;  %v5525_v11 = vor.u32 %v6429_v18, %v5522_v1  ;;  %v5493_v32 = vor.u32 %v6421_v41, %v5490_v46  ;;  %v10206_v35 = vld [vmem:[#allocation36_spill] sm:$0xff] }
 0x380   :  { %v2188_v58 = vadd.f32 %v6734_v54, %v2187_v29  ;;  %2444 = vmatpush.bf16.msrb.mxu1 %v5271_v36  ;;  %v2259_v50 = vunpack.c.l.b16 %v2211_v63  ;;  %v5497_v36 = vor.u32 %v6426_v24, %v5496_v19  ;;  %v6424_v29 = vld [vmem:[%s10104_s2 + $0xc4] sm:$0xf]  ;;  %v5480_v63 = vld [vmem:[%s10104_s2 + $0xa0] sm:$0xf] }
 0x381   :  { %2430 = vmatpush.bf16.msrb.mxu0 %v5267_v39 }
 0x382   :  { %v2192_v62 = vsel %vm2191_vm14, %v6734_v54, %v2188_v58  ;;  %2458 = vmatpush.bf16.msrb.mxu2 %v5275_v59  ;;  %2472 = vmatpush.bf16.msrb.mxu3 %v5279_v4  ;;  %v376_v54 = vadd.f32 %v10202_v42, %v7431_v10 }
 0x383   :  { %v2197_v6 = vsel %vm2194_vm15, %v2196_v5, %v2192_v62  ;;  %v5501_v5 = vor.u32 %v6424_v29, %v5498_v0  ;;  %v6427_v62 = vld [vmem:[%s10104_s2 + $0xd4] sm:$0xf0] }
 0x384   :  { %v6738_v12 = vpop.eup %6737  ;;  %2839 = vmatpush.bf16.msra.mxu1 %v5517_v20 }
 0x385   :  { %v2210_v2 = vmul.f32 %v6738_v12, %v2197_v6  ;;  %2825 = vmatpush.bf16.msra.mxu0 %v5513_v44  ;;  %v5504_v12 = vld [vmem:[%s10104_s2 + $0xc8] sm:$0xf]  ;;  %v6425_v6 = vld [vmem:[%s10104_s2 + $0xcc] sm:$0xf] }
 0x386   :  { %2853 = vmatpush.bf16.msra.mxu2 %v5521_v9  ;;  %2867 = vmatpush.bf16.msra.mxu3 %v5525_v11 }
 0x387   :  { %v2212_v31 = vpack.c.bf16 %v2210_v2, %v2210_v2  ;;  %v6586_v25 = vpack.c.bf16 %v2210_v2, %v2209_v51  ;;  %v5506_v2 = vld [vmem:[%s10104_s2 + $0xd8] sm:$0xf0] }
 0x388   :  { %2840 = vmatpush.bf16.msra.mxu1 %v5501_v5 }
 0x389   :  { %6587 = vst [vmem:[#allocation5 + $0x28] sm:$0xff] %v6586_v25   ;;  %v2260_v21 = vunpack.c.l.b16 %v2212_v31  ;;  %2826 = vmatpush.bf16.msra.mxu0 %v5497_v36  ;;  %v10204_v31 = vld [vmem:[#allocation32_spill] sm:$0xff] }
 0x38a   :  { %v472_v25 = vadd.f32 %v10204_v31, %v7535_v22 }
 0x38b   :  { %v2261_v14 = vpack.c.b16 %v2260_v21, %v2259_v50  ;;  %v6422_v21 = vld [vmem:[%s10104_s2 + $0xac] sm:$0xf0] }
 0x38d   :  { %2431 = vmatmul.bf16.vlgmr.msrb.gmra.mxu0 %v2261_v14  ;;  %2445 = vmatmul.bf16.vlgmr.msrb.gmra.mxu1 %v2261_v14 }
 0x38e   :  { %2459 = vmatmul.bf16.vlgmr.msrb.gmra.mxu2 %v2261_v14  ;;  %2473 = vmatmul.bf16.vlgmr.msrb.gmra.mxu3 %v2261_v14  ;;  %v6420_v14 = vld [vmem:[%s10104_s2 + $0xa4] sm:$0xf] }
 0x40a   :  { %v2432_v47 = vpop.f32.mrf.mxu0  ;;  %v2446_v13 = vpop.f32.mrf.mxu1 }
 0x40b   :  { %v2479_v48 = vadd.f32 %v2432_v47, %v374_v61  ;;  %v2480_v8 = vadd.f32 %v2446_v13, %v423_v43  ;;  %v523_v61 = vadd.f32 %v10205_v16, %v7486_v17  ;;  %v5505_v43 = vor.u32 %v6427_v62, %v5504_v12  ;;  %v5482_v47 = vld [vmem:[%s10104_s2 + $0xb0] sm:$0xf0]  ;;  %v5488_v13 = vld [vmem:[%s10104_s2 + $0xa8] sm:$0xf]  ;;  %v6419_v62 = vld [vmem:[%s10104_s2 + $0x94] sm:$0xf0] }
 0x40c   :  { %v5485_v53 = vor.u32 %v6420_v14, %v5482_v47  ;;  %v5472_v12 = vld [vmem:[%s10104_s2 + $0x88] sm:$0xf] }
 0x40d   :  { %v5392_v52 = vmul.f32 -1.442695, %v2479_v48  ;;  %v5393_v34 = vmul.f32 -1.442695, %v2480_v8  ;;  %2854 = vmatpush.bf16.msra.mxu2 %v5505_v43  ;;  %v5448_v43 = vld [vmem:[%s10104_s2 + $0x60] sm:$0xf] }
 0x40e   :  { %2841 = vmatpush.bf16.msra.mxu1 %v5485_v53  ;;  %v6412_v53 = vld [vmem:[%s10104_s2 + $0x64] sm:$0xf] }
 0x40f   :  { %6739 = vpow2.f32 %v5392_v52  ;;  %v5509_v52 = vor.u32 %v6425_v6, %v5506_v2 }
 0x410   :  { %6741 = vpow2.f32 %v5393_v34  ;;  %v5481_v34 = vor.u32 %v6422_v21, %v5480_v63  ;;  %v5442_v63 = vld [vmem:[%s10104_s2 + $0x58] sm:$0xf0] }
 0x411   :  { %v2474_v23 = vpop.f32.mrf.mxu3  ;;  %v2460_v51 = vpop.f32.mrf.mxu2  ;;  %2868 = vmatpush.bf16.msra.mxu3 %v5509_v52  ;;  %v5473_v52 = vor.u32 %v6419_v62, %v5472_v12 }
 0x412   :  { %v2482_v26 = vadd.f32 %v2474_v23, %v521_v7  ;;  %v2434_v33 = vpop.f32.mrf.mxu0  ;;  %v2448_v27 = vpop.f32.mrf.mxu1  ;;  %v2481_v8 = vadd.f32 %v2460_v51, %v472_v25  ;;  %v6423_v7 = vld [vmem:[%s10104_s2 + $0xb4] sm:$0xf0]  ;;  %2827 = vmatpush.bf16.msra.mxu0 %v5481_v34  ;;  %v6417_v25 = vld [vmem:[%s10104_s2 + $0x8c] sm:$0xf]  ;;  %v6414_v34 = vld [vmem:[%s10104_s2 + $0x6c] sm:$0xf0] }
 0x413   :  { %v2483_v60 = vadd.f32 %v2434_v33, %v376_v54  ;;  %v2484_v37 = vadd.f32 %v2448_v27, %v425_v30  ;;  %v5489_v55 = vor.u32 %v6423_v7, %v5488_v13  ;;  %v5450_v7 = vld [vmem:[%s10104_s2 + $0x70] sm:$0xf0] }
 0x414   :  { %v5394_v49 = vmul.f32 -1.442695, %v2482_v26  ;;  %v474_v26 = vadd.f32 %v10206_v35, %v7535_v22 }
 0x415   :  { %v6740_v56 = vpop.eup %6739  ;;  %v5395_v39 = vmul.f32 -1.442695, %v2483_v60  ;;  %v5396_v4 = vmul.f32 -1.442695, %v2484_v37  ;;  %2855 = vmatpush.bf16.msra.mxu2 %v5489_v55  ;;  %2869 = vmatpush.bf16.msra.mxu3 %v5493_v32  ;;  %v5456_v55 = vld [vmem:[%s10104_s2 + $0x68] sm:$0xf] }
 0x416   :  { %v6742_v3 = vpop.eup %6741  ;;  %v8868_v59 = vadd.f32 1.0, %v6740_v56  ;;  %6743 = vpow2.f32 %v5394_v49  ;;  %v5464_v56 = vld [vmem:[%s10104_s2 + $0x80] sm:$0xf] }
 0x417   :  { %v8873_v58 = vadd.f32 1.0, %v6742_v3  ;;  %6745 = vpow2.f32 %v5395_v39  ;;  %v6418_v39 = vld [vmem:[%s10104_s2 + $0x8c] sm:$0xf0]  ;;  %v6416_v3 = vld [vmem:[%s10104_s2 + $0x84] sm:$0xf] }
 0x418   :  { %6747 = vrcp.f32 %v8868_v59  ;;  %v2520_v57 = vand.u32 2147483647, %v8868_v59  ;;  %v2522_v23 = vand.u32 2147483648, %v8868_v59  ;;  %vm2516_vm1 = vweird.f32 %v8868_v59 }
 0x419   :  { %6749 = vrcp.f32 %v8873_v58  ;;  %v2476_v50 = vpop.f32.mrf.mxu3  ;;  %v2537_v27 = vand.u32 2147483648, %v8873_v58  ;;  %v2535_v1 = vand.u32 2147483647, %v8873_v58  ;;  %v2462_v11 = vpop.f32.mrf.mxu2  ;;  %vm2531_vm4 = vweird.f32 %v8873_v58  ;;  %2856 = vmatpush.bf16.msra.mxu2 %v5473_v52 }
 0x41a   :  { %6751 = vpow2.f32 %v5396_v4  ;;  %v2486_v54 = vadd.f32 %v2476_v50, %v523_v61  ;;  %vm8935_vm0 = vcmp.eq.f32.partialorder %v2520_v57, 8.507059e+37  ;;  %v2523_v24 = vor.u32 1.1754944e-38, %v2522_v23  ;;  %v5466_v4 = vld [vmem:[%s10104_s2 + $0x90] sm:$0xf0]  ;;  %v5474_v50 = vld [vmem:[%s10104_s2 + $0x98] sm:$0xf0] }
 0x41b   :  { %v2538_v36 = vor.u32 1.1754944e-38, %v2537_v27  ;;  %v2485_v51 = vadd.f32 %v2462_v11, %v474_v26  ;;  %vm8980_vm6 = vcmp.eq.f32.partialorder %v2535_v1, 8.507059e+37  ;;  %v5465_v31 = vor.u32 %v6418_v39, %v5464_v56  ;;  %v6413_v23 = vld [vmem:[%s10104_s2 + $0x6c] sm:$0xf]  ;;  %v5432_v27 = vld [vmem:[%s10104_s2 + $0x40] sm:$0xf] }
 0x41c   :  { %v6744_v48 = vpop.eup %6743  ;;  %v5397_v49 = vmul.f32 -1.442695, %v2486_v54  ;;  %v5477_v26 = vor.u32 %v6417_v25, %v5474_v50  ;;  %v5434_v11 = vld [vmem:[%s10104_s2 + $0x50] sm:$0xf0]  ;;  %v5453_v56 = vor.u32 %v6412_v53, %v5450_v7  ;;  %v5416_v50 = vld [vmem:[%s10104_s2 + $0x20] sm:$0xf] }
 0x41d   :  { %v6746_v28 = vpop.eup %6745  ;;  %v8918_v42 = vadd.f32 1.0, %v6744_v48  ;;  %2828 = vmatpush.bf16.msra.mxu0 %v5465_v31  ;;  %v6405_v53 = vld [vmem:[%s10104_s2 + $0x2c] sm:$0xf]  ;;  %v5426_v7 = vld [vmem:[%s10104_s2 + $0x38] sm:$0xf0] }
 0x41e   :  { %v8920_v30 = vpop.eup %6747  ;;  %v8923_v44 = vadd.f32 1.0, %v6746_v28  ;;  %2870 = vmatpush.bf16.msra.mxu3 %v5477_v26  ;;  %v5402_v54 = vld [vmem:[%s10104_s2 + $0x10] sm:$0xf0]  ;;  %v5408_v26 = vld [vmem:[%s10104_s2 + $0x8] sm:$0xf] }
 0x41f   :  { %v8925_v38 = vpop.eup %6749  ;;  %v2512_v33 = vmul.f32 %v8920_v30, %v8868_v59  ;;  %6753 = vrcp.f32 %v8918_v42  ;;  %vm2517_vm2 = vweird.f32 %v8920_v30  ;;  %v6404_v59 = vld [vmem:[%s10104_s2 + $0x24] sm:$0xf] }
 0x420   :  { %v6752_v20 = vpop.eup %6751  ;;  %v2527_v9 = vmul.f32 %v8925_v38, %v8873_v58  ;;  %6755 = vtanh.f32 %v2481_v8  ;;  %vm2532_vm3 = vweird.f32 %v8925_v38  ;;  %v2565_v5 = vand.u32 2147483647, %v8923_v44  ;;  %vm8976_vm5 = vmor %vm2516_vm1, %vm2517_vm2  ;;  %v6409_v58 = vld [vmem:[%s10104_s2 + $0x4c] sm:$0xf] }
 0x421   :  { %v2513_v60 = vsub.f32 1.0, %v2512_v33  ;;  %6757 = vrcp.f32 %v8923_v44  ;;  %v8941_v37 = vadd.f32 1.0, %v6752_v20  ;;  %vm8992_vm7 = vmor %vm2531_vm4, %vm2532_vm3  ;;  %v2567_v61 = vand.u32 2147483648, %v8923_v44  ;;  %v5458_v33 = vld [vmem:[%s10104_s2 + $0x78] sm:$0xf0] }
 0x422   :  { %v2528_v19 = vsub.f32 1.0, %v2527_v9  ;;  %v5469_v8 = vor.u32 %v6416_v3, %v5466_v4  ;;  %vm9026_vm8 = vcmp.eq.f32.partialorder %v2565_v5, 8.507059e+37  ;;  %vm2561_vm9 = vweird.f32 %v8923_v44  ;;  %v6410_v20 = vld [vmem:[%s10104_s2 + $0x4c] sm:$0xf0]  ;;  %v5440_v4 = vld [vmem:[%s10104_s2 + $0x48] sm:$0xf] }
 0x423   :  { %v2514_v29 = vmul.f32 %v8920_v30, %v2513_v60  ;;  %6759 = vrcp.f32 %v8941_v37  ;;  %v2582_v16 = vand.u32 2147483648, %v8941_v37  ;;  %v2580_v57 = vand.u32 2147483647, %v8941_v37  ;;  %v6408_v60 = vld [vmem:[%s10104_s2 + $0x44] sm:$0xf] }
 0x424   :  { %v2529_v0 = vmul.f32 %v8925_v38, %v2528_v19  ;;  %6761 = vpow2.f32 %v5397_v49  ;;  %2842 = vmatpush.bf16.msra.mxu1 %v5469_v8  ;;  %v2568_v3 = vor.u32 1.1754944e-38, %v2567_v61  ;;  %v5461_v12 = vor.u32 %v6413_v23, %v5458_v33  ;;  %v5418_v61 = vld [vmem:[%s10104_s2 + $0x30] sm:$0xf0]  ;;  %v6403_v33 = vld [vmem:[%s10104_s2 + $0x14] sm:$0xf0] }
 0x425   :  { %v8969_v6 = vpop.eup %6753  ;;  %v2515_v2 = vadd.f32 %v8920_v30, %v2514_v29  ;;  %6763 = vtanh.f32 %v2485_v51  ;;  %v5433_v62 = vor.u32 %v6410_v20, %v5432_v27  ;;  %vm2576_vm13 = vweird.f32 %v8941_v37 }
 0x426   :  { %v6756_v21 = vpop.eup %6755  ;;  %v2530_v14 = vadd.f32 %v8925_v38, %v2529_v0  ;;  %v2542_v48 = vmul.f32 %v8969_v6, %v8918_v42  ;;  %v6411_v0 = vld [vmem:[%s10104_s2 + $0x54] sm:$0xf0]  ;;  %2871 = vmatpush.bf16.msra.mxu3 %v5461_v12  ;;  %vm2581_vm15 = vcmp.eq.f32.partialorder %v2580_v57, 8.507059e+37  ;;  %v6400_v57 = vld [vmem:[%s10104_s2 + $0x4] sm:$0xf]  ;;  %vm2546_vm1 = vweird.f32 %v8918_v42 }
 0x427   :  { %v9003_v47 = vpop.eup %6757  ;;  %v2519_v13 = vsel %vm8976_vm5, %v8920_v30, %v2515_v2  ;;  %v6415_v30 = vld [vmem:[%s10104_s2 + $0x74] sm:$0xf0]  ;;  %v5437_v2 = vor.u32 %v6408_v60, %v5434_v11  ;;  %v5441_v52 = vor.u32 %v6411_v0, %v5440_v4  ;;  %v2552_v60 = vand.u32 2147483648, %v8918_v42 }
 0x428   :  { %v2524_v41 = vsel %vm8935_vm0, %v2523_v24, %v2519_v13  ;;  %v2534_v46 = vsel %vm8992_vm7, %v8925_v38, %v2530_v14  ;;  %v2557_v28 = vmul.f32 %v9003_v47, %v8923_v44  ;;  %vm2562_vm10 = vweird.f32 %v9003_v47  ;;  %2843 = vmatpush.bf16.msra.mxu1 %v5453_v56  ;;  %v6407_v13 = vld [vmem:[%s10104_s2 + $0x34] sm:$0xf0] }
 0x429   :  { %v9039_v32 = vpop.eup %6759  ;;  %v2539_v38 = vsel %vm8980_vm6, %v2538_v36, %v2534_v46  ;;  %v2605_v35 = vmul.f32 %v6756_v21, %v2524_v41  ;;  %v2543_v19 = vsub.f32 1.0, %v2542_v48  ;;  %v5449_v24 = vor.u32 %v6414_v34, %v5448_v43  ;;  %vm9076_vm11 = vmor %vm2561_vm9, %vm2562_vm10  ;;  %v6406_v21 = vld [vmem:[%s10104_s2 + $0x2c] sm:$0xf0]  ;;  %v5424_v43 = vld [vmem:[%s10104_s2 + $0x28] sm:$0xf] }
 0x42a   :  { %v2603_v9 = vmul.f32 %v2539_v38, %v8674_v45  ;;  %v2558_v18 = vsub.f32 1.0, %v2557_v28  ;;  %v2572_v1 = vmul.f32 %v9039_v32, %v8941_v37  ;;  %v6762_v49 = vpop.eup %6761  ;;  %v5457_v45 = vor.u32 %v6415_v30, %v5456_v55  ;;  %v5400_v55 = vld [vmem:[%s10104_s2] sm:$0xf]  ;;  %v6402_v37 = vld [vmem:[%s10104_s2 + $0xc] sm:$0xf0] }
 0x42b   :  { %v9080_v5 = vadd.f32 1.0, %v6762_v49  ;;  %2829 = vmatpush.bf16.msra.mxu0 %v5449_v24  ;;  %v6764_v44 = vpop.eup %6763  ;;  %vm2577_vm12 = vweird.f32 %v9039_v32  ;;  %v2544_v14 = vmul.f32 %v8969_v6, %v2543_v19  ;;  %v5445_v34 = vor.u32 %v6409_v58, %v5442_v63  ;;  %v5646_v41 = vld [vmem:[%s10104_s2 + $0xe0] sm:$0xf] }
 0x42c   :  { %v9063_v39 = vadd.f32 %v2605_v35, %v2603_v9  ;;  %v2573_v36 = vsub.f32 1.0, %v2572_v1  ;;  %v2559_v29 = vmul.f32 %v9003_v47, %v2558_v18  ;;  %2857 = vmatpush.bf16.msra.mxu2 %v5457_v45  ;;  %vm9124_vm14 = vmor %vm2576_vm13, %vm2577_vm12  ;;  %2844 = vmatpush.bf16.msra.mxu1 %v5437_v2  ;;  %v5417_v28 = vor.u32 %v6406_v21, %v5416_v50  ;;  %v6401_v9 = vld [vmem:[%s10104_s2 + $0xc] sm:$0xf]  ;;  %v5410_v18 = vld [vmem:[%s10104_s2 + $0x18] sm:$0xf0] }
 0x42d   :  { %6765 = vrcp.f32 %v9080_v5  ;;  %v5425_v38 = vor.u32 %v6407_v13, %v5424_v43  ;;  %2872 = vmatpush.bf16.msra.mxu3 %v5445_v34  ;;  %v2545_v27 = vadd.f32 %v8969_v6, %v2544_v14  ;;  %vm2547_vm0 = vweird.f32 %v8969_v6  ;;  %v6459_v45 = vld [vmem:[%s10104_s2 + $0xd4] sm:$0xf0] }
 0x42e   :  { %v2574_v31 = vmul.f32 %v9039_v32, %v2573_v36  ;;  %v2560_v25 = vadd.f32 %v9003_v47, %v2559_v29  ;;  %6767 = vtanh.f32 %v9063_v39  ;;  %v5401_v11 = vor.u32 %v6402_v37, %v5400_v55  ;;  %vm9173_vm2 = vmor %vm2546_vm1, %vm2547_vm0  ;;  %v6463_v37 = vld [vmem:[%s10104_s2 + $0xf4] sm:$0xf0] }
 0x42f   :  { %2830 = vmatpush.bf16.msra.mxu0 %v5433_v62  ;;  %v5405_v49 = vor.u32 %v6400_v57, %v5402_v54  ;;  %v2550_v19 = vand.u32 2147483647, %v8918_v42  ;;  %v5409_v56 = vor.u32 %v6403_v33, %v5408_v26  ;;  %v5413_v36 = vor.u32 %v6401_v9, %v5410_v18  ;;  %v6461_v57 = vld [vmem:[%s10104_s2 + $0xec] sm:$0xf]  ;;  %v6456_v9 = vld [vmem:[%s10104_s2 + $0xc4] sm:$0xf] }
 0x430   :  { %v2564_v48 = vsel %vm9076_vm11, %v9003_v47, %v2560_v25  ;;  %v2575_v8 = vadd.f32 %v9039_v32, %v2574_v31  ;;  %v2583_v47 = vor.u32 1.1754944e-38, %v2582_v16  ;;  %2858 = vmatpush.bf16.msra.mxu2 %v5441_v52  ;;  %v5421_v16 = vor.u32 %v6404_v59, %v5418_v61  ;;  %v10226_v18 = vld [vmem:[#allocation26_spill] sm:$0xff] }
 0x431   :  { %v2569_v46 = vsel %vm9026_vm8, %v2568_v3, %v2564_v48  ;;  %v2549_v29 = vsel %vm9173_vm2, %v8969_v6, %v2545_v27  ;;  %v2553_v4 = vor.u32 1.1754944e-38, %v2552_v60  ;;  %v2597_v0 = vand.u32 2147483648, %v9080_v5  ;;  %v10224_v48 = vld [vmem:[#allocation23_spill] sm:$0xff]  ;;  %v5630_v27 = vld [vmem:[%s10104_s2 + $0xc0] sm:$0xf] }
 0x432   :  { %v2579_v30 = vsel %vm9124_vm14, %v9039_v32, %v2575_v8  ;;  %v2606_v23 = vmul.f32 %v6764_v44, %v2569_v46  ;;  %v5429_v32 = vor.u32 %v6405_v53, %v5426_v7  ;;  %2845 = vmatpush.bf16.msra.mxu1 %v5421_v16  ;;  %vm2551_vm3 = vcmp.eq.f32.partialorder %v2550_v19, 8.507059e+37  ;;  %v6460_v46 = vld [vmem:[%s10104_s2 + $0xe4] sm:$0xf]  ;;  %v10227_v60 = vld [vmem:[#allocation27_spill] sm:$0xff] }
 0x433   :  { %v2584_v35 = vsel %vm2581_vm15, %v2583_v47, %v2579_v30  ;;  %v6766_v1 = vpop.eup %6765  ;;  %2831 = vmatpush.bf16.msra.mxu0 %v5417_v28  ;;  %v2595_v12 = vand.u32 2147483647, %v9080_v5  ;;  %v2554_v62 = vsel %vm2551_vm3, %v2553_v4, %v2549_v29  ;;  %vm2591_vm5 = vweird.f32 %v9080_v5  ;;  %v6462_v47 = vld [vmem:[%s10104_s2 + $0xec] sm:$0xf0] }
 0x434   :  { %v2604_v20 = vmul.f32 %v2584_v35, %v8782_v40  ;;  %v2587_v24 = vmul.f32 %v6766_v1, %v9080_v5  ;;  %2859 = vmatpush.bf16.msra.mxu2 %v5425_v38  ;;  %2873 = vmatpush.bf16.msra.mxu3 %v5429_v32  ;;  %v6768_v3 = vpop.eup %6767  ;;  %vm2592_vm4 = vweird.f32 %v6766_v1  ;;  %v2598_v58 = vor.u32 1.1754944e-38, %v2597_v0  ;;  %v10223_v5 = vld [vmem:[#allocation22_spill] sm:$0xff]  ;;  %v5654_v38 = vld [vmem:[%s10104_s2 + $0xe8] sm:$0xf]  ;;  %v5656_v35 = vld [vmem:[%s10104_s2 + $0xf8] sm:$0xf0] }
 0x435   :  { %v2611_v6 = vmul.f32 %v6768_v3, %v2554_v62  ;;  %vm2593_vm6 = vmor %vm2591_vm5, %vm2592_vm4  ;;  %vm2596_vm7 = vcmp.eq.f32.partialorder %v2595_v12, 8.507059e+37  ;;  %v369_v13 = vadd.f32 %v10223_v5, %v7431_v10  ;;  %v418_v8 = vadd.f32 %v10224_v48, %v7434_v15  ;;  %v10225_v32 = vld [vmem:[#allocation25_spill] sm:$0xff]  ;;  %v6457_v0 = vld [vmem:[%s10104_s2 + $0xcc] sm:$0xf] }
 0x436   :  { %v9168_v40 = vadd.f32 %v2606_v23, %v2604_v20  ;;  %v2588_v42 = vsub.f32 1.0, %v2587_v24  ;;  %2846 = vmatpush.bf16.msra.mxu1 %v5405_v49  ;;  %v5647_v30 = vor.u32 %v6462_v47, %v5646_v41  ;;  %v5648_v23 = vld [vmem:[%s10104_s2 + $0xf0] sm:$0xf0]  ;;  %v5655_v54 = vor.u32 %v6463_v37, %v5654_v38  ;;  %v6458_v20 = vld [vmem:[%s10104_s2 + $0xcc] sm:$0xf0] }
 0x437   :  { %2832 = vmatpush.bf16.msra.mxu0 %v5401_v11  ;;  %v2613_v50 = vpack.c.bf16 %v2611_v6, %v2611_v6  ;;  %v5651_v16 = vor.u32 %v6460_v46, %v5648_v23  ;;  %v516_v26 = vadd.f32 %v10225_v32, %v7486_v17  ;;  %v5659_v33 = vor.u32 %v6461_v57, %v5656_v35  ;;  %v5632_v24 = vld [vmem:[%s10104_s2 + $0xd0] sm:$0xf0]  ;;  %v5622_v48 = vld [vmem:[%s10104_s2 + $0xa8] sm:$0xf]  ;;  %v6450_v46 = vld [vmem:[%s10104_s2 + $0x8c] sm:$0xf0] }
 0x438   :  { %6769 = vtanh.f32 %v9168_v40  ;;  %v2589_v51 = vmul.f32 %v6766_v1, %v2588_v42  ;;  %2860 = vmatpush.bf16.msra.mxu2 %v5409_v56  ;;  %2874 = vmatpush.bf16.msra.mxu3 %v5413_v36  ;;  %v420_v11 = vadd.f32 %v10227_v60, %v7434_v15  ;;  %v5631_v19 = vor.u32 %v6458_v20, %v5630_v27  ;;  %v5638_v56 = vld [vmem:[%s10104_s2 + $0xc8] sm:$0xf]  ;;  %v5600_v38 = vld [vmem:[%s10104_s2 + $0x90] sm:$0xf0]  ;;  %v6449_v27 = vld [vmem:[%s10104_s2 + $0x8c] sm:$0xf] }
 0x439   :  { %v2661_v14 = vunpack.c.l.b16 %v2613_v50  ;;  %v5635_v3 = vor.u32 %v6456_v9, %v5632_v24  ;;  %v5639_v4 = vor.u32 %v6459_v45, %v5638_v56  ;;  %v6452_v50 = vld [vmem:[%s10104_s2 + $0xa4] sm:$0xf]  ;;  %v5606_v37 = vld [vmem:[%s10104_s2 + $0x88] sm:$0xf]  ;;  %v5608_v20 = vld [vmem:[%s10104_s2 + $0x98] sm:$0xf0] }
 0x43a   :  { %v2590_v2 = vadd.f32 %v6766_v1, %v2589_v51  ;;  %3241 = vmatpush.bf16.msrb.mxu1 %v5651_v16  ;;  %v5640_v51 = vld [vmem:[%s10104_s2 + $0xd8] sm:$0xf0]  ;;  %v5611_v24 = vor.u32 %v6449_v27, %v5608_v20  ;;  %v10230_v45 = vld [vmem:[#allocation28_spill] sm:$0xff] }
 0x43b   :  { %3227 = vmatpush.bf16.msrb.mxu0 %v5647_v30 }
 0x43c   :  { %v2594_v44 = vsel %vm2593_vm6, %v6766_v1, %v2590_v2  ;;  %v371_v1 = vadd.f32 %v10226_v18, %v7431_v10  ;;  %3255 = vmatpush.bf16.msrb.mxu2 %v5655_v54  ;;  %3269 = vmatpush.bf16.msrb.mxu3 %v5659_v33  ;;  %v5643_v2 = vor.u32 %v6457_v0, %v5640_v51  ;;  %v6451_v33 = vld [vmem:[%s10104_s2 + $0x94] sm:$0xf0] }
 0x43d   :  { %v2599_v31 = vsel %vm2596_vm7, %v2598_v58, %v2594_v44  ;;  %v5614_v58 = vld [vmem:[%s10104_s2 + $0xa0] sm:$0xf]  ;;  %v5607_v60 = vor.u32 %v6451_v33, %v5606_v37  ;;  %v5568_v33 = vld [vmem:[%s10104_s2 + $0x50] sm:$0xf0] }
 0x43e   :  { %v6770_v63 = vpop.eup %6769  ;;  %3242 = vmatpush.bf16.msrb.mxu1 %v5635_v3 }
 0x43f   :  { %v2612_v25 = vmul.f32 %v6770_v63, %v2599_v31  ;;  %3228 = vmatpush.bf16.msrb.mxu0 %v5631_v19  ;;  %v6454_v63 = vld [vmem:[%s10104_s2 + $0xac] sm:$0xf0] }
 0x440   :  { %3256 = vmatpush.bf16.msrb.mxu2 %v5639_v4  ;;  %3270 = vmatpush.bf16.msrb.mxu3 %v5643_v2 }
 0x441   :  { %v2614_v21 = vpack.c.bf16 %v2612_v25, %v2612_v25  ;;  %v6591_v59 = vpack.c.bf16 %v2612_v25, %v2611_v6  ;;  %v5615_v25 = vor.u32 %v6454_v63, %v5614_v58 }
 0x443   :  { %6592 = vst [vmem:[#allocation5 + $0x30] sm:$0xff] %v6591_v59   ;;  %v2662_v61 = vunpack.c.l.b16 %v2614_v21  ;;  %3229 = vmatpush.bf16.msrb.mxu0 %v5615_v25 }
 0x445   :  { %v2663_v43 = vpack.c.b16 %v2662_v61, %v2661_v14  ;;  %v5616_v61 = vld [vmem:[%s10104_s2 + $0xb0] sm:$0xf0] }
 0x447   :  { %2833 = vmatmul.bf16.vlgmr.msra.gmra.mxu0 %v2663_v43  ;;  %2847 = vmatmul.bf16.vlgmr.msra.gmra.mxu1 %v2663_v43 }
 0x448   :  { %2861 = vmatmul.bf16.vlgmr.msra.gmra.mxu2 %v2663_v43  ;;  %2875 = vmatmul.bf16.vlgmr.msra.gmra.mxu3 %v2663_v43 }
 0x4c4   :  { %v2834_v52 = vpop.f32.mrf.mxu0  ;;  %v2848_v34 = vpop.f32.mrf.mxu1 }
 0x4c5   :  { %v2881_v53 = vadd.f32 %v2834_v52, %v369_v13  ;;  %v2882_v7 = vadd.f32 %v2848_v34, %v418_v8  ;;  %v5619_v13 = vor.u32 %v6452_v50, %v5616_v61  ;;  %v6455_v8 = vld [vmem:[%s10104_s2 + $0xb4] sm:$0xf0]  ;;  %v6453_v52 = vld [vmem:[%s10104_s2 + $0xac] sm:$0xf]  ;;  %v5624_v34 = vld [vmem:[%s10104_s2 + $0xb8] sm:$0xf0] }
 0x4c6   :  { %v5623_v16 = vor.u32 %v6455_v8, %v5622_v48  ;;  %v5627_v35 = vor.u32 %v6453_v52, %v5624_v34  ;;  %v5590_v48 = vld [vmem:[%s10104_s2 + $0x68] sm:$0xf]  ;;  %v6447_v8 = vld [vmem:[%s10104_s2 + $0x74] sm:$0xf0] }
 0x4c7   :  { %v5526_v28 = vmul.f32 -1.442695, %v2881_v53  ;;  %v5527_v55 = vmul.f32 -1.442695, %v2882_v7  ;;  %3243 = vmatpush.bf16.msrb.mxu1 %v5619_v13  ;;  %v5598_v53 = vld [vmem:[%s10104_s2 + $0x80] sm:$0xf] }
 0x4c8   :  { %v10228_v7 = vld [vmem:[#allocation24_spill] sm:$0xff]  ;;  %v5599_v32 = vor.u32 %v6450_v46, %v5598_v53  ;;  %3257 = vmatpush.bf16.msrb.mxu2 %v5623_v16  ;;  %3271 = vmatpush.bf16.msrb.mxu3 %v5627_v35  ;;  %v5566_v16 = vld [vmem:[%s10104_s2 + $0x40] sm:$0xf]  ;;  %v5591_v35 = vor.u32 %v6447_v8, %v5590_v48  ;;  %v5560_v53 = vld [vmem:[%s10104_s2 + $0x38] sm:$0xf0] }
 0x4c9   :  { %6771 = vpow2.f32 %v5526_v28  ;;  %v467_v41 = vadd.f32 %v10228_v7, %v7535_v22  ;;  %v6448_v28 = vld [vmem:[%s10104_s2 + $0x84] sm:$0xf] }
 0x4ca   :  { %6773 = vpow2.f32 %v5527_v55  ;;  %v10229_v55 = vld [vmem:[#allocation29_spill] sm:$0xff]  ;;  %3230 = vmatpush.bf16.msrb.mxu0 %v5599_v32  ;;  %v6442_v32 = vld [vmem:[%s10104_s2 + $0x4c] sm:$0xf0] }
 0x4cb   :  { %v2876_v49 = vpop.f32.mrf.mxu3  ;;  %v2862_v5 = vpop.f32.mrf.mxu2  ;;  %v518_v30 = vadd.f32 %v10229_v55, %v7486_v17 }
 0x4cc   :  { %v2884_v36 = vadd.f32 %v2876_v49, %v516_v26  ;;  %v2836_v29 = vpop.f32.mrf.mxu0  ;;  %v2850_v42 = vpop.f32.mrf.mxu1  ;;  %v2883_v54 = vadd.f32 %v2862_v5, %v467_v41  ;;  %v5603_v26 = vor.u32 %v6448_v28, %v5600_v38  ;;  %3258 = vmatpush.bf16.msrb.mxu2 %v5607_v60  ;;  %3272 = vmatpush.bf16.msrb.mxu3 %v5611_v24  ;;  %v6445_v41 = vld [vmem:[%s10104_s2 + $0x6c] sm:$0xf]  ;;  %v5574_v60 = vld [vmem:[%s10104_s2 + $0x48] sm:$0xf] }
 0x4cd   :  { %v2885_v12 = vadd.f32 %v2836_v29, %v371_v1  ;;  %v2886_v62 = vadd.f32 %v2850_v42, %v420_v11 }
 0x4ce   :  { %v5528_v6 = vmul.f32 -1.442695, %v2884_v36  ;;  %v469_v36 = vadd.f32 %v10230_v45, %v7535_v22  ;;  %3244 = vmatpush.bf16.msrb.mxu1 %v5603_v26  ;;  %v6440_v26 = vld [vmem:[%s10104_s2 + $0x44] sm:$0xf] }
 0x4cf   :  { %v6772_v44 = vpop.eup %6771  ;;  %v5529_v31 = vmul.f32 -1.442695, %v2885_v12  ;;  %v5530_v14 = vmul.f32 -1.442695, %v2886_v62 }
 0x4d0   :  { %v6774_v21 = vpop.eup %6773  ;;  %v9251_v59 = vadd.f32 1.0, %v6772_v44  ;;  %6775 = vpow2.f32 %v5528_v6  ;;  %v5582_v44 = vld [vmem:[%s10104_s2 + $0x60] sm:$0xf]  ;;  %3259 = vmatpush.bf16.msrb.mxu2 %v5591_v35 }
 0x4d1   :  { %v9256_v43 = vadd.f32 1.0, %v6774_v21  ;;  %6777 = vpow2.f32 %v5529_v31  ;;  %v6446_v31 = vld [vmem:[%s10104_s2 + $0x6c] sm:$0xf0]  ;;  %v6444_v21 = vld [vmem:[%s10104_s2 + $0x64] sm:$0xf] }
 0x4d2   :  { %6779 = vrcp.f32 %v9251_v59  ;;  %v2922_v23 = vand.u32 2147483647, %v9251_v59  ;;  %v2924_v49 = vand.u32 2147483648, %v9251_v59  ;;  %vm2918_vm9 = vweird.f32 %v9251_v59 }
 0x4d3   :  { %6781 = vrcp.f32 %v9256_v43  ;;  %v2878_v47 = vpop.f32.mrf.mxu3  ;;  %v2939_v42 = vand.u32 2147483648, %v9256_v43  ;;  %v2937_v51 = vand.u32 2147483647, %v9256_v43  ;;  %v2864_v2 = vpop.f32.mrf.mxu2  ;;  %vm2933_vm12 = vweird.f32 %v9256_v43 }
 0x4d4   :  { %6783 = vpow2.f32 %v5530_v14  ;;  %v2888_v1 = vadd.f32 %v2878_v47, %v518_v30  ;;  %vm9318_vm8 = vcmp.eq.f32.partialorder %v2922_v23, 8.507059e+37  ;;  %v2925_v63 = vor.u32 1.1754944e-38, %v2924_v49  ;;  %v5584_v14 = vld [vmem:[%s10104_s2 + $0x70] sm:$0xf0]  ;;  %v5592_v47 = vld [vmem:[%s10104_s2 + $0x78] sm:$0xf0] }
 0x4d5   :  { %v2940_v25 = vor.u32 1.1754944e-38, %v2939_v42  ;;  %v2887_v5 = vadd.f32 %v2864_v2, %v469_v36  ;;  %vm9363_vm14 = vcmp.eq.f32.partialorder %v2937_v51, 8.507059e+37  ;;  %v5583_v7 = vor.u32 %v6446_v31, %v5582_v44  ;;  %v6441_v49 = vld [vmem:[%s10104_s2 + $0x4c] sm:$0xf]  ;;  %v5550_v42 = vld [vmem:[%s10104_s2 + $0x20] sm:$0xf] }
 0x4d6   :  { %v6776_v57 = vpop.eup %6775  ;;  %v5531_v6 = vmul.f32 -1.442695, %v2888_v1  ;;  %v5595_v36 = vor.u32 %v6445_v41, %v5592_v47  ;;  %v5552_v2 = vld [vmem:[%s10104_s2 + $0x30] sm:$0xf0]  ;;  %v5571_v44 = vor.u32 %v6440_v26, %v5568_v33  ;;  %v5534_v47 = vld [vmem:[%s10104_s2] sm:$0xf] }
 0x4d7   :  { %v6778_v9 = vpop.eup %6777  ;;  %v9301_v18 = vadd.f32 1.0, %v6776_v57  ;;  %3231 = vmatpush.bf16.msrb.mxu0 %v5583_v7  ;;  %v6433_v26 = vld [vmem:[%s10104_s2 + $0xc] sm:$0xf]  ;;  %v5544_v33 = vld [vmem:[%s10104_s2 + $0x18] sm:$0xf0] }
 0x4d8   :  { %v9303_v11 = vpop.eup %6779  ;;  %v9306_v19 = vadd.f32 1.0, %v6778_v9  ;;  %3273 = vmatpush.bf16.msrb.mxu3 %v5595_v36 }
 0x4d9   :  { %v9308_v56 = vpop.eup %6781  ;;  %v2914_v29 = vmul.f32 %v9303_v11, %v9251_v59  ;;  %6785 = vrcp.f32 %v9301_v18  ;;  %vm2919_vm10 = vweird.f32 %v9303_v11  ;;  %v6432_v59 = vld [vmem:[%s10104_s2 + $0x4] sm:$0xf] }
 0x4da   :  { %v6784_v3 = vpop.eup %6783  ;;  %v2929_v4 = vmul.f32 %v9308_v56, %v9256_v43  ;;  %6787 = vtanh.f32 %v2883_v54  ;;  %vm2934_vm11 = vweird.f32 %v9308_v56  ;;  %v2967_v13 = vand.u32 2147483647, %v9306_v19  ;;  %vm9359_vm13 = vmor %vm2918_vm9, %vm2919_vm10  ;;  %v6437_v43 = vld [vmem:[%s10104_s2 + $0x2c] sm:$0xf] }
 0x4db   :  { %v2915_v12 = vsub.f32 1.0, %v2914_v29  ;;  %6789 = vrcp.f32 %v9306_v19  ;;  %v9324_v62 = vadd.f32 1.0, %v6784_v3  ;;  %vm9375_vm15 = vmor %vm2933_vm12, %vm2934_vm11  ;;  %v2969_v30 = vand.u32 2147483648, %v9306_v19  ;;  %v5576_v29 = vld [vmem:[%s10104_s2 + $0x58] sm:$0xf0] }
 0x4dc   :  { %v2930_v58 = vsub.f32 1.0, %v2929_v4  ;;  %v5587_v54 = vor.u32 %v6444_v21, %v5584_v14  ;;  %vm9409_vm0 = vcmp.eq.f32.partialorder %v2967_v13, 8.507059e+37  ;;  %vm2963_vm1 = vweird.f32 %v9306_v19  ;;  %v6438_v3 = vld [vmem:[%s10104_s2 + $0x2c] sm:$0xf0]  ;;  %v5558_v14 = vld [vmem:[%s10104_s2 + $0x28] sm:$0xf] }
 0x4dd   :  { %v2916_v50 = vmul.f32 %v9303_v11, %v2915_v12  ;;  %6791 = vrcp.f32 %v9324_v62  ;;  %v2984_v55 = vand.u32 2147483648, %v9324_v62  ;;  %v2982_v23 = vand.u32 2147483647, %v9324_v62  ;;  %v6436_v12 = vld [vmem:[%s10104_s2 + $0x24] sm:$0xf] }
 0x4de   :  { %v2931_v61 = vmul.f32 %v9308_v56, %v2930_v58  ;;  %6793 = vpow2.f32 %v5531_v6  ;;  %3245 = vmatpush.bf16.msrb.mxu1 %v5587_v54  ;;  %v2970_v21 = vor.u32 1.1754944e-38, %v2969_v30  ;;  %v5579_v48 = vor.u32 %v6441_v49, %v5576_v29  ;;  %v5536_v30 = vld [vmem:[%s10104_s2 + $0x10] sm:$0xf0] }
 0x4df   :  { %v9352_v52 = vpop.eup %6785  ;;  %v2917_v34 = vadd.f32 %v9303_v11, %v2916_v50  ;;  %6795 = vtanh.f32 %v2887_v5  ;;  %v5551_v8 = vor.u32 %v6438_v3, %v5550_v42  ;;  %vm2978_vm5 = vweird.f32 %v9324_v62 }
 0x4e0   :  { %v6788_v46 = vpop.eup %6787  ;;  %v2932_v28 = vadd.f32 %v9308_v56, %v2931_v61  ;;  %v2944_v57 = vmul.f32 %v9352_v52, %v9301_v18  ;;  %v6439_v61 = vld [vmem:[%s10104_s2 + $0x34] sm:$0xf0]  ;;  %3274 = vmatpush.bf16.msrb.mxu3 %v5579_v48  ;;  %vm2983_vm7 = vcmp.eq.f32.partialorder %v2982_v23, 8.507059e+37  ;;  %vm2948_vm9 = vweird.f32 %v9301_v18  ;;  %v6494_v48 = vld [vmem:[%s10104_s2 + $0xec] sm:$0xf0] }
 0x4e1   :  { %v9386_v38 = vpop.eup %6789  ;;  %v2921_v37 = vsel %vm9359_vm13, %v9303_v11, %v2917_v34  ;;  %v6443_v11 = vld [vmem:[%s10104_s2 + $0x54] sm:$0xf0]  ;;  %v5555_v34 = vor.u32 %v6436_v12, %v5552_v2  ;;  %v5559_v35 = vor.u32 %v6439_v61, %v5558_v14 }
 0x4e2   :  { %v2926_v27 = vsel %vm9318_vm8, %v2925_v63, %v2921_v37  ;;  %v2936_v20 = vsel %vm9375_vm15, %v9308_v56, %v2932_v28  ;;  %v2959_v9 = vmul.f32 %v9386_v38, %v9306_v19  ;;  %vm2964_vm2 = vweird.f32 %v9386_v38  ;;  %3246 = vmatpush.bf16.msrb.mxu1 %v5571_v44  ;;  %v6435_v37 = vld [vmem:[%s10104_s2 + $0x14] sm:$0xf0] }
 0x4e3   :  { %v9422_v24 = vpop.eup %6791  ;;  %v2941_v56 = vsel %vm9363_vm14, %v2940_v25, %v2936_v20  ;;  %v3007_v45 = vmul.f32 %v6788_v46, %v2926_v27  ;;  %v2945_v58 = vsub.f32 1.0, %v2944_v57  ;;  %v5567_v63 = vor.u32 %v6442_v32, %v5566_v16  ;;  %vm9459_vm3 = vmor %vm2963_vm1, %vm2964_vm2  ;;  %v6434_v46 = vld [vmem:[%s10104_s2 + $0xc] sm:$0xf0]  ;;  %v5542_v16 = vld [vmem:[%s10104_s2 + $0x8] sm:$0xf] }
 0x4e4   :  { %v3005_v4 = vmul.f32 %v2941_v56, %v9063_v39  ;;  %v2960_v0 = vsub.f32 1.0, %v2959_v9  ;;  %v2974_v51 = vmul.f32 %v9422_v24, %v9324_v62  ;;  %v6794_v6 = vpop.eup %6793  ;;  %v5575_v39 = vor.u32 %v6443_v11, %v5574_v60 }
 0x4e5   :  { %v9463_v13 = vadd.f32 1.0, %v6794_v6  ;;  %3232 = vmatpush.bf16.msrb.mxu0 %v5567_v63  ;;  %v6796_v19 = vpop.eup %6795  ;;  %vm2979_vm4 = vweird.f32 %v9422_v24  ;;  %v2946_v28 = vmul.f32 %v9352_v52, %v2945_v58  ;;  %v5563_v32 = vor.u32 %v6437_v43, %v5560_v53  ;;  %v6495_v43 = vld [vmem:[%s10104_s2 + $0xf4] sm:$0xf0]  ;;  %v6493_v53 = vld [vmem:[%s10104_s2 + $0xec] sm:$0xf] }
 0x4e6   :  { %v9446_v31 = vadd.f32 %v3007_v45, %v3005_v4  ;;  %v2975_v25 = vsub.f32 1.0, %v2974_v51  ;;  %v2961_v50 = vmul.f32 %v9386_v38, %v2960_v0  ;;  %3260 = vmatpush.bf16.msrb.mxu2 %v5575_v39  ;;  %vm2980_vm6 = vmor %vm2978_vm5, %vm2979_vm4  ;;  %v2985_v27 = vor.u32 1.1754944e-38, %v2984_v55  ;;  %3247 = vmatpush.bf16.msrb.mxu1 %v5555_v34 }
 0x4e7   :  { %6797 = vrcp.f32 %v9463_v13  ;;  %v5535_v20 = vor.u32 %v6434_v46, %v5534_v47  ;;  %v5539_v11 = vor.u32 %v6432_v59, %v5536_v30  ;;  %v5543_v49 = vor.u32 %v6435_v37, %v5542_v16  ;;  %3275 = vmatpush.bf16.msrb.mxu3 %v5563_v32  ;;  %v5764_v47 = vld [vmem:[%s10104_s2 + $0xc0] sm:$0xf]  ;;  %v6490_v46 = vld [vmem:[%s10104_s2 + $0xcc] sm:$0xf0]  ;;  %v5772_v59 = vld [vmem:[%s10104_s2 + $0xc8] sm:$0xf] }
 0x4e8   :  { %v2976_v7 = vmul.f32 %v9422_v24, %v2975_v25  ;;  %v2962_v41 = vadd.f32 %v9386_v38, %v2961_v50  ;;  %6799 = vtanh.f32 %v9446_v31  ;;  %v5547_v55 = vor.u32 %v6433_v26, %v5544_v33  ;;  %v6491_v30 = vld [vmem:[%s10104_s2 + $0xd4] sm:$0xf0]  ;;  %v6489_v16 = vld [vmem:[%s10104_s2 + $0xcc] sm:$0xf]  ;;  %v5774_v37 = vld [vmem:[%s10104_s2 + $0xd8] sm:$0xf0] }
 0x4e9   :  { %3233 = vmatpush.bf16.msrb.mxu0 %v5551_v8  ;;  %v2947_v1 = vadd.f32 %v9352_v52, %v2946_v28  ;;  %vm2949_vm8 = vweird.f32 %v9352_v52  ;;  %v2954_v45 = vand.u32 2147483648, %v9301_v18  ;;  %v2999_v0 = vand.u32 2147483648, %v9463_v13  ;;  %v5788_v8 = vld [vmem:[%s10104_s2 + $0xe8] sm:$0xf]  ;;  %v6486_v32 = vld [vmem:[%s10104_s2 + $0xac] sm:$0xf0] }
 0x4ea   :  { %v2966_v57 = vsel %vm9459_vm3, %v9386_v38, %v2962_v41  ;;  %v2977_v54 = vadd.f32 %v9422_v24, %v2976_v7  ;;  %3261 = vmatpush.bf16.msrb.mxu2 %v5559_v35  ;;  %3248 = vmatpush.bf16.msrb.mxu1 %v5539_v11  ;;  %vm2950_vm10 = vmor %vm2948_vm9, %vm2949_vm8  ;;  %vm2993_vm13 = vweird.f32 %v9463_v13  ;;  %v5789_v7 = vor.u32 %v6495_v43, %v5788_v8  ;;  %v5748_v35 = vld [vmem:[%s10104_s2 + $0xa0] sm:$0xf]  ;;  %v5756_v26 = vld [vmem:[%s10104_s2 + $0xa8] sm:$0xf] }
 0x4eb   :  { %v2971_v38 = vsel %vm9409_vm0, %v2970_v21, %v2966_v57  ;;  %3276 = vmatpush.bf16.msrb.mxu3 %v5547_v55  ;;  %v2951_v42 = vsel %vm2950_vm10, %v9352_v52, %v2947_v1  ;;  %v2955_v4 = vor.u32 1.1754944e-38, %v2954_v45  ;;  %v3000_v58 = vor.u32 1.1754944e-38, %v2999_v0  ;;  %v5732_v11 = vld [vmem:[%s10104_s2 + $0x80] sm:$0xf]  ;;  %v6483_v1 = vld [vmem:[%s10104_s2 + $0x94] sm:$0xf0] }
 0x4ec   :  { %v2981_v9 = vsel %vm2980_vm6, %v9422_v24, %v2977_v54  ;;  %v3008_v60 = vmul.f32 %v6796_v19, %v2971_v38  ;;  %v2952_v24 = vand.u32 2147483647, %v9301_v18  ;;  %v2997_v18 = vand.u32 2147483647, %v9463_v13  ;;  %v5790_v19 = vld [vmem:[%s10104_s2 + $0xf8] sm:$0xf0] }
 0x4ed   :  { %v2986_v56 = vsel %vm2983_vm7, %v2985_v27, %v2981_v9  ;;  %v6798_v23 = vpop.eup %6797  ;;  %3234 = vmatpush.bf16.msrb.mxu0 %v5535_v20  ;;  %v5793_v41 = vor.u32 %v6493_v53, %v5790_v19  ;;  %v5765_v28 = vor.u32 %v6490_v46, %v5764_v47  ;;  %v5773_v57 = vor.u32 %v6491_v30, %v5772_v59  ;;  %v6487_v27 = vld [vmem:[%s10104_s2 + $0xb4] sm:$0xf0]  ;;  %v6485_v38 = vld [vmem:[%s10104_s2 + $0xac] sm:$0xf]  ;;  %v5758_v20 = vld [vmem:[%s10104_s2 + $0xb8] sm:$0xf0] }
 0x4ee   :  { %v3006_v62 = vmul.f32 %v2986_v56, %v9168_v40  ;;  %v2989_v29 = vmul.f32 %v6798_v23, %v9463_v13  ;;  %3262 = vmatpush.bf16.msrb.mxu2 %v5543_v49  ;;  %v6800_v3 = vpop.eup %6799  ;;  %vm2953_vm11 = vcmp.eq.f32.partialorder %v2952_v24, 8.507059e+37  ;;  %vm2994_vm12 = vweird.f32 %v6798_v23  ;;  %v5780_v13 = vld [vmem:[%s10104_s2 + $0xe0] sm:$0xf]  ;;  %v6482_v49 = vld [vmem:[%s10104_s2 + $0x8c] sm:$0xf0] }
 0x4ef   :  { %v2956_v12 = vsel %vm2953_vm11, %v2955_v4, %v2951_v42  ;;  %vm2995_vm14 = vmor %vm2993_vm13, %vm2994_vm12  ;;  %vm2998_vm15 = vcmp.eq.f32.partialorder %v2997_v18, 8.507059e+37  ;;  %v5781_v34 = vor.u32 %v6494_v48, %v5780_v13  ;;  %3670 = vmatpush.bf16.msra.mxu3 %v5793_v41  ;;  %v5777_v54 = vor.u32 %v6489_v16, %v5774_v37  ;;  %v5740_v56 = vld [vmem:[%s10104_s2 + $0x88] sm:$0xf]  ;;  %v6478_v42 = vld [vmem:[%s10104_s2 + $0x6c] sm:$0xf0] }
 0x4f0   :  { %v9521_v36 = vadd.f32 %v3008_v60, %v3006_v62  ;;  %v2990_v40 = vsub.f32 1.0, %v2989_v29  ;;  %v3013_v6 = vmul.f32 %v6800_v3, %v2956_v12  ;;  %v5749_v33 = vor.u32 %v6486_v32, %v5748_v35  ;;  %v6481_v62 = vld [vmem:[%s10104_s2 + $0x8c] sm:$0xf]  ;;  %v5716_v29 = vld [vmem:[%s10104_s2 + $0x60] sm:$0xf] }
 0x4f1   :  { %3628 = vmatpush.bf16.msra.mxu0 %v5781_v34  ;;  %v5757_v9 = vor.u32 %v6487_v27, %v5756_v26  ;;  %v5761_v60 = vor.u32 %v6485_v38, %v5758_v20  ;;  %v5733_v55 = vor.u32 %v6482_v49, %v5732_v11  ;;  %v5741_v45 = vor.u32 %v6483_v1, %v5740_v56  ;;  %v6479_v4 = vld [vmem:[%s10104_s2 + $0x74] sm:$0xf0]  ;;  %v6477_v0 = vld [vmem:[%s10104_s2 + $0x6c] sm:$0xf]  ;;  %v5684_v13 = vld [vmem:[%s10104_s2 + $0x20] sm:$0xf] }
 0x4f2   :  { %6801 = vtanh.f32 %v9521_v36  ;;  %v2991_v51 = vmul.f32 %v6798_v23, %v2990_v40  ;;  %v3015_v25 = vpack.c.bf16 %v3013_v6, %v3013_v6  ;;  %3656 = vmatpush.bf16.msra.mxu2 %v5789_v7  ;;  %v5724_v40 = vld [vmem:[%s10104_s2 + $0x68] sm:$0xf]  ;;  %v5717_v3 = vor.u32 %v6478_v42, %v5716_v29  ;;  %v6470_v48 = vld [vmem:[%s10104_s2 + $0x2c] sm:$0xf0]  ;;  %v6471_v19 = vld [vmem:[%s10104_s2 + $0x34] sm:$0xf0] }
 0x4f3   :  { %3671 = vmatpush.bf16.msra.mxu3 %v5777_v54  ;;  %v5725_v18 = vor.u32 %v6479_v4, %v5724_v40  ;;  %v5692_v8 = vld [vmem:[%s10104_s2 + $0x28] sm:$0xf]  ;;  %v5685_v53 = vor.u32 %v6470_v48, %v5684_v13  ;;  %v6469_v7 = vld [vmem:[%s10104_s2 + $0x2c] sm:$0xf]  ;;  %v5694_v41 = vld [vmem:[%s10104_s2 + $0x38] sm:$0xf0] }
 0x4f4   :  { %v2992_v2 = vadd.f32 %v6798_v23, %v2991_v51  ;;  %v3063_v14 = vunpack.c.l.b16 %v3015_v25  ;;  %v5726_v51 = vld [vmem:[%s10104_s2 + $0x78] sm:$0xf0]  ;;  %v5693_v59 = vor.u32 %v6471_v19, %v5692_v8  ;;  %v6492_v30 = vld [vmem:[%s10104_s2 + $0xe4] sm:$0xf]  ;;  %v5782_v16 = vld [vmem:[%s10104_s2 + $0xf0] sm:$0xf0] }
 0x4f5   :  { %3629 = vmatpush.bf16.msra.mxu0 %v5765_v28  ;;  %v5729_v12 = vor.u32 %v6477_v0, %v5726_v51  ;;  %v5697_v28 = vor.u32 %v6469_v7, %v5694_v41  ;;  %v5785_v37 = vor.u32 %v6492_v30, %v5782_v16  ;;  %v5668_v35 = vld [vmem:[%s10104_s2] sm:$0xf]  ;;  %v6466_v32 = vld [vmem:[%s10104_s2 + $0xc] sm:$0xf0]  ;;  %v5676_v26 = vld [vmem:[%s10104_s2 + $0x8] sm:$0xf] }
 0x4f6   :  { %v2996_v63 = vsel %vm2995_vm14, %v6798_v23, %v2992_v2  ;;  %3657 = vmatpush.bf16.msra.mxu2 %v5773_v57  ;;  %v5742_v23 = vld [vmem:[%s10104_s2 + $0x98] sm:$0xf0]  ;;  %v5700_v2 = vld [vmem:[%s10104_s2 + $0x40] sm:$0xf]  ;;  %v5669_v27 = vor.u32 %v6466_v32, %v5668_v35  ;;  %v6465_v20 = vld [vmem:[%s10104_s2 + $0xc] sm:$0xf] }
 0x4f7   :  { %v3001_v44 = vsel %vm2998_vm15, %v3000_v58, %v2996_v63  ;;  %3672 = vmatpush.bf16.msra.mxu3 %v5761_v60  ;;  %v5745_v24 = vor.u32 %v6481_v62, %v5742_v23  ;;  %v5708_v58 = vld [vmem:[%s10104_s2 + $0x48] sm:$0xf]  ;;  %v6475_v63 = vld [vmem:[%s10104_s2 + $0x54] sm:$0xf0]  ;;  %3642 = vmatpush.bf16.msra.mxu1 %v5785_v37  ;;  %v6488_v62 = vld [vmem:[%s10104_s2 + $0xc4] sm:$0xf] }
 0x4f8   :  { %v6802_v52 = vpop.eup %6801  ;;  %v5709_v25 = vor.u32 %v6475_v63, %v5708_v58  ;;  %v6513_v60 = vld [vmem:[%s10107_s4 + $0x78] sm:$0xff]  ;;  %v10246_v23 = vld [vmem:[#allocation18_spill] sm:$0xff]  ;;  %v5766_v40 = vld [vmem:[%s10104_s2 + $0xd0] sm:$0xf0] }
 0x4f9   :  { %v3014_v39 = vmul.f32 %v6802_v52, %v3001_v44  ;;  %3630 = vmatpush.bf16.msra.mxu0 %v5749_v33  ;;  %v6473_v44 = vld [vmem:[%s10104_s2 + $0x4c] sm:$0xf]  ;;  %v6467_v33 = vld [vmem:[%s10104_s2 + $0x14] sm:$0xf0]  ;;  %v5769_v51 = vor.u32 %v6488_v62, %v5766_v40  ;;  %v6530_v58 = vld [vmem:[%s10107_s4 + $0xf0] sm:$0xff] }
 0x4fa   :  { %3658 = vmatpush.bf16.msra.mxu2 %v5757_v9  ;;  %v5677_v38 = vor.u32 %v6467_v33, %v5676_v26  ;;  %v5678_v9 = vld [vmem:[%s10104_s2 + $0x18] sm:$0xf0]  ;;  %v6484_v63 = vld [vmem:[%s10104_s2 + $0xa4] sm:$0xf]  ;;  %v6511_v13 = vld [vmem:[%s10107_s4 + $0x68] sm:$0xff] }
 0x4fb   :  { %v3016_v50 = vpack.c.bf16 %v3014_v39, %v3014_v39  ;;  %v6596_v21 = vpack.c.bf16 %v3014_v39, %v3013_v6  ;;  %3673 = vmatpush.bf16.msra.mxu3 %v5745_v24  ;;  %v6474_v6 = vld [vmem:[%s10104_s2 + $0x4c] sm:$0xf0]  ;;  %v5710_v39 = vld [vmem:[%s10104_s2 + $0x58] sm:$0xf0]  ;;  %v5681_v56 = vor.u32 %v6465_v20, %v5678_v9  ;;  %v10247_v24 = vld [vmem:[#allocation19_spill] sm:$0xff]  ;;  %3643 = vmatpush.bf16.msra.mxu1 %v5769_v51 }
 0x4fc   :  { %v5701_v52 = vor.u32 %v6474_v6, %v5700_v2  ;;  %v10245_v11 = vld [vmem:[#allocation17_spill] sm:$0xff]  ;;  %v415_v29 = vadd.f32 %v10247_v24, %v7434_v15  ;;  %v6512_v2 = vld [vmem:[%s10107_s4 + $0x70] sm:$0xff]  ;;  %v6520_v48 = vld [vmem:[%s10107_s4 + $0xa8] sm:$0xff] }
 0x4fd   :  { %6597 = vst [vmem:[#allocation5 + $0x18] sm:$0xff] %v6596_v21   ;;  %v3064_v61 = vunpack.c.l.b16 %v3016_v50  ;;  %3631 = vmatpush.bf16.msra.mxu0 %v5733_v55  ;;  %v5713_v50 = vor.u32 %v6473_v44, %v5710_v39  ;;  %v10243_v21 = vld [vmem:[#allocation14_spill] sm:$0xff]  ;;  %v511_v49 = vadd.f32 %v10245_v11, %v7486_v17  ;;  %v6522_v55 = vld [vmem:[%s10107_s4 + $0xb8] sm:$0xff]  ;;  %v6521_v6 = vld [vmem:[%s10107_s4 + $0xb0] sm:$0xff] }
 0x4fe   :  { %3659 = vmatpush.bf16.msra.mxu2 %v5741_v45  ;;  %v6531_v1 = vld [vmem:[%s10107_s4 + $0xf8] sm:$0xff]  ;;  %v366_v45 = vadd.f32 %v10246_v23, %v7431_v10  ;;  %v5750_v44 = vld [vmem:[%s10104_s2 + $0xb0] sm:$0xf0]  ;;  %v6529_v8 = vld [vmem:[%s10107_s4 + $0xe8] sm:$0xff] }
 0x4ff   :  { %v3065_v5 = vpack.c.b16 %v3064_v61, %v3063_v14  ;;  %3674 = vmatpush.bf16.msra.mxu3 %v5729_v12  ;;  %v364_v14 = vadd.f32 %v10243_v21, %v7431_v10  ;;  %v10244_v61 = vld [vmem:[#allocation15_spill] sm:$0xff]  ;;  %v10248_v7 = vld [vmem:[#allocation21_spill] sm:$0xff]  ;;  %v10249_v16 = vld [vmem:[#allocation16_spill] sm:$0xff] }
 0x500   :  { %v513_v41 = vadd.f32 %v10248_v7, %v7486_v17  ;;  %v462_v37 = vadd.f32 %v10249_v16, %v7535_v22  ;;  %v6509_v9 = vld [vmem:[%s10107_s4 + $0x58] sm:$0xff]  ;;  %v6525_v16 = vld [vmem:[%s10107_s4 + $0xc8] sm:$0xff] }
 0x501   :  { %3235 = vmatmul.bf16.vlgmr.msrb.gmra.mxu0 %v3065_v5  ;;  %3249 = vmatmul.bf16.vlgmr.msrb.gmra.mxu1 %v3065_v5 }
 0x502   :  { %3263 = vmatmul.bf16.vlgmr.msrb.gmra.mxu2 %v3065_v5  ;;  %3277 = vmatmul.bf16.vlgmr.msrb.gmra.mxu3 %v3065_v5  ;;  %v413_v5 = vadd.f32 %v10244_v61, %v7434_v15 }
 0x503   :  { %3632 = vmatpush.bf16.msra.mxu0 %v5717_v3  ;;  %3660 = vmatpush.bf16.msra.mxu2 %v5725_v18 }
 0x504   :  { %3675 = vmatpush.bf16.msra.mxu3 %v5713_v50  ;;  %v5753_v50 = vor.u32 %v6484_v63, %v5750_v44  ;;  %v6526_v63 = vld [vmem:[%s10107_s4 + $0xd0] sm:$0xff]  ;;  %v6468_v44 = vld [vmem:[%s10104_s2 + $0x24] sm:$0xf] }
 0x506   :  { %3644 = vmatpush.bf16.msra.mxu1 %v5753_v50 }
 0x507   :  { %3633 = vmatpush.bf16.msra.mxu0 %v5701_v52  ;;  %3661 = vmatpush.bf16.msra.mxu2 %v5709_v25 }
 0x508   :  { %3676 = vmatpush.bf16.msra.mxu3 %v5697_v28  ;;  %v6528_v28 = vld [vmem:[%s10107_s4 + $0xe0] sm:$0xff] }
 0x50b   :  { %3634 = vmatpush.bf16.msra.mxu0 %v5685_v53  ;;  %3662 = vmatpush.bf16.msra.mxu2 %v5693_v59  ;;  %v5734_v53 = vld [vmem:[%s10104_s2 + $0x90] sm:$0xf0]  ;;  %v6519_v59 = vld [vmem:[%s10107_s4 + $0xa0] sm:$0xff] }
 0x50c   :  { %3677 = vmatpush.bf16.msra.mxu3 %v5681_v56  ;;  %v6527_v56 = vld [vmem:[%s10107_s4 + $0xd8] sm:$0xff] }
 0x50f   :  { %3635 = vmatpush.bf16.msra.mxu0 %v5669_v27  ;;  %3663 = vmatpush.bf16.msra.mxu2 %v5677_v38 }
 0x510   :  { %4161 = vmatpush.bf16.msrb.mxu3 %v6531_v1 }
 0x513   :  { %3917 = vmatpush.bf16.msrb.mxu0 %v6513_v60  ;;  %4072 = vmatpush.bf16.msrb.mxu2 %v6522_v55 }
 0x514   :  { %4162 = vmatpush.bf16.msrb.mxu3 %v6530_v58 }
 0x517   :  { %3918 = vmatpush.bf16.msrb.mxu0 %v6512_v2  ;;  %4073 = vmatpush.bf16.msrb.mxu2 %v6521_v6  ;;  %v6517_v2 = vld [vmem:[%s10107_s4 + $0x90] sm:$0xff] }
 0x518   :  { %4163 = vmatpush.bf16.msrb.mxu3 %v6529_v8  ;;  %v10250_v6 = vld [vmem:[#allocation20_spill] sm:$0xff] }
 0x519   :  { %v464_v58 = vadd.f32 %v10250_v6, %v7535_v22 }
 0x51b   :  { %3919 = vmatpush.bf16.msrb.mxu0 %v6511_v13  ;;  %4074 = vmatpush.bf16.msrb.mxu2 %v6520_v48 }
 0x51c   :  { %4164 = vmatpush.bf16.msrb.mxu3 %v6528_v28 }
 0x51f   :  { %4075 = vmatpush.bf16.msrb.mxu2 %v6519_v59 }
 0x520   :  { %4165 = vmatpush.bf16.msrb.mxu3 %v6527_v56 }
 0x524   :  { %4166 = vmatpush.bf16.msrb.mxu3 %v6526_v63 }
 0x528   :  { %4167 = vmatpush.bf16.msrb.mxu3 %v6525_v16 }
 0x57e   :  { %v3236_v34 = vpop.f32.mrf.mxu0  ;;  %v3250_v43 = vpop.f32.mrf.mxu1 }
 0x57f   :  { %v3283_v47 = vadd.f32 %v3236_v34, %v364_v14  ;;  %v3284_v46 = vadd.f32 %v3250_v43, %v413_v5  ;;  %v6480_v34 = vld [vmem:[%s10104_s2 + $0x84] sm:$0xf] }
 0x581   :  { %v5660_v57 = vmul.f32 -1.442695, %v3283_v47  ;;  %v5661_v54 = vmul.f32 -1.442695, %v3284_v46  ;;  %v5737_v47 = vor.u32 %v6480_v34, %v5734_v53  ;;  %v6510_v46 = vld [vmem:[%s10107_s4 + $0x60] sm:$0xff] }
 0x582   :  { %3920 = vmatpush.bf16.msrb.mxu0 %v6510_v46 }
 0x583   :  { %6803 = vpow2.f32 %v5660_v57  ;;  %v6476_v57 = vld [vmem:[%s10104_s2 + $0x64] sm:$0xf]  ;;  %3645 = vmatpush.bf16.msra.mxu1 %v5737_v47  ;;  %v6516_v47 = vld [vmem:[%s10107_s4 + $0x88] sm:$0xff] }
 0x584   :  { %6805 = vpow2.f32 %v5661_v54  ;;  %v5718_v54 = vld [vmem:[%s10104_s2 + $0x70] sm:$0xf0] }
 0x585   :  { %v3278_v42 = vpop.f32.mrf.mxu3  ;;  %v3264_v43 = vpop.f32.mrf.mxu2  ;;  %v5721_v33 = vor.u32 %v6476_v57, %v5718_v54  ;;  %v5670_v57 = vld [vmem:[%s10104_s2 + $0x10] sm:$0xf0] }
 0x586   :  { %v3286_v3 = vadd.f32 %v3278_v42, %v511_v49  ;;  %v3238_v4 = vpop.f32.mrf.mxu0  ;;  %v3252_v0 = vpop.f32.mrf.mxu1  ;;  %v3285_v38 = vadd.f32 %v3264_v43, %v462_v37  ;;  %v6518_v49 = vld [vmem:[%s10107_s4 + $0x98] sm:$0xff]  ;;  %3921 = vmatpush.bf16.msrb.mxu0 %v6509_v9  ;;  %v6464_v37 = vld [vmem:[%s10104_s2 + $0x4] sm:$0xf] }
 0x587   :  { %v3287_v18 = vadd.f32 %v3238_v4, %v366_v45  ;;  %v3288_v12 = vadd.f32 %v3252_v0, %v415_v29  ;;  %3646 = vmatpush.bf16.msra.mxu1 %v5721_v33  ;;  %v5702_v4 = vld [vmem:[%s10104_s2 + $0x50] sm:$0xf0]  ;;  %4076 = vmatpush.bf16.msrb.mxu2 %v6518_v49  ;;  %v6506_v9 = vld [vmem:[%s10107_s4 + $0x40] sm:$0xff] }
 0x588   :  { %v5662_v52 = vmul.f32 -1.442695, %v3286_v3  ;;  %v6472_v3 = vld [vmem:[%s10104_s2 + $0x44] sm:$0xf]  ;;  %v6508_v0 = vld [vmem:[%s10107_s4 + $0x50] sm:$0xff] }
 0x589   :  { %v6804_v39 = vpop.eup %6803  ;;  %v5663_v25 = vmul.f32 -1.442695, %v3287_v18  ;;  %v5664_v61 = vmul.f32 -1.442695, %v3288_v12 }
 0x58a   :  { %v6806_v21 = vpop.eup %6805  ;;  %v9719_v14 = vadd.f32 1.0, %v6804_v39  ;;  %6807 = vpow2.f32 %v5662_v52  ;;  %v5686_v39 = vld [vmem:[%s10104_s2 + $0x30] sm:$0xf0]  ;;  %3922 = vmatpush.bf16.msrb.mxu0 %v6508_v0 }
 0x58b   :  { %v9721_v5 = vadd.f32 1.0, %v6806_v21  ;;  %6809 = vpow2.f32 %v5663_v25  ;;  %v5705_v21 = vor.u32 %v6472_v3, %v5702_v4  ;;  %4077 = vmatpush.bf16.msrb.mxu2 %v6517_v2 }
 0x58c   :  { %6811 = vrcp.f32 %v9719_v14  ;;  %v3324_v23 = vand.u32 2147483647, %v9719_v14  ;;  %v3326_v45 = vand.u32 2147483648, %v9719_v14  ;;  %vm3320_vm2 = vweird.f32 %v9719_v14 }
 0x58d   :  { %6813 = vrcp.f32 %v9721_v5  ;;  %v3280_v19 = vpop.f32.mrf.mxu3  ;;  %v3341_v62 = vand.u32 2147483648, %v9721_v5  ;;  %v3339_v18 = vand.u32 2147483647, %v9721_v5  ;;  %v3266_v12 = vpop.f32.mrf.mxu2  ;;  %vm3335_vm3 = vweird.f32 %v9721_v5  ;;  %3647 = vmatpush.bf16.msra.mxu1 %v5705_v21 }
 0x58e   :  { %6815 = vpow2.f32 %v5664_v61  ;;  %v3290_v26 = vadd.f32 %v3280_v19, %v513_v41  ;;  %vm9827_vm5 = vcmp.eq.f32.partialorder %v3324_v23, 8.507059e+37  ;;  %v3327_v13 = vor.u32 1.1754944e-38, %v3326_v45  ;;  %v6524_v45 = vld [vmem:[%s10107_s4 + $0xc0] sm:$0xff] }
 0x58f   :  { %v3289_v8 = vadd.f32 %v3266_v12, %v464_v58  ;;  %v3342_v53 = vor.u32 1.1754944e-38, %v3341_v62  ;;  %v5689_v41 = vor.u32 %v6468_v44, %v5686_v39  ;;  %vm3340_vm7 = vcmp.eq.f32.partialorder %v3339_v18, 8.507059e+37  ;;  %4078 = vmatpush.bf16.msrb.mxu2 %v6516_v47  ;;  %4168 = vmatpush.bf16.msrb.mxu3 %v6524_v45  ;;  %v6514_v45 = vld [vmem:[#allocation5 + $0x18] sm:$0xff] }
 0x590   :  { %v6808_v30 = vpop.eup %6807  ;;  %v5665_v42 = vmul.f32 -1.442695, %v3290_v26 }
 0x591   :  { %v6810_v35 = vpop.eup %6809  ;;  %v9759_v32 = vadd.f32 1.0, %v6808_v30  ;;  %3648 = vmatpush.bf16.msra.mxu1 %v5689_v41 }
 0x592   :  { %v9761_v27 = vpop.eup %6811  ;;  %v9763_v20 = vadd.f32 1.0, %v6810_v35 }
 0x593   :  { %v9768_v60 = vpop.eup %6813  ;;  %v3316_v11 = vmul.f32 %v9761_v27, %v9719_v14  ;;  %6817 = vrcp.f32 %v9759_v32  ;;  %vm3321_vm0 = vweird.f32 %v9761_v27  ;;  %v3354_v21 = vand.u32 2147483647, %v9759_v32 }
 0x594   :  { %v6816_v55 = vpop.eup %6815  ;;  %v3331_v1 = vmul.f32 %v9768_v60, %v9721_v5  ;;  %6819 = vrcp.f32 %v9763_v20  ;;  %vm3336_vm1 = vweird.f32 %v9768_v60  ;;  %vm9823_vm4 = vmor %vm3320_vm2, %vm3321_vm0  ;;  %v6507_v5 = vld [vmem:[%s10107_s4 + $0x48] sm:$0xff]  ;;  %v3369_v49 = vand.u32 2147483647, %v9763_v20 }
 0x595   :  { %v3317_v24 = vsub.f32 1.0, %v3316_v11  ;;  %v9785_v29 = vadd.f32 1.0, %v6816_v55  ;;  %6821 = vtanh.f32 %v3285_v38  ;;  %vm9839_vm6 = vmor %vm3335_vm3, %vm3336_vm1  ;;  %3923 = vmatpush.bf16.msrb.mxu0 %v6507_v5  ;;  %v3371_v56 = vand.u32 2147483648, %v9763_v20 }
 0x596   :  { %v3332_v40 = vsub.f32 1.0, %v3331_v1  ;;  %v5673_v55 = vor.u32 %v6464_v37, %v5670_v57  ;;  %vm3365_vm9 = vweird.f32 %v9763_v20  ;;  %vm3370_vm13 = vcmp.eq.f32.partialorder %v3369_v49, 8.507059e+37  ;;  %v6537_v49 = vld [vmem:[%s10107_s4 + $0x120] sm:$0xff] }
 0x597   :  { %v3318_v51 = vmul.f32 %v9761_v27, %v3317_v24  ;;  %6823 = vrcp.f32 %v9785_v29  ;;  %v3386_v24 = vand.u32 2147483648, %v9785_v29  ;;  %v3384_v4 = vand.u32 2147483647, %v9785_v29 }
 0x598   :  { %v3333_v52 = vmul.f32 %v9768_v60, %v3332_v40  ;;  %6825 = vpow2.f32 %v5665_v42  ;;  %vm3380_vm11 = vweird.f32 %v9785_v29  ;;  %v3372_v0 = vor.u32 1.1754944e-38, %v3371_v56  ;;  %3649 = vmatpush.bf16.msra.mxu1 %v5673_v55  ;;  %v6555_v56 = vld [vmem:[%s10107_s4 + $0x1a0] sm:$0xff] }
 0x599   :  { %v9817_v25 = vpop.eup %6817  ;;  %v3319_v50 = vadd.f32 %v9761_v27, %v3318_v51  ;;  %6827 = vtanh.f32 %v3289_v8  ;;  %3924 = vmatpush.bf16.msrb.mxu0 %v6506_v9  ;;  %v3387_v2 = vor.u32 1.1754944e-38, %v3386_v24  ;;  %vm3385_vm15 = vcmp.eq.f32.partialorder %v3384_v4, 8.507059e+37  ;;  %v6538_v9 = vld [vmem:[%s10107_s4 + $0x128] sm:$0xff]  ;;  %v6564_v55 = vld [vmem:[%s10107_s4 + $0x1e0] sm:$0xff]  ;;  %v6523_v24 = vld [vmem:[#allocation5 + $0x30] sm:$0xff] }
 0x59a   :  { %v3334_v48 = vadd.f32 %v9768_v60, %v3333_v52  ;;  %v9835_v34 = vpop.eup %6819  ;;  %v3346_v7 = vmul.f32 %v9817_v25, %v9759_v32  ;;  %vm3351_vm0 = vweird.f32 %v9817_v25  ;;  %vm3350_vm1 = vweird.f32 %v9759_v32  ;;  %v6562_v4 = vld [vmem:[%s10107_s4 + $0x1d0] sm:$0xff] }
 0x59b   :  { %v3323_v19 = vsel %vm9823_vm4, %v9761_v27, %v3319_v50  ;;  %v6822_v46 = vpop.eup %6821  ;;  %v3361_v30 = vmul.f32 %v9835_v34, %v9763_v20  ;;  %vm3366_vm8 = vweird.f32 %v9835_v34  ;;  %v3356_v50 = vand.u32 2147483648, %v9759_v32  ;;  %vm3352_vm2 = vmor %vm3350_vm1, %vm3351_vm0 }
 0x59c   :  { %v3328_v59 = vsel %vm9827_vm5, %v3327_v13, %v3323_v19  ;;  %v3338_v28 = vsel %vm9839_vm6, %v9768_v60, %v3334_v48  ;;  %v3347_v11 = vsub.f32 1.0, %v3346_v7  ;;  %vm3367_vm12 = vmor %vm3365_vm9, %vm3366_vm8  ;;  %vm3355_vm3 = vcmp.eq.f32.partialorder %v3354_v21, 8.507059e+37  ;;  %v6503_v21 = vld [vmem:[%s10107_s4 + $0x30] sm:$0xff] }
 0x59d   :  { %v6824_v54 = vpop.eup %6823  ;;  %v3343_v35 = vsel %vm3340_vm7, %v3342_v53, %v3338_v28  ;;  %v3409_v26 = vmul.f32 %v6822_v46, %v3328_v59  ;;  %v3362_v27 = vsub.f32 1.0, %v3361_v30  ;;  %v3357_v5 = vor.u32 1.1754944e-38, %v3356_v50 }
 0x59e   :  { %v3407_v33 = vmul.f32 %v3343_v35, %v9446_v31  ;;  %v3376_v38 = vmul.f32 %v6824_v54, %v9785_v29  ;;  %v6826_v60 = vpop.eup %6825  ;;  %v6515_v31 = vld [vmem:[%s10107_s4 + $0x80] sm:$0xff]  ;;  %vm3381_vm10 = vweird.f32 %v6824_v54  ;;  %v3348_v18 = vmul.f32 %v9817_v25, %v3347_v11  ;;  %v6558_v35 = vld [vmem:[%s10107_s4 + $0x1b8] sm:$0xff]  ;;  %v6565_v11 = vld [vmem:[%s10107_s4 + $0x1e8] sm:$0xff] }
 0x59f   :  { %v3363_v23 = vmul.f32 %v9835_v34, %v3362_v27  ;;  %v3314_v42 = vadd.f32 1.0, %v6826_v60  ;;  %4079 = vmatpush.bf16.msrb.mxu2 %v6515_v31  ;;  %v6828_v51 = vpop.eup %6827  ;;  %vm3382_vm14 = vmor %vm3380_vm11, %vm3381_vm10  ;;  %v6557_v27 = vld [vmem:[%s10107_s4 + $0x1b0] sm:$0xff]  ;;  %v6556_v60 = vld [vmem:[%s10107_s4 + $0x1a8] sm:$0xff] }
 0x5a0   :  { %v9877_v1 = vadd.f32 %v3409_v26, %v3407_v33  ;;  %v3377_v62 = vsub.f32 1.0, %v3376_v38  ;;  %v3349_v63 = vadd.f32 %v9817_v25, %v3348_v18  ;;  %v6567_v26 = vld [vmem:[%s10107_s4 + $0x1f8] sm:$0xff]  ;;  %v6539_v33 = vld [vmem:[%s10107_s4 + $0x130] sm:$0xff]  ;;  %v6561_v18 = vld [vmem:[%s10107_s4 + $0x1c8] sm:$0xff] }
 0x5a1   :  { %v3364_v3 = vadd.f32 %v9835_v34, %v3363_v23  ;;  %6829 = vrcp.f32 %v3314_v42  ;;  %v3399_v43 = vand.u32 2147483647, %v3314_v42  ;;  %vm3395_vm5 = vweird.f32 %v3314_v42  ;;  %v6566_v38 = vld [vmem:[%s10107_s4 + $0x1f0] sm:$0xff]  ;;  %v6554_v23 = vld [vmem:[%s10107_s4 + $0x198] sm:$0xff] }
 0x5a2   :  { %v3378_v40 = vmul.f32 %v6824_v54, %v3377_v62  ;;  %6831 = vtanh.f32 %v9877_v1  ;;  %v3353_v13 = vsel %vm3352_vm2, %v9817_v25, %v3349_v63  ;;  %v6536_v62 = vld [vmem:[%s10107_s4 + $0x118] sm:$0xff]  ;;  %v10257_v63 = vld [vmem:[#allocation6_spill] sm:$0xff] }
 0x5a3   :  { %v3368_v20 = vsel %vm3367_vm12, %v9835_v34, %v3364_v3  ;;  %v3401_v34 = vand.u32 2147483648, %v3314_v42  ;;  %v3358_v53 = vsel %vm3355_vm3, %v3357_v5, %v3353_v13  ;;  %vm3400_vm7 = vcmp.eq.f32.partialorder %v3399_v43, 8.507059e+37  ;;  %v6553_v3 = vld [vmem:[%s10107_s4 + $0x190] sm:$0xff]  ;;  %v10259_v43 = vld [vmem:[#allocation9_spill] sm:$0xff] }
 0x5a4   :  { %v3379_v12 = vadd.f32 %v6824_v54, %v3378_v40  ;;  %v3373_v6 = vsel %vm3370_vm13, %v3372_v0, %v3368_v20  ;;  %v6535_v40 = vld [vmem:[%s10107_s4 + $0x110] sm:$0xff]  ;;  %v6534_v0 = vld [vmem:[%s10107_s4 + $0x108] sm:$0xff]  ;;  %v6533_v20 = vld [vmem:[%s10107_s4 + $0x100] sm:$0xff] }
 0x5a5   :  { %v3410_v29 = vmul.f32 %v6828_v51, %v3373_v6  ;;  %v3402_v7 = vor.u32 1.1754944e-38, %v3401_v34  ;;  %v6552_v51 = vld [vmem:[%s10107_s4 + $0x188] sm:$0xff] }
 0x5a6   :  { %v3383_v58 = vsel %vm3382_vm14, %v6824_v54, %v3379_v12  ;;  %v6540_v54 = vld [vmem:[%s10107_s4 + $0x138] sm:$0xff]  ;;  %v6551_v12 = vld [vmem:[%s10107_s4 + $0x180] sm:$0xff]  ;;  %v6532_v6 = vld [vmem:[#allocation5 + $0x28] sm:$0xff] }
 0x5a7   :  { %v3388_v52 = vsel %vm3385_vm15, %v3387_v2, %v3383_v58  ;;  %v6830_v39 = vpop.eup %6829  ;;  %v6560_v2 = vld [vmem:[%s10107_s4 + $0x1c0] sm:$0xff]  ;;  %v6550_v58 = vld [vmem:[#allocation5 + $0x38] sm:$0xff] }
 0x5a8   :  { %v3408_v44 = vmul.f32 %v3388_v52, %v9521_v36  ;;  %v3391_v61 = vmul.f32 %v6830_v39, %v3314_v42  ;;  %v6832_v8 = vpop.eup %6831  ;;  %vm3396_vm4 = vweird.f32 %v6830_v39  ;;  %v6563_v42 = vld [vmem:[%s10107_s4 + $0x1d8] sm:$0xff] }
 0x5a9   :  { %v3415_v32 = vmul.f32 %v6832_v8, %v3358_v53  ;;  %vm3397_vm6 = vmor %vm3395_vm5, %vm3396_vm4  ;;  %v6504_v52 = vld [vmem:[%s10107_s4 + $0x38] sm:$0xff]  ;;  %v506_v53 = vadd.f32 %v10259_v43, %v7486_v17 }
 0x5aa   :  { %v9899_v14 = vadd.f32 %v3410_v29, %v3408_v44  ;;  %v3392_v48 = vsub.f32 1.0, %v3391_v61  ;;  %v6559_v29 = vld [vmem:[#allocation5 + $0x8] sm:$0xff]  ;;  %3985 = vmatpush.bf16.msrb.mxu1 %v6504_v52  ;;  %v359_v44 = vadd.f32 %v10257_v63, %v7431_v10 }
 0x5ab   :  { %v3417_v59 = vpack.c.bf16 %v3415_v32, %v3415_v32 }
 0x5ac   :  { %6833 = vtanh.f32 %v9899_v14  ;;  %v3393_v36 = vmul.f32 %v6830_v39, %v3392_v48 }
 0x5ad   :  { %v3464_v16 = vunpack.c.l.b16 %v3417_v59 }
 0x5ae   :  { %v3394_v19 = vadd.f32 %v6830_v39, %v3393_v36  ;;  %3986 = vmatpush.bf16.msrb.mxu1 %v6503_v21  ;;  %v6502_v36 = vld [vmem:[%s10107_s4 + $0x28] sm:$0xff] }
 0x5b0   :  { %v3398_v47 = vsel %vm3397_vm6, %v6830_v39, %v3394_v19  ;;  %v10258_v39 = vld [vmem:[#allocation7_spill] sm:$0xff]  ;;  %v10260_v19 = vld [vmem:[#allocation10_spill] sm:$0xff] }
 0x5b1   :  { %v3403_v25 = vsel %vm3400_vm7, %v3402_v7, %v3398_v47  ;;  %v408_v50 = vadd.f32 %v10258_v39, %v7434_v15  ;;  %v10261_v7 = vld [vmem:[#allocation11_spill] sm:$0xff] }
 0x5b2   :  { %v6834_v41 = vpop.eup %6833  ;;  %3987 = vmatpush.bf16.msrb.mxu1 %v6502_v36 }
 0x5b3   :  { %v3416_v46 = vmul.f32 %v6834_v41, %v3403_v25  ;;  %v410_v41 = vadd.f32 %v10261_v7, %v7434_v15  ;;  %v6501_v25 = vld [vmem:[%s10107_s4 + $0x20] sm:$0xff] }
 0x5b5   :  { %v3418_v28 = vpack.c.bf16 %v3416_v46, %v3416_v46  ;;  %v6601_v30 = vpack.c.bf16 %v3416_v46, %v3415_v32  ;;  %v361_v32 = vadd.f32 %v10260_v19, %v7431_v10  ;;  %v6500_v10 = vld [vmem:[%s10107_s4 + $0x18] sm:$0xff] }
 0x5b6   :  { %3988 = vmatpush.bf16.msrb.mxu1 %v6501_v25 }
 0x5b7   :  { %6602 = vst [vmem:[#allocation5 + $0x10] sm:$0xff] %v6601_v30   ;;  %v3465_v37 = vunpack.c.l.b16 %v3418_v28 }
 0x5b9   :  { %v3466_v57 = vpack.c.b16 %v3465_v37, %v3464_v16 }
 0x5ba   :  { %3989 = vmatpush.bf16.msrb.mxu1 %v6500_v10 }
 0x5bb   :  { %3636 = vmatmul.bf16.vlgmr.msra.gmra.mxu0 %v3466_v57  ;;  %3650 = vmatmul.bf16.vlgmr.msra.gmra.mxu1 %v3466_v57 }
 0x5bc   :  { %3664 = vmatmul.bf16.vlgmr.msra.gmra.mxu2 %v3466_v57  ;;  %3678 = vmatmul.bf16.vlgmr.msra.gmra.mxu3 %v3466_v57 }
 0x5bd   :  { %4250 = vmatpush.bf16.msra.mxu0 %v6540_v54  ;;  %4428 = vmatpush.bf16.msra.mxu2 %v6558_v35 }
 0x5be   :  { %4517 = vmatpush.bf16.msra.mxu3 %v6567_v26  ;;  %v6505_v31 = vld [vmem:[#allocation5 + $0x10] sm:$0xff] }
 0x5c1   :  { %4251 = vmatpush.bf16.msra.mxu0 %v6539_v33  ;;  %4429 = vmatpush.bf16.msra.mxu2 %v6557_v27 }
 0x5c2   :  { %4518 = vmatpush.bf16.msra.mxu3 %v6566_v38  ;;  %v6499_v38 = vld [vmem:[%s10107_s4 + $0x10] sm:$0xff] }
 0x5c3   :  { %3990 = vmatpush.bf16.msrb.mxu1 %v6499_v38 }
 0x5c5   :  { %4252 = vmatpush.bf16.msra.mxu0 %v6538_v9  ;;  %4430 = vmatpush.bf16.msra.mxu2 %v6556_v60  ;;  %v10262_v9 = vld [vmem:[#allocation8_spill] sm:$0xff] }
 0x5c6   :  { %4519 = vmatpush.bf16.msra.mxu3 %v6565_v11  ;;  %v457_v60 = vadd.f32 %v10262_v9, %v7535_v22 }
 0x5c9   :  { %4253 = vmatpush.bf16.msra.mxu0 %v6537_v49  ;;  %4431 = vmatpush.bf16.msra.mxu2 %v6555_v56  ;;  %v10263_v49 = vld [vmem:[#allocation13_spill] sm:$0xff] }
 0x5ca   :  { %4520 = vmatpush.bf16.msra.mxu3 %v6564_v55  ;;  %v508_v56 = vadd.f32 %v10263_v49, %v7486_v17 }
 0x5cb   :  { %3925 = vmatmul.bf16.vlgmr.msrb.gmra.mxu0 %v6505_v31 }
 0x5cc   :  { %4080 = vmatmul.bf16.vlgmr.msrb.gmra.mxu2 %v6514_v45  ;;  %4169 = vmatmul.bf16.vlgmr.msrb.gmra.mxu3 %v6523_v24  ;;  %v6498_v24 = vld [vmem:[%s10107_s4 + $0x8] sm:$0xff] }
 0x5cd   :  { %4254 = vmatpush.bf16.msra.mxu0 %v6536_v62  ;;  %4432 = vmatpush.bf16.msra.mxu2 %v6554_v23 }
 0x5ce   :  { %4521 = vmatpush.bf16.msra.mxu3 %v6563_v42  ;;  %3991 = vmatpush.bf16.msrb.mxu1 %v6498_v24 }
 0x5d1   :  { %4255 = vmatpush.bf16.msra.mxu0 %v6535_v40  ;;  %4433 = vmatpush.bf16.msra.mxu2 %v6553_v3 }
 0x5d2   :  { %4522 = vmatpush.bf16.msra.mxu3 %v6562_v4 }
 0x5d5   :  { %4256 = vmatpush.bf16.msra.mxu0 %v6534_v0  ;;  %4434 = vmatpush.bf16.msra.mxu2 %v6552_v51  ;;  %v10264_v0 = vld [vmem:[#allocation12_spill] sm:$0xff] }
 0x5d6   :  { %4523 = vmatpush.bf16.msra.mxu3 %v6561_v18  ;;  %v459_v51 = vadd.f32 %v10264_v0, %v7535_v22 }
 0x5d9   :  { %4257 = vmatpush.bf16.msra.mxu0 %v6533_v20  ;;  %4435 = vmatpush.bf16.msra.mxu2 %v6551_v12 }
 0x5da   :  { %4524 = vmatpush.bf16.msra.mxu3 %v6560_v2 }
 0x5dc   :  { %4258 = vmatmul.bf16.vlgmr.msra.gmra.mxu0 %v6532_v6  ;;  %4436 = vmatmul.bf16.vlgmr.msra.gmra.mxu2 %v6550_v58  ;;  %v6497_v6 = vld [vmem:[%s10107_s4] sm:$0xff] }
 0x5dd   :  { %4525 = vmatmul.bf16.vlgmr.msra.gmra.mxu3 %v6559_v29  ;;  %3992 = vmatpush.bf16.msrb.mxu1 %v6497_v6 }
 0x638   :  { %v3637_v61 = vpop.f32.mrf.mxu0  ;;  %v3651_v13 = vpop.f32.mrf.mxu1 }
 0x639   :  { %v3684_v48 = vadd.f32 %v3637_v61, %v359_v44  ;;  %v3685_v8 = vadd.f32 %v3651_v13, %v408_v50  ;;  %v6549_v44 = vld [vmem:[%s10107_s4 + $0x178] sm:$0xff]  ;;  %v6548_v61 = vld [vmem:[%s10107_s4 + $0x170] sm:$0xff] }
 0x63a   :  { %4339 = vmatpush.bf16.msra.mxu1 %v6549_v44 }
 0x63b   :  { %v5794_v5 = vmul.f32 -1.442695, %v3684_v48  ;;  %v5795_v34 = vmul.f32 -1.442695, %v3685_v8 }
 0x63d   :  { %6835 = vpow2.f32 %v5794_v5 }
 0x63e   :  { %6837 = vpow2.f32 %v5795_v34  ;;  %4340 = vmatpush.bf16.msra.mxu1 %v6548_v61 }
 0x63f   :  { %v3679_v47 = vpop.f32.mrf.mxu3  ;;  %v3665_v27 = vpop.f32.mrf.mxu2 }
 0x640   :  { %v3687_v46 = vadd.f32 %v3679_v47, %v506_v53  ;;  %v3639_v59 = vpop.f32.mrf.mxu0  ;;  %v3653_v28 = vpop.f32.mrf.mxu1  ;;  %v3686_v31 = vadd.f32 %v3665_v27, %v457_v60 }
 0x641   :  { %v3688_v30 = vadd.f32 %v3639_v59, %v361_v32  ;;  %v3689_v16 = vadd.f32 %v3653_v28, %v410_v41 }
 0x642   :  { %v5796_v37 = vmul.f32 -1.442695, %v3687_v46  ;;  %v6547_v46 = vld [vmem:[%s10107_s4 + $0x168] sm:$0xff] }
 0x643   :  { %v6836_v57 = vpop.eup %6835  ;;  %v5797_v54 = vmul.f32 -1.442695, %v3688_v30  ;;  %v5798_v26 = vmul.f32 -1.442695, %v3689_v16  ;;  %4341 = vmatpush.bf16.msra.mxu1 %v6547_v46 }
 0x644   :  { %v6838_v35 = vpop.eup %6837  ;;  %v10000_v15 = vadd.f32 1.0, %v6836_v57  ;;  %6839 = vpow2.f32 %v5796_v37 }
 0x645   :  { %v10002_v33 = vadd.f32 1.0, %v6838_v35  ;;  %6841 = vpow2.f32 %v5797_v54 }
 0x646   :  { %6843 = vrcp.f32 %v10000_v15  ;;  %v3725_v52 = vand.u32 2147483647, %v10000_v15  ;;  %v3727_v22 = vand.u32 2147483648, %v10000_v15  ;;  %vm3721_vm10 = vweird.f32 %v10000_v15 }
 0x647   :  { %6845 = vrcp.f32 %v10002_v33  ;;  %v3681_v11 = vpop.f32.mrf.mxu3  ;;  %v3742_v29 = vand.u32 2147483648, %v10002_v33  ;;  %v3667_v63 = vpop.f32.mrf.mxu2  ;;  %v3740_v50 = vand.u32 2147483647, %v10002_v33  ;;  %vm3736_vm11 = vweird.f32 %v10002_v33 }
 0x648   :  { %6847 = vpow2.f32 %v5798_v26  ;;  %v3691_v45 = vadd.f32 %v3681_v11, %v508_v56  ;;  %v3690_v8 = vadd.f32 %v3667_v63, %v459_v51  ;;  %v3728_v34 = vor.u32 1.1754944e-38, %v3727_v22 }
 0x649   :  { %v3743_v19 = vor.u32 1.1754944e-38, %v3742_v29  ;;  %vm3726_vm14 = vcmp.eq.f32.partialorder %v3725_v52, 8.507059e+37  ;;  %vm3741_vm15 = vcmp.eq.f32.partialorder %v3740_v50, 8.507059e+37 }
 0x64a   :  { %v6840_v55 = vpop.eup %6839  ;;  %v5799_v2 = vmul.f32 -1.442695, %v3691_v45 }
 0x64b   :  { %v6842_v62 = vpop.eup %6841  ;;  %v10013_v23 = vadd.f32 1.0, %v6840_v55 }
 0x64c   :  { %v6844_v42 = vpop.eup %6843  ;;  %v10018_v40 = vadd.f32 1.0, %v6842_v62 }
 0x64d   :  { %v6846_v3 = vpop.eup %6845  ;;  %v3717_v4 = vmul.f32 %v6844_v42, %v10000_v15  ;;  %6849 = vrcp.f32 %v10013_v23  ;;  %vm3722_vm8 = vweird.f32 %v6844_v42  ;;  %v3757_v16 = vand.u32 2147483648, %v10013_v23 }
 0x64e   :  { %v6848_v17 = vpop.eup %6847  ;;  %v3732_v18 = vmul.f32 %v6846_v3, %v10002_v33  ;;  %6851 = vtanh.f32 %v3686_v31  ;;  %vm3737_vm9 = vweird.f32 %v6846_v3  ;;  %vm3723_vm12 = vmor %vm3721_vm10, %vm3722_vm8  ;;  %vm3766_vm0 = vweird.f32 %v10018_v40 }
 0x64f   :  { %v3718_v20 = vsub.f32 1.0, %v3717_v4  ;;  %6853 = vrcp.f32 %v10018_v40  ;;  %v10026_v12 = vadd.f32 1.0, %v6848_v17  ;;  %vm3738_vm13 = vmor %vm3736_vm11, %vm3737_vm9  ;;  %v3770_v26 = vand.u32 2147483647, %v10018_v40  ;;  %v6545_v4 = vld [vmem:[%s10107_s4 + $0x158] sm:$0xff] }
 0x650   :  { %v3733_v58 = vsub.f32 1.0, %v3732_v18  ;;  %v3772_v33 = vand.u32 2147483648, %v10018_v40  ;;  %vm3751_vm4 = vweird.f32 %v10013_v23  ;;  %v3755_v62 = vand.u32 2147483647, %v10013_v23 }
 0x651   :  { %v3719_v39 = vmul.f32 %v6844_v42, %v3718_v20  ;;  %6855 = vrcp.f32 %v10026_v12  ;;  %v3787_v15 = vand.u32 2147483648, %v10026_v12  ;;  %v3785_v11 = vand.u32 2147483647, %v10026_v12 }
 0x652   :  { %v3734_v21 = vmul.f32 %v6846_v3, %v3733_v58  ;;  %6857 = vpow2.f32 %v5799_v2  ;;  %v3773_v45 = vor.u32 1.1754944e-38, %v3772_v33  ;;  %vm3781_vm7 = vweird.f32 %v10026_v12  ;;  %v6544_v58 = vld [vmem:[%s10107_s4 + $0x150] sm:$0xff] }
 0x653   :  { %v10042_v13 = vpop.eup %6849  ;;  %v3720_v48 = vadd.f32 %v6844_v42, %v3719_v39  ;;  %6859 = vtanh.f32 %v3690_v8  ;;  %vm3771_vm8 = vcmp.eq.f32.partialorder %v3770_v26, 8.507059e+37  ;;  %v3758_v0 = vor.u32 1.1754944e-38, %v3757_v16  ;;  %v6543_v39 = vld [vmem:[%s10107_s4 + $0x148] sm:$0xff] }
 0x654   :  { %v6852_v5 = vpop.eup %6851  ;;  %v3735_v36 = vadd.f32 %v6846_v3, %v3734_v21  ;;  %v3747_v43 = vmul.f32 %v10042_v13, %v10013_v23  ;;  %vm3752_vm2 = vweird.f32 %v10042_v13  ;;  %vm3786_vm10 = vcmp.eq.f32.partialorder %v3785_v11, 8.507059e+37 }
 0x655   :  { %v6854_v53 = vpop.eup %6853  ;;  %v3724_v32 = vsel %vm3723_vm12, %v6844_v42, %v3720_v48  ;;  %vm10072_vm6 = vmor %vm3751_vm4, %vm3752_vm2  ;;  %vm3756_vm11 = vcmp.eq.f32.partialorder %v3755_v62, 8.507059e+37 }
 0x656   :  { %v3729_v7 = vsel %vm3726_vm14, %v3728_v34, %v3724_v32  ;;  %v3739_v41 = vsel %vm3738_vm13, %v6846_v3, %v3735_v36  ;;  %v3748_v47 = vsub.f32 1.0, %v3747_v43  ;;  %v3762_v25 = vmul.f32 %v6854_v53, %v10018_v40  ;;  %v3926_v32 = vpop.f32.mrf.mxu0 }
 0x657   :  { %v6856_v59 = vpop.eup %6855  ;;  %v3744_v28 = vsel %vm3741_vm15, %v3743_v19, %v3739_v41  ;;  %v3810_v30 = vmul.f32 %v6852_v5, %v3729_v7  ;;  %vm3767_vm1 = vweird.f32 %v6854_v53  ;;  %v3788_v40 = vor.u32 1.1754944e-38, %v3787_v15  ;;  %v6541_v19 = vld [vmem:[#allocation5 + $0x20] sm:$0xff]  ;;  %v4081_v7 = vpop.f32.mrf.mxu2 }
 0x658   :  { %v3808_v37 = vmul.f32 %v3744_v28, %v9877_v1  ;;  %v3749_v57 = vmul.f32 %v10042_v13, %v3748_v47  ;;  %v3763_v54 = vsub.f32 1.0, %v3762_v25  ;;  %v3777_v10 = vmul.f32 %v6856_v59, %v10026_v12  ;;  %v6858_v35 = vpop.eup %6857  ;;  %v6546_v1 = vld [vmem:[%s10107_s4 + $0x160] sm:$0xff]  ;;  %vm3768_vm5 = vmor %vm3766_vm0, %vm3767_vm1  ;;  %v4170_v41 = vpop.f32.mrf.mxu3 }
 0x659   :  { %v3715_v49 = vadd.f32 1.0, %v6858_v35  ;;  %vm3782_vm3 = vweird.f32 %v6856_v59  ;;  %v6860_v31 = vpop.eup %6859  ;;  %4342 = vmatpush.bf16.msra.mxu1 %v6546_v1 }
 0x65a   :  { %v3812_v27 = vadd.f32 %v3810_v30, %v3808_v37  ;;  %v3778_v38 = vsub.f32 1.0, %v3777_v10  ;;  %v3764_v9 = vmul.f32 %v6854_v53, %v3763_v54  ;;  %v3750_v60 = vadd.f32 %v10042_v13, %v3749_v57  ;;  %vm3783_vm9 = vmor %vm3781_vm7, %vm3782_vm3 }
 0x65b   :  { %v3802_v50 = vand.u32 2147483648, %v3715_v49  ;;  %vm3796_vm13 = vweird.f32 %v3715_v49 }
 0x65c   :  { %6861 = vtanh.f32 %v3812_v27  ;;  %v3779_v56 = vmul.f32 %v6856_v59, %v3778_v38  ;;  %v3765_v55 = vadd.f32 %v6854_v53, %v3764_v9  ;;  %v3754_v23 = vsel %vm10072_vm6, %v10042_v13, %v3750_v60  ;;  %v6542_v13 = vld [vmem:[%s10107_s4 + $0x140] sm:$0xff] }
 0x65d   :  { %6863 = vrcp.f32 %v3715_v49  ;;  %v3759_v2 = vsel %vm3756_vm11, %v3758_v0, %v3754_v23  ;;  %4343 = vmatpush.bf16.msra.mxu1 %v6545_v4  ;;  %v3803_v48 = vor.u32 1.1754944e-38, %v3802_v50  ;;  %v6610_v60 = vld [vmem:[%s10108_s5] ss:$0 sm:$0xff] }
 0x65e   :  { %v3769_v42 = vsel %vm3768_vm5, %v6854_v53, %v3765_v55  ;;  %v3780_v3 = vadd.f32 %v6856_v59, %v3779_v56  ;;  %v3928_v25 = vpop.f32.mrf.mxu0 }
 0x65f   :  { %v3774_v17 = vsel %vm3771_vm8, %v3773_v45, %v3769_v42 }
 0x660   :  { %v3784_v51 = vsel %vm3783_vm9, %v6856_v59, %v3780_v3  ;;  %v3811_v18 = vmul.f32 %v6860_v31, %v3774_v17  ;;  %v4083_v59 = vpop.f32.mrf.mxu2  ;;  %v4172_v30 = vpop.f32.mrf.mxu3 }
 0x661   :  { %v3789_v20 = vsel %vm3786_vm10, %v3788_v40, %v3784_v51  ;;  %4344 = vmatpush.bf16.msra.mxu1 %v6544_v58 }
 0x662   :  { %v6862_v12 = vpop.eup %6861  ;;  %v3809_v6 = vmul.f32 %v3789_v20, %v9899_v14  ;;  %v3800_v14 = vand.u32 2147483647, %v3715_v49 }
 0x663   :  { %v6864_v29 = vpop.eup %6863  ;;  %v3816_v52 = vmul.f32 %v6862_v12, %v3759_v2 }
 0x664   :  { %v3813_v22 = vadd.f32 %v3811_v18, %v3809_v6  ;;  %v3792_v63 = vmul.f32 %v6864_v29, %v3715_v49  ;;  %vm3797_vm12 = vweird.f32 %v6864_v29  ;;  %vm3801_vm15 = vcmp.eq.f32.partialorder %v3800_v14, 8.507059e+37 }
 0x665   :  { %4345 = vmatpush.bf16.msra.mxu1 %v6543_v39  ;;  %vm3798_vm14 = vmor %vm3796_vm13, %vm3797_vm12 }
 0x666   :  { %6865 = vtanh.f32 %v3813_v22  ;;  %v3793_v44 = vsub.f32 1.0, %v3792_v63  ;;  %v4259_v54 = vpop.f32.mrf.mxu0 }
 0x668   :  { %v3794_v21 = vmul.f32 %v6864_v29, %v3793_v44  ;;  %v4437_v15 = vpop.f32.mrf.mxu2  ;;  %v4526_v27 = vpop.f32.mrf.mxu3 }
 0x669   :  { %4346 = vmatpush.bf16.msra.mxu1 %v6542_v13 }
 0x66a   :  { %v3795_v61 = vadd.f32 %v6864_v29, %v3794_v21 }
 0x66c   :  { %v6866_v8 = vpop.eup %6865  ;;  %v3799_v5 = vsel %vm3798_vm14, %v6864_v29, %v3795_v61 }
 0x66d   :  { %v3804_v34 = vsel %vm3801_vm15, %v3803_v48, %v3799_v5 }
 0x66e   :  { %v3817_v36 = vmul.f32 %v6866_v8, %v3804_v34  ;;  %v4261_v11 = vpop.f32.mrf.mxu0 }
 0x670   :  { %v6606_v43 = vpack.c.bf16 %v3817_v36, %v3816_v52  ;;  %v4439_v62 = vpop.f32.mrf.mxu2  ;;  %v4528_v24 = vpop.f32.mrf.mxu3 }
 0x672   :  { %6607 = vst [vmem:[#allocation5] sm:$0xff] %v6606_v43  }
 0x679   :  { %v6496_v53 = vld [vmem:[#allocation5] sm:$0xff] }
 0x67a   :  { %3993 = vmatmul.bf16.vlgmr.msrb.gmra.mxu1 %v6496_v53 }
 0x68a   :  { %4347 = vmatmul.bf16.vlgmr.msra.gmra.mxu1 %v6541_v19 }
 0x6f7   :  { %v3994_v47 = vpop.f32.mrf.mxu1 }
 0x6f8   :  { %v3995_v46 = vadd.f32 %v3994_v47, %v3926_v32 }
 0x6fa   :  { %v4086_v28 = vadd.f32 %v4081_v7, %v3995_v46 }
 0x6fc   :  { %v4175_v57 = vadd.f32 %v4170_v41, %v4086_v28 }
 0x6fe   :  { %v4264_v35 = vadd.f32 %v4259_v54, %v4175_v57 }
 0x6ff   :  { %v3996_v16 = vpop.f32.mrf.mxu1 }
 0x700   :  { %v3997_v37 = vadd.f32 %v3996_v16, %v3928_v25 }
 0x702   :  { %v4087_v10 = vadd.f32 %v4083_v59, %v3997_v37 }
 0x704   :  { %v4176_v9 = vadd.f32 %v4172_v30, %v4087_v10 }
 0x706   :  { %v4265_v49 = vadd.f32 %v4261_v11, %v4176_v9 }
 0x707   :  { %v4348_v26 = vpop.f32.mrf.mxu1 }
 0x708   :  { %v4353_v33 = vadd.f32 %v4348_v26, %v4264_v35 }
 0x70a   :  { %v4442_v38 = vadd.f32 %v4437_v15, %v4353_v33 }
 0x70c   :  { %v4531_v1 = vadd.f32 %v4526_v27, %v4442_v38 }
 0x70e   :  { %v4548_v55 = vadd.f32 %v6610_v60, %v4531_v1 }
 0x70f   :  { %v4350_v56 = vpop.f32.mrf.mxu1 }
 0x710   :  { %v4354_v31 = vadd.f32 %v4350_v56, %v4265_v49  ;;  %4550 = vst [vmem:[%s10109_s6] sm:$0xff] %v4548_v55 }
 0x712   :  { %v4443_v45 = vadd.f32 %v4439_v62, %v4354_v31 }
 0x714   :  { %v4532_v42 = vadd.f32 %v4528_v24, %v4443_v45 }
 0x716   :  { %v4549_v3 = vadd.f32 %v6610_v60, %v4532_v42 }
 0x718   :  { %4551 = vst [vmem:[%s10109_s6 + $0x8] sm:$0xff] %v4549_v3 }

</bundles_post_ra>
